<compile_context>
chip_gen: v7x
topology: tpu7x:2x2x1
jax: 0.10.0
libtpu: 0.0.40
codegen_flags: <defaults>
</compile_context>

<pallas_src>
import jax
import jax.numpy as jnp
import numpy as np
from jax import lax
from jax.experimental import pallas as pl
from jax.experimental.pallas import tpu as pltpu


def _pick_tq(n):
    """Largest query-tile size <= 512 that divides N (falls back to N)."""
    for tq in (512, 256, 128, 64, 32, 16, 8):
        if n % tq == 0:
            return tq
    return n


def _make_attention_kernel(heads, dim_head, hidden, tq):
    def kernel(x_ref, wq_ref, wk_ref, wv_ref, wo_ref, bias_ref, o_ref,
               k_scr, v_scr, q_scr, y_scr):
        qi = pl.program_id(1)

        # --- K/V projection for the whole sequence, once per batch element. ---
        # (bf16 MXU operands, f32 accumulation, result staged as bf16 in persistent scratch)
        @pl.when(qi == 0)
        def _():
            x_full = x_ref[0]                                                   # (N, C_pad) bf16
            k = jnp.dot(x_full, wk_ref[...], preferred_element_type=jnp.float32)
            v = jnp.dot(x_full, wv_ref[...], preferred_element_type=jnp.float32)
            k_scr[...] = k.astype(jnp.bfloat16)
            v_scr[...] = v.astype(jnp.bfloat16)

        # --- Q projection for this query tile (softmax scale folded into wq). ---
        row0 = pl.multiple_of(qi * tq, tq)
        x_q = x_ref[0, pl.ds(row0, tq), :]                                      # (TQ, C_pad) bf16
        q = jnp.dot(x_q, wq_ref[...], preferred_element_type=jnp.float32)
        q_scr[...] = q.astype(jnp.bfloat16)                                     # (TQ, hidden)

        # --- Per-head attention; accumulate the out-projection into y_scr. ---
        # Static unroll with all intermediates flowing through VMEM scratch so each head's
        # (TQ, N) score/exp slab is dead before the next head starts.
        for h in range(heads):
            lo = h * dim_head
            q_h = q_scr[:, lo:lo + dim_head]                                    # (TQ, dh) bf16 (Ref slice)
            k_h = k_scr[:, lo:lo + dim_head]                                    # (N,  dh) bf16
            v_h = v_scr[:, lo:lo + dim_head]                                    # (N,  dh) bf16

            # sim[i, j] = sum_d q[i, d] * k[j, d] -- contract dim_head of both operands, no k relayout.
            sim = lax.dot_general(q_h, k_h, (((1,), (1,)), ((), ())),
                                  preferred_element_type=jnp.float32)           # (TQ, N) f32
            m = jnp.max(sim, axis=-1, keepdims=True)
            e = jnp.exp(sim - m)                                                 # f32 (v5e EUP has no bf16)
            l = jnp.sum(e, axis=-1, keepdims=True)

            # Unnormalized e @ v, then deferred normalization on the small (TQ, dh) result.
            o_h = jnp.dot(e.astype(jnp.bfloat16), v_h,
                          preferred_element_type=jnp.float32)                    # (TQ, dh) f32
            o_h = o_h * pl.reciprocal(l, approx=True)

            # Fold this head straight into the out-projection accumulator.
            contrib = jnp.dot(o_h.astype(jnp.bfloat16), wo_ref[lo:lo + dim_head, :],
                              preferred_element_type=jnp.float32)                # (TQ, C_pad) f32
            if h == 0:
                y_scr[...] = contrib + bias_ref[...]
            else:
                y_scr[...] = y_scr[...] + contrib

        o_ref[0] = y_scr[...].astype(o_ref.dtype)                                # lane-dense full-width store

    return kernel


def attention_pallas(x_nchw, w_qkv, w_out, b_out, heads, dim_head):
    """x_nchw: (B, C, H, W) f32. w_qkv: (3*heads*dim_head, C). w_out: (C, heads*dim_head). b_out: (C,)."""
    B, C, H, W = x_nchw.shape
    N = H * W
    hidden = heads * dim_head
    scale = dim_head ** (-0.5)
    C_pad = int(pl.cdiv(C, 128)) * 128
    TQ = _pick_tq(N)
    NQ = N // TQ

    # NCHW -> (B, N, C_pad) bf16 tokens, channel dim zero-padded to lane width (lane-dense DMA/loads).
    x_tok = jnp.transpose(x_nchw, (0, 2, 3, 1)).reshape(B, N, C)
    x_pad = jnp.zeros((B, N, C_pad), jnp.bfloat16).at[..., :C].set(x_tok.astype(jnp.bfloat16))

    # QKV weights, (C_pad, hidden) each, bf16; softmax scale folded into Wq columns.
    wq = (w_qkv[0 * hidden:1 * hidden].T * scale).astype(jnp.bfloat16)
    wk = w_qkv[1 * hidden:2 * hidden].T.astype(jnp.bfloat16)
    wv = w_qkv[2 * hidden:3 * hidden].T.astype(jnp.bfloat16)
    wq_p = jnp.zeros((C_pad, hidden), jnp.bfloat16).at[:C].set(wq)
    wk_p = jnp.zeros((C_pad, hidden), jnp.bfloat16).at[:C].set(wk)
    wv_p = jnp.zeros((C_pad, hidden), jnp.bfloat16).at[:C].set(wv)

    # Out-projection weight (hidden, C_pad) bf16 (zero-padded channels); bias (1, C_pad) f32.
    wo_p = jnp.zeros((hidden, C_pad), jnp.bfloat16).at[:, :C].set(w_out.T.astype(jnp.bfloat16))
    bias_p = jnp.zeros((1, C_pad), jnp.float32).at[0, :C].set(b_out.astype(jnp.float32))

    # Explicit scoped-VMEM budget: blocks (double-buffered) + scratch + live score slabs + headroom.
    est_vmem = (
        2 * N * C_pad * 2            # x block (bf16, double-buffered)
        + 2 * TQ * C_pad * 4         # output block (f32, double-buffered)
        + 2 * N * hidden * 2         # K + V scratch (bf16)
        + TQ * hidden * 2            # Q scratch (bf16)
        + TQ * C_pad * 4             # out-projection accumulator (f32)
        + 4 * TQ * N * 4             # live score / exp slabs (f32), with slack
        + 2 * (3 * C_pad * hidden * 2 + hidden * C_pad * 2 + C_pad * 4)  # weights + bias (double-buffered)
        + (4 << 20)                  # headroom
    )
    vmem_limit = int(min(max(est_vmem, 32 << 20), 64 << 20))

    out_pad = pl.pallas_call(
        _make_attention_kernel(heads, dim_head, hidden, TQ),
        out_shape=jax.ShapeDtypeStruct((B, N, C_pad), x_nchw.dtype),
        grid_spec=pltpu.PrefetchScalarGridSpec(
            num_scalar_prefetch=0,
            grid=(B, NQ),
            in_specs=[
                pl.BlockSpec((1, N, C_pad), lambda b, qi: (b, 0, 0)),      # full-sequence tokens (per batch)
                pl.BlockSpec((C_pad, hidden), lambda b, qi: (0, 0)),       # Wq (scale folded in)
                pl.BlockSpec((C_pad, hidden), lambda b, qi: (0, 0)),       # Wk
                pl.BlockSpec((C_pad, hidden), lambda b, qi: (0, 0)),       # Wv
                pl.BlockSpec((hidden, C_pad), lambda b, qi: (0, 0)),       # Wout (padded)
                pl.BlockSpec((1, C_pad), lambda b, qi: (0, 0)),            # bias (padded)
            ],
            out_specs=pl.BlockSpec((1, TQ, C_pad), lambda b, qi: (b, qi, 0)),
            scratch_shapes=[
                pltpu.VMEM((N, hidden), jnp.bfloat16),    # K (whole sequence, persists across q tiles)
                pltpu.VMEM((N, hidden), jnp.bfloat16),    # V
                pltpu.VMEM((TQ, hidden), jnp.bfloat16),   # Q tile
                pltpu.VMEM((TQ, C_pad), jnp.float32),     # out-projection accumulator
            ],
        ),
        compiler_params=pltpu.CompilerParams(
            dimension_semantics=("parallel", "arbitrary"),
            vmem_limit_bytes=vmem_limit,
        ),
    )(x_pad, wq_p, wk_p, wv_p, wo_p, bias_p)

    # Strip channel padding, (B, N, C) -> NCHW.
    out_tok = out_pad[..., :C]
    return jnp.transpose(out_tok.reshape(B, H, W, C), (0, 3, 1, 2))


def attention_reference(x_nchw, w_qkv, w_out, b_out, heads, dim_head):
    """Pure-JAX reference mirroring the PyTorch forward exactly (f32 throughout)."""
    B, C, H, W = x_nchw.shape
    N = H * W
    hidden = heads * dim_head
    scale = dim_head ** (-0.5)

    x_flat = x_nchw.reshape(B, C, N)                       # (B, C, N)
    qkv = jnp.einsum('oc,bcn->bon', w_qkv, x_flat)         # (B, 3*hidden, N)
    q, k, v = jnp.split(qkv, 3, axis=1)

    def to_heads(t):
        return t.reshape(B, heads, dim_head, N)            # b h d (xy)

    q, k, v = map(to_heads, (q, k, v))
    q = q * scale
    sim = jnp.einsum('bhdi,bhdj->bhij', q, k)
    sim = sim - jnp.max(sim, axis=-1, keepdims=True)
    attn = jax.nn.softmax(sim, axis=-1)
    out = jnp.einsum('bhij,bhdj->bhid', attn, v)           # (B, heads, N, dim_head)
    out = jnp.transpose(out, (0, 1, 3, 2)).reshape(B, hidden, N)   # b (h d) (x y)
    y = jnp.einsum('oc,bcn->bon', w_out, out) + b_out[None, :, None]
    return y.reshape(B, C, H, W)


if __name__ == "__main__":
    # Small shapes consistent with the module defaults: dim=8, heads=4, dim_head=32, spatial 16x16.
    B, dim, H, W = 2, 8, 16, 16
    heads, dim_head = 4, 32
    hidden = heads * dim_head

    key = jax.random.PRNGKey(0)
    k1, k2, k3, k4 = jax.random.split(key, 4)
    x = jax.random.normal(k1, (B, dim, H, W), dtype=jnp.float32)
    w_qkv = jax.random.normal(k2, (3 * hidden, dim), dtype=jnp.float32) * 0.05   # Conv2d(dim, 3*hidden, 1, bias=False)
    w_out = jax.random.normal(k3, (dim, hidden), dtype=jnp.float32) * 0.05        # Conv2d(hidden, dim, 1)
    b_out = jax.random.normal(k4, (dim,), dtype=jnp.float32) * 0.05

    y = attention_pallas(x, w_qkv, w_out, b_out, heads, dim_head)
    y = jax.block_until_ready(y)

    y_ref = attention_reference(x, w_qkv, w_out, b_out, heads, dim_head)
    np.testing.assert_allclose(np.asarray(y), np.asarray(y_ref), rtol=2e-2, atol=2e-2)

    print("KERNEL_OK")
</pallas_src>

<mosaic_0001>
module attributes {stable_mosaic.version = 11 : i64} {
  func.func @kernel(%arg0: i32, %arg1: i32, %arg2: memref<1x256x128xbf16, #tpu.memory_space<vmem>>, %arg3: memref<128x128xbf16, #tpu.memory_space<vmem>>, %arg4: memref<128x128xbf16, #tpu.memory_space<vmem>>, %arg5: memref<128x128xbf16, #tpu.memory_space<vmem>>, %arg6: memref<128x128xbf16, #tpu.memory_space<vmem>>, %arg7: memref<1x128xf32, #tpu.memory_space<vmem>>, %arg8: memref<1x256x128xf32, #tpu.memory_space<vmem>>, %arg9: memref<256x128xbf16, #tpu.memory_space<vmem>>, %arg10: memref<256x128xbf16, #tpu.memory_space<vmem>>, %arg11: memref<256x128xbf16, #tpu.memory_space<vmem>>, %arg12: memref<256x128xf32, #tpu.memory_space<vmem>>) attributes {dimension_semantics = [#tpu.dimension_semantics<parallel>, #tpu.dimension_semantics<arbitrary>], iteration_bounds = array<i64: 2, 1>, scalar_prefetch = 0 : i64, scratch_operands = 4 : i64, tpu.core_type = #tpu.core_type<tc>, window_params = [{transform_indices = @transform_0, window_bounds = array<i64: 1, 256, 128>}, {pipeline_mode = #tpu.pipeline_mode<synchronous>, transform_indices = @transform_1, window_bounds = array<i64: 128, 128>}, {pipeline_mode = #tpu.pipeline_mode<synchronous>, transform_indices = @transform_2, window_bounds = array<i64: 128, 128>}, {pipeline_mode = #tpu.pipeline_mode<synchronous>, transform_indices = @transform_3, window_bounds = array<i64: 128, 128>}, {pipeline_mode = #tpu.pipeline_mode<synchronous>, transform_indices = @transform_4, window_bounds = array<i64: 128, 128>}, {pipeline_mode = #tpu.pipeline_mode<synchronous>, transform_indices = @transform_5, window_bounds = array<i64: 1, 128>}, {transform_indices = @transform_6, window_bounds = array<i64: 1, 256, 128>}]} {
    %c0_i32 = arith.constant 0 : i32
    %0 = arith.cmpi eq, %arg1, %c0_i32 : i32
    %1 = arith.extui %0 : i1 to i32
    %c0_i32_0 = arith.constant 0 : i32
    %2 = arith.cmpi ne, %1, %c0_i32_0 : i32
    scf.if %2 {
      %c0_76 = arith.constant 0 : index
      %c0_77 = arith.constant 0 : index
      %c0_78 = arith.constant 0 : index
      %105 = vector.load %arg2[%c0_76, %c0_77, %c0_78] : memref<1x256x128xbf16, #tpu.memory_space<vmem>>, vector<1x256x128xbf16>
      %106 = vector.shape_cast %105 : vector<1x256x128xbf16> to vector<256x128xbf16>
      %c0_79 = arith.constant 0 : index
      %c0_80 = arith.constant 0 : index
      %107 = vector.load %arg4[%c0_79, %c0_80] : memref<128x128xbf16, #tpu.memory_space<vmem>>, vector<128x128xbf16>
      %cst_81 = arith.constant dense<0.000000e+00> : vector<256x128xf32>
      %108 = tpu.matmul %106, %107, %cst_81 {dimension_numbers = #tpu.dot_dimension_numbers<[1], [0], [0], [1], [0, 0, 1, 1], [], []>} : vector<256x128xbf16>, vector<128x128xbf16>, vector<256x128xf32> -> vector<256x128xf32>
      %c0_82 = arith.constant 0 : index
      %c0_83 = arith.constant 0 : index
      %109 = vector.load %arg5[%c0_82, %c0_83] : memref<128x128xbf16, #tpu.memory_space<vmem>>, vector<128x128xbf16>
      %cst_84 = arith.constant dense<0.000000e+00> : vector<256x128xf32>
      %110 = tpu.matmul %106, %109, %cst_84 {dimension_numbers = #tpu.dot_dimension_numbers<[1], [0], [0], [1], [0, 0, 1, 1], [], []>} : vector<256x128xbf16>, vector<128x128xbf16>, vector<256x128xf32> -> vector<256x128xf32>
      %111 = arith.truncf %108 : vector<256x128xf32> to vector<256x128xbf16>
      %c0_85 = arith.constant 0 : index
      %c0_86 = arith.constant 0 : index
      %112 = vector.load %arg9[%c0_85, %c0_86] : memref<256x128xbf16, #tpu.memory_space<vmem>>, vector<256x128xbf16>
      tpu.vector_store %arg9[%c0_85, %c0_86], %111 {strides = array<i32>} : memref<256x128xbf16, #tpu.memory_space<vmem>>, vector<256x128xbf16>,
      %113 = arith.truncf %110 : vector<256x128xf32> to vector<256x128xbf16>
      %c0_87 = arith.constant 0 : index
      %c0_88 = arith.constant 0 : index
      %114 = vector.load %arg10[%c0_87, %c0_88] : memref<256x128xbf16, #tpu.memory_space<vmem>>, vector<256x128xbf16>
      tpu.vector_store %arg10[%c0_87, %c0_88], %113 {strides = array<i32>} : memref<256x128xbf16, #tpu.memory_space<vmem>>, vector<256x128xbf16>,
    } else {
    }
    %c256_i32 = arith.constant 256 : i32
    %3 = arith.muli %arg1, %c256_i32 : i32
    %4 = tpu.assume_multiple %3, 256 : i32
    %c0 = arith.constant 0 : index
    %5 = arith.index_cast %4 : i32 to index
    %c0_1 = arith.constant 0 : index
    %6 = vector.load %arg2[%c0, %5, %c0_1] : memref<1x256x128xbf16, #tpu.memory_space<vmem>>, vector<1x256x128xbf16>
    %7 = vector.shape_cast %6 : vector<1x256x128xbf16> to vector<256x128xbf16>
    %c0_2 = arith.constant 0 : index
    %c0_3 = arith.constant 0 : index
    %8 = vector.load %arg3[%c0_2, %c0_3] : memref<128x128xbf16, #tpu.memory_space<vmem>>, vector<128x128xbf16>
    %cst = arith.constant dense<0.000000e+00> : vector<256x128xf32>
    %9 = tpu.matmul %7, %8, %cst {dimension_numbers = #tpu.dot_dimension_numbers<[1], [0], [0], [1], [0, 0, 1, 1], [], []>} : vector<256x128xbf16>, vector<128x128xbf16>, vector<256x128xf32> -> vector<256x128xf32>
    %10 = arith.truncf %9 : vector<256x128xf32> to vector<256x128xbf16>
    %c0_4 = arith.constant 0 : index
    %c0_5 = arith.constant 0 : index
    %11 = vector.load %arg11[%c0_4, %c0_5] : memref<256x128xbf16, #tpu.memory_space<vmem>>, vector<256x128xbf16>
    tpu.vector_store %arg11[%c0_4, %c0_5], %10 {strides = array<i32>} : memref<256x128xbf16, #tpu.memory_space<vmem>>, vector<256x128xbf16>,
    %c0_6 = arith.constant 0 : index
    %c0_7 = arith.constant 0 : index
    %12 = vector.load %arg11[%c0_6, %c0_7] : memref<256x128xbf16, #tpu.memory_space<vmem>>, vector<256x32xbf16>
    %c0_8 = arith.constant 0 : index
    %c0_9 = arith.constant 0 : index
    %13 = vector.load %arg9[%c0_8, %c0_9] : memref<256x128xbf16, #tpu.memory_space<vmem>>, vector<256x32xbf16>
    %c0_10 = arith.constant 0 : index
    %c0_11 = arith.constant 0 : index
    %14 = vector.load %arg10[%c0_10, %c0_11] : memref<256x128xbf16, #tpu.memory_space<vmem>>, vector<256x32xbf16>
    %cst_12 = arith.constant dense<0.000000e+00> : vector<256x256xf32>
    %15 = tpu.matmul %12, %13, %cst_12 {dimension_numbers = #tpu.dot_dimension_numbers<[1], [1], [0], [0], [0, 0, 1, 0], [], []>} : vector<256x32xbf16>, vector<256x32xbf16>, vector<256x256xf32> -> vector<256x256xf32>
    %cst_13 = arith.constant dense<0xFF800000> : vector<256xf32>
    %16 = vector.multi_reduction <maximumf>, %15, %cst_13 [1] : vector<256x256xf32> to vector<256xf32>
    %17 = vector.shape_cast %16 : vector<256xf32> to vector<256x1xf32>
    %18 = vector.broadcast %17 : vector<256x1xf32> to vector<256x256xf32>
    %19 = arith.subf %15, %18 : vector<256x256xf32>
    %20 = math.exp %19 : vector<256x256xf32>
    %cst_14 = arith.constant dense<0.000000e+00> : vector<256xf32>
    %21 = vector.multi_reduction <add>, %20, %cst_14 [1] : vector<256x256xf32> to vector<256xf32>
    %22 = vector.shape_cast %21 : vector<256xf32> to vector<256x1xf32>
    %23 = arith.truncf %20 : vector<256x256xf32> to vector<256x256xbf16>
    %cst_15 = arith.constant dense<0.000000e+00> : vector<256x32xf32>
    %24 = tpu.matmul %23, %14, %cst_15 {dimension_numbers = #tpu.dot_dimension_numbers<[1], [0], [0], [1], [0, 0, 1, 1], [], []>} : vector<256x256xbf16>, vector<256x32xbf16>, vector<256x32xf32> -> vector<256x32xf32>
    %25 = tpu.reciprocal %22 {approx = true} : vector<256x1xf32> -> vector<256x1xf32>
    %26 = vector.broadcast %25 : vector<256x1xf32> to vector<256x32xf32>
    %27 = arith.mulf %24, %26 : vector<256x32xf32>
    %28 = arith.truncf %27 : vector<256x32xf32> to vector<256x32xbf16>
    %c0_16 = arith.constant 0 : index
    %c0_17 = arith.constant 0 : index
    %29 = vector.load %arg6[%c0_16, %c0_17] : memref<128x128xbf16, #tpu.memory_space<vmem>>, vector<32x128xbf16>
    %cst_18 = arith.constant dense<0.000000e+00> : vector<256x128xf32>
    %30 = tpu.matmul %28, %29, %cst_18 {dimension_numbers = #tpu.dot_dimension_numbers<[1], [0], [0], [1], [0, 0, 1, 1], [], []>} : vector<256x32xbf16>, vector<32x128xbf16>, vector<256x128xf32> -> vector<256x128xf32>
    %c0_19 = arith.constant 0 : index
    %c0_20 = arith.constant 0 : index
    %31 = vector.load %arg7[%c0_19, %c0_20] : memref<1x128xf32, #tpu.memory_space<vmem>>, vector<1x128xf32>
    %32 = vector.broadcast %31 : vector<1x128xf32> to vector<256x128xf32>
    %33 = arith.addf %30, %32 : vector<256x128xf32>
    %c0_21 = arith.constant 0 : index
    %c0_22 = arith.constant 0 : index
    %34 = vector.load %arg12[%c0_21, %c0_22] : memref<256x128xf32, #tpu.memory_space<vmem>>, vector<256x128xf32>
    tpu.vector_store %arg12[%c0_21, %c0_22], %33 {strides = array<i32>} : memref<256x128xf32, #tpu.memory_space<vmem>>, vector<256x128xf32>,
    %c0_23 = arith.constant 0 : index
    %c32 = arith.constant 32 : index
    %35 = vector.load %arg11[%c0_23, %c32] : memref<256x128xbf16, #tpu.memory_space<vmem>>, vector<256x32xbf16>
    %c0_24 = arith.constant 0 : index
    %c32_25 = arith.constant 32 : index
    %36 = vector.load %arg9[%c0_24, %c32_25] : memref<256x128xbf16, #tpu.memory_space<vmem>>, vector<256x32xbf16>
    %c0_26 = arith.constant 0 : index
    %c32_27 = arith.constant 32 : index
    %37 = vector.load %arg10[%c0_26, %c32_27] : memref<256x128xbf16, #tpu.memory_space<vmem>>, vector<256x32xbf16>
    %cst_28 = arith.constant dense<0.000000e+00> : vector<256x256xf32>
    %38 = tpu.matmul %35, %36, %cst_28 {dimension_numbers = #tpu.dot_dimension_numbers<[1], [1], [0], [0], [0, 0, 1, 0], [], []>} : vector<256x32xbf16>, vector<256x32xbf16>, vector<256x256xf32> -> vector<256x256xf32>
    %cst_29 = arith.constant dense<0xFF800000> : vector<256xf32>
    %39 = vector.multi_reduction <maximumf>, %38, %cst_29 [1] : vector<256x256xf32> to vector<256xf32>
    %40 = vector.shape_cast %39 : vector<256xf32> to vector<256x1xf32>
    %41 = vector.broadcast %40 : vector<256x1xf32> to vector<256x256xf32>
    %42 = arith.subf %38, %41 : vector<256x256xf32>
    %43 = math.exp %42 : vector<256x256xf32>
    %cst_30 = arith.constant dense<0.000000e+00> : vector<256xf32>
    %44 = vector.multi_reduction <add>, %43, %cst_30 [1] : vector<256x256xf32> to vector<256xf32>
    %45 = vector.shape_cast %44 : vector<256xf32> to vector<256x1xf32>
    %46 = arith.truncf %43 : vector<256x256xf32> to vector<256x256xbf16>
    %cst_31 = arith.constant dense<0.000000e+00> : vector<256x32xf32>
    %47 = tpu.matmul %46, %37, %cst_31 {dimension_numbers = #tpu.dot_dimension_numbers<[1], [0], [0], [1], [0, 0, 1, 1], [], []>} : vector<256x256xbf16>, vector<256x32xbf16>, vector<256x32xf32> -> vector<256x32xf32>
    %48 = tpu.reciprocal %45 {approx = true} : vector<256x1xf32> -> vector<256x1xf32>
    %49 = vector.broadcast %48 : vector<256x1xf32> to vector<256x32xf32>
    %50 = arith.mulf %47, %49 : vector<256x32xf32>
    %51 = arith.truncf %50 : vector<256x32xf32> to vector<256x32xbf16>
    %c32_32 = arith.constant 32 : index
    %c0_33 = arith.constant 0 : index
    %52 = vector.load %arg6[%c32_32, %c0_33] : memref<128x128xbf16, #tpu.memory_space<vmem>>, vector<32x128xbf16>
    %cst_34 = arith.constant dense<0.000000e+00> : vector<256x128xf32>
    %53 = tpu.matmul %51, %52, %cst_34 {dimension_numbers = #tpu.dot_dimension_numbers<[1], [0], [0], [1], [0, 0, 1, 1], [], []>} : vector<256x32xbf16>, vector<32x128xbf16>, vector<256x128xf32> -> vector<256x128xf32>
    %c0_35 = arith.constant 0 : index
    %c0_36 = arith.constant 0 : index
    %54 = vector.load %arg12[%c0_35, %c0_36] : memref<256x128xf32, #tpu.memory_space<vmem>>, vector<256x128xf32>
    %55 = arith.addf %54, %53 : vector<256x128xf32>
    %c0_37 = arith.constant 0 : index
    %c0_38 = arith.constant 0 : index
    %56 = vector.load %arg12[%c0_37, %c0_38] : memref<256x128xf32, #tpu.memory_space<vmem>>, vector<256x128xf32>
    tpu.vector_store %arg12[%c0_37, %c0_38], %55 {strides = array<i32>} : memref<256x128xf32, #tpu.memory_space<vmem>>, vector<256x128xf32>,
    %c0_39 = arith.constant 0 : index
    %c64 = arith.constant 64 : index
    %57 = vector.load %arg11[%c0_39, %c64] : memref<256x128xbf16, #tpu.memory_space<vmem>>, vector<256x32xbf16>
    %c0_40 = arith.constant 0 : index
    %c64_41 = arith.constant 64 : index
    %58 = vector.load %arg9[%c0_40, %c64_41] : memref<256x128xbf16, #tpu.memory_space<vmem>>, vector<256x32xbf16>
    %c0_42 = arith.constant 0 : index
    %c64_43 = arith.constant 64 : index
    %59 = vector.load %arg10[%c0_42, %c64_43] : memref<256x128xbf16, #tpu.memory_space<vmem>>, vector<256x32xbf16>
    %cst_44 = arith.constant dense<0.000000e+00> : vector<256x256xf32>
    %60 = tpu.matmul %57, %58, %cst_44 {dimension_numbers = #tpu.dot_dimension_numbers<[1], [1], [0], [0], [0, 0, 1, 0], [], []>} : vector<256x32xbf16>, vector<256x32xbf16>, vector<256x256xf32> -> vector<256x256xf32>
    %cst_45 = arith.constant dense<0xFF800000> : vector<256xf32>
    %61 = vector.multi_reduction <maximumf>, %60, %cst_45 [1] : vector<256x256xf32> to vector<256xf32>
    %62 = vector.shape_cast %61 : vector<256xf32> to vector<256x1xf32>
    %63 = vector.broadcast %62 : vector<256x1xf32> to vector<256x256xf32>
    %64 = arith.subf %60, %63 : vector<256x256xf32>
    %65 = math.exp %64 : vector<256x256xf32>
    %cst_46 = arith.constant dense<0.000000e+00> : vector<256xf32>
    %66 = vector.multi_reduction <add>, %65, %cst_46 [1] : vector<256x256xf32> to vector<256xf32>
    %67 = vector.shape_cast %66 : vector<256xf32> to vector<256x1xf32>
    %68 = arith.truncf %65 : vector<256x256xf32> to vector<256x256xbf16>
    %cst_47 = arith.constant dense<0.000000e+00> : vector<256x32xf32>
    %69 = tpu.matmul %68, %59, %cst_47 {dimension_numbers = #tpu.dot_dimension_numbers<[1], [0], [0], [1], [0, 0, 1, 1], [], []>} : vector<256x256xbf16>, vector<256x32xbf16>, vector<256x32xf32> -> vector<256x32xf32>
    %70 = tpu.reciprocal %67 {approx = true} : vector<256x1xf32> -> vector<256x1xf32>
    %71 = vector.broadcast %70 : vector<256x1xf32> to vector<256x32xf32>
    %72 = arith.mulf %69, %71 : vector<256x32xf32>
    %73 = arith.truncf %72 : vector<256x32xf32> to vector<256x32xbf16>
    %c64_48 = arith.constant 64 : index
    %c0_49 = arith.constant 0 : index
    %74 = vector.load %arg6[%c64_48, %c0_49] : memref<128x128xbf16, #tpu.memory_space<vmem>>, vector<32x128xbf16>
    %cst_50 = arith.constant dense<0.000000e+00> : vector<256x128xf32>
    %75 = tpu.matmul %73, %74, %cst_50 {dimension_numbers = #tpu.dot_dimension_numbers<[1], [0], [0], [1], [0, 0, 1, 1], [], []>} : vector<256x32xbf16>, vector<32x128xbf16>, vector<256x128xf32> -> vector<256x128xf32>
    %c0_51 = arith.constant 0 : index
    %c0_52 = arith.constant 0 : index
    %76 = vector.load %arg12[%c0_51, %c0_52] : memref<256x128xf32, #tpu.memory_space<vmem>>, vector<256x128xf32>
    %77 = arith.addf %76, %75 : vector<256x128xf32>
    %c0_53 = arith.constant 0 : index
    %c0_54 = arith.constant 0 : index
    %78 = vector.load %arg12[%c0_53, %c0_54] : memref<256x128xf32, #tpu.memory_space<vmem>>, vector<256x128xf32>
    tpu.vector_store %arg12[%c0_53, %c0_54], %77 {strides = array<i32>} : memref<256x128xf32, #tpu.memory_space<vmem>>, vector<256x128xf32>,
    %c0_55 = arith.constant 0 : index
    %c96 = arith.constant 96 : index
    %79 = vector.load %arg11[%c0_55, %c96] : memref<256x128xbf16, #tpu.memory_space<vmem>>, vector<256x32xbf16>
    %c0_56 = arith.constant 0 : index
    %c96_57 = arith.constant 96 : index
    %80 = vector.load %arg9[%c0_56, %c96_57] : memref<256x128xbf16, #tpu.memory_space<vmem>>, vector<256x32xbf16>
    %c0_58 = arith.constant 0 : index
    %c96_59 = arith.constant 96 : index
    %81 = vector.load %arg10[%c0_58, %c96_59] : memref<256x128xbf16, #tpu.memory_space<vmem>>, vector<256x32xbf16>
    %cst_60 = arith.constant dense<0.000000e+00> : vector<256x256xf32>
    %82 = tpu.matmul %79, %80, %cst_60 {dimension_numbers = #tpu.dot_dimension_numbers<[1], [1], [0], [0], [0, 0, 1, 0], [], []>} : vector<256x32xbf16>, vector<256x32xbf16>, vector<256x256xf32> -> vector<256x256xf32>
    %cst_61 = arith.constant dense<0xFF800000> : vector<256xf32>
    %83 = vector.multi_reduction <maximumf>, %82, %cst_61 [1] : vector<256x256xf32> to vector<256xf32>
    %84 = vector.shape_cast %83 : vector<256xf32> to vector<256x1xf32>
    %85 = vector.broadcast %84 : vector<256x1xf32> to vector<256x256xf32>
    %86 = arith.subf %82, %85 : vector<256x256xf32>
    %87 = math.exp %86 : vector<256x256xf32>
    %cst_62 = arith.constant dense<0.000000e+00> : vector<256xf32>
    %88 = vector.multi_reduction <add>, %87, %cst_62 [1] : vector<256x256xf32> to vector<256xf32>
    %89 = vector.shape_cast %88 : vector<256xf32> to vector<256x1xf32>
    %90 = arith.truncf %87 : vector<256x256xf32> to vector<256x256xbf16>
    %cst_63 = arith.constant dense<0.000000e+00> : vector<256x32xf32>
    %91 = tpu.matmul %90, %81, %cst_63 {dimension_numbers = #tpu.dot_dimension_numbers<[1], [0], [0], [1], [0, 0, 1, 1], [], []>} : vector<256x256xbf16>, vector<256x32xbf16>, vector<256x32xf32> -> vector<256x32xf32>
    %92 = tpu.reciprocal %89 {approx = true} : vector<256x1xf32> -> vector<256x1xf32>
    %93 = vector.broadcast %92 : vector<256x1xf32> to vector<256x32xf32>
    %94 = arith.mulf %91, %93 : vector<256x32xf32>
    %95 = arith.truncf %94 : vector<256x32xf32> to vector<256x32xbf16>
    %c96_64 = arith.constant 96 : index
    %c0_65 = arith.constant 0 : index
    %96 = vector.load %arg6[%c96_64, %c0_65] : memref<128x128xbf16, #tpu.memory_space<vmem>>, vector<32x128xbf16>
    %cst_66 = arith.constant dense<0.000000e+00> : vector<256x128xf32>
    %97 = tpu.matmul %95, %96, %cst_66 {dimension_numbers = #tpu.dot_dimension_numbers<[1], [0], [0], [1], [0, 0, 1, 1], [], []>} : vector<256x32xbf16>, vector<32x128xbf16>, vector<256x128xf32> -> vector<256x128xf32>
    %c0_67 = arith.constant 0 : index
    %c0_68 = arith.constant 0 : index
    %98 = vector.load %arg12[%c0_67, %c0_68] : memref<256x128xf32, #tpu.memory_space<vmem>>, vector<256x128xf32>
    %99 = arith.addf %98, %97 : vector<256x128xf32>
    %c0_69 = arith.constant 0 : index
    %c0_70 = arith.constant 0 : index
    %100 = vector.load %arg12[%c0_69, %c0_70] : memref<256x128xf32, #tpu.memory_space<vmem>>, vector<256x128xf32>
    tpu.vector_store %arg12[%c0_69, %c0_70], %99 {strides = array<i32>} : memref<256x128xf32, #tpu.memory_space<vmem>>, vector<256x128xf32>,
    %c0_71 = arith.constant 0 : index
    %c0_72 = arith.constant 0 : index
    %101 = vector.load %arg12[%c0_71, %c0_72] : memref<256x128xf32, #tpu.memory_space<vmem>>, vector<256x128xf32>
    %c0_73 = arith.constant 0 : index
    %c0_74 = arith.constant 0 : index
    %c0_75 = arith.constant 0 : index
    %102 = vector.load %arg8[%c0_73, %c0_74, %c0_75] : memref<1x256x128xf32, #tpu.memory_space<vmem>>, vector<1x256x128xf32>
    %103 = vector.shape_cast %102 : vector<1x256x128xf32> to vector<256x128xf32>
    %104 = vector.shape_cast %101 : vector<256x128xf32> to vector<1x256x128xf32>
    tpu.vector_store %arg8[%c0_73, %c0_74, %c0_75], %104 {strides = array<i32>} : memref<1x256x128xf32, #tpu.memory_space<vmem>>, vector<1x256x128xf32>,
    return
  }
  func.func @transform_0(%arg0: i32, %arg1: i32) -> (i32, i32, i32) {
    %c0_i32 = arith.constant 0 : i32
    %c0_i32_0 = arith.constant 0 : i32
    %c0_i32_1 = arith.constant 0 : i32
    return %arg0, %c0_i32, %c0_i32_0 : i32, i32, i32
  }
  func.func @transform_1(%arg0: i32, %arg1: i32) -> (i32, i32) {
    %c0_i32 = arith.constant 0 : i32
    %c0_i32_0 = arith.constant 0 : i32
    %c0_i32_1 = arith.constant 0 : i32
    return %c0_i32, %c0_i32_0 : i32, i32
  }
  func.func @transform_2(%arg0: i32, %arg1: i32) -> (i32, i32) {
    %c0_i32 = arith.constant 0 : i32
    %c0_i32_0 = arith.constant 0 : i32
    %c0_i32_1 = arith.constant 0 : i32
    return %c0_i32, %c0_i32_0 : i32, i32
  }
  func.func @transform_3(%arg0: i32, %arg1: i32) -> (i32, i32) {
    %c0_i32 = arith.constant 0 : i32
    %c0_i32_0 = arith.constant 0 : i32
    %c0_i32_1 = arith.constant 0 : i32
    return %c0_i32, %c0_i32_0 : i32, i32
  }
  func.func @transform_4(%arg0: i32, %arg1: i32) -> (i32, i32) {
    %c0_i32 = arith.constant 0 : i32
    %c0_i32_0 = arith.constant 0 : i32
    %c0_i32_1 = arith.constant 0 : i32
    return %c0_i32, %c0_i32_0 : i32, i32
  }
  func.func @transform_5(%arg0: i32, %arg1: i32) -> (i32, i32) {
    %c0_i32 = arith.constant 0 : i32
    %c0_i32_0 = arith.constant 0 : i32
    %c0_i32_1 = arith.constant 0 : i32
    return %c0_i32, %c0_i32_0 : i32, i32
  }
  func.func @transform_6(%arg0: i32, %arg1: i32) -> (i32, i32, i32) {
    %c0_i32 = arith.constant 0 : i32
    %c0_i32_0 = arith.constant 0 : i32
    return %arg0, %arg1, %c0_i32 : i32, i32, i32
  }
}

</mosaic_0001>

<bundles_post_ra>
// kernel: tpu_custom_call.1
= control target key start
LH: loop header
LB: loop body
LE: loop exit
PB: predicated region body
PF: predicated region fallthrough
CT: control target
= control target key end

     0   :  { %s13576_s0 = inlined_call_operand.hbm [shape: bf16[2,256,128], index: 0, kind: input, shape index: {}]   ;;  %s13577_s1 = inlined_call_operand.hbm [shape: bf16[128,128], index: 1, kind: input, shape index: {}]   ;;  %s13578_s2 = inlined_call_operand.hbm [shape: bf16[128,128], index: 2, kind: input, shape index: {}]   ;;  %s13579_s3 = inlined_call_operand.hbm [shape: bf16[128,128], index: 3, kind: input, shape index: {}]   ;;  %s13580_s4 = inlined_call_operand.hbm [shape: bf16[128,128], index: 4, kind: input, shape index: {}]   ;;  %s13581_s5 = inlined_call_operand.vmem [shape: f32[1,128], index: 5, kind: input, shape index: {}]   ;;  %s13582_s6 = inlined_call_operand.hbm [shape: f32[2,256,128], index: 6, kind: output, shape index: {}]  }
   0x1   :  { %13942 = sst [smem:[#allocation146_spill]] %s13582_s6 }
   0x2   :  { %11 = vsyncpa [#allocation7], 0 }
   0x3   :  { %13 = vsyncpa [#allocation7 + $0x1], 0 }
   0x4   :  { %14 = vsyncpa [#allocation10], 0 }
   0x5   :  { %15 = vsyncpa [#allocation13], 0 }
   0x6   :  { %16 = vsyncpa [#allocation8], 0 }
   0x7   :  { %18 = vsyncpa [#allocation8 + $0x1], 0  ;;  %s9958_s21 = smov 0   ;;  %s9960_s22 = smov 0  }
   0x8   :  { %s9962_s23 = smov 0   ;;  %s9964_s24 = smov 0  }
   0x9   :  { %s9966_s25 = smov 0   ;;  %s9968_s26 = smov 0  }
   0xa LB: > { %13943 = sst [smem:[#allocation20_spill]] %s9888_s21  ;;  %s7268_s27 = sadd.s32 4294967295, %s9908_s26   ;;  %s9908_s26 = sphi %s9968_s26, %s24_s26   ;;  %s9904_s25 = sphi %s9966_s25, %s14651_s25   ;;  %s9900_s24 = sphi %s9964_s24, %s14650_s24   ;;  %s9896_s23 = sphi %s9962_s23, %s14649_s23   ;;  %s9892_s22 = sphi %s9960_s22, %s14648_s22   ;;  %s9888_s21 = sphi %s9958_s21, %s14647_s21  }
   0xb   : > { %s7269_s28 = sadd.s32 4294967294, %s9908_s26   ;;  %p56_p0 = scmp.ne.s32.totalorder %s9892_s22, %s9888_s21 }
   0xc   : > { %p9992_p1 = scmp.eq.s32.totalorder %s7268_s27, 0  ;;  %p9996_p2 = scmp.eq.s32.totalorder %s7268_s27, 1 }
   0xd   : > { %p193_p3 = scmp.eq.s32.totalorder %s7269_s28, 1  ;;  %p7270_p5 = scmp.ge.s32.totalorder %s9908_s26, 1 }
   0xe   : > { %s13944_s29 = scalar_select %p9992_p1, 1, 0 }
   0xf   : > { %s13945_s30 = scalar_select %p9996_p2, 1, 0 }
  0x10   : > { %p10002_p4 = por %p9992_p1, %p56_p0  ;;  %p10007_p6 = por %p193_p3, %p56_p0 }
  0x11   : > { %p200_p7 = scmp.lt.s32.totalorder %s9908_s26, 3  ;;  %s9910_s10 = smov [#allocation9]  }
  0x12   : > { %s13946_s7 = scalar_select %p10002_p4, 1, 0 }
  0x13   : > { %s13947_s8 = scalar_select %p10007_p6, 1, 0 }
  0x14   : > { %p10012_p8 = pnand %p7270_p5, %p200_p7  ;;  %s212_s11 = sshll.u32 %s9910_s10, 4  ;;  %s10016_s11 = int_to_ptr.vmem [resolvable:$true] %s212_s11 }
  0x15   : > { %13948 = sst [smem:[#allocation21_spill]] %s13947_s8  ;;  %s9911_s13 = smov [#allocation12]  }
  0x16   : > { %s13949_s9 = scalar_select %p10012_p8, 1, 0 }
  0x17   : > { %p8754_p9 = pneg %p10012_p8  ;;  %s238_s14 = sshll.u32 %s9911_s13, 4  ;;  %s10027_s14 = int_to_ptr.vmem [resolvable:$true] %s238_s14 }
  0x18   : > { %s9912_s15 = smov [#allocation11]   ;;  %s9676_s19 = scalar_lea.hbm %s13577_s1, 1024 }
  0x19   : > { %p10023_p11 = pnand %p8754_p9, %p9992_p1  ;;  %s10029_s16 = sshll.u32 %s9912_s15, 4  ;;  %s226_s16 = int_to_ptr.vmem [resolvable:$true] %s10029_s16 }
  0x1a   : > { %p9677_p12 = scmp.ne.s32.totalorder %s13577_s1, %s9676_s19  ;;  %p9683_p5 = scmp.lt.u32.totalorder %s9676_s19, %s13577_s1 }
  0x1b   : > { %p10039_p13 = pneg %p10023_p11 }
  0x1d   : > { %p9679_p0 = pnand %p10039_p13, %p9677_p12 }
  0x1f   : > { %p9680_p3 = pneg %p9679_p0 }
  0x21   : > { %p9685_p7 = pnand %p9683_p5, %p9680_p3 }
  0x23   : > { %9688 = shalt.err (!%p9685_p7)
}
  0x24   : > { %s9689_s15 = scalar_lea.vmem %s10016_s11, 1024  ;;  %p9697_p1 = scmp.lt.s32.totalorder %s10016_s11, %s10016_s11 }
  0x25   : > { %p9690_p9 = scmp.ne.s32.totalorder %s10016_s11, %s9689_s15  ;;  %p9698_p4 = scmp.lt.s32.totalorder %s9689_s15, %s9689_s15 }
  0x27   : > { %p9692_p10 = pnand %p9690_p9, %p10039_p13  ;;  %p9699_p12 = por %p9698_p4, %p9697_p1 }
  0x29   : > { %p9693_p6 = pneg %p9692_p10 }
  0x2b   : > { %p9700_p0 = pnand %p9699_p12, %p9693_p6 }
  0x2d   : > { %9703 = shalt.err (!%p9700_p0)
}
  0x2e   : > { %s9913_s17 = smov 64   ;;  %s9914_s18 = smov 4  }
  0x2f   : > { %8757 = dma.hbm_to_vmem [thread:$0]  (!%p10023_p11), %s13577_s1, 1024, %s10016_s11, [#allocation10], %s9913_s17, %s9913_s17, %s9914_s18  }
  0x30   : > { %s9704_s13 = scalar_lea.hbm %s13579_s3, 1024 }
  0x31   : > { %p9705_p1 = scmp.ne.s32.totalorder %s13579_s3, %s9704_s13  ;;  %p9711_p10 = scmp.lt.u32.totalorder %s9704_s13, %s13579_s3 }
  0x33   : > { %p9707_p4 = pnand %p9705_p1, %p10039_p13 }
  0x35   : > { %p9708_p6 = pneg %p9707_p4 }
  0x37   : > { %p9713_p3 = pnand %p9711_p10, %p9708_p6 }
  0x39   : > { %9716 = shalt.err (!%p9713_p3)
}
  0x3a   : > { %s9717_s11 = scalar_lea.vmem %s10027_s14, 1024  ;;  %p9725_p12 = scmp.lt.s32.totalorder %s10027_s14, %s10027_s14 }
  0x3b   : > { %p9718_p5 = scmp.ne.s32.totalorder %s10027_s14, %s9717_s11  ;;  %p9726_p0 = scmp.lt.s32.totalorder %s9717_s11, %s9717_s11 }
  0x3d   : > { %p9720_p7 = pnand %p9718_p5, %p10039_p13  ;;  %p9727_p1 = por %p9726_p0, %p9725_p12 }
  0x3f   : > { %p9721_p9 = pneg %p9720_p7 }
  0x41   : > { %p9728_p4 = pnand %p9727_p1, %p9721_p9 }
  0x43   : > { %9731 = shalt.err (!%p9728_p4)
}
  0x44   : > { %8763 = dma.hbm_to_vmem [thread:$0]  (!%p10023_p11), %s13579_s3, 1024, %s10027_s14, [#allocation13], %s9913_s17, %s9913_s17, %s9914_s18  }
  0x45   : > { %s9732_s20 = scalar_lea.hbm %s13578_s2, 1024 }
  0x46   : > { %p9733_p6 = scmp.ne.s32.totalorder %s13578_s2, %s9732_s20  ;;  %p9739_p5 = scmp.lt.u32.totalorder %s9732_s20, %s13578_s2 }
  0x48   : > { %p9735_p10 = pnand %p9733_p6, %p10039_p13 }
  0x4a   : > { %p9736_p3 = pneg %p9735_p10 }
  0x4c   : > { %p9741_p7 = pnand %p9739_p5, %p9736_p3 }
  0x4e   : > { %9744 = shalt.err (!%p9741_p7)
}
  0x4f   : > { %s9745_s11 = scalar_lea.vmem %s226_s16, 1024  ;;  %p9753_p1 = scmp.lt.s32.totalorder %s226_s16, %s226_s16 }
  0x50   : > { %p9746_p9 = scmp.ne.s32.totalorder %s226_s16, %s9745_s11  ;;  %p9754_p4 = scmp.lt.s32.totalorder %s9745_s11, %s9745_s11 }
  0x52   : > { %p9748_p12 = pnand %p9746_p9, %p10039_p13  ;;  %p9755_p8 = por %p9754_p4, %p9753_p1 }
  0x54   : > { %p9749_p0 = pneg %p9748_p12 }
  0x56   : > { %p9756_p2 = pnand %p9755_p8, %p9749_p0 }
  0x58   : > { %9759 = shalt.err (!%p9756_p2)
}
  0x59   : > { %8760 = dma.hbm_to_vmem [thread:$0]  (!%p10023_p11), %s13578_s2, 1024, %s226_s16, [#allocation10], %s9913_s17, %s9913_s17, %s9914_s18  }
  0x5a   : > { %s9915_s21 = smov [#allocation14]   ;;  %s9760_s27 = scalar_lea.hbm %s13580_s4, 1024 }
  0x5b   : > { %s251_s8 = sshll.u32 %s9915_s21, 4  ;;  %p9761_p2 = scmp.ne.s32.totalorder %s13580_s4, %s9760_s27  ;;  %s252_s8 = int_to_ptr.vmem [resolvable:$true] %s251_s8 }
  0x5c   : > { %p9767_p10 = scmp.lt.u32.totalorder %s9760_s27, %s13580_s4 }
  0x5d   : > { %p9763_p8 = pnand %p9761_p2, %p10039_p13 }
  0x5f   : > { %p9764_p6 = pneg %p9763_p8 }
  0x61   : > { %p9769_p3 = pnand %p9767_p10, %p9764_p6 }
  0x63   : > { %9772 = shalt.err (!%p9769_p3)
}
  0x64   : > { %s9773_s16 = scalar_lea.vmem %s252_s8, 1024  ;;  %p9781_p12 = scmp.lt.s32.totalorder %s252_s8, %s252_s8 }
  0x65   : > { %p9774_p5 = scmp.ne.s32.totalorder %s252_s8, %s9773_s16  ;;  %p9782_p0 = scmp.lt.s32.totalorder %s9773_s16, %s9773_s16 }
  0x67   : > { %p9776_p7 = pnand %p9774_p5, %p10039_p13  ;;  %p9783_p1 = por %p9782_p0, %p9781_p12 }
  0x69   : > { %p9777_p9 = pneg %p9776_p7 }
  0x6b   : > { %p9784_p4 = pnand %p9783_p1, %p9777_p9 }
  0x6d   : > { %9787 = shalt.err (!%p9784_p4)
}
  0x6e   : > { %8766 = dma.hbm_to_vmem [thread:$0]  (!%p10023_p11), %s13580_s4, 1024, %s252_s8, [#allocation13], %s9913_s17, %s9913_s17, %s9914_s18  }
  0x6f   : > { %s36_s28 = sadd.s32 1, %s9904_s25  ;;  %s43_s12 = sadd.s32 1, %s9896_s23 }
  0x70   : > { %p38_p13 = scmp.ge.s32.totalorder %s36_s28, 2  ;;  %p50_p2 = scmp.ne.s32.totalorder %s9896_s23, %s9892_s22 }
  0x71   : > { %p51_p8 = scmp.eq.s32.totalorder %s9908_s26, 0  ;;  %p8779_p6 = scmp.lt.s32.totalorder %s9908_s26, 2 }
  0x72   : > { %s14653_s28 = smov (%p38_p13, %s36_s28), 0  ;;  %p13952_p3 = scmp.ne.s32.totalorder %s13945_s30, 0 }
  0x73   : > { %p52_p10 = por %p51_p8, %p50_p2  ;;  %s40_s19 = ssub.s32 %s9904_s25, %s14653_s28 }
  0x74   : > { %p10142_p5 = por %p13952_p3, %p50_p2  ;;  %s268_s20 = sand.u32 1, %s9896_s23  }
  0x75   : > { %p41_p7 = scmp.eq.s32.totalorder %s40_s19, 0  ;;  %s7276_s8 = sshll.u32 %s268_s20, 7 }
  0x76   : > { %s7484_s27 = sshll.u32 %s9904_s25, 11  ;;  %s272_s30 = scalar_lea.vmem [#allocation6], %s7276_s8 }
  0x77   : > { %s10151_s10 = scalar_select %p41_p7, %s9896_s23, %s43_s12  }
  0x78   : > { %s10156_s11 = scalar_lea.hbm %s13576_s0, %s7484_s27  ;;  %s279_s16 = sshll.u32 %s272_s30, 4  ;;  %s10164_s16 = int_to_ptr.vmem [resolvable:$true] %s279_s16 }
  0x79   : > { %p10160_p11 = pnand %p8779_p6, %p52_p10  ;;  %s10166_s6 = scalar_lea.sflag [#allocation7], %s268_s20 }
  0x7a   : > { %s9788_s12 = scalar_lea.hbm %s10156_s11, 2048  ;;  %s9793_s27 = scalar_lea.hbm %s13576_s0, 4096 }
  0x7b   : > { %p9789_p9 = scmp.ne.s32.totalorder %s10156_s11, %s9788_s12  ;;  %p9790_p12 = pneg %p10160_p11 }
  0x7c   : > { %p9794_p4 = scmp.lt.u32.totalorder %s10156_s11, %s13576_s0  ;;  %p9795_p13 = scmp.lt.u32.totalorder %s9793_s27, %s9788_s12 }
  0x7d   : > { %p9791_p0 = pnand %p9790_p12, %p9789_p9  ;;  %p9797_p8 = scmp.lt.u32.totalorder %s9788_s12, %s10156_s11 }
  0x7e   : > { %p9796_p2 = por %p9795_p13, %p9794_p4 }
  0x7f   : > { %p9792_p1 = pneg %p9791_p0 }
  0x80   : > { %p9798_p6 = por %p9797_p8, %p9796_p2 }
  0x82   : > { %p9799_p10 = pnand %p9798_p6, %p9792_p1 }
  0x84   : > { %9802 = shalt.err (!%p9799_p10)
}
  0x85   : > { %s9803_s20 = scalar_lea.vmem %s10164_s16, 2048  ;;  %s9916_s30 = smov [#allocation6]  }
  0x86   : > { %p9804_p3 = scmp.ne.s32.totalorder %s10164_s16, %s9803_s20  ;;  %s9808_s19 = sshll.u32 %s9916_s30, 4  ;;  %s9809_s19 = int_to_ptr.vmem [resolvable:$false] %s9808_s19 }
  0x87   : > { %s9810_s8 = scalar_lea.vmem %s9809_s19, 4096  ;;  %p9811_p0 = scmp.lt.s32.totalorder %s10164_s16, %s9809_s19 }
  0x88   : > { %p9806_p7 = pnand %p9804_p3, %p9790_p12  ;;  %p9812_p4 = scmp.lt.s32.totalorder %s9810_s8, %s9803_s20 }
  0x8a   : > { %p9807_p9 = pneg %p9806_p7  ;;  %p9813_p13 = por %p9812_p4, %p9811_p0 }
  0x8c   : > { %p9814_p2 = pnand %p9813_p13, %p9807_p9 }
  0x8e   : > { %9817 = shalt.err (!%p9814_p2)
}
  0x8f   : > { %8770 = dma.hbm_to_vmem [thread:$0]  (!%p10160_p11), %s10156_s11, 2048, %s10164_s16, %s10166_s6, %s9913_s17, %s9913_s17, %s9914_s18  }
  0x90   : > { %p13955_p12 = scmp.ne.s32.totalorder %s13949_s9, 0 }
  0x92   : > { %291 = sbr.rel (%p13955_p12) target bundleno = 2832 (0xb10), region = 44 }
  0x99   : > { %s10200_s12 = sand.u32 1, %s9892_s22   ;;  %p13956_p1 = scmp.ne.s32.totalorder %s13946_s7, 0 }
  0x9a   : > { %s7280_s27 = sshll.u32 %s10200_s12, 7  ;;  %s294_s13 = scalar_lea.sflag [#allocation7], %s10200_s12 }
  0x9b   : > { %s10204_s15 = scalar_lea.vmem [#allocation6], %s7280_s27 }
  0x9c   : > { %9871 = dma.done.wait (%p13956_p1), %s294_s13, 2048  }
  0x9d   : > { %9873 = vsyncadd (%p13956_p1), %s294_s13, 4294965248  ;;  %p13957_p11 = scmp.ne.s32.totalorder %s13944_s29, 0 }
  0x9f   : > { %9875 = dma.done.wait (%p13957_p11), [#allocation10], 2048  }
  0xa0   : > { %9877 = vsyncadd (%p13957_p11), [#allocation10], 4294965248 }
  0xa1   : > { %9879 = dma.done.wait (%p13957_p11), [#allocation13], 2048  }
  0xa2   : > { %9881 = vsyncadd (%p13957_p11), [#allocation13], 4294965248  ;;  %v8844_v0 = vld [vmem:[#allocation11] sm:$0xff]   ;;  %v8845_v1 = vld [vmem:[#allocation11 + $0x8] sm:$0xff]   ;;  %vm1428_vm0 = vcmask 261120   ;;  %s9917_s29 = smov 96  }
  0xa3   : > { %8270 = vmatprep.subr.bf16.mxu0 %v8844_v0  ;;  %8558 = vmatprep.subr.bf16.mxu1 %v8844_v0  ;;  %v8846_v2 = vld [vmem:[#allocation11 + $0x10] sm:$0xff]   ;;  %v8847_v3 = vld [vmem:[#allocation11 + $0x18] sm:$0xff]   ;;  %v10219_v4 = vld [vmem:[%s10204_s15] sm:$0xff]   ;;  %s9918_s7 = smov 64   ;;  %s9919_s9 = smov 32  }
  0xa4   : > { %8271 = vmatpush3.bf16.msra.mxu0 %v8844_v0  ;;  %8566 = vmatpush3.bf16.msra.mxu1 %v8844_v0  ;;  %v10222_v5 = vld [vmem:[%s10204_s15 + $0x40] sm:$0xff]   ;;  %v8849_v7 = vld [vmem:[#allocation11 + $0x28] sm:$0xff]   ;;  %v8850_v8 = vld [vmem:[#allocation11 + $0x30] sm:$0xff]   ;;  %s7285_s17 = sshll.u32 %s10200_s12, 8  ;;  %s7485_s14 = sshll.u32 %s9900_s24, 12 }
  0xa5   : > { %8272 = vmatprep.subr.bf16.mxu0 %v8845_v1  ;;  %8559 = vmatprep.subr.bf16.mxu1 %v8845_v1  ;;  %v8848_v6 = vld [vmem:[#allocation11 + $0x20] sm:$0xff]   ;;  %v8851_v9 = vld [vmem:[#allocation11 + $0x38] sm:$0xff]   ;;  %v10227_v11 = vld [vmem:[%s10204_s15 + $0x8] sm:$0xff]   ;;  %s13456_s16 = scalar_lea.vmem [#allocation15], %s7285_s17  ;;  %s14642_s19 = sld [smem:[#allocation146_spill]] }
  0xa6   : > { %8286 = vmatprep.mubr.bf16.mxu0 %v10219_v4  ;;  %8302 = vmatprep.mubr.bf16.mxu1 %v10222_v5  ;;  %v8858_v10 = vld [vmem:[#allocation12] sm:$0xff]   ;;  %v10230_v13 = vld [vmem:[%s10204_s15 + $0x48] sm:$0xff]   ;;  %v10233_v14 = vld [vmem:[%s10204_s15 + $0x10] sm:$0xff]   ;;  %s7144_s6 = sshll.u32 %s13456_s16, 4  ;;  %s7129_s24 = scalar_lea.sflag [#allocation8], %s10200_s12  ;;  %s13523_s6 = int_to_ptr.vmem [resolvable:$true] %s7144_s6 }
  0xa7   : > { %v8861_v12 = vld [vmem:[#allocation9] sm:$0xff]   ;;  %v10236_v15 = vld [vmem:[%s10204_s15 + $0x50] sm:$0xff]   ;;  %v8862_v16 = vld [vmem:[#allocation12 + $0x8] sm:$0xff]   ;;  %s9818_s27 = scalar_lea.vmem %s13523_s6, 4096  ;;  %s9920_s13 = smov [#allocation15]  }
  0xa8   : > { %8273 = vmatpush3.bf16.msra.mxu0 %v8845_v1  ;;  %8567 = vmatpush3.bf16.msra.mxu1 %v8845_v1  ;;  %v8863_v17 = vld [vmem:[#allocation9 + $0x8] sm:$0xff]   ;;  %v10243_v18 = vld [vmem:[%s10204_s15 + $0x18] sm:$0xff]   ;;  %v8864_v20 = vld [vmem:[#allocation12 + $0x10] sm:$0xff]   ;;  %p9819_p8 = scmp.ne.s32.totalorder %s13523_s6, %s9818_s27 }
  0xa9   : > { %8274 = vmatprep.subr.bf16.mxu0 %v8846_v2  ;;  %8560 = vmatprep.subr.bf16.mxu1 %v8846_v2  ;;  %v10246_v19 = vld [vmem:[%s10204_s15 + $0x58] sm:$0xff]   ;;  %v8865_v21 = vld [vmem:[#allocation9 + $0x10] sm:$0xff]   ;;  %v10249_v22 = vld [vmem:[%s10204_s15 + $0x60] sm:$0xff]  }
  0xaa   : > { %v10252_v23 = vld [vmem:[%s10204_s15 + $0x20] sm:$0xff]   ;;  %v8866_v24 = vld [vmem:[#allocation12 + $0x18] sm:$0xff]   ;;  %v10259_v27 = vld [vmem:[%s10204_s15 + $0x68] sm:$0xff]   ;;  %p9820_p6 = pnand %p9819_p8, %p10142_p5 }
  0xab   : > { %v8868_v25 = vld [vmem:[#allocation9 + $0x18] sm:$0xff]   ;;  %v8871_v26 = vld [vmem:[#allocation12 + $0x20] sm:$0xff]   ;;  %v8872_v28 = vld [vmem:[%s10204_s15 + $0x28] sm:$0xff]   ;;  %s13521_s8 = scalar_lea.hbm %s14642_s19, %s7485_s14 }
  0xac   : > { %8275 = vmatpush3.bf16.msra.mxu0 %v8846_v2  ;;  %8568 = vmatpush3.bf16.msra.mxu1 %v8846_v2  ;;  %v8873_v29 = vld [vmem:[#allocation9 + $0x20] sm:$0xff]   ;;  %v10263_v30 = vld [vmem:[%s10204_s15 + $0x70] sm:$0xff]   ;;  %v8874_v32 = vld [vmem:[#allocation12 + $0x28] sm:$0xff]   ;;  %p9821_p10 = pneg %p9820_p6 }
  0xad   : > { %8276 = vmatprep.subr.bf16.mxu0 %v8847_v3  ;;  %8561 = vmatprep.subr.bf16.mxu1 %v8847_v3  ;;  %v8879_v31 = vld [vmem:[%s10204_s15 + $0x30] sm:$0xff]   ;;  %v8876_v33 = vld [vmem:[#allocation9 + $0x28] sm:$0xff]   ;;  %v10269_v34 = vld [vmem:[%s10204_s15 + $0x78] sm:$0xff]  }
  0xae   : > { %v8878_v35 = vld [vmem:[#allocation12 + $0x30] sm:$0xff]   ;;  %v8880_v37 = vld [vmem:[%s10204_s15 + $0x38] sm:$0xff]   ;;  %v8884_v40 = vld [vmem:[%s10204_s15] sm:$0xff]  }
  0xaf   : > { %v8881_v36 = vld [vmem:[#allocation9 + $0x30] sm:$0xff]   ;;  %v8882_v38 = vld [vmem:[#allocation12 + $0x38] sm:$0xff]   ;;  %v8885_v41 = vld [vmem:[%s10204_s15 + $0x8] sm:$0xff]  }
  0xb0   : > { %8277 = vmatpush3.bf16.msra.mxu0 %v8847_v3  ;;  %8569 = vmatpush3.bf16.msra.mxu1 %v8847_v3  ;;  %v8883_v39 = vld [vmem:[#allocation9 + $0x38] sm:$0xff]   ;;  %v8886_v42 = vld [vmem:[%s10204_s15 + $0x10] sm:$0xff]   ;;  %v8888_v44 = vld [vmem:[%s10204_s15 + $0x20] sm:$0xff]  }
  0xb1   : > { %8278 = vmatprep.subr.bf16.mxu0 %v8848_v6  ;;  %8562 = vmatprep.subr.bf16.mxu1 %v8848_v6  ;;  %v8887_v43 = vld [vmem:[%s10204_s15 + $0x18] sm:$0xff]   ;;  %v8889_v45 = vld [vmem:[%s10204_s15 + $0x28] sm:$0xff]   ;;  %v8890_v46 = vld [vmem:[%s10204_s15 + $0x30] sm:$0xff]  }
  0xb2   : > { %v8891_v47 = vld [vmem:[%s10204_s15 + $0x38] sm:$0xff]   ;;  %v8892_v48 = vld [vmem:[%s10204_s15 + $0x40] sm:$0xff]   ;;  %v8893_v49 = vld [vmem:[%s10204_s15 + $0x48] sm:$0xff]  }
  0xb3   : > { %v8894_v50 = vld [vmem:[%s10204_s15 + $0x50] sm:$0xff]   ;;  %v8895_v51 = vld [vmem:[%s10204_s15 + $0x58] sm:$0xff]   ;;  %v8896_v52 = vld [vmem:[%s10204_s15 + $0x60] sm:$0xff]  }
  0xb4   : > { %8279 = vmatpush3.bf16.msra.mxu0 %v8848_v6  ;;  %8570 = vmatpush3.bf16.msra.mxu1 %v8848_v6  ;;  %v8897_v53 = vld [vmem:[%s10204_s15 + $0x68] sm:$0xff]   ;;  %v8898_v54 = vld [vmem:[%s10204_s15 + $0x70] sm:$0xff]   ;;  %v8899_v55 = vld [vmem:[%s10204_s15 + $0x78] sm:$0xff]   ;;  %s9822_s15 = sshll.u32 %s9920_s13, 4  ;;  %s9823_s15 = int_to_ptr.vmem [resolvable:$false] %s9822_s15 }
  0xb5   : > { %8280 = vmatprep.subr.bf16.mxu0 %v8849_v7  ;;  %8563 = vmatprep.subr.bf16.mxu1 %v8849_v7  ;;  %p9825_p3 = scmp.lt.s32.totalorder %s13523_s6, %s9823_s15 }
  0xb8   : > { %8281 = vmatpush3.bf16.msra.mxu0 %v8849_v7  ;;  %8571 = vmatpush3.bf16.msra.mxu1 %v8849_v7 }
  0xb9   : > { %8282 = vmatprep.subr.bf16.mxu0 %v8850_v8  ;;  %8564 = vmatprep.subr.bf16.mxu1 %v8850_v8 }
  0xbc   : > { %8283 = vmatpush3.bf16.msra.mxu0 %v8850_v8  ;;  %8572 = vmatpush3.bf16.msra.mxu1 %v8850_v8 }
  0xbd   : > { %8284 = vmatprep.subr.bf16.mxu0 %v8851_v9  ;;  %8565 = vmatprep.subr.bf16.mxu1 %v8851_v9 }
  0xc0   : > { %8285 = vmatpush3.bf16.msra.mxu0 %v8851_v9  ;;  %8573 = vmatpush3.bf16.msra.mxu1 %v8851_v9 }
  0xc1   : > { %8318 = vmatprep.subr.bf16.mxu1 %v8858_v10  ;;  %8366 = vmatprep.subr.bf16.mxu0 %v8861_v12 }
  0xc3   : > { %8287 = vmatmul.mubr.bf16.vlgmr.msra.gmra.mrb[0].mxu0 %v10227_v11  ;;  %8303 = vmatmul.mubr.bf16.vlgmr.msra.gmra.mrb[0].mxu1 %v10230_v13 }
  0xc4   : > { %8290 = vmatprep.mubr.bf16.mxu0 %v10233_v14  ;;  %8306 = vmatprep.mubr.bf16.mxu1 %v10236_v15 }
  0xc5   : > { %8319 = vmatpush3.bf16.msra.mxu1 %v8858_v10  ;;  %8367 = vmatpush3.bf16.msra.mxu0 %v8861_v12 }
  0xc6   : > { %8320 = vmatprep.subr.bf16.mxu1 %v8862_v16  ;;  %8368 = vmatprep.subr.bf16.mxu0 %v8863_v17 }
  0xc9   : > { %8321 = vmatpush3.bf16.msra.mxu1 %v8862_v16  ;;  %8369 = vmatpush3.bf16.msra.mxu0 %v8863_v17 }
  0xca   : > { %8322 = vmatprep.subr.bf16.mxu1 %v8864_v20  ;;  %8370 = vmatprep.subr.bf16.mxu0 %v8865_v21 }
  0xcb   : > { %8291 = vmatmul.mubr.bf16.gmra.mrb[4].mxu0 %v10243_v18  ;;  %8307 = vmatmul.mubr.bf16.gmra.mrb[4].mxu1 %v10246_v19 }
  0xcc   : > { %8310 = vmatprep.mubr.bf16.mxu1 %v10249_v22  ;;  %8294 = vmatprep.mubr.bf16.mxu0 %v10252_v23 }
  0xcd   : > { %8323 = vmatpush3.bf16.msra.mxu1 %v8864_v20  ;;  %8371 = vmatpush3.bf16.msra.mxu0 %v8865_v21 }
  0xce   : > { %8324 = vmatprep.subr.bf16.mxu1 %v8866_v24  ;;  %8372 = vmatprep.subr.bf16.mxu0 %v8868_v25 }
  0xd1   : > { %8325 = vmatpush3.bf16.msra.mxu1 %v8866_v24  ;;  %8373 = vmatpush3.bf16.msra.mxu0 %v8868_v25 }
  0xd2   : > { %8326 = vmatprep.subr.bf16.mxu1 %v8871_v26  ;;  %8374 = vmatprep.subr.bf16.mxu0 %v8873_v29 }
  0xd3   : > { %8311 = vmatmul.mubr.bf16.gmra.mrb[8].mxu1 %v10259_v27  ;;  %8295 = vmatmul.mubr.bf16.gmra.mrb[8].mxu0 %v8872_v28 }
  0xd4   : > { %8314 = vmatprep.mubr.bf16.mxu1 %v10263_v30  ;;  %8298 = vmatprep.mubr.bf16.mxu0 %v8879_v31 }
  0xd5   : > { %8327 = vmatpush3.bf16.msra.mxu1 %v8871_v26  ;;  %8375 = vmatpush3.bf16.msra.mxu0 %v8873_v29 }
  0xd6   : > { %8328 = vmatprep.subr.bf16.mxu1 %v8874_v32  ;;  %8376 = vmatprep.subr.bf16.mxu0 %v8876_v33 }
  0xd9   : > { %8329 = vmatpush3.bf16.msra.mxu1 %v8874_v32  ;;  %8377 = vmatpush3.bf16.msra.mxu0 %v8876_v33 }
  0xda   : > { %8330 = vmatprep.subr.bf16.mxu1 %v8878_v35  ;;  %8378 = vmatprep.subr.bf16.mxu0 %v8881_v36 }
  0xdb   : > { %8315 = vmatmul.mubr.bf16.gmra.mrb[12].mxu1 %v10269_v34  ;;  %8299 = vmatmul.mubr.bf16.gmra.mrb[12].mxu0 %v8880_v37 }
  0xdc   : > { %8334 = vmatprep.mubr.bf16.mxu1 %v10219_v4  ;;  %8382 = vmatprep.mubr.bf16.mxu0 %v8884_v40 }
  0xdd   : > { %8331 = vmatpush3.bf16.msra.mxu1 %v8878_v35  ;;  %8379 = vmatpush3.bf16.msra.mxu0 %v8881_v36 }
  0xde   : > { %8332 = vmatprep.subr.bf16.mxu1 %v8882_v38  ;;  %8380 = vmatprep.subr.bf16.mxu0 %v8883_v39 }
  0xe1   : > { %8333 = vmatpush3.bf16.msra.mxu1 %v8882_v38  ;;  %8381 = vmatpush3.bf16.msra.mxu0 %v8883_v39 }
  0xe4   : > { %8335 = vmatmul.mubr.bf16.vlgmr.msra.gmra.mrb[16].mxu1 %v10227_v11  ;;  %8383 = vmatmul.mubr.bf16.vlgmr.msra.gmra.mrb[16].mxu0 %v8885_v41 }
  0xe5   : > { %8338 = vmatprep.mubr.bf16.mxu1 %v10233_v14  ;;  %8386 = vmatprep.mubr.bf16.mxu0 %v8886_v42 }
  0xec   : > { %8339 = vmatmul.mubr.bf16.gmra.mrb[20].mxu1 %v10243_v18  ;;  %8387 = vmatmul.mubr.bf16.gmra.mrb[20].mxu0 %v8887_v43 }
  0xed   : > { %8342 = vmatprep.mubr.bf16.mxu1 %v10252_v23  ;;  %8390 = vmatprep.mubr.bf16.mxu0 %v8888_v44 }
  0xf4   : > { %8343 = vmatmul.mubr.bf16.gmra.mrb[24].mxu1 %v8872_v28  ;;  %8391 = vmatmul.mubr.bf16.gmra.mrb[24].mxu0 %v8889_v45 }
  0xf5   : > { %8346 = vmatprep.mubr.bf16.mxu1 %v8879_v31  ;;  %8394 = vmatprep.mubr.bf16.mxu0 %v8890_v46 }
  0xfc   : > { %8347 = vmatmul.mubr.bf16.gmra.mrb[28].mxu1 %v8880_v37  ;;  %8395 = vmatmul.mubr.bf16.gmra.mrb[28].mxu0 %v8891_v47 }
  0xfd   : > { %8350 = vmatprep.mubr.bf16.mxu1 %v10222_v5  ;;  %8398 = vmatprep.mubr.bf16.mxu0 %v8892_v48 }
 0x104   : > { %8351 = vmatmul.mubr.bf16.gmra.mrb[32].mxu1 %v10230_v13  ;;  %8399 = vmatmul.mubr.bf16.gmra.mrb[32].mxu0 %v8893_v49 }
 0x105   : > { %8402 = vmatprep.mubr.bf16.mxu0 %v8894_v50  ;;  %8354 = vmatprep.mubr.bf16.mxu1 %v10236_v15 }
 0x10c   : > { %8403 = vmatmul.mubr.bf16.gmra.mrb[36].mxu0 %v8895_v51  ;;  %8355 = vmatmul.mubr.bf16.gmra.mrb[36].mxu1 %v10246_v19 }
 0x10d   : > { %8406 = vmatprep.mubr.bf16.mxu0 %v8896_v52  ;;  %8358 = vmatprep.mubr.bf16.mxu1 %v10249_v22 }
 0x114   : > { %8407 = vmatmul.mubr.bf16.gmra.mrb[40].mxu0 %v8897_v53  ;;  %8359 = vmatmul.mubr.bf16.gmra.mrb[40].mxu1 %v10259_v27 }
 0x115   : > { %8410 = vmatprep.mubr.bf16.mxu0 %v8898_v54  ;;  %8362 = vmatprep.mubr.bf16.mxu1 %v10263_v30 }
 0x11c   : > { %8411 = vmatmul.mubr.bf16.gmra.mrb[44].mxu0 %v8899_v55  ;;  %8363 = vmatmul.mubr.bf16.gmra.mrb[44].mxu1 %v10269_v34 }
 0x196   : > { %v8288_v56 = vpop.f32.mrb[0].mxu0  ;;  %v8304_v57 = vpop.f32.mrb[0].mxu1 }
 0x197   : > { %v574_v58 = vpop.f32.mrb[1].mxu0  ;;  %v638_v59 = vpop.f32.mrb[1].mxu1 }
 0x198   : > { %v8289_v60 = vpop.f32.mrb[2].mxu0  ;;  %v8305_v61 = vpop.f32.mrb[2].mxu1 }
 0x199   : > { %v10302_v62 = vpack.c.bf16 %v8289_v60, %v8288_v56  ;;  %v10304_v63 = vpack.c.bf16 %v8305_v61, %v8304_v57  ;;  %v577_v0 = vpop.f32.mrb[3].mxu0  ;;  %v641_v1 = vpop.f32.mrb[3].mxu1 }
 0x19a   : > { %v10306_v2 = vpack.c.bf16 %v577_v0, %v574_v58  ;;  %v10308_v3 = vpack.c.bf16 %v641_v1, %v638_v59 }
 0x19b   : > { %13958 = vst [vmem:[#allocation22_spill] sm:$0xff] %v10302_v62  ;;  %13959 = vst [vmem:[#allocation23_spill] sm:$0xff] %v10304_v63  ;;  %2769 = vrot.lane.b32.xlu1 %v10304_v63, %s9917_s29  ;;  %2753 = vrot.lane.b32.xlu0 %v10302_v62, %s9917_s29  ;;  %v1481_v17 = vsel %vm1428_vm0, %v10302_v62, 0 }
 0x19c   : > { %13960 = vst [vmem:[#allocation24_spill] sm:$0xff] %v10306_v2  ;;  %13961 = vst [vmem:[#allocation25_spill] sm:$0xff] %v10308_v3  ;;  %8702 = vmatprep.subr.msk.bf16.mxu1 %vm1428_vm0, %v10308_v3  ;;  %v1478_v4 = vsel %vm1428_vm0, %v10306_v2, 0 }
 0x19d   : > { %7559 = vmatpush3.bf16.xpose.msra.mxu1 %v1478_v4 }
 0x19e   : > { %8703 = vmatprep.subr.msk.bf16.mxu1 %vm1428_vm0, %v10304_v63  ;;  %v8308_v5 = vpop.f32.mrb[4].mxu1  ;;  %v8292_v6 = vpop.f32.mrb[4].mxu0 }
 0x19f   : > { %4244 = vrot.lane.b32.xlu1 %v10304_v63, %s9918_s7  ;;  %4228 = vrot.lane.b32.xlu0 %v10302_v62, %s9918_s7  ;;  %v590_v7 = vpop.f32.mrb[5].mxu0  ;;  %v654_v8 = vpop.f32.mrb[5].mxu1 }
 0x1a0   : > { %v8293_v9 = vpop.f32.mrb[6].mxu0  ;;  %v8309_v10 = vpop.f32.mrb[6].mxu1 }
 0x1a1   : > { %v10324_v11 = vpack.c.bf16 %v8293_v9, %v8292_v6  ;;  %v10326_v12 = vpack.c.bf16 %v8309_v10, %v8308_v5  ;;  %v593_v13 = vpop.f32.mrb[7].mxu0  ;;  %v657_v14 = vpop.f32.mrb[7].mxu1 }
 0x1a2   : > { %v10328_v15 = vpack.c.bf16 %v593_v13, %v590_v7  ;;  %v10330_v16 = vpack.c.bf16 %v657_v14, %v654_v8 }
 0x1a3   : > { %13962 = vst [vmem:[#allocation26_spill] sm:$0xff] %v10324_v11  ;;  %13963 = vst [vmem:[#allocation27_spill] sm:$0xff] %v10326_v12  ;;  %2767 = vrot.lane.b32.xlu1 %v10308_v3, %s9917_s29  ;;  %2751 = vrot.lane.b32.xlu0 %v10306_v2, %s9917_s29  ;;  %v1487_v43 = vsel %vm1428_vm0, %v10324_v11, 0 }
 0x1a4   : > { %13964 = vst [vmem:[#allocation28_spill] sm:$0xff] %v10328_v15  ;;  %13965 = vst [vmem:[#allocation29_spill] sm:$0xff] %v10330_v16  ;;  %v1484_v30 = vsel %vm1428_vm0, %v10328_v15, 0 }
 0x1a5   : > { %7561 = vmatpush3.bf16.xpose.msra.mxu1 %v1481_v17 }
 0x1a6   : > { %8704 = vmatprep.subr.msk.bf16.mxu1 %vm1428_vm0, %v10330_v16  ;;  %v8312_v18 = vpop.f32.mrb[8].mxu1  ;;  %v8296_v19 = vpop.f32.mrb[8].mxu0 }
 0x1a7   : > { %4242 = vrot.lane.b32.xlu1 %v10308_v3, %s9918_s7  ;;  %4226 = vrot.lane.b32.xlu0 %v10306_v2, %s9918_s7  ;;  %v606_v20 = vpop.f32.mrb[9].mxu0  ;;  %v670_v21 = vpop.f32.mrb[9].mxu1 }
 0x1a8   : > { %v8297_v22 = vpop.f32.mrb[10].mxu0  ;;  %v8313_v23 = vpop.f32.mrb[10].mxu1 }
 0x1a9   : > { %v10344_v24 = vpack.c.bf16 %v8297_v22, %v8296_v19  ;;  %v10346_v25 = vpack.c.bf16 %v8313_v23, %v8312_v18  ;;  %v609_v26 = vpop.f32.mrb[11].mxu0  ;;  %v673_v27 = vpop.f32.mrb[11].mxu1 }
 0x1aa   : > { %v10348_v28 = vpack.c.bf16 %v609_v26, %v606_v20  ;;  %v10350_v29 = vpack.c.bf16 %v673_v27, %v670_v21 }
 0x1ab   : > { %13966 = vst [vmem:[#allocation30_spill] sm:$0xff] %v10344_v24  ;;  %13967 = vst [vmem:[#allocation31_spill] sm:$0xff] %v10346_v25  ;;  %2773 = vrot.lane.b32.xlu1 %v10326_v12, %s9917_s29  ;;  %2757 = vrot.lane.b32.xlu0 %v10324_v11, %s9917_s29  ;;  %v1493_v9 = vsel %vm1428_vm0, %v10344_v24, 0 }
 0x1ac   : > { %13968 = vst [vmem:[#allocation32_spill] sm:$0xff] %v10348_v28  ;;  %13969 = vst [vmem:[#allocation33_spill] sm:$0xff] %v10350_v29  ;;  %v1490_v56 = vsel %vm1428_vm0, %v10348_v28, 0 }
 0x1ad   : > { %7563 = vmatpush3.bf16.xpose.msra.mxu1 %v1484_v30 }
 0x1ae   : > { %8705 = vmatprep.subr.msk.bf16.mxu1 %vm1428_vm0, %v10326_v12  ;;  %v8300_v31 = vpop.f32.mrb[12].mxu0  ;;  %v8316_v32 = vpop.f32.mrb[12].mxu1 }
 0x1af   : > { %4248 = vrot.lane.b32.xlu1 %v10326_v12, %s9918_s7  ;;  %4232 = vrot.lane.b32.xlu0 %v10324_v11, %s9918_s7  ;;  %v622_v33 = vpop.f32.mrb[13].mxu0  ;;  %v686_v34 = vpop.f32.mrb[13].mxu1 }
 0x1b0   : > { %v8301_v35 = vpop.f32.mrb[14].mxu0  ;;  %v8317_v36 = vpop.f32.mrb[14].mxu1 }
 0x1b1   : > { %v10364_v37 = vpack.c.bf16 %v8301_v35, %v8300_v31  ;;  %v10366_v38 = vpack.c.bf16 %v8317_v36, %v8316_v32  ;;  %v625_v39 = vpop.f32.mrb[15].mxu0  ;;  %v689_v40 = vpop.f32.mrb[15].mxu1 }
 0x1b2   : > { %v10368_v41 = vpack.c.bf16 %v625_v39, %v622_v33  ;;  %v10370_v42 = vpack.c.bf16 %v689_v40, %v686_v34 }
 0x1b3   : > { %13970 = vst [vmem:[#allocation34_spill] sm:$0xff] %v10364_v37  ;;  %13971 = vst [vmem:[#allocation35_spill] sm:$0xff] %v10366_v38  ;;  %2771 = vrot.lane.b32.xlu1 %v10330_v16, %s9917_s29  ;;  %2755 = vrot.lane.b32.xlu0 %v10328_v15, %s9917_s29 }
 0x1b4   : > { %13972 = vst [vmem:[#allocation36_spill] sm:$0xff] %v10368_v41  ;;  %13973 = vst [vmem:[#allocation37_spill] sm:$0xff] %v10370_v42  ;;  %v1496_v30 = vsel %vm1428_vm0, %v10368_v41, 0 }
 0x1b5   : > { %7565 = vmatpush3.bf16.xpose.msra.mxu1 %v1487_v43 }
 0x1b6   : > { %8706 = vmatprep.subr.msk.bf16.mxu1 %vm1428_vm0, %v10350_v29 }
 0x1b7   : > { %4246 = vrot.lane.b32.xlu1 %v10330_v16, %s9918_s7  ;;  %4230 = vrot.lane.b32.xlu0 %v10328_v15, %s9918_s7  ;;  %v8384_v44 = vpop.f32.mrb[16].mxu0  ;;  %v8336_v45 = vpop.f32.mrb[16].mxu1 }
 0x1b8   : > { %v1221_v46 = vpop.f32.mrb[17].mxu0  ;;  %v799_v47 = vpop.f32.mrb[17].mxu1 }
 0x1b9   : > { %v8385_v48 = vpop.f32.mrb[18].mxu0  ;;  %v8337_v49 = vpop.f32.mrb[18].mxu1 }
 0x1ba   : > { %v10384_v50 = vpack.c.bf16 %v8385_v48, %v8384_v44  ;;  %v1224_v51 = vpop.f32.mrb[19].mxu0  ;;  %v10386_v52 = vpack.c.bf16 %v8337_v49, %v8336_v45  ;;  %v802_v53 = vpop.f32.mrb[19].mxu1 }
 0x1bb   : > { %2777 = vrot.lane.b32.xlu1 %v10346_v25, %s9917_s29  ;;  %2761 = vrot.lane.b32.xlu0 %v10344_v24, %s9917_s29  ;;  %v10392_v54 = vpack.c.bf16 %v1224_v51, %v1221_v46  ;;  %v10394_v55 = vpack.c.bf16 %v802_v53, %v799_v47  ;;  %v1499_v47 = vsel %vm1428_vm0, %v10364_v37, 0 }
 0x1bc   : > { %13974 = vst [vmem:[#allocation38_spill] sm:$0xff] %v10384_v50  ;;  %13975 = vst [vmem:[#allocation39_spill] sm:$0xff] %v10386_v52 }
 0x1bd   : > { %13976 = vst [vmem:[#allocation40_spill] sm:$0xff] %v10392_v54  ;;  %13977 = vst [vmem:[#allocation41_spill] sm:$0xff] %v10394_v55  ;;  %7567 = vmatpush3.bf16.xpose.msra.mxu1 %v1490_v56  ;;  %7574 = vmatprep.mubr.msk.bf16.mxu1 %vm1428_vm0, %v10392_v54 }
 0x1be   : > { %8707 = vmatprep.subr.msk.bf16.mxu1 %vm1428_vm0, %v10346_v25 }
 0x1bf   : > { %4252 = vrot.lane.b32.xlu1 %v10346_v25, %s9918_s7  ;;  %4236 = vrot.lane.b32.xlu0 %v10344_v24, %s9918_s7  ;;  %v8388_v57 = vpop.f32.mrb[20].mxu0  ;;  %v8340_v58 = vpop.f32.mrb[20].mxu1 }
 0x1c0   : > { %v1237_v59 = vpop.f32.mrb[21].mxu0  ;;  %v815_v60 = vpop.f32.mrb[21].mxu1 }
 0x1c1   : > { %v8389_v61 = vpop.f32.mrb[22].mxu0  ;;  %v8341_v0 = vpop.f32.mrb[22].mxu1 }
 0x1c2   : > { %v10406_v1 = vpack.c.bf16 %v8389_v61, %v8388_v57  ;;  %v10408_v4 = vpack.c.bf16 %v8341_v0, %v8340_v58  ;;  %v1240_v5 = vpop.f32.mrb[23].mxu0  ;;  %v818_v6 = vpop.f32.mrb[23].mxu1 }
 0x1c3   : > { %4234 = vrot.lane.b32.xlu0 %v10348_v28, %s9918_s7  ;;  %2759 = vrot.lane.b32.xlu1 %v10348_v28, %s9917_s29  ;;  %v10414_v7 = vpack.c.bf16 %v1240_v5, %v1237_v59  ;;  %v10416_v8 = vpack.c.bf16 %v818_v6, %v815_v60 }
 0x1c4   : > { %13978 = vst [vmem:[#allocation42_spill] sm:$0xff] %v10406_v1  ;;  %13979 = vst [vmem:[#allocation43_spill] sm:$0xff] %v10408_v4 }
 0x1c5   : > { %13980 = vst [vmem:[#allocation44_spill] sm:$0xff] %v10414_v7  ;;  %13981 = vst [vmem:[#allocation45_spill] sm:$0xff] %v10416_v8  ;;  %7569 = vmatpush3.bf16.xpose.msra.mxu1 %v1493_v9 }
 0x1c6   : > { %8708 = vmatprep.subr.msk.bf16.mxu1 %vm1428_vm0, %v10370_v42 }
 0x1c7   : > { %2775 = vrot.lane.b32.xlu1 %v10350_v29, %s9917_s29  ;;  %2765 = vrot.lane.b32.xlu0 %v10364_v37, %s9917_s29  ;;  %v8392_v10 = vpop.f32.mrb[24].mxu0  ;;  %v8344_v13 = vpop.f32.mrb[24].mxu1 }
 0x1c8   : > { %v1253_v14 = vpop.f32.mrb[25].mxu0  ;;  %v831_v17 = vpop.f32.mrb[25].mxu1 }
 0x1c9   : > { %v8393_v18 = vpop.f32.mrb[26].mxu0  ;;  %v8345_v19 = vpop.f32.mrb[26].mxu1 }
 0x1ca   : > { %v10426_v20 = vpack.c.bf16 %v8393_v18, %v8392_v10  ;;  %v10428_v21 = vpack.c.bf16 %v8345_v19, %v8344_v13  ;;  %v1256_v22 = vpop.f32.mrb[27].mxu0  ;;  %v834_v23 = vpop.f32.mrb[27].mxu1 }
 0x1cb   : > { %4250 = vrot.lane.b32.xlu1 %v10350_v29, %s9918_s7  ;;  %2763 = vrot.lane.b32.xlu0 %v10368_v41, %s9917_s29  ;;  %v10434_v26 = vpack.c.bf16 %v1256_v22, %v1253_v14  ;;  %v10436_v27 = vpack.c.bf16 %v834_v23, %v831_v17 }
 0x1cc   : > { %13982 = vst [vmem:[#allocation46_spill] sm:$0xff] %v10426_v20  ;;  %13983 = vst [vmem:[#allocation47_spill] sm:$0xff] %v10428_v21 }
 0x1cd   : > { %13984 = vst [vmem:[#allocation48_spill] sm:$0xff] %v10434_v26  ;;  %13985 = vst [vmem:[#allocation49_spill] sm:$0xff] %v10436_v27  ;;  %7571 = vmatpush3.bf16.xpose.msra.mxu1 %v1496_v30 }
 0x1ce   : > { %8709 = vmatprep.subr.msk.bf16.mxu1 %vm1428_vm0, %v10366_v38 }
 0x1cf   : > { %2781 = vrot.lane.b32.xlu1 %v10366_v38, %s9917_s29  ;;  %4238 = vrot.lane.b32.xlu0 %v10368_v41, %s9918_s7  ;;  %v8396_v31 = vpop.f32.mrb[28].mxu0  ;;  %v8348_v32 = vpop.f32.mrb[28].mxu1 }
 0x1d0   : > { %v1269_v33 = vpop.f32.mrb[29].mxu0  ;;  %v847_v34 = vpop.f32.mrb[29].mxu1 }
 0x1d1   : > { %v8397_v35 = vpop.f32.mrb[30].mxu0  ;;  %v8349_v36 = vpop.f32.mrb[30].mxu1 }
 0x1d2   : > { %v10446_v39 = vpack.c.bf16 %v8397_v35, %v8396_v31  ;;  %v10448_v40 = vpack.c.bf16 %v8349_v36, %v8348_v32  ;;  %v1272_v43 = vpop.f32.mrb[31].mxu0  ;;  %v850_v44 = vpop.f32.mrb[31].mxu1 }
 0x1d3   : > { %4240 = vrot.lane.b32.xlu1 %v10364_v37, %s9918_s7  ;;  %2703 = vrot.lane.b32.xlu0 %v10392_v54, %s9917_s29  ;;  %v10454_v45 = vpack.c.bf16 %v1272_v43, %v1269_v33  ;;  %v10456_v46 = vpack.c.bf16 %v850_v44, %v847_v34 }
 0x1d4   : > { %13986 = vst [vmem:[#allocation50_spill] sm:$0xff] %v10446_v39  ;;  %13987 = vst [vmem:[#allocation51_spill] sm:$0xff] %v10448_v40 }
 0x1d5   : > { %13988 = vst [vmem:[#allocation52_spill] sm:$0xff] %v10454_v45  ;;  %13989 = vst [vmem:[#allocation53_spill] sm:$0xff] %v10456_v46  ;;  %7573 = vmatpush3.bf16.xpose.msra.mxu1 %v1499_v47 }
 0x1d7   : > { %4256 = vrot.lane.b32.xlu1 %v10366_v38, %s9918_s7  ;;  %4178 = vrot.lane.b32.xlu0 %v10392_v54, %s9918_s7  ;;  %v8352_v48 = vpop.f32.mrb[32].mxu1  ;;  %v8400_v49 = vpop.f32.mrb[32].mxu0 }
 0x1d8   : > { %v863_v51 = vpop.f32.mrb[33].mxu1  ;;  %v1285_v53 = vpop.f32.mrb[33].mxu0 }
 0x1d9   : > { %v8353_v56 = vpop.f32.mrb[34].mxu1  ;;  %v8401_v57 = vpop.f32.mrb[34].mxu0 }
 0x1da   : > { %v10464_v58 = vpack.c.bf16 %v8353_v56, %v8352_v48  ;;  %v10466_v59 = vpack.c.bf16 %v8401_v57, %v8400_v49  ;;  %v1288_v60 = vpop.f32.mrb[35].mxu0  ;;  %v866_v61 = vpop.f32.mrb[35].mxu1 }
 0x1db   : > { %2779 = vrot.lane.b32.xlu1 %v10370_v42, %s9917_s29  ;;  %2707 = vrot.lane.b32.xlu0 %v10414_v7, %s9917_s29  ;;  %v10472_v0 = vpack.c.bf16 %v1288_v60, %v1285_v53  ;;  %v10474_v5 = vpack.c.bf16 %v866_v61, %v863_v51 }
 0x1dc   : > { %13990 = vst [vmem:[#allocation54_spill] sm:$0xff] %v10464_v58  ;;  %13991 = vst [vmem:[#allocation55_spill] sm:$0xff] %v10466_v59  ;;  %7575 = vmatmul.mubr.msk.bf16.vlgmr.msra.gmra.mrb[48].mxu1 %vm1428_vm0, %v10392_v54 }
 0x1dd   : > { %13992 = vst [vmem:[#allocation56_spill] sm:$0xff] %v10472_v0  ;;  %13993 = vst [vmem:[#allocation57_spill] sm:$0xff] %v10474_v5  ;;  %7576 = vmatprep.mubr.msk.bf16.mxu1 %vm1428_vm0, %v10384_v50  ;;  %7606 = vmatprep.subr.bf16.mxu0 %v10474_v5 }
 0x1de   : > { %7607 = vmatpush3.bf16.msra.mxu0 %v10394_v55 }
 0x1df   : > { %4254 = vrot.lane.b32.xlu1 %v10370_v42, %s9918_s7  ;;  %2711 = vrot.lane.b32.xlu0 %v10434_v26, %s9917_s29  ;;  %v8404_v6 = vpop.f32.mrb[36].mxu0  ;;  %v8356_v9 = vpop.f32.mrb[36].mxu1 }
 0x1e0   : > { %v1301_v10 = vpop.f32.mrb[37].mxu0  ;;  %v879_v13 = vpop.f32.mrb[37].mxu1  ;;  %7608 = vmatprep.subr.bf16.mxu0 %v10464_v58 }
 0x1e1   : > { %v8405_v14 = vpop.f32.mrb[38].mxu0  ;;  %v8357_v17 = vpop.f32.mrb[38].mxu1 }
 0x1e2   : > { %v10487_v18 = vpack.c.bf16 %v8405_v14, %v8404_v6  ;;  %v1304_v19 = vpop.f32.mrb[39].mxu0  ;;  %v10489_v22 = vpack.c.bf16 %v8357_v17, %v8356_v9  ;;  %v882_v23 = vpop.f32.mrb[39].mxu1  ;;  %7609 = vmatpush3.bf16.msra.mxu0 %v10386_v52 }
 0x1e3   : > { %2705 = vrot.lane.b32.xlu1 %v10384_v50, %s9917_s29  ;;  %2715 = vrot.lane.b32.xlu0 %v10454_v45, %s9917_s29  ;;  %v10496_v30 = vpack.c.bf16 %v1304_v19, %v1301_v10  ;;  %v10498_v31 = vpack.c.bf16 %v882_v23, %v879_v13 }
 0x1e4   : > { %13994 = vst [vmem:[#allocation58_spill] sm:$0xff] %v10487_v18  ;;  %13995 = vst [vmem:[#allocation59_spill] sm:$0xff] %v10489_v22  ;;  %7577 = vmatmul.mubr.msk.bf16.gmra.mrb[52].mxu1 %vm1428_vm0, %v10384_v50 }
 0x1e5   : > { %13996 = vst [vmem:[#allocation60_spill] sm:$0xff] %v10496_v30  ;;  %13997 = vst [vmem:[#allocation61_spill] sm:$0xff] %v10498_v31  ;;  %7578 = vmatprep.mubr.msk.bf16.mxu1 %vm1428_vm0, %v10414_v7  ;;  %7610 = vmatprep.subr.bf16.mxu0 %v10498_v31 }
 0x1e6   : > { %7611 = vmatpush3.bf16.msra.mxu0 %v10416_v8 }
 0x1e7   : > { %3506 = vrot.lane.b32.xlu1 %v10386_v52, %s9917_s29  ;;  %3522 = vrot.lane.b32.xlu0 %v10464_v58, %s9917_s29  ;;  %v8408_v32 = vpop.f32.mrb[40].mxu0  ;;  %v8360_v33 = vpop.f32.mrb[40].mxu1 }
 0x1e8   : > { %v1317_v34 = vpop.f32.mrb[41].mxu0  ;;  %v895_v35 = vpop.f32.mrb[41].mxu1  ;;  %7612 = vmatprep.subr.bf16.mxu0 %v10489_v22 }
 0x1e9   : > { %v8409_v36 = vpop.f32.mrb[42].mxu0  ;;  %v8361_v43 = vpop.f32.mrb[42].mxu1 }
 0x1ea   : > { %v10511_v44 = vpack.c.bf16 %v8409_v36, %v8408_v32  ;;  %v1320_v47 = vpop.f32.mrb[43].mxu0  ;;  %v10513_v48 = vpack.c.bf16 %v8361_v43, %v8360_v33  ;;  %v898_v49 = vpop.f32.mrb[43].mxu1  ;;  %7613 = vmatpush3.bf16.msra.mxu0 %v10408_v4 }
 0x1eb   : > { %3504 = vrot.lane.b32.xlu1 %v10394_v55, %s9917_s29  ;;  %2719 = vrot.lane.b32.xlu0 %v10472_v0, %s9917_s29  ;;  %v10520_v51 = vpack.c.bf16 %v1320_v47, %v1317_v34  ;;  %v10522_v53 = vpack.c.bf16 %v898_v49, %v895_v35 }
 0x1ec   : > { %13998 = vst [vmem:[#allocation62_spill] sm:$0xff] %v10511_v44  ;;  %13999 = vst [vmem:[#allocation63_spill] sm:$0xff] %v10513_v48  ;;  %7579 = vmatmul.mubr.msk.bf16.gmra.mrb[56].mxu1 %vm1428_vm0, %v10414_v7 }
 0x1ed   : > { %14000 = vst [vmem:[#allocation64_spill] sm:$0xff] %v10520_v51  ;;  %14001 = vst [vmem:[#allocation65_spill] sm:$0xff] %v10522_v53  ;;  %7580 = vmatprep.mubr.msk.bf16.mxu1 %vm1428_vm0, %v10406_v1  ;;  %7614 = vmatprep.subr.bf16.mxu0 %v10522_v53 }
 0x1ee   : > { %7615 = vmatpush3.bf16.msra.mxu0 %v10436_v27 }
 0x1ef   : > { %2709 = vrot.lane.b32.xlu1 %v10406_v1, %s9917_s29  ;;  %3520 = vrot.lane.b32.xlu0 %v10474_v5, %s9917_s29  ;;  %v8412_v56 = vpop.f32.mrb[44].mxu0  ;;  %v8364_v57 = vpop.f32.mrb[44].mxu1 }
 0x1f0   : > { %v1333_v60 = vpop.f32.mrb[45].mxu0  ;;  %v911_v61 = vpop.f32.mrb[45].mxu1  ;;  %7616 = vmatprep.subr.bf16.mxu0 %v10513_v48 }
 0x1f1   : > { %v8413_v6 = vpop.f32.mrb[46].mxu0  ;;  %v8365_v9 = vpop.f32.mrb[46].mxu1 }
 0x1f2   : > { %v10535_v10 = vpack.c.bf16 %v8413_v6, %v8412_v56  ;;  %v1336_v13 = vpop.f32.mrb[47].mxu0  ;;  %v10537_v14 = vpack.c.bf16 %v8365_v9, %v8364_v57  ;;  %v914_v17 = vpop.f32.mrb[47].mxu1  ;;  %7617 = vmatpush3.bf16.msra.mxu0 %v10428_v21 }
 0x1f3   : > { %3508 = vrot.lane.b32.xlu1 %v10416_v8, %s9917_s29  ;;  %2723 = vrot.lane.b32.xlu0 %v10496_v30, %s9917_s29  ;;  %v10544_v19 = vpack.c.bf16 %v1336_v13, %v1333_v60  ;;  %v10546_v23 = vpack.c.bf16 %v914_v17, %v911_v61 }
 0x1f4   : > { %14002 = vst [vmem:[#allocation66_spill] sm:$0xff] %v10535_v10  ;;  %14003 = vst [vmem:[#allocation67_spill] sm:$0xff] %v10537_v14  ;;  %7581 = vmatmul.mubr.msk.bf16.gmra.mrb[60].mxu1 %vm1428_vm0, %v10406_v1 }
 0x1f5   : > { %14004 = vst [vmem:[#allocation68_spill] sm:$0xff] %v10544_v19  ;;  %14005 = vst [vmem:[#allocation69_spill] sm:$0xff] %v10546_v23  ;;  %7582 = vmatprep.mubr.msk.bf16.mxu1 %vm1428_vm0, %v10434_v26  ;;  %7618 = vmatprep.subr.bf16.mxu0 %v10546_v23 }
 0x1f6   : > { %7619 = vmatpush3.bf16.msra.mxu0 %v10456_v46 }
 0x1f7   : > { %2713 = vrot.lane.b32.xlu1 %v10426_v20, %s9917_s29  ;;  %3524 = vrot.lane.b32.xlu0 %v10498_v31, %s9917_s29 }
 0x1f8   : > { %7620 = vmatprep.subr.bf16.mxu0 %v10537_v14 }
 0x1fa   : > { %7621 = vmatpush3.bf16.msra.mxu0 %v10448_v40 }
 0x1fb   : > { %2717 = vrot.lane.b32.xlu1 %v10446_v39, %s9917_s29  ;;  %3510 = vrot.lane.b32.xlu0 %v10408_v4, %s9917_s29 }
 0x1fc   : > { %7583 = vmatmul.mubr.msk.bf16.gmra.mrb[64].mxu1 %vm1428_vm0, %v10434_v26 }
 0x1fd   : > { %7584 = vmatprep.mubr.msk.bf16.mxu1 %vm1428_vm0, %v10426_v20 }
 0x1ff   : > { %2721 = vrot.lane.b32.xlu1 %v10466_v59, %s9917_s29  ;;  %2727 = vrot.lane.b32.xlu0 %v10520_v51, %s9917_s29 }
 0x203   : > { %2725 = vrot.lane.b32.xlu1 %v10487_v18, %s9917_s29  ;;  %2731 = vrot.lane.b32.xlu0 %v10544_v19, %s9917_s29 }
 0x204   : > { %7585 = vmatmul.mubr.msk.bf16.gmra.mrb[68].mxu1 %vm1428_vm0, %v10426_v20 }
 0x205   : > { %7586 = vmatprep.mubr.msk.bf16.mxu1 %vm1428_vm0, %v10454_v45 }
 0x207   : > { %3526 = vrot.lane.b32.xlu1 %v10489_v22, %s9917_s29  ;;  %3528 = vrot.lane.b32.xlu0 %v10522_v53, %s9917_s29  ;;  %v8901_v53 = vld [vmem:[#allocation14 + $0x8] sm:$0xff]  }
 0x20b   : > { %2729 = vrot.lane.b32.xlu1 %v10511_v44, %s9917_s29  ;;  %3530 = vrot.lane.b32.xlu0 %v10513_v48, %s9917_s29 }
 0x20c   : > { %7587 = vmatmul.mubr.msk.bf16.gmra.mrb[72].mxu1 %vm1428_vm0, %v10454_v45 }
 0x20d   : > { %v10590_v32 = vpop.permute.xlu1 %2769  ;;  %v10592_v33 = vpop.permute.xlu0 %2753  ;;  %7588 = vmatprep.mubr.msk.bf16.mxu1 %vm1428_vm0, %v10446_v39 }
 0x20f   : > { %2733 = vrot.lane.b32.xlu1 %v10535_v10, %s9917_s29  ;;  %3532 = vrot.lane.b32.xlu0 %v10546_v23, %s9917_s29 }
 0x211   : > { %v10600_v34 = vpop.permute.xlu1 %4244  ;;  %v10602_v35 = vpop.permute.xlu0 %4228 }
 0x212   : > { %14006 = vst [vmem:[#allocation70_spill] sm:$0xff] %v10600_v34  ;;  %14007 = vst [vmem:[#allocation71_spill] sm:$0xff] %v10602_v35 }
 0x213   : > { %3512 = vrot.lane.b32.xlu1 %v10436_v27, %s9917_s29  ;;  %4182 = vrot.lane.b32.xlu0 %v10414_v7, %s9918_s7  ;;  %v8900_v27 = vld [vmem:[#allocation14] sm:$0xff]  }
 0x214   : > { %7589 = vmatmul.mubr.msk.bf16.gmra.mrb[76].mxu1 %vm1428_vm0, %v10446_v39  ;;  %8414 = vmatprep.subr.bf16.mxu1 %v8900_v27 }
 0x215   : > { %v2768_v36 = vpop.permute.xlu1 %2767  ;;  %v10610_v43 = vpop.permute.xlu0 %2751  ;;  %7590 = vmatprep.mubr.msk.bf16.mxu1 %vm1428_vm0, %v10472_v0  ;;  %8415 = vmatpush3.bf16.msra.mxu1 %v8900_v27 }
 0x216   : > { %8710 = vmatprep.subr.msk.bf16.mxu0 %vm1428_vm0, %v2768_v36  ;;  %8416 = vmatprep.subr.bf16.mxu1 %v8901_v53 }
 0x217   : > { %4180 = vrot.lane.b32.xlu1 %v10384_v50, %s9918_s7 }
 0x219   : > { %v10617_v47 = vpop.permute.xlu0 %4226  ;;  %8417 = vmatpush3.bf16.msra.mxu1 %v8901_v53  ;;  %v10689_v31 = vpop.permute.xlu1 %4242 }
 0x21a   : > { %14008 = vst [vmem:[#allocation72_spill] sm:$0xff] %v10617_v47  ;;  %14022 = vst [vmem:[#allocation86_spill] sm:$0xff] %v10689_v31 }
 0x21b   : > { %3514 = vrot.lane.b32.xlu1 %v10428_v21, %s9917_s29 }
 0x21c   : > { %7591 = vmatmul.mubr.msk.bf16.gmra.mrb[80].mxu1 %vm1428_vm0, %v10472_v0 }
 0x21d   : > { %v10623_v49 = vpop.permute.xlu0 %2757  ;;  %7592 = vmatprep.mubr.msk.bf16.mxu1 %vm1428_vm0, %v10466_v59  ;;  %v10691_v58 = vpop.permute.xlu1 %2773 }
 0x21f   : > { %3516 = vrot.lane.b32.xlu1 %v10456_v46, %s9917_s29 }
 0x221   : > { %v10629_v56 = vpop.permute.xlu0 %4232  ;;  %v10693_v55 = vpop.permute.xlu1 %4248 }
 0x222   : > { %14009 = vst [vmem:[#allocation73_spill] sm:$0xff] %v10629_v56  ;;  %14023 = vst [vmem:[#allocation87_spill] sm:$0xff] %v10693_v55 }
 0x223   : > { %3534 = vrot.lane.b32.xlu1 %v10537_v14, %s9917_s29 }
 0x224   : > { %7593 = vmatmul.mubr.msk.bf16.gmra.mrb[84].mxu1 %vm1428_vm0, %v10466_v59 }
 0x225   : > { %v10635_v57 = vpop.permute.xlu0 %2755  ;;  %7594 = vmatprep.mubr.msk.bf16.mxu1 %vm1428_vm0, %v10496_v30  ;;  %v10695_v52 = vpop.permute.xlu1 %2771 }
 0x229   : > { %v10639_v60 = vpop.permute.xlu0 %4230  ;;  %v10697_v5 = vpop.permute.xlu1 %4246 }
 0x22a   : > { %14010 = vst [vmem:[#allocation74_spill] sm:$0xff] %v10639_v60  ;;  %14024 = vst [vmem:[#allocation88_spill] sm:$0xff] %v10697_v5 }
 0x22c   : > { %7595 = vmatmul.mubr.msk.bf16.gmra.mrb[88].mxu1 %vm1428_vm0, %v10496_v30 }
 0x22d   : > { %v10643_v61 = vpop.permute.xlu0 %2761  ;;  %7596 = vmatprep.mubr.msk.bf16.mxu1 %vm1428_vm0, %v10487_v18  ;;  %v10699_v27 = vpop.permute.xlu1 %2777 }
 0x231   : > { %v10647_v6 = vpop.permute.xlu0 %4236  ;;  %v10713_v38 = vpop.permute.xlu1 %4252 }
 0x232   : > { %14011 = vst [vmem:[#allocation75_spill] sm:$0xff] %v10647_v6  ;;  %14025 = vst [vmem:[#allocation89_spill] sm:$0xff] %v10713_v38 }
 0x234   : > { %7597 = vmatmul.mubr.msk.bf16.gmra.mrb[92].mxu1 %vm1428_vm0, %v10487_v18 }
 0x235   : > { %v10651_v9 = vpop.permute.xlu0 %4234  ;;  %7598 = vmatprep.mubr.msk.bf16.mxu1 %vm1428_vm0, %v10520_v51  ;;  %v10723_v24 = vpop.permute.xlu1 %2759 }
 0x236   : > { %14012 = vst [vmem:[#allocation76_spill] sm:$0xff] %v10651_v9 }
 0x239   : > { %v10655_v13 = vpop.permute.xlu0 %2765 }
 0x23a   : > { %14013 = vst [vmem:[#allocation77_spill] sm:$0xff] %v10655_v13 }
 0x23c   : > { %7599 = vmatmul.mubr.msk.bf16.gmra.mrb[96].mxu1 %vm1428_vm0, %v10520_v51 }
 0x23d   : > { %v10659_v17 = vpop.permute.xlu0 %2763  ;;  %7600 = vmatprep.mubr.msk.bf16.mxu1 %vm1428_vm0, %v10511_v44 }
 0x241   : > { %v10663_v36 = vpop.permute.xlu0 %4238 }
 0x242   : > { %14014 = vst [vmem:[#allocation78_spill] sm:$0xff] %v10663_v36 }
 0x244   : > { %7601 = vmatmul.mubr.msk.bf16.gmra.mrb[100].mxu1 %vm1428_vm0, %v10511_v44 }
 0x245   : > { %v10667_v14 = vpop.permute.xlu0 %2703  ;;  %7602 = vmatprep.mubr.msk.bf16.mxu1 %vm1428_vm0, %v10544_v19 }
 0x246   : > { %14015 = vst [vmem:[#allocation79_spill] sm:$0xff] %v10667_v14 }
 0x249   : > { %v10671_v46 = vpop.permute.xlu0 %4178 }
 0x24a   : > { %14016 = vst [vmem:[#allocation80_spill] sm:$0xff] %v10671_v46 }
 0x24c   : > { %7603 = vmatmul.mubr.msk.bf16.gmra.mrb[104].mxu1 %vm1428_vm0, %v10544_v19 }
 0x24d   : > { %v10675_v23 = vpop.permute.xlu0 %2707  ;;  %7604 = vmatprep.mubr.msk.bf16.mxu1 %vm1428_vm0, %v10535_v10 }
 0x24e   : > { %14017 = vst [vmem:[#allocation81_spill] sm:$0xff] %v10675_v23 }
 0x251   : > { %v10679_v48 = vpop.permute.xlu0 %2711 }
 0x252   : > { %14018 = vst [vmem:[#allocation82_spill] sm:$0xff] %v10679_v48 }
 0x254   : > { %7605 = vmatmul.mubr.msk.bf16.gmra.mrb[108].mxu1 %vm1428_vm0, %v10535_v10 }
 0x255   : > { %v10683_v21 = vpop.permute.xlu0 %2715 }
 0x256   : > { %14019 = vst [vmem:[#allocation83_spill] sm:$0xff] %v10683_v21 }
 0x259   : > { %v10685_v22 = vpop.permute.xlu0 %3522 }
 0x25a   : > { %14020 = vst [vmem:[#allocation84_spill] sm:$0xff] %v10685_v22 }
 0x25d   : > { %v10687_v8 = vpop.permute.xlu0 %2719 }
 0x25e   : > { %14021 = vst [vmem:[#allocation85_spill] sm:$0xff] %v10687_v8 }
 0x261   : > { %v3521_v4 = vpop.permute.xlu0 %3520 }
 0x262   : > { %7784 = vmatprep.subr.bf16.mxu1 %v3521_v4 }
 0x2af   : > { %v10701_v37 = vpop.f32.mrb[48].mxu1 }
 0x2b0   : > { %v10703_v7 = vpop.f32.mrb[49].mxu1 }
 0x2b1   : > { %v10705_v53 = vpop.f32.mrb[50].mxu1  ;;  %v1718_v4 = vmax.f32 %v10701_v37, %v10703_v7 }
 0x2b2   : > { %v10709_v50 = vpop.f32.mrb[51].mxu1 }
 0x2b3   : > { %1719 = vmax.xlane.f32.xlu0 %v1718_v4  ;;  %v1721_v54 = vmax.f32 %v10705_v53, %v10709_v50 }
 0x2b7   : > { %1722 = vmax.xlane.f32.xlu0 %v1721_v54  ;;  %v10715_v10 = vpop.f32.mrb[52].mxu1  ;;  %v10731_v54 = vpop.permute.xlu1 %2775 }
 0x2b8   : > { %v10717_v42 = vpop.f32.mrb[53].mxu1 }
 0x2b9   : > { %v10719_v25 = vpop.f32.mrb[54].mxu1  ;;  %v1724_v41 = vmax.f32 %v10715_v10, %v10717_v42 }
 0x2ba   : > { %v10725_v19 = vpop.f32.mrb[55].mxu1 }
 0x2bb   : > { %1725 = vmax.xlane.f32.xlu1 %v1724_v41  ;;  %v1727_v4 = vmax.f32 %v10719_v25, %v10725_v19  ;;  %v10743_v51 = vpop.permute.xlu1 %4250 }
 0x2bc   : > { %14026 = vst [vmem:[#allocation90_spill] sm:$0xff] %v10743_v51 }
 0x2bf   : > { %1728 = vmax.xlane.f32.xlu1 %v1727_v4  ;;  %v10729_v44 = vpop.f32.mrb[56].mxu1  ;;  %v10757_v62 = vpop.permute.xlu1 %2781 }
 0x2c0   : > { %v10733_v29 = vpop.f32.mrb[57].mxu1  ;;  %14027 = vst [vmem:[#allocation91_spill] sm:$0xff] %v10757_v62 }
 0x2c1   : > { %v10735_v12 = vpop.f32.mrb[58].mxu1  ;;  %v1730_v28 = vmax.f32 %v10729_v44, %v10733_v29 }
 0x2c2   : > { %v10739_v11 = vpop.f32.mrb[59].mxu1 }
 0x2c3   : > { %1731 = vmax.xlane.f32.xlu0 %v1730_v28  ;;  %v1733_v41 = vmax.f32 %v10735_v12, %v10739_v11  ;;  %v10767_v22 = vpop.permute.xlu1 %4240 }
 0x2c4   : > { %14028 = vst [vmem:[#allocation92_spill] sm:$0xff] %v10767_v22 }
 0x2c5   : > { %1734 = vmax.xlane.f32.xlu1 %v1733_v41 }
 0x2c7   : > { %v10745_v4 = vpop.f32.mrb[60].mxu1 }
 0x2c8   : > { %v10747_v18 = vpop.f32.mrb[61].mxu1 }
 0x2c9   : > { %v10749_v16 = vpop.f32.mrb[62].mxu1  ;;  %v1736_v63 = vmax.f32 %v10745_v4, %v10747_v18 }
 0x2ca   : > { %v10753_v15 = vpop.f32.mrb[63].mxu1 }
 0x2cb   : > { %1737 = vmax.xlane.f32.xlu0 %v1736_v63  ;;  %v1739_v28 = vmax.f32 %v10749_v16, %v10753_v15 }
 0x2cd   : > { %1740 = vmax.xlane.f32.xlu1 %v1739_v28  ;;  %v10775_v28 = vpop.permute.xlu1 %4256 }
 0x2ce   : > { %14029 = vst [vmem:[#allocation93_spill] sm:$0xff] %v10775_v28 }
 0x2cf   : > { %v10759_v41 = vpop.f32.mrb[64].mxu1 }
 0x2d0   : > { %v10761_v30 = vpop.f32.mrb[65].mxu1 }
 0x2d1   : > { %v10763_v59 = vpop.f32.mrb[66].mxu1  ;;  %v1742_v46 = vmax.f32 %v10759_v41, %v10761_v30  ;;  %v10787_v22 = vpop.permute.xlu1 %2779 }
 0x2d2   : > { %v10769_v8 = vpop.f32.mrb[67].mxu1 }
 0x2d3   : > { %1743 = vmax.xlane.f32.xlu0 %v1742_v46  ;;  %v1745_v63 = vmax.f32 %v10763_v59, %v10769_v8 }
 0x2d5   : > { %1746 = vmax.xlane.f32.xlu1 %v1745_v63  ;;  %v10801_v39 = vpop.permute.xlu1 %4254 }
 0x2d6   : > { %14030 = vst [vmem:[#allocation94_spill] sm:$0xff] %v10801_v39 }
 0x2d7   : > { %v10773_v36 = vpop.f32.mrb[68].mxu1 }
 0x2d8   : > { %v10777_v21 = vpop.f32.mrb[69].mxu1 }
 0x2d9   : > { %v10779_v6 = vpop.f32.mrb[70].mxu1  ;;  %v1748_v38 = vmax.f32 %v10773_v36, %v10777_v21  ;;  %v10811_v2 = vpop.permute.xlu1 %2705 }
 0x2da   : > { %v10783_v9 = vpop.f32.mrb[71].mxu1  ;;  %14031 = vst [vmem:[#allocation95_spill] sm:$0xff] %v10811_v2 }
 0x2db   : > { %1749 = vmax.xlane.f32.xlu0 %v1748_v38  ;;  %v1751_v46 = vmax.f32 %v10779_v6, %v10783_v9 }
 0x2dd   : > { %1752 = vmax.xlane.f32.xlu1 %v1751_v46 }
 0x2df   : > { %v10789_v63 = vpop.f32.mrb[72].mxu1 }
 0x2e0   : > { %v10791_v51 = vpop.f32.mrb[73].mxu1 }
 0x2e1   : > { %v10793_v28 = vpop.f32.mrb[74].mxu1  ;;  %v1754_v48 = vmax.f32 %v10789_v63, %v10791_v51 }
 0x2e2   : > { %v10797_v56 = vpop.f32.mrb[75].mxu1 }
 0x2e3   : > { %1755 = vmax.xlane.f32.xlu0 %v1754_v48  ;;  %v1757_v38 = vmax.f32 %v10793_v28, %v10797_v56 }
 0x2e5   : > { %1758 = vmax.xlane.f32.xlu1 %v1757_v38  ;;  %v10819_v38 = vpop.permute.xlu1 %3506 }
 0x2e6   : > { %14032 = vst [vmem:[#allocation96_spill] sm:$0xff] %v10819_v38 }
 0x2e7   : > { %v10803_v46 = vpop.f32.mrb[76].mxu1 }
 0x2e8   : > { %v10805_v3 = vpop.f32.mrb[77].mxu1 }
 0x2e9   : > { %v10807_v20 = vpop.f32.mrb[78].mxu1  ;;  %v1760_v55 = vmax.f32 %v10803_v46, %v10805_v3  ;;  %v10831_v23 = vpop.permute.xlu1 %3504 }
 0x2ea   : > { %v10813_v60 = vpop.f32.mrb[79].mxu1  ;;  %14033 = vst [vmem:[#allocation97_spill] sm:$0xff] %v10831_v23 }
 0x2eb   : > { %1761 = vmax.xlane.f32.xlu0 %v1760_v55  ;;  %v1763_v48 = vmax.f32 %v10807_v20, %v10813_v60 }
 0x2ed   : > { %1764 = vmax.xlane.f32.xlu1 %v1763_v48  ;;  %v10845_v34 = vpop.permute.xlu1 %2709 }
 0x2ee   : > { %14036 = vst [vmem:[#allocation100_spill] sm:$0xff] %v10845_v34 }
 0x2ef   : > { %v10817_v39 = vpop.f32.mrb[80].mxu1 }
 0x2f0   : > { %v10821_v1 = vpop.f32.mrb[81].mxu1 }
 0x2f1   : > { %v10823_v0 = vpop.f32.mrb[82].mxu1  ;;  %v1766_v40 = vmax.f32 %v10817_v39, %v10821_v1  ;;  %v10855_v14 = vpop.permute.xlu1 %3508 }
 0x2f2   : > { %v10827_v5 = vpop.f32.mrb[83].mxu1  ;;  %14040 = vst [vmem:[#allocation104_spill] sm:$0xff] %v10855_v14  ;;  %v10875_v14 = vpop.permute.xlu0 %2723 }
 0x2f3   : > { %1767 = vmax.xlane.f32.xlu0 %v1766_v40  ;;  %v1769_v55 = vmax.f32 %v10823_v0, %v10827_v5  ;;  %14047 = vst [vmem:[#allocation111_spill] sm:$0xff] %v10875_v14 }
 0x2f5   : > { %1770 = vmax.xlane.f32.xlu1 %v1769_v55 }
 0x2f7   : > { %v10833_v48 = vpop.f32.mrb[84].mxu1 }
 0x2f8   : > { %v10835_v45 = vpop.f32.mrb[85].mxu1 }
 0x2f9   : > { %v10837_v38 = vpop.f32.mrb[86].mxu1  ;;  %v1772_v35 = vmax.f32 %v10833_v48, %v10835_v45 }
 0x2fa   : > { %14034 = vst [vmem:[#allocation98_spill] sm:$0xff] %v10837_v38  ;;  %v10841_v26 = vpop.f32.mrb[87].mxu1 }
 0x2fb   : > { %14035 = vst [vmem:[#allocation99_spill] sm:$0xff] %v10841_v26  ;;  %1773 = vmax.xlane.f32.xlu0 %v1772_v35  ;;  %v1775_v40 = vmax.f32 %v10837_v38, %v10841_v26 }
 0x2fd   : > { %1776 = vmax.xlane.f32.xlu1 %v1775_v40  ;;  %v10863_v40 = vpop.permute.xlu1 %2713 }
 0x2fe   : > { %14043 = vst [vmem:[#allocation107_spill] sm:$0xff] %v10863_v40 }
 0x2ff   : > { %v10847_v55 = vpop.f32.mrb[88].mxu1 }
 0x300   : > { %14037 = vst [vmem:[#allocation101_spill] sm:$0xff] %v10847_v55  ;;  %v10849_v23 = vpop.f32.mrb[89].mxu1 }
 0x301   : > { %14038 = vst [vmem:[#allocation102_spill] sm:$0xff] %v10849_v23  ;;  %v10851_v2 = vpop.f32.mrb[90].mxu1  ;;  %v1778_v47 = vmax.f32 %v10847_v55, %v10849_v23 }
 0x302   : > { %14039 = vst [vmem:[#allocation103_spill] sm:$0xff] %v10851_v2  ;;  %v10857_v31 = vpop.f32.mrb[91].mxu1 }
 0x303   : > { %14041 = vst [vmem:[#allocation105_spill] sm:$0xff] %v10857_v31  ;;  %1779 = vmax.xlane.f32.xlu0 %v1778_v47  ;;  %v1781_v35 = vmax.f32 %v10851_v2, %v10857_v31 }
 0x305   : > { %1782 = vmax.xlane.f32.xlu1 %v1781_v35  ;;  %v10877_v35 = vpop.permute.xlu1 %2717 }
 0x306   : > { %14048 = vst [vmem:[#allocation112_spill] sm:$0xff] %v10877_v35 }
 0x307   : > { %v10861_v34 = vpop.f32.mrb[92].mxu1 }
 0x308   : > { %14042 = vst [vmem:[#allocation106_spill] sm:$0xff] %v10861_v34  ;;  %v10865_v13 = vpop.f32.mrb[93].mxu1 }
 0x309   : > { %14044 = vst [vmem:[#allocation108_spill] sm:$0xff] %v10865_v13  ;;  %v10867_v26 = vpop.f32.mrb[94].mxu1  ;;  %v1784_v23 = vmax.f32 %v10861_v34, %v10865_v13  ;;  %v10887_v34 = vpop.permute.xlu0 %3524 }
 0x30a   : > { %14045 = vst [vmem:[#allocation109_spill] sm:$0xff] %v10867_v26  ;;  %v10871_v55 = vpop.f32.mrb[95].mxu1  ;;  %14052 = vst [vmem:[#allocation116_spill] sm:$0xff] %v10887_v34 }
 0x30b   : > { %14046 = vst [vmem:[#allocation110_spill] sm:$0xff] %v10871_v55  ;;  %1785 = vmax.xlane.f32.xlu0 %v1784_v23  ;;  %v1787_v47 = vmax.f32 %v10867_v26, %v10871_v55 }
 0x30d   : > { %1788 = vmax.xlane.f32.xlu1 %v1787_v47  ;;  %v10893_v47 = vpop.permute.xlu1 %2721  ;;  %v10897_v55 = vpop.permute.xlu0 %3510 }
 0x30e   : > { %14054 = vst [vmem:[#allocation118_spill] sm:$0xff] %v10893_v47  ;;  %14056 = vst [vmem:[#allocation120_spill] sm:$0xff] %v10897_v55 }
 0x30f   : > { %v10879_v31 = vpop.f32.mrb[96].mxu1 }
 0x310   : > { %14049 = vst [vmem:[#allocation113_spill] sm:$0xff] %v10879_v31  ;;  %v10881_v40 = vpop.f32.mrb[97].mxu1 }
 0x311   : > { %14050 = vst [vmem:[#allocation114_spill] sm:$0xff] %v10881_v40  ;;  %v10883_v2 = vpop.f32.mrb[98].mxu1  ;;  %v1790_v13 = vmax.f32 %v10879_v31, %v10881_v40  ;;  %v10905_v40 = vpop.permute.xlu1 %2725 }
 0x312   : > { %14051 = vst [vmem:[#allocation115_spill] sm:$0xff] %v10883_v2  ;;  %v10889_v23 = vpop.f32.mrb[99].mxu1  ;;  %14059 = vst [vmem:[#allocation123_spill] sm:$0xff] %v10905_v40 }
 0x313   : > { %14053 = vst [vmem:[#allocation117_spill] sm:$0xff] %v10889_v23  ;;  %1791 = vmax.xlane.f32.xlu0 %v1790_v13  ;;  %v1793_v14 = vmax.f32 %v10883_v2, %v10889_v23 }
 0x315   : > { %1794 = vmax.xlane.f32.xlu1 %v1793_v14  ;;  %v10911_v14 = vpop.permute.xlu0 %2727  ;;  %v10915_v55 = vpop.permute.xlu1 %3526 }
 0x316   : > { %14061 = vst [vmem:[#allocation125_spill] sm:$0xff] %v10911_v14  ;;  %14063 = vst [vmem:[#allocation127_spill] sm:$0xff] %v10915_v55 }
 0x317   : > { %v10895_v35 = vpop.f32.mrb[100].mxu1 }
 0x318   : > { %14055 = vst [vmem:[#allocation119_spill] sm:$0xff] %v10895_v35  ;;  %v10899_v26 = vpop.f32.mrb[101].mxu1 }
 0x319   : > { %14057 = vst [vmem:[#allocation121_spill] sm:$0xff] %v10899_v26  ;;  %v10901_v38 = vpop.f32.mrb[102].mxu1  ;;  %v1796_v34 = vmax.f32 %v10895_v35, %v10899_v26  ;;  %v10929_v14 = vpop.permute.xlu1 %2729 }
 0x31a   : > { %14058 = vst [vmem:[#allocation122_spill] sm:$0xff] %v10901_v38  ;;  %v10907_v13 = vpop.f32.mrb[103].mxu1  ;;  %14068 = vst [vmem:[#allocation132_spill] sm:$0xff] %v10929_v14 }
 0x31b   : > { %14060 = vst [vmem:[#allocation124_spill] sm:$0xff] %v10907_v13  ;;  %1797 = vmax.xlane.f32.xlu1 %v1796_v34  ;;  %v1799_v47 = vmax.f32 %v10901_v38, %v10907_v13 }
 0x31d   : > { %1800 = vmax.xlane.f32.xlu0 %v1799_v47  ;;  %v10927_v47 = vpop.permute.xlu0 %2731 }
 0x31e   : > { %14067 = vst [vmem:[#allocation131_spill] sm:$0xff] %v10927_v47 }
 0x31f   : > { %v10913_v23 = vpop.f32.mrb[104].mxu1 }
 0x320   : > { %14062 = vst [vmem:[#allocation126_spill] sm:$0xff] %v10913_v23  ;;  %v10917_v2 = vpop.f32.mrb[105].mxu1 }
 0x321   : > { %14064 = vst [vmem:[#allocation128_spill] sm:$0xff] %v10917_v2  ;;  %v1802_v26 = vmax.f32 %v10913_v23, %v10917_v2  ;;  %v10921_v35 = vpop.f32.mrb[106].mxu1  ;;  %v10939_v38 = vpop.permute.xlu0 %3528 }
 0x322   : > { %14065 = vst [vmem:[#allocation129_spill] sm:$0xff] %v10921_v35  ;;  %v10923_v40 = vpop.f32.mrb[107].mxu1  ;;  %14072 = vst [vmem:[#allocation136_spill] sm:$0xff] %v10939_v38 }
 0x323   : > { %14066 = vst [vmem:[#allocation130_spill] sm:$0xff] %v10923_v40  ;;  %1803 = vmax.xlane.f32.xlu1 %v1802_v26  ;;  %v1805_v34 = vmax.f32 %v10921_v35, %v10923_v40 }
 0x325   : > { %1806 = vmax.xlane.f32.xlu0 %v1805_v34  ;;  %v10945_v34 = vpop.permute.xlu1 %2733  ;;  %v10947_v14 = vpop.permute.xlu0 %3530 }
 0x326   : > { %14074 = vst [vmem:[#allocation138_spill] sm:$0xff] %v10945_v34  ;;  %14075 = vst [vmem:[#allocation139_spill] sm:$0xff] %v10947_v14 }
 0x327   : > { %v10931_v13 = vpop.f32.mrb[108].mxu1 }
 0x328   : > { %14069 = vst [vmem:[#allocation133_spill] sm:$0xff] %v10931_v13  ;;  %v10933_v55 = vpop.f32.mrb[109].mxu1 }
 0x329   : > { %14070 = vst [vmem:[#allocation134_spill] sm:$0xff] %v10933_v55  ;;  %v1808_v2 = vmax.f32 %v10931_v13, %v10933_v55  ;;  %v10937_v23 = vpop.f32.mrb[110].mxu1  ;;  %v10949_v40 = vpop.permute.xlu1 %3512 }
 0x32a   : > { %14071 = vst [vmem:[#allocation135_spill] sm:$0xff] %v10937_v23  ;;  %v10941_v26 = vpop.f32.mrb[111].mxu1  ;;  %14076 = vst [vmem:[#allocation140_spill] sm:$0xff] %v10949_v40  ;;  %v10951_v35 = vpop.permute.xlu0 %3532 }
 0x32b   : > { %14073 = vst [vmem:[#allocation137_spill] sm:$0xff] %v10941_v26  ;;  %1809 = vmax.xlane.f32.xlu1 %v1808_v2  ;;  %v1811_v47 = vmax.f32 %v10937_v23, %v10941_v26  ;;  %14077 = vst [vmem:[#allocation141_spill] sm:$0xff] %v10951_v35 }
 0x32d   : > { %1812 = vmax.xlane.f32.xlu0 %v1811_v47  ;;  %v10953_v55 = vpop.permute.xlu1 %4180 }
 0x32e   : > { %14078 = vst [vmem:[#allocation142_spill] sm:$0xff] %v10953_v55  ;;  %v10955_v13 = vpop.permute.xlu0 %4182 }
 0x32f   : > { %14079 = vst [vmem:[#allocation143_spill] sm:$0xff] %v10955_v13 }
 0x331   : > { %v10957_v38 = vpop.permute.xlu1 %3514 }
 0x332   : > { %14080 = vst [vmem:[#allocation144_spill] sm:$0xff] %v10957_v38 }
 0x335   : > { %v10959_v31 = vpop.permute.xlu1 %3516 }
 0x336   : > { %14081 = vst [vmem:[#allocation145_spill] sm:$0xff] %v10959_v31 }
 0x339   : > { %v10963_v14 = vpop.permute.xlu1 %3534 }
 0x340   : > { %v1720_v2 = vpop.xlane.xlu0 %1719 }
 0x341   : > { %v1814_v26 = vsub.f32 %v10701_v37, %v1720_v2  ;;  %v1815_v34 = vsub.f32 %v10703_v7, %v1720_v2 }
 0x343   : > { %v1878_v47 = vmul.f32 1.442695, %v1814_v26  ;;  %v1880_v23 = vmul.f32 1.442695, %v1815_v34 }
 0x344   : > { %v1723_v40 = vpop.xlane.xlu0 %1722 }
 0x345   : > { %8908 = vpow2.f32 %v1878_v47  ;;  %v1816_v35 = vsub.f32 %v10705_v53, %v1723_v40  ;;  %v1817_v55 = vsub.f32 %v10709_v50, %v1723_v40 }
 0x346   : > { %8910 = vpow2.f32 %v1880_v23 }
 0x347   : > { %v1882_v13 = vmul.f32 1.442695, %v1816_v35  ;;  %v1884_v38 = vmul.f32 1.442695, %v1817_v55 }
 0x348   : > { %v1726_v62 = vpop.xlane.xlu1 %1725 }
 0x349   : > { %8912 = vpow2.f32 %v1882_v13  ;;  %v1818_v31 = vsub.f32 %v10715_v10, %v1726_v62  ;;  %v1819_v37 = vsub.f32 %v10717_v42, %v1726_v62 }
 0x34a   : > { %8914 = vpow2.f32 %v1884_v38 }
 0x34b   : > { %v1886_v7 = vmul.f32 1.442695, %v1818_v31  ;;  %v1888_v26 = vmul.f32 1.442695, %v1819_v37 }
 0x34c   : > { %v1729_v34 = vpop.xlane.xlu1 %1728 }
 0x34d   : > { %8916 = vpow2.f32 %v1886_v7  ;;  %v1820_v2 = vsub.f32 %v10719_v25, %v1729_v34  ;;  %v1821_v53 = vsub.f32 %v10725_v19, %v1729_v34 }
 0x34e   : > { %8918 = vpow2.f32 %v1888_v26 }
 0x34f   : > { %v8909_v50 = vpop.eup %8908  ;;  %v1890_v40 = vmul.f32 1.442695, %v1820_v2  ;;  %v1892_v35 = vmul.f32 1.442695, %v1821_v53 }
 0x350   : > { %v8911_v55 = vpop.eup %8910  ;;  %v1732_v23 = vpop.xlane.xlu0 %1731 }
 0x351   : > { %8920 = vpow2.f32 %v1890_v40  ;;  %v1822_v10 = vsub.f32 %v10729_v44, %v1732_v23  ;;  %v1823_v62 = vsub.f32 %v10733_v29, %v1732_v23  ;;  %v2006_v42 = vadd.f32 %v8911_v55, %v8909_v50 }
 0x352   : > { %8922 = vpow2.f32 %v1892_v35  ;;  %v1735_v31 = vpop.xlane.xlu1 %1734  ;;  %v2832_v40 = vsel %vm1428_vm0, %v10610_v43, 0 }
 0x353   : > { %v8913_v38 = vpop.eup %8912  ;;  %v1894_v13 = vmul.f32 1.442695, %v1822_v10  ;;  %v1896_v47 = vmul.f32 1.442695, %v1823_v62  ;;  %v1824_v25 = vsub.f32 %v10735_v12, %v1735_v31  ;;  %v1825_v19 = vsub.f32 %v10739_v11, %v1735_v31  ;;  %2007 = vadd.xlane.f32.xlu0 %v2006_v42 }
 0x354   : > { %v8915_v37 = vpop.eup %8914  ;;  %v2102_v7 = vpack.c.bf16 %v8913_v38, %v8909_v50 }
 0x355   : > { %8924 = vpow2.f32 %v1894_v13  ;;  %v1898_v26 = vmul.f32 1.442695, %v1824_v25  ;;  %v1900_v34 = vmul.f32 1.442695, %v1825_v19  ;;  %v2103_v2 = vpack.c.bf16 %v8915_v37, %v8911_v55 }
 0x356   : > { %8926 = vpow2.f32 %v1896_v47  ;;  %v2009_v44 = vadd.f32 %v8915_v37, %v8913_v38  ;;  %v2835_v19 = vsel %vm1428_vm0, %v10592_v33, 0 }
 0x357   : > { %v8917_v29 = vpop.eup %8916  ;;  %8928 = vpow2.f32 %v1898_v26  ;;  %2166 = vmatprep.mubr.bf16.mxu0 %v2103_v2 }
 0x358   : > { %v8919_v53 = vpop.eup %8918  ;;  %8930 = vpow2.f32 %v1900_v34  ;;  %2010 = vadd.xlane.f32.xlu1 %v2009_v44  ;;  %2167 = vmatmul.mubr.bf16.vlgmr.msra.gmra.mrb[48].mxu0 %v2102_v7  ;;  %v1738_v11 = vpop.xlane.xlu0 %1737 }
 0x359   : > { %7737 = vmatpush3.bf16.xpose.msra.mxu0 %v2832_v40  ;;  %v1826_v12 = vsub.f32 %v10745_v4, %v1738_v11  ;;  %v1827_v50 = vsub.f32 %v10747_v18, %v1738_v11  ;;  %v2012_v35 = vadd.f32 %v8919_v53, %v8917_v29 }
 0x35a   : > { %8711 = vmatprep.subr.msk.bf16.mxu0 %vm1428_vm0, %v10590_v32  ;;  %v1741_v55 = vpop.xlane.xlu1 %1740 }
 0x35b   : > { %v8921_v23 = vpop.eup %8920  ;;  %v1902_v10 = vmul.f32 1.442695, %v1826_v12  ;;  %v1904_v62 = vmul.f32 1.442695, %v1827_v50  ;;  %v1828_v42 = vsub.f32 %v10749_v16, %v1741_v55  ;;  %v1829_v43 = vsub.f32 %v10753_v15, %v1741_v55  ;;  %2013 = vadd.xlane.f32.xlu0 %v2012_v35 }
 0x35c   : > { %v8923_v31 = vpop.eup %8922  ;;  %v2104_v38 = vpack.c.bf16 %v8921_v23, %v8917_v29  ;;  %v2838_v35 = vsel %vm1428_vm0, %v10635_v57, 0 }
 0x35d   : > { %8932 = vpow2.f32 %v1902_v10  ;;  %v1906_v13 = vmul.f32 1.442695, %v1828_v42  ;;  %v1908_v4 = vmul.f32 1.442695, %v1829_v43  ;;  %v2105_v47 = vpack.c.bf16 %v8923_v31, %v8919_v53 }
 0x35e   : > { %8934 = vpow2.f32 %v1904_v62  ;;  %v2015_v18 = vadd.f32 %v8923_v31, %v8921_v23 }
 0x35f   : > { %v8925_v25 = vpop.eup %8924  ;;  %8936 = vpow2.f32 %v1906_v13  ;;  %2174 = vmatprep.mubr.bf16.mxu0 %v2105_v47 }
 0x360   : > { %v8927_v32 = vpop.eup %8926  ;;  %8938 = vpow2.f32 %v1908_v4  ;;  %2016 = vadd.xlane.f32.xlu0 %v2015_v18  ;;  %2175 = vmatmul.mubr.bf16.gmra.mrb[52].mxu0 %v2104_v38  ;;  %v1744_v15 = vpop.xlane.xlu0 %1743 }
 0x361   : > { %v8929_v16 = vpop.eup %8928  ;;  %7739 = vmatpush3.bf16.xpose.msra.mxu0 %v2835_v19  ;;  %v1830_v37 = vsub.f32 %v10759_v41, %v1744_v15  ;;  %v1831_v7 = vsub.f32 %v10761_v30, %v1744_v15  ;;  %v2018_v26 = vadd.f32 %v8927_v32, %v8925_v25 }
 0x362   : > { %v8931_v34 = vpop.eup %8930  ;;  %8712 = vmatprep.subr.msk.bf16.mxu0 %vm1428_vm0, %v10695_v52  ;;  %v1747_v2 = vpop.xlane.xlu1 %1746  ;;  %v2106_v44 = vpack.c.bf16 %v8929_v16, %v8925_v25  ;;  %v2841_v25 = vsel %vm1428_vm0, %v10623_v49, 0 }
 0x363   : > { %v1910_v29 = vmul.f32 1.442695, %v1830_v37  ;;  %v1912_v53 = vmul.f32 1.442695, %v1831_v7  ;;  %v1832_v33 = vsub.f32 %v10763_v59, %v1747_v2  ;;  %v1833_v40 = vsub.f32 %v10769_v8, %v1747_v2 }
 0x364   : > { %2019 = vadd.xlane.f32.xlu0 %v2018_v26  ;;  %v2107_v11 = vpack.c.bf16 %v8931_v34, %v8927_v32  ;;  %v2021_v12 = vadd.f32 %v8931_v34, %v8929_v16 }
 0x365   : > { %8940 = vpow2.f32 %v1910_v29  ;;  %v1914_v41 = vmul.f32 1.442695, %v1832_v33  ;;  %v1916_v50 = vmul.f32 1.442695, %v1833_v40  ;;  %v2844_v33 = vsel %vm1428_vm0, %v10723_v24, 0 }
 0x366   : > { %8942 = vpow2.f32 %v1912_v53  ;;  %2182 = vmatprep.mubr.bf16.mxu0 %v2107_v11  ;;  %2022 = vadd.xlane.f32.xlu1 %v2021_v12 }
 0x367   : > { %v8933_v30 = vpop.eup %8932  ;;  %8944 = vpow2.f32 %v1914_v41 }
 0x368   : > { %v8935_v52 = vpop.eup %8934  ;;  %8946 = vpow2.f32 %v1916_v50  ;;  %2183 = vmatmul.mubr.bf16.gmra.mrb[56].mxu0 %v2106_v44  ;;  %v1750_v59 = vpop.xlane.xlu0 %1749 }
 0x369   : > { %v8937_v55 = vpop.eup %8936  ;;  %7741 = vmatpush3.bf16.xpose.msra.mxu0 %v2838_v35  ;;  %v1834_v8 = vsub.f32 %v10773_v36, %v1750_v59  ;;  %v1835_v23 = vsub.f32 %v10777_v21, %v1750_v59  ;;  %v2024_v10 = vadd.f32 %v8935_v52, %v8933_v30 }
 0x36a   : > { %v8939_v62 = vpop.eup %8938  ;;  %8713 = vmatprep.subr.msk.bf16.mxu0 %vm1428_vm0, %v10691_v58  ;;  %v1753_v42 = vpop.xlane.xlu1 %1752  ;;  %v2108_v43 = vpack.c.bf16 %v8937_v55, %v8933_v30 }
 0x36b   : > { %v1918_v31 = vmul.f32 1.442695, %v1834_v8  ;;  %v1920_v38 = vmul.f32 1.442695, %v1835_v23  ;;  %v1836_v57 = vsub.f32 %v10779_v6, %v1753_v42  ;;  %v1837_v13 = vsub.f32 %v10783_v9, %v1753_v42  ;;  %2025 = vadd.xlane.f32.xlu1 %v2024_v10 }
 0x36c   : > { %v2109_v4 = vpack.c.bf16 %v8939_v62, %v8935_v52  ;;  %v2027_v47 = vadd.f32 %v8939_v62, %v8937_v55  ;;  %v2847_v10 = vsel %vm1428_vm0, %v10643_v61, 0 }
 0x36d   : > { %8948 = vpow2.f32 %v1918_v31  ;;  %v1922_v36 = vmul.f32 1.442695, %v1836_v57  ;;  %v1924_v18 = vmul.f32 1.442695, %v1837_v13 }
 0x36e   : > { %8950 = vpow2.f32 %v1920_v38  ;;  %2190 = vmatprep.mubr.bf16.mxu0 %v2109_v4  ;;  %2028 = vadd.xlane.f32.xlu0 %v2027_v47 }
 0x36f   : > { %v8941_v21 = vpop.eup %8940  ;;  %8952 = vpow2.f32 %v1922_v36 }
 0x370   : > { %v8943_v58 = vpop.eup %8942  ;;  %8954 = vpow2.f32 %v1924_v18  ;;  %2191 = vmatmul.mubr.bf16.gmra.mrb[60].mxu0 %v2108_v43  ;;  %v1756_v6 = vpop.xlane.xlu0 %1755 }
 0x371   : > { %v8945_v32 = vpop.eup %8944  ;;  %7743 = vmatpush3.bf16.xpose.msra.mxu0 %v2841_v25  ;;  %v1838_v9 = vsub.f32 %v10789_v63, %v1756_v6  ;;  %v1839_v19 = vsub.f32 %v10791_v51, %v1756_v6  ;;  %v2030_v15 = vadd.f32 %v8943_v58, %v8941_v21 }
 0x372   : > { %v8947_v16 = vpop.eup %8946  ;;  %8714 = vmatprep.subr.msk.bf16.mxu0 %vm1428_vm0, %v10731_v54  ;;  %v1759_v37 = vpop.xlane.xlu1 %1758  ;;  %v2110_v7 = vpack.c.bf16 %v8945_v32, %v8941_v21 }
 0x373   : > { %v1926_v26 = vmul.f32 1.442695, %v1838_v9  ;;  %v1928_v34 = vmul.f32 1.442695, %v1839_v19  ;;  %v1840_v49 = vsub.f32 %v10793_v28, %v1759_v37  ;;  %v1841_v2 = vsub.f32 %v10797_v56, %v1759_v37  ;;  %2031 = vadd.xlane.f32.xlu0 %v2030_v15  ;;  %v14082_v19 = vld [vmem:[#allocation91_spill] sm:$0xff] }
 0x374   : > { %v2111_v44 = vpack.c.bf16 %v8947_v16, %v8943_v58  ;;  %v2033_v29 = vadd.f32 %v8947_v16, %v8945_v32  ;;  %v2850_v58 = vsel %vm1428_vm0, %v10659_v17, 0 }
 0x375   : > { %8956 = vpow2.f32 %v1926_v26  ;;  %v1930_v63 = vmul.f32 1.442695, %v1840_v49  ;;  %v1932_v53 = vmul.f32 1.442695, %v1841_v2  ;;  %v14083_v26 = vld [vmem:[#allocation98_spill] sm:$0xff] }
 0x376   : > { %8958 = vpow2.f32 %v1928_v34  ;;  %2198 = vmatprep.mubr.bf16.mxu0 %v2111_v44  ;;  %2034 = vadd.xlane.f32.xlu1 %v2033_v29  ;;  %v14084_v34 = vld [vmem:[#allocation99_spill] sm:$0xff] }
 0x377   : > { %v8949_v51 = vpop.eup %8948  ;;  %8960 = vpow2.f32 %v1930_v63 }
 0x378   : > { %v8951_v54 = vpop.eup %8950  ;;  %8962 = vpow2.f32 %v1932_v53  ;;  %2199 = vmatmul.mubr.bf16.gmra.mrb[64].mxu0 %v2110_v7  ;;  %v1762_v28 = vpop.xlane.xlu0 %1761  ;;  %v14085_v53 = vld [vmem:[#allocation77_spill] sm:$0xff] }
 0x379   : > { %v8953_v40 = vpop.eup %8952  ;;  %7745 = vmatpush3.bf16.xpose.msra.mxu0 %v2844_v33  ;;  %v1842_v56 = vsub.f32 %v10803_v46, %v1762_v28  ;;  %v1843_v11 = vsub.f32 %v10805_v3, %v1762_v28  ;;  %v2036_v12 = vadd.f32 %v8951_v54, %v8949_v51  ;;  %v14086_v28 = vld [vmem:[#allocation101_spill] sm:$0xff] }
 0x37a   : > { %v8955_v41 = vpop.eup %8954  ;;  %8715 = vmatprep.subr.msk.bf16.mxu0 %vm1428_vm0, %v10699_v27  ;;  %v1765_v50 = vpop.xlane.xlu1 %1764  ;;  %v2112_v30 = vpack.c.bf16 %v8953_v40, %v8949_v51  ;;  %v2853_v51 = vsel %vm1428_vm0, %v14085_v53, 0 }
 0x37b   : > { %v1934_v52 = vmul.f32 1.442695, %v1842_v56  ;;  %v1936_v35 = vmul.f32 1.442695, %v1843_v11  ;;  %v1844_v24 = vsub.f32 %v10807_v20, %v1765_v50  ;;  %v1845_v59 = vsub.f32 %v10813_v60, %v1765_v50  ;;  %2037 = vadd.xlane.f32.xlu1 %v2036_v12  ;;  %v14087_v56 = vld [vmem:[#allocation102_spill] sm:$0xff] }
 0x37c   : > { %v2113_v55 = vpack.c.bf16 %v8955_v41, %v8951_v54  ;;  %v2039_v8 = vadd.f32 %v8955_v41, %v8953_v40  ;;  %v14088_v50 = vld [vmem:[#allocation86_spill] sm:$0xff] }
 0x37d   : > { %8964 = vpow2.f32 %v1934_v52  ;;  %v1938_v46 = vmul.f32 1.442695, %v1844_v24  ;;  %v1940_v23 = vmul.f32 1.442695, %v1845_v59  ;;  %v14089_v59 = vld [vmem:[#allocation103_spill] sm:$0xff] }
 0x37e   : > { %8966 = vpow2.f32 %v1936_v35  ;;  %2206 = vmatprep.mubr.bf16.mxu0 %v2113_v55  ;;  %2040 = vadd.xlane.f32.xlu0 %v2039_v8  ;;  %v14090_v8 = vld [vmem:[#allocation105_spill] sm:$0xff] }
 0x37f   : > { %v8957_v3 = vpop.eup %8956  ;;  %8968 = vpow2.f32 %v1938_v46 }
 0x380   : > { %v8959_v27 = vpop.eup %8958  ;;  %8970 = vpow2.f32 %v1940_v23  ;;  %2207 = vmatmul.mubr.bf16.gmra.mrb[68].mxu0 %v2112_v30  ;;  %v1768_v20 = vpop.xlane.xlu0 %1767 }
 0x381   : > { %v8961_v62 = vpop.eup %8960  ;;  %7747 = vmatpush3.bf16.xpose.msra.mxu0 %v2847_v10  ;;  %v1846_v60 = vsub.f32 %v10817_v39, %v1768_v20  ;;  %v1847_v42 = vsub.f32 %v10821_v1, %v1768_v20  ;;  %v2042_v43 = vadd.f32 %v8959_v27, %v8957_v3 }
 0x382   : > { %v8963_v31 = vpop.eup %8962  ;;  %8716 = vmatprep.subr.msk.bf16.mxu0 %vm1428_vm0, %v10787_v22  ;;  %v1771_v38 = vpop.xlane.xlu1 %1770  ;;  %v2114_v57 = vpack.c.bf16 %v8961_v62, %v8957_v3 }
 0x383   : > { %v1942_v13 = vmul.f32 1.442695, %v1846_v60  ;;  %v1944_v4 = vmul.f32 1.442695, %v1847_v42  ;;  %v1848_v61 = vsub.f32 %v10823_v0, %v1771_v38  ;;  %v1849_v47 = vsub.f32 %v10827_v5, %v1771_v38  ;;  %2043 = vadd.xlane.f32.xlu0 %v2042_v43  ;;  %v14091_v43 = vld [vmem:[#allocation106_spill] sm:$0xff]  ;;  %v14092_v38 = vld [vmem:[#allocation108_spill] sm:$0xff] }
 0x384   : > { %v2115_v36 = vpack.c.bf16 %v8963_v31, %v8959_v27  ;;  %v2045_v18 = vadd.f32 %v8963_v31, %v8961_v62 }
 0x385   : > { %8972 = vpow2.f32 %v1942_v13  ;;  %v1946_v39 = vmul.f32 1.442695, %v1848_v61  ;;  %v1948_v21 = vmul.f32 1.442695, %v1849_v47 }
 0x386   : > { %8974 = vpow2.f32 %v1944_v4  ;;  %2214 = vmatprep.mubr.bf16.mxu0 %v2115_v36  ;;  %2046 = vadd.xlane.f32.xlu1 %v2045_v18 }
 0x387   : > { %v8965_v1 = vpop.eup %8964  ;;  %8976 = vpow2.f32 %v1946_v39  ;;  %v14093_v39 = vld [vmem:[#allocation109_spill] sm:$0xff] }
 0x388   : > { %v8967_v22 = vpop.eup %8966  ;;  %8978 = vpow2.f32 %v1948_v21  ;;  %2215 = vmatmul.mubr.bf16.gmra.mrb[72].mxu0 %v2114_v57  ;;  %v1774_v0 = vpop.xlane.xlu0 %1773 }
 0x389   : > { %v8969_v25 = vpop.eup %8968  ;;  %7749 = vmatpush3.bf16.xpose.msra.mxu0 %v2850_v58  ;;  %v1850_v5 = vsub.f32 %v10833_v48, %v1774_v0  ;;  %v1851_v6 = vsub.f32 %v10835_v45, %v1774_v0  ;;  %v2048_v32 = vadd.f32 %v8967_v22, %v8965_v1 }
 0x38a   : > { %v8971_v9 = vpop.eup %8970  ;;  %8717 = vmatprep.subr.msk.bf16.mxu0 %vm1428_vm0, %v14082_v19  ;;  %v1777_v15 = vpop.xlane.xlu1 %1776  ;;  %v2116_v16 = vpack.c.bf16 %v8969_v25, %v8965_v1  ;;  %v14094_v1 = vld [vmem:[#allocation110_spill] sm:$0xff] }
 0x38b   : > { %v1950_v37 = vmul.f32 1.442695, %v1850_v5  ;;  %v1952_v7 = vmul.f32 1.442695, %v1851_v6  ;;  %v1852_v17 = vsub.f32 %v14083_v26, %v1777_v15  ;;  %v1853_v49 = vsub.f32 %v14084_v34, %v1777_v15  ;;  %2049 = vadd.xlane.f32.xlu1 %v2048_v32  ;;  %v14095_v15 = vld [vmem:[#allocation113_spill] sm:$0xff] }
 0x38c   : > { %v2117_v2 = vpack.c.bf16 %v8971_v9, %v8967_v22  ;;  %v2051_v44 = vadd.f32 %v8971_v9, %v8969_v25 }
 0x38d   : > { %8980 = vpow2.f32 %v1950_v37  ;;  %v1954_v48 = vmul.f32 1.442695, %v1852_v17  ;;  %v1956_v29 = vmul.f32 1.442695, %v1853_v49  ;;  %v14096_v37 = vld [vmem:[#allocation114_spill] sm:$0xff] }
 0x38e   : > { %8982 = vpow2.f32 %v1952_v7  ;;  %2222 = vmatprep.mubr.bf16.mxu0 %v2117_v2  ;;  %2052 = vadd.xlane.f32.xlu0 %v2051_v44 }
 0x38f   : > { %v8973_v45 = vpop.eup %8972  ;;  %8984 = vpow2.f32 %v1954_v48  ;;  %v14097_v48 = vld [vmem:[#allocation115_spill] sm:$0xff] }
 0x390   : > { %v8975_v63 = vpop.eup %8974  ;;  %8986 = vpow2.f32 %v1956_v29  ;;  %2223 = vmatmul.mubr.bf16.gmra.mrb[76].mxu0 %v2116_v16  ;;  %v1780_v54 = vpop.xlane.xlu0 %1779 }
 0x391   : > { %v8977_v33 = vpop.eup %8976  ;;  %7751 = vmatpush3.bf16.xpose.msra.mxu0 %v2853_v51  ;;  %v1854_v40 = vsub.f32 %v14086_v28, %v1780_v54  ;;  %v1855_v11 = vsub.f32 %v14087_v56, %v1780_v54  ;;  %v2054_v12 = vadd.f32 %v8975_v63, %v8973_v45 }
 0x392   : > { %v8979_v41 = vpop.eup %8978  ;;  %8718 = vmatprep.subr.msk.bf16.mxu0 %vm1428_vm0, %v14088_v50  ;;  %v1783_v30 = vpop.xlane.xlu1 %1782  ;;  %v2118_v52 = vpack.c.bf16 %v8977_v33, %v8973_v45  ;;  %v14098_v45 = vld [vmem:[#allocation117_spill] sm:$0xff] }
 0x393   : > { %v1958_v35 = vmul.f32 1.442695, %v1854_v40  ;;  %v1960_v24 = vmul.f32 1.442695, %v1855_v11  ;;  %v1856_v55 = vsub.f32 %v14089_v59, %v1783_v30  ;;  %v1857_v46 = vsub.f32 %v14090_v8, %v1783_v30  ;;  %2055 = vadd.xlane.f32.xlu0 %v2054_v12  ;;  %v14099_v12 = vld [vmem:[#allocation119_spill] sm:$0xff]  ;;  %v14100_v50 = vld [vmem:[#allocation121_spill] sm:$0xff] }
 0x394   : > { %v2119_v23 = vpack.c.bf16 %v8979_v41, %v8975_v63  ;;  %v2057_v3 = vadd.f32 %v8979_v41, %v8977_v33 }
 0x395   : > { %8988 = vpow2.f32 %v1958_v35  ;;  %v1962_v27 = vmul.f32 1.442695, %v1856_v55  ;;  %v1964_v10 = vmul.f32 1.442695, %v1857_v46  ;;  %v14101_v46 = vld [vmem:[#allocation122_spill] sm:$0xff] }
 0x396   : > { %8990 = vpow2.f32 %v1960_v24  ;;  %2230 = vmatprep.mubr.bf16.mxu0 %v2119_v23  ;;  %2058 = vadd.xlane.f32.xlu1 %v2057_v3  ;;  %v14102_v3 = vld [vmem:[#allocation124_spill] sm:$0xff] }
 0x397   : > { %v8981_v20 = vpop.eup %8980  ;;  %8992 = vpow2.f32 %v1962_v27 }
 0x398   : > { %v8983_v62 = vpop.eup %8982  ;;  %8994 = vpow2.f32 %v1964_v10  ;;  %2231 = vmatmul.mubr.bf16.gmra.mrb[80].mxu0 %v2118_v52  ;;  %v1786_v60 = vpop.xlane.xlu0 %1785 }
 0x399   : > { %v8985_v42 = vpop.eup %8984  ;;  %v1858_v31 = vsub.f32 %v14091_v43, %v1786_v60  ;;  %v1859_v57 = vsub.f32 %v14092_v38, %v1786_v60  ;;  %v2060_v13 = vadd.f32 %v8983_v62, %v8981_v20 }
 0x39a   : > { %v8987_v4 = vpop.eup %8986  ;;  %v1789_v61 = vpop.xlane.xlu1 %1788  ;;  %v2120_v47 = vpack.c.bf16 %v8985_v42, %v8981_v20 }
 0x39b   : > { %v1966_v36 = vmul.f32 1.442695, %v1858_v31  ;;  %v1968_v18 = vmul.f32 1.442695, %v1859_v57  ;;  %v1860_v21 = vsub.f32 %v14093_v39, %v1789_v61  ;;  %v1861_v22 = vsub.f32 %v14094_v1, %v1789_v61  ;;  %2061 = vadd.xlane.f32.xlu1 %v2060_v13  ;;  %v14103_v57 = vld [vmem:[#allocation126_spill] sm:$0xff] }
 0x39c   : > { %v2121_v58 = vpack.c.bf16 %v8987_v4, %v8983_v62  ;;  %v2063_v0 = vadd.f32 %v8987_v4, %v8985_v42  ;;  %v14104_v4 = vld [vmem:[#allocation128_spill] sm:$0xff] }
 0x39d   : > { %8996 = vpow2.f32 %v1966_v36  ;;  %v1970_v25 = vmul.f32 1.442695, %v1860_v21  ;;  %v1972_v5 = vmul.f32 1.442695, %v1861_v22  ;;  %v14105_v22 = vld [vmem:[#allocation129_spill] sm:$0xff] }
 0x39e   : > { %8998 = vpow2.f32 %v1968_v18  ;;  %2238 = vmatprep.mubr.bf16.mxu0 %v2121_v58  ;;  %2064 = vadd.xlane.f32.xlu0 %v2063_v0  ;;  %v14106_v0 = vld [vmem:[#allocation130_spill] sm:$0xff] }
 0x39f   : > { %v8989_v6 = vpop.eup %8988  ;;  %9000 = vpow2.f32 %v1970_v25 }
 0x3a0   : > { %v8991_v32 = vpop.eup %8990  ;;  %9002 = vpow2.f32 %v1972_v5  ;;  %2239 = vmatmul.mubr.bf16.gmra.mrb[84].mxu0 %v2120_v47  ;;  %v1792_v9 = vpop.xlane.xlu0 %1791 }
 0x3a1   : > { %v8993_v19 = vpop.eup %8992  ;;  %v1862_v16 = vsub.f32 %v14095_v15, %v1792_v9  ;;  %v1863_v7 = vsub.f32 %v14096_v37, %v1792_v9  ;;  %v2066_v26 = vadd.f32 %v8991_v32, %v8989_v6 }
 0x3a2   : > { %v8995_v17 = vpop.eup %8994  ;;  %v1795_v34 = vpop.xlane.xlu1 %1794  ;;  %v2122_v49 = vpack.c.bf16 %v8993_v19, %v8989_v6 }
 0x3a3   : > { %v1974_v2 = vmul.f32 1.442695, %v1862_v16  ;;  %v1976_v44 = vmul.f32 1.442695, %v1863_v7  ;;  %v1864_v29 = vsub.f32 %v14097_v48, %v1795_v34  ;;  %v1865_v63 = vsub.f32 %v14098_v45, %v1795_v34  ;;  %2067 = vadd.xlane.f32.xlu0 %v2066_v26  ;;  %v14107_v7 = vld [vmem:[#allocation133_spill] sm:$0xff] }
 0x3a4   : > { %v2123_v53 = vpack.c.bf16 %v8995_v17, %v8991_v32  ;;  %v2069_v51 = vadd.f32 %v8995_v17, %v8993_v19  ;;  %v14108_v17 = vld [vmem:[#allocation134_spill] sm:$0xff] }
 0x3a5   : > { %9004 = vpow2.f32 %v1974_v2  ;;  %v1978_v54 = vmul.f32 1.442695, %v1864_v29  ;;  %v1980_v33 = vmul.f32 1.442695, %v1865_v63  ;;  %v14109_v63 = vld [vmem:[#allocation135_spill] sm:$0xff] }
 0x3a6   : > { %9006 = vpow2.f32 %v1976_v44  ;;  %2246 = vmatprep.mubr.bf16.mxu0 %v2123_v53  ;;  %2070 = vadd.xlane.f32.xlu1 %v2069_v51  ;;  %v14110_v51 = vld [vmem:[#allocation137_spill] sm:$0xff] }
 0x3a7   : > { %v8997_v28 = vpop.eup %8996  ;;  %9008 = vpow2.f32 %v1978_v54 }
 0x3a8   : > { %v8999_v40 = vpop.eup %8998  ;;  %9010 = vpow2.f32 %v1980_v33  ;;  %2247 = vmatmul.mubr.bf16.gmra.mrb[88].mxu0 %v2122_v49  ;;  %v1798_v56 = vpop.xlane.xlu1 %1797 }
 0x3a9   : > { %v9001_v11 = vpop.eup %9000  ;;  %v1866_v41 = vsub.f32 %v14099_v12, %v1798_v56  ;;  %v1867_v30 = vsub.f32 %v14100_v50, %v1798_v56  ;;  %v2072_v52 = vadd.f32 %v8999_v40, %v8997_v28 }
 0x3aa   : > { %v9003_v35 = vpop.eup %9002  ;;  %v1801_v24 = vpop.xlane.xlu0 %1800  ;;  %v2124_v59 = vpack.c.bf16 %v9001_v11, %v8997_v28 }
 0x3ab   : > { %v1982_v55 = vmul.f32 1.442695, %v1866_v41  ;;  %v1984_v8 = vmul.f32 1.442695, %v1867_v30  ;;  %v1868_v23 = vsub.f32 %v14101_v46, %v1801_v24  ;;  %v1869_v27 = vsub.f32 %v14102_v3, %v1801_v24  ;;  %2073 = vadd.xlane.f32.xlu1 %v2072_v52 }
 0x3ac   : > { %v2125_v10 = vpack.c.bf16 %v9003_v35, %v8999_v40  ;;  %v2075_v20 = vadd.f32 %v9003_v35, %v9001_v11 }
 0x3ad   : > { %9012 = vpow2.f32 %v1982_v55  ;;  %v1986_v62 = vmul.f32 1.442695, %v1868_v23  ;;  %v1988_v60 = vmul.f32 1.442695, %v1869_v27 }
 0x3ae   : > { %9014 = vpow2.f32 %v1984_v8  ;;  %2254 = vmatprep.mubr.bf16.mxu0 %v2125_v10  ;;  %2076 = vadd.xlane.f32.xlu0 %v2075_v20  ;;  %v14111_v20 = vld [vmem:[#allocation79_spill] sm:$0xff] }
 0x3af   : > { %v9005_v42 = vpop.eup %9004  ;;  %9016 = vpow2.f32 %v1986_v62  ;;  %v14112_v62 = vld [vmem:[#allocation72_spill] sm:$0xff] }
 0x3b0   : > { %v9007_v43 = vpop.eup %9006  ;;  %9018 = vpow2.f32 %v1988_v60  ;;  %2255 = vmatmul.mubr.bf16.gmra.mrb[92].mxu0 %v2124_v59  ;;  %v1804_v31 = vpop.xlane.xlu1 %1803  ;;  %v4307_v60 = vsel %vm1428_vm0, %v14112_v62, 0 }
 0x3b1   : > { %v9009_v38 = vpop.eup %9008  ;;  %v1870_v13 = vsub.f32 %v14103_v57, %v1804_v31  ;;  %v1871_v61 = vsub.f32 %v14104_v4, %v1804_v31  ;;  %v2078_v47 = vadd.f32 %v9007_v43, %v9005_v42  ;;  %v14115_v31 = vld [vmem:[#allocation48_spill] sm:$0xff]  ;;  %v14118_v4 = vld [vmem:[#allocation81_spill] sm:$0xff] }
 0x3b2   : > { %v9011_v36 = vpop.eup %9010  ;;  %v1807_v18 = vpop.xlane.xlu0 %1806  ;;  %v2126_v39 = vpack.c.bf16 %v9009_v38, %v9005_v42  ;;  %v14113_v42 = vld [vmem:[#allocation95_spill] sm:$0xff] }
 0x3b3   : > { %v1990_v21 = vmul.f32 1.442695, %v1870_v13  ;;  %v1992_v1 = vmul.f32 1.442695, %v1871_v61  ;;  %v1872_v58 = vsub.f32 %v14105_v22, %v1807_v18  ;;  %v1873_v25 = vsub.f32 %v14106_v0, %v1807_v18  ;;  %2079 = vadd.xlane.f32.xlu0 %v2078_v47  ;;  %v14117_v13 = vld [vmem:[#allocation52_spill] sm:$0xff]  ;;  %v14120_v47 = vld [vmem:[#allocation51_spill] sm:$0xff] }
 0x3b4   : > { %v2127_v5 = vpack.c.bf16 %v9011_v36, %v9007_v43  ;;  %v2081_v6 = vadd.f32 %v9011_v36, %v9009_v38  ;;  %v14114_v43 = vld [vmem:[#allocation70_spill] sm:$0xff]  ;;  %v14116_v38 = vld [vmem:[#allocation71_spill] sm:$0xff]  ;;  %v14119_v61 = vld [vmem:[#allocation88_spill] sm:$0xff] }
 0x3b5   : > { %9020 = vpow2.f32 %v1990_v21  ;;  %v1994_v32 = vmul.f32 1.442695, %v1872_v58  ;;  %v1996_v9 = vmul.f32 1.442695, %v1873_v25  ;;  %v4310_v57 = vsel %vm1428_vm0, %v14116_v38, 0  ;;  %v14121_v36 = vld [vmem:[#allocation56_spill] sm:$0xff] }
 0x3b6   : > { %9022 = vpow2.f32 %v1992_v1  ;;  %2262 = vmatprep.mubr.bf16.mxu0 %v2127_v5  ;;  %2082 = vadd.xlane.f32.xlu1 %v2081_v6  ;;  %v14122_v18 = vld [vmem:[#allocation42_spill] sm:$0xff]  ;;  %v14124_v1 = vld [vmem:[#allocation24_spill] sm:$0xff]  ;;  %v14126_v58 = vld [vmem:[#allocation87_spill] sm:$0xff] }
 0x3b7   : > { %v9013_v19 = vpop.eup %9012  ;;  %9024 = vpow2.f32 %v1994_v32  ;;  %v14125_v22 = vld [vmem:[#allocation100_spill] sm:$0xff]  ;;  %v14127_v0 = vld [vmem:[#allocation46_spill] sm:$0xff]  ;;  %v14128_v25 = vld [vmem:[#allocation25_spill] sm:$0xff] }
 0x3b8   : > { %v9015_v15 = vpop.eup %9014  ;;  %9026 = vpow2.f32 %v1996_v9  ;;  %2263 = vmatmul.mubr.bf16.gmra.mrb[96].mxu0 %v2126_v39  ;;  %v1810_v16 = vpop.xlane.xlu1 %1809  ;;  %v14123_v39 = vld [vmem:[#allocation74_spill] sm:$0xff]  ;;  %v14130_v6 = vld [vmem:[#allocation73_spill] sm:$0xff] }
 0x3b9   : > { %v9017_v37 = vpop.eup %9016  ;;  %v1874_v26 = vsub.f32 %v14107_v7, %v1810_v16  ;;  %v1875_v34 = vsub.f32 %v14108_v17, %v1810_v16  ;;  %v2084_v49 = vadd.f32 %v9015_v15, %v9013_v19  ;;  %v4313_v21 = vsel %vm1428_vm0, %v14123_v39, 0  ;;  %v14129_v5 = vld [vmem:[#allocation50_spill] sm:$0xff]  ;;  %v14135_v7 = vld [vmem:[#allocation89_spill] sm:$0xff] }
 0x3ba   : > { %v9019_v2 = vpop.eup %9018  ;;  %v1813_v44 = vpop.xlane.xlu0 %1812  ;;  %v2128_v48 = vpack.c.bf16 %v9017_v37, %v9013_v19  ;;  %v4316_v32 = vsel %vm1428_vm0, %v14130_v6, 0  ;;  %v14131_v9 = vld [vmem:[#allocation82_spill] sm:$0xff] }
 0x3bb   : > { %v1998_v29 = vmul.f32 1.442695, %v1874_v26  ;;  %v2000_v45 = vmul.f32 1.442695, %v1875_v34  ;;  %2085 = vadd.xlane.f32.xlu1 %v2084_v49  ;;  %v1876_v53 = vsub.f32 %v14109_v63, %v1813_v44  ;;  %v1877_v54 = vsub.f32 %v14110_v51, %v1813_v44  ;;  %v14132_v19 = vld [vmem:[#allocation90_spill] sm:$0xff]  ;;  %v14136_v26 = vld [vmem:[#allocation75_spill] sm:$0xff] }
 0x3bc   : > { %v2129_v33 = vpack.c.bf16 %v9019_v2, %v9015_v15  ;;  %v2087_v28 = vadd.f32 %v9019_v2, %v9017_v37  ;;  %v14133_v15 = vld [vmem:[#allocation76_spill] sm:$0xff]  ;;  %v14134_v37 = vld [vmem:[#allocation107_spill] sm:$0xff]  ;;  %v4322_v17 = vsel %vm1428_vm0, %v14136_v26, 0  ;;  %v14138_v49 = vld [vmem:[#allocation94_spill] sm:$0xff] }
 0x3bd   : > { %9028 = vpow2.f32 %v1998_v29  ;;  %v2002_v40 = vmul.f32 1.442695, %v1876_v53  ;;  %v2004_v56 = vmul.f32 1.442695, %v1877_v54  ;;  %v4319_v16 = vsel %vm1428_vm0, %v14133_v15, 0  ;;  %v14137_v34 = vld [vmem:[#allocation83_spill] sm:$0xff] }
 0x3be   : > { %9030 = vpow2.f32 %v2000_v45  ;;  %2270 = vmatprep.mubr.bf16.mxu0 %v2129_v33  ;;  %2088 = vadd.xlane.f32.xlu0 %v2087_v28  ;;  %v14139_v2 = vld [vmem:[#allocation78_spill] sm:$0xff]  ;;  %v14141_v29 = vld [vmem:[#allocation93_spill] sm:$0xff]  ;;  %v14142_v45 = vld [vmem:[#allocation92_spill] sm:$0xff] }
 0x3bf   : > { %v9021_v11 = vpop.eup %9020  ;;  %9032 = vpow2.f32 %v2002_v40  ;;  %v4325_v44 = vsel %vm1428_vm0, %v14139_v2, 0  ;;  %v4328_v63 = vsel %vm1428_vm0, %v14142_v45, 0  ;;  %v14143_v53 = vld [vmem:[#allocation85_spill] sm:$0xff]  ;;  %v14144_v54 = vld [vmem:[#allocation118_spill] sm:$0xff]  ;;  %v14150_v45 = vld [vmem:[#allocation84_spill] sm:$0xff] }
 0x3c0   : > { %v9023_v12 = vpop.eup %9022  ;;  %9034 = vpow2.f32 %v2004_v56  ;;  %2271 = vmatmul.mubr.bf16.gmra.mrb[100].mxu0 %v2128_v48  ;;  %v14140_v48 = vld [vmem:[#allocation112_spill] sm:$0xff]  ;;  %v14145_v56 = vld [vmem:[#allocation111_spill] sm:$0xff]  ;;  %v14149_v2 = vld [vmem:[#allocation97_spill] sm:$0xff] }
 0x3c1   : > { %v9025_v41 = vpop.eup %9024  ;;  %v2090_v50 = vadd.f32 %v9023_v12, %v9021_v11 }
 0x3c2   : > { %v9027_v30 = vpop.eup %9026  ;;  %v2130_v52 = vpack.c.bf16 %v9025_v41, %v9021_v11 }
 0x3c3   : > { %2091 = vadd.xlane.f32.xlu0 %v2090_v50  ;;  %v2131_v35 = vpack.c.bf16 %v9027_v30, %v9023_v12  ;;  %v2093_v24 = vadd.f32 %v9027_v30, %v9025_v41  ;;  %v14146_v50 = vld [vmem:[#allocation123_spill] sm:$0xff] }
 0x3c5   : > { %2278 = vmatprep.mubr.bf16.mxu0 %v2131_v35  ;;  %2094 = vadd.xlane.f32.xlu1 %v2093_v24 }
 0x3c7   : > { %v9029_v59 = vpop.eup %9028 }
 0x3c8   : > { %v9031_v55 = vpop.eup %9030  ;;  %2279 = vmatmul.mubr.bf16.gmra.mrb[104].mxu0 %v2130_v52 }
 0x3c9   : > { %v9033_v8 = vpop.eup %9032  ;;  %v2096_v46 = vadd.f32 %v9031_v55, %v9029_v59 }
 0x3ca   : > { %v9035_v23 = vpop.eup %9034  ;;  %v2132_v3 = vpack.c.bf16 %v9033_v8, %v9029_v59 }
 0x3cb   : > { %2097 = vadd.xlane.f32.xlu1 %v2096_v46  ;;  %v2133_v27 = vpack.c.bf16 %v9035_v23, %v9031_v55  ;;  %v2099_v10 = vadd.f32 %v9035_v23, %v9033_v8 }
 0x3cd   : > { %2286 = vmatprep.mubr.bf16.mxu0 %v2133_v27  ;;  %2100 = vadd.xlane.f32.xlu0 %v2099_v10 }
 0x3d0   : > { %2287 = vmatmul.mubr.bf16.gmra.mrb[108].mxu0 %v2132_v3 }
 0x3d1   : > { %7752 = vmatprep.mubr.msk.bf16.mxu0 %vm1428_vm0, %v14111_v20 }
 0x3d8   : > { %7753 = vmatmul.mubr.msk.bf16.vlgmr.msra.gmra.mrb[112].mxu0 %vm1428_vm0, %v14111_v20 }
 0x3d9   : > { %7915 = vmatpush3.bf16.xpose.msra.mxu0 %v4307_v60  ;;  %7754 = vmatprep.mubr.msk.bf16.mxu0 %vm1428_vm0, %v14113_v42  ;;  %v14147_v60 = vld [vmem:[#allocation125_spill] sm:$0xff] }
 0x3da   : > { %8719 = vmatprep.subr.msk.bf16.mxu0 %vm1428_vm0, %v14114_v43 }
 0x3dc   : > { %4186 = vrot.lane.b32.xlu1 %v14115_v31, %s9918_s7 }
 0x3e0   : > { %4190 = vrot.lane.b32.xlu1 %v14117_v13, %s9918_s7  ;;  %7755 = vmatmul.mubr.msk.bf16.gmra.mrb[116].mxu0 %vm1428_vm0, %v14113_v42  ;;  %v2008_v51 = vpop.xlane.xlu0 %2007 }
 0x3e1   : > { %7917 = vmatpush3.bf16.xpose.msra.mxu0 %v4310_v57  ;;  %7756 = vmatprep.mubr.msk.bf16.mxu0 %vm1428_vm0, %v14118_v4  ;;  %9036 = vrcp.f32 %v2008_v51 }
 0x3e2   : > { %8720 = vmatprep.subr.msk.bf16.mxu0 %vm1428_vm0, %v14119_v61 }
 0x3e3   : > { %3518 = vrot.lane.b32.xlu0 %v14120_v47, %s9917_s29  ;;  %s9824_s29 = scalar_lea.vmem %s9823_s15, 8192 }
 0x3e4   : > { %4194 = vrot.lane.b32.xlu1 %v14121_v36, %s9918_s7  ;;  %p9826_p7 = scmp.lt.s32.totalorder %s9824_s29, %s9818_s27 }
 0x3e5   : > { %v2011_v28 = vpop.xlane.xlu1 %2010 }
 0x3e6   : > { %9038 = vrcp.f32 %v2011_v28  ;;  %p9827_p9 = por %p9826_p7, %p9825_p3 }
 0x3e7   : > { %4184 = vrot.lane.b32.xlu0 %v14122_v18, %s9918_s7 }
 0x3e8   : > { %5701 = vrot.lane.b32.xlu1 %v14124_v1, %s9919_s9  ;;  %7757 = vmatmul.mubr.msk.bf16.gmra.mrb[120].mxu0 %vm1428_vm0, %v14118_v4  ;;  %v2014_v33 = vpop.xlane.xlu0 %2013  ;;  %p9828_p0 = pnand %p9827_p9, %p9821_p10 }
 0x3e9   : > { %7919 = vmatpush3.bf16.xpose.msra.mxu0 %v4313_v21  ;;  %7758 = vmatprep.mubr.msk.bf16.mxu0 %vm1428_vm0, %v14125_v22  ;;  %9040 = vrcp.f32 %v2014_v33  ;;  %v14151_v33 = vld [vmem:[#allocation131_spill] sm:$0xff] }
 0x3ea   : > { %8721 = vmatprep.subr.msk.bf16.mxu0 %vm1428_vm0, %v14126_v58 }
 0x3eb   : > { %4188 = vrot.lane.b32.xlu0 %v14127_v0, %s9918_s7  ;;  %v9037_v23 = vpop.eup %9036 }
 0x3ec   : > { %5717 = vrot.lane.b32.xlu1 %v14128_v25, %s9919_s9 }
 0x3ed   : > { %v2017_v40 = vpop.xlane.xlu0 %2016 }
 0x3ee   : > { %9042 = vrcp.f32 %v2017_v40  ;;  %v14152_v40 = vld [vmem:[#allocation96_spill] sm:$0xff] }
 0x3ef   : > { %4192 = vrot.lane.b32.xlu0 %v14129_v5, %s9918_s7 }
 0x3f0   : > { %7759 = vmatmul.mubr.msk.bf16.gmra.mrb[124].mxu0 %vm1428_vm0, %v14125_v22  ;;  %v9039_v27 = vpop.eup %9038 }
 0x3f1   : > { %7921 = vmatpush3.bf16.xpose.msra.mxu0 %v4316_v32  ;;  %7760 = vmatprep.mubr.msk.bf16.mxu0 %vm1428_vm0, %v14131_v9  ;;  %v2020_v12 = vpop.xlane.xlu0 %2019 }
 0x3f2   : > { %8722 = vmatprep.subr.msk.bf16.mxu0 %vm1428_vm0, %v14132_v19  ;;  %9044 = vrcp.f32 %v2020_v12  ;;  %v14148_v19 = vld [vmem:[#allocation132_spill] sm:$0xff] }
 0x3f3   : > { %v2023_v11 = vpop.xlane.xlu1 %2022  ;;  %v9041_v22 = vpop.eup %9040 }
 0x3f4   : > { %9046 = vrcp.f32 %v2023_v11 }
 0x3f8   : > { %7761 = vmatmul.mubr.msk.bf16.gmra.mrb[128].mxu0 %vm1428_vm0, %v14131_v9  ;;  %v2026_v41 = vpop.xlane.xlu1 %2025  ;;  %v9043_v25 = vpop.eup %9042 }
 0x3f9   : > { %7923 = vmatpush3.bf16.xpose.msra.mxu0 %v4319_v16  ;;  %7762 = vmatprep.mubr.msk.bf16.mxu0 %vm1428_vm0, %v14134_v37  ;;  %9048 = vrcp.f32 %v2026_v41 }
 0x3fa   : > { %8723 = vmatprep.subr.msk.bf16.mxu0 %vm1428_vm0, %v14135_v7 }
 0x3fb   : > { %v2029_v30 = vpop.xlane.xlu0 %2028 }
 0x3fc   : > { %9050 = vrcp.f32 %v2029_v30 }
 0x400   : > { %7763 = vmatmul.mubr.msk.bf16.gmra.mrb[132].mxu0 %vm1428_vm0, %v14134_v37  ;;  %v2032_v8 = vpop.xlane.xlu0 %2031 }
 0x401   : > { %7925 = vmatpush3.bf16.xpose.msra.mxu0 %v4322_v17  ;;  %7764 = vmatprep.mubr.msk.bf16.mxu0 %vm1428_vm0, %v14137_v34  ;;  %9052 = vrcp.f32 %v2032_v8 }
 0x402   : > { %8724 = vmatprep.subr.msk.bf16.mxu0 %vm1428_vm0, %v14138_v49 }
 0x403   : > { %v11153_v35 = vpop.xlane.xlu1 %2034 }
 0x404   : > { %9054 = vrcp.f32 %v11153_v35 }
 0x408   : > { %7765 = vmatmul.mubr.msk.bf16.gmra.mrb[136].mxu0 %vm1428_vm0, %v14137_v34  ;;  %v11155_v10 = vpop.xlane.xlu1 %2037 }
 0x409   : > { %7927 = vmatpush3.bf16.xpose.msra.mxu0 %v4325_v44  ;;  %7766 = vmatprep.mubr.msk.bf16.mxu0 %vm1428_vm0, %v14140_v48  ;;  %9056 = vrcp.f32 %v11155_v10 }
 0x40a   : > { %8725 = vmatprep.subr.msk.bf16.mxu0 %vm1428_vm0, %v14141_v29 }
 0x40b   : > { %v11161_v42 = vpop.xlane.xlu0 %2040 }
 0x40c   : > { %9058 = vrcp.f32 %v11161_v42 }
 0x410   : > { %7767 = vmatmul.mubr.msk.bf16.gmra.mrb[140].mxu0 %vm1428_vm0, %v14140_v48  ;;  %v11166_v21 = vpop.xlane.xlu0 %2043  ;;  %v9045_v48 = vpop.eup %9044 }
 0x411   : > { %7929 = vmatpush3.bf16.xpose.msra.mxu0 %v4328_v63  ;;  %7768 = vmatprep.mubr.msk.bf16.mxu0 %vm1428_vm0, %v14143_v53  ;;  %v9047_v63 = vpop.eup %9046  ;;  %9060 = vrcp.f32 %v11166_v21 }
 0x413   : > { %v11163_v57 = vpop.xlane.xlu1 %2046 }
 0x414   : > { %9062 = vrcp.f32 %v11163_v57 }
 0x418   : > { %7769 = vmatmul.mubr.msk.bf16.gmra.mrb[144].mxu0 %vm1428_vm0, %v14143_v53  ;;  %v11168_v6 = vpop.xlane.xlu1 %2049 }
 0x419   : > { %7770 = vmatprep.mubr.msk.bf16.mxu0 %vm1428_vm0, %v14144_v54  ;;  %9064 = vrcp.f32 %v11168_v6  ;;  %v14166_v6 = vld [vmem:[#allocation143_spill] sm:$0xff] }
 0x41b   : > { %v11174_v15 = vpop.xlane.xlu0 %2052 }
 0x41c   : > { %9066 = vrcp.f32 %v11174_v15 }
 0x420   : > { %7771 = vmatmul.mubr.msk.bf16.gmra.mrb[148].mxu0 %vm1428_vm0, %v14144_v54  ;;  %v11179_v49 = vpop.xlane.xlu0 %2055 }
 0x421   : > { %7772 = vmatprep.mubr.msk.bf16.mxu0 %vm1428_vm0, %v14145_v56  ;;  %9068 = vrcp.f32 %v11179_v49 }
 0x423   : > { %v11176_v7 = vpop.xlane.xlu1 %2058 }
 0x424   : > { %9070 = vrcp.f32 %v11176_v7 }
 0x428   : > { %7773 = vmatmul.mubr.msk.bf16.gmra.mrb[152].mxu0 %vm1428_vm0, %v14145_v56  ;;  %v11183_v53 = vpop.xlane.xlu1 %2061  ;;  %v14153_v56 = vld [vmem:[#allocation116_spill] sm:$0xff] }
 0x429   : > { %7774 = vmatprep.mubr.msk.bf16.mxu0 %vm1428_vm0, %v14146_v50  ;;  %9072 = vrcp.f32 %v11183_v53 }
 0x42b   : > { %v7622_v52 = vpop.f32.mrb[48].mxu0  ;;  %v11189_v28 = vpop.xlane.xlu0 %2064 }
 0x42c   : > { %v7623_v24 = vpop.f32.mrb[49].mxu0  ;;  %9074 = vrcp.f32 %v11189_v28 }
 0x42d   : > { %v7624_v59 = vadd.f32 %v7623_v24, %v7622_v52  ;;  %v7625_v55 = vpop.f32.mrb[50].mxu0 }
 0x42e   : > { %v7626_v46 = vpop.f32.mrb[51].mxu0 }
 0x42f   : > { %v7627_v3 = vadd.f32 %v7626_v46, %v7625_v55  ;;  %v2327_v20 = vmul.f32 %v9037_v23, %v7624_v59  ;;  %v14154_v59 = vld [vmem:[#allocation104_spill] sm:$0xff]  ;;  %v9049_v46 = vpop.eup %9048 }
 0x430   : > { %7775 = vmatmul.mubr.msk.bf16.gmra.mrb[156].mxu0 %vm1428_vm0, %v14146_v50  ;;  %v11197_v24 = vpop.xlane.xlu0 %2067 }
 0x431   : > { %v2328_v62 = vmul.f32 %v9039_v27, %v7627_v3  ;;  %7776 = vmatprep.mubr.msk.bf16.mxu0 %vm1428_vm0, %v14147_v60  ;;  %v14155_v3 = vld [vmem:[#allocation127_spill] sm:$0xff]  ;;  %v9051_v27 = vpop.eup %9050  ;;  %9076 = vrcp.f32 %v11197_v24 }
 0x433   : > { %v7628_v43 = vpop.f32.mrb[52].mxu0  ;;  %v2359_v38 = vpack.c.bf16 %v2328_v62, %v2327_v20  ;;  %v11193_v41 = vpop.xlane.xlu1 %2070 }
 0x434   : > { %v7629_v4 = vpop.f32.mrb[53].mxu0  ;;  %9078 = vrcp.f32 %v11193_v41 }
 0x435   : > { %v7630_v61 = vadd.f32 %v7629_v4, %v7628_v43  ;;  %v7631_v39 = vpop.f32.mrb[54].mxu0  ;;  %8418 = vmatprep.mubr.msk.bf16.mxu1 %vm1428_vm0, %v2359_v38  ;;  %v14157_v43 = vld [vmem:[#allocation120_spill] sm:$0xff] }
 0x436   : > { %v7632_v1 = vpop.f32.mrb[55].mxu0  ;;  %v14158_v38 = vld [vmem:[#allocation136_spill] sm:$0xff] }
 0x437   : > { %v7633_v58 = vadd.f32 %v7632_v1, %v7631_v39  ;;  %v2329_v32 = vmul.f32 %v9041_v22, %v7630_v61 }
 0x438   : > { %7777 = vmatmul.mubr.msk.bf16.gmra.mrb[160].mxu0 %vm1428_vm0, %v14147_v60  ;;  %v11201_v20 = vpop.xlane.xlu1 %2073  ;;  %v14156_v60 = vld [vmem:[#allocation138_spill] sm:$0xff] }
 0x439   : > { %v2330_v9 = vmul.f32 %v9043_v25, %v7633_v58  ;;  %7778 = vmatprep.mubr.msk.bf16.mxu0 %vm1428_vm0, %v14148_v19  ;;  %9080 = vrcp.f32 %v11201_v20 }
 0x43b   : > { %v2360_v16 = vpack.c.bf16 %v2330_v9, %v2329_v32  ;;  %v7634_v37 = vpop.f32.mrb[56].mxu0  ;;  %v11207_v35 = vpop.xlane.xlu0 %2076  ;;  %v14159_v32 = vld [vmem:[#allocation140_spill] sm:$0xff] }
 0x43c   : > { %v7635_v26 = vpop.f32.mrb[57].mxu0  ;;  %9082 = vrcp.f32 %v11207_v35 }
 0x43d   : > { %v7636_v17 = vadd.f32 %v7635_v26, %v7634_v37  ;;  %v7637_v34 = vpop.f32.mrb[58].mxu0  ;;  %8419 = vmatmul.mubr.msk.bf16.vlgmr.msra.gmra.mrb[112].mxu1 %vm1428_vm0, %v2360_v16  ;;  %v14160_v37 = vld [vmem:[#allocation139_spill] sm:$0xff] }
 0x43e   : > { %7785 = vmatpush3.bf16.msra.mxu1 %v14149_v2  ;;  %v7638_v44 = vpop.f32.mrb[59].mxu0  ;;  %v14161_v2 = vld [vmem:[#allocation80_spill] sm:$0xff] }
 0x43f   : > { %v7639_v29 = vadd.f32 %v7638_v44, %v7637_v34  ;;  %7786 = vmatprep.subr.bf16.mxu1 %v14150_v45  ;;  %v2331_v51 = vmul.f32 %v9045_v48, %v7636_v17  ;;  %v14162_v44 = vld [vmem:[#allocation144_spill] sm:$0xff]  ;;  %v14163_v48 = vld [vmem:[#allocation141_spill] sm:$0xff] }
 0x440   : > { %7779 = vmatmul.mubr.msk.bf16.gmra.mrb[164].mxu0 %vm1428_vm0, %v14148_v19  ;;  %v11216_v25 = vpop.xlane.xlu0 %2079  ;;  %v9053_v19 = vpop.eup %9052 }
 0x441   : > { %v2332_v54 = vmul.f32 %v9047_v63, %v7639_v29  ;;  %7780 = vmatprep.mubr.msk.bf16.mxu0 %vm1428_vm0, %v14151_v33  ;;  %v9055_v26 = vpop.eup %9054  ;;  %9084 = vrcp.f32 %v11216_v25 }
 0x442   : > { %7787 = vmatpush3.bf16.msra.mxu1 %v14152_v40 }
 0x443   : > { %7788 = vmatprep.subr.bf16.mxu1 %v14153_v56  ;;  %v7640_v11 = vpop.f32.mrb[60].mxu0  ;;  %v2361_v12 = vpack.c.bf16 %v2332_v54, %v2331_v51  ;;  %v11211_v39 = vpop.xlane.xlu1 %2082  ;;  %v14164_v56 = vld [vmem:[#allocation145_spill] sm:$0xff] }
 0x444   : > { %v7641_v50 = vpop.f32.mrb[61].mxu0  ;;  %9086 = vrcp.f32 %v11211_v39 }
 0x445   : > { %v7642_v30 = vadd.f32 %v7641_v50, %v7640_v11  ;;  %v7643_v52 = vpop.f32.mrb[62].mxu0  ;;  %8422 = vmatprep.mubr.msk.bf16.mxu1 %vm1428_vm0, %v2361_v12  ;;  %v9057_v12 = vpop.eup %9056 }
 0x446   : > { %7789 = vmatpush3.bf16.msra.mxu1 %v14154_v59  ;;  %v7644_v55 = vpop.f32.mrb[63].mxu0 }
 0x447   : > { %v7645_v23 = vadd.f32 %v7644_v55, %v7643_v52  ;;  %7790 = vmatprep.subr.bf16.mxu1 %v14155_v3  ;;  %v2333_v8 = vmul.f32 %v9049_v46, %v7642_v30  ;;  %v9059_v30 = vpop.eup %9058  ;;  %v14165_v55 = vld [vmem:[#allocation142_spill] sm:$0xff] }
 0x448   : > { %7781 = vmatmul.mubr.msk.bf16.gmra.mrb[168].mxu0 %vm1428_vm0, %v14151_v33  ;;  %v11220_v17 = vpop.xlane.xlu1 %2085 }
 0x449   : > { %v2334_v62 = vmul.f32 %v9051_v27, %v7645_v23  ;;  %7782 = vmatprep.mubr.msk.bf16.mxu0 %vm1428_vm0, %v14156_v60  ;;  %9088 = vrcp.f32 %v11220_v17 }
 0x44a   : > { %7791 = vmatpush3.bf16.msra.mxu1 %v14157_v43  ;;  %v9061_v43 = vpop.eup %9060 }
 0x44b   : > { %7792 = vmatprep.subr.bf16.mxu1 %v14158_v38  ;;  %v7646_v4 = vpop.f32.mrb[64].mxu0  ;;  %v2362_v61 = vpack.c.bf16 %v2334_v62, %v2333_v8  ;;  %v11226_v42 = vpop.xlane.xlu0 %2088 }
 0x44c   : > { %v7647_v1 = vpop.f32.mrb[65].mxu0  ;;  %9090 = vrcp.f32 %v11226_v42 }
 0x44d   : > { %v7648_v22 = vadd.f32 %v7647_v1, %v7646_v4  ;;  %v7649_v58 = vpop.f32.mrb[66].mxu0  ;;  %8423 = vmatmul.mubr.msk.bf16.gmra.mrb[116].mxu1 %vm1428_vm0, %v2362_v61  ;;  %v9063_v4 = vpop.eup %9062 }
 0x44e   : > { %7793 = vmatpush3.bf16.msra.mxu1 %v14159_v32  ;;  %v7650_v9 = vpop.f32.mrb[67].mxu0 }
 0x44f   : > { %v7651_v16 = vadd.f32 %v7650_v9, %v7649_v58  ;;  %7794 = vmatprep.subr.bf16.mxu1 %v14160_v37  ;;  %v2335_v10 = vmul.f32 %v9053_v19, %v7648_v22 }
 0x450   : > { %7783 = vmatmul.mubr.msk.bf16.gmra.mrb[172].mxu0 %vm1428_vm0, %v14156_v60  ;;  %v11235_v40 = vpop.xlane.xlu0 %2091 }
 0x451   : > { %v2336_v34 = vmul.f32 %v9055_v26, %v7651_v16  ;;  %7930 = vmatprep.mubr.msk.bf16.mxu0 %vm1428_vm0, %v14161_v2  ;;  %v9065_v26 = vpop.eup %9064  ;;  %9092 = vrcp.f32 %v11235_v40 }
 0x452   : > { %7795 = vmatpush3.bf16.msra.mxu1 %v14162_v44  ;;  %v11230_v63 = vpop.xlane.xlu1 %2094 }
 0x453   : > { %7796 = vmatprep.subr.bf16.mxu1 %v14163_v48  ;;  %v7652_v29 = vpop.f32.mrb[68].mxu0  ;;  %v2363_v45 = vpack.c.bf16 %v2336_v34, %v2335_v10  ;;  %v9067_v34 = vpop.eup %9066  ;;  %9094 = vrcp.f32 %v11230_v63 }
 0x454   : > { %v7653_v51 = vpop.f32.mrb[69].mxu0 }
 0x455   : > { %v7654_v54 = vadd.f32 %v7653_v51, %v7652_v29  ;;  %v7655_v33 = vpop.f32.mrb[70].mxu0  ;;  %8426 = vmatprep.mubr.msk.bf16.mxu1 %vm1428_vm0, %v2363_v45 }
 0x456   : > { %7797 = vmatpush3.bf16.msra.mxu1 %v14164_v56  ;;  %v7656_v11 = vpop.f32.mrb[71].mxu0 }
 0x457   : > { %v7657_v50 = vadd.f32 %v7656_v11, %v7655_v33  ;;  %7798 = vmatprep.subr.bf16.mxu1 %v10963_v14  ;;  %v2337_v21 = vmul.f32 %v9057_v12, %v7654_v54  ;;  %v9069_v12 = vpop.eup %9068 }
 0x458   : > { %v11239_v52 = vpop.xlane.xlu1 %2097  ;;  %7931 = vmatmul.mubr.msk.bf16.vlgmr.msra.gmra.mrb[176].mxu0 %vm1428_vm0, %v14161_v2 }
 0x459   : > { %v2338_v59 = vmul.f32 %v9059_v30, %v7657_v50  ;;  %7932 = vmatprep.mubr.msk.bf16.mxu0 %vm1428_vm0, %v14165_v55  ;;  %v9071_v30 = vpop.eup %9070  ;;  %9096 = vrcp.f32 %v11239_v52 }
 0x45a   : > { %v11245_v57 = vpop.xlane.xlu0 %2100 }
 0x45b   : > { %v7658_v46 = vpop.f32.mrb[72].mxu0  ;;  %v2364_v23 = vpack.c.bf16 %v2338_v59, %v2337_v21  ;;  %9098 = vrcp.f32 %v11245_v57 }
 0x45c   : > { %v7659_v3 = vpop.f32.mrb[73].mxu0  ;;  %v11247_v27 = vpop.permute.xlu1 %4186 }
 0x45d   : > { %v7660_v14 = vadd.f32 %v7659_v3, %v7658_v46  ;;  %v7661_v8 = vpop.f32.mrb[74].mxu0  ;;  %8427 = vmatmul.mubr.msk.bf16.gmra.mrb[120].mxu1 %vm1428_vm0, %v2364_v23 }
 0x45e   : > { %v7662_v62 = vpop.f32.mrb[75].mxu0  ;;  %v3519_v60 = vpop.permute.xlu0 %3518 }
 0x45f   : > { %v7663_v38 = vadd.f32 %v7662_v62, %v7661_v8  ;;  %7799 = vmatpush3.bf16.msra.mxu1 %v3519_v60  ;;  %v2339_v1 = vmul.f32 %v9061_v43, %v7660_v14  ;;  %v9073_v14 = vpop.eup %9072 }
 0x460   : > { %v11252_v61 = vpop.permute.xlu1 %4190  ;;  %7933 = vmatmul.mubr.msk.bf16.gmra.mrb[180].mxu0 %vm1428_vm0, %v14165_v55  ;;  %v9075_v62 = vpop.eup %9074 }
 0x461   : > { %v2340_v22 = vmul.f32 %v9063_v4, %v7663_v38  ;;  %7934 = vmatprep.mubr.msk.bf16.mxu0 %vm1428_vm0, %v14166_v6 }
 0x462   : > { %v4185_v2 = vpop.permute.xlu0 %4184 }
 0x463   : > { %v7664_v58 = vpop.f32.mrb[76].mxu0  ;;  %v2365_v32 = vpack.c.bf16 %v2340_v22, %v2339_v1 }
 0x464   : > { %v7665_v9 = vpop.f32.mrb[77].mxu0  ;;  %v11258_v15 = vpop.permute.xlu1 %4194 }
 0x465   : > { %v7666_v19 = vadd.f32 %v7665_v9, %v7664_v58  ;;  %v7667_v16 = vpop.f32.mrb[78].mxu0  ;;  %8430 = vmatprep.mubr.msk.bf16.mxu1 %vm1428_vm0, %v2365_v32  ;;  %v9077_v58 = vpop.eup %9076 }
 0x466   : > { %v7668_v37 = vpop.f32.mrb[79].mxu0  ;;  %v4189_v60 = vpop.permute.xlu0 %4188 }
 0x467   : > { %v7669_v10 = vadd.f32 %v7668_v37, %v7667_v16  ;;  %v2341_v48 = vmul.f32 %v9065_v26, %v7666_v19  ;;  %v9079_v9 = vpop.eup %9078 }
 0x468   : > { %v5702_v44 = vpop.permute.xlu1 %5701  ;;  %7935 = vmatmul.mubr.msk.bf16.gmra.mrb[184].mxu0 %vm1428_vm0, %v14166_v6 }
 0x469   : > { %v2342_v29 = vmul.f32 %v9067_v34, %v7669_v10  ;;  %7936 = vmatprep.mubr.msk.bf16.mxu0 %vm1428_vm0, %v4185_v2  ;;  %v5782_v7 = vsel %vm1428_vm0, %v5702_v44, 0  ;;  %v9081_v34 = vpop.eup %9080 }
 0x46a   : > { %v9083_v44 = vpop.eup %9082 }
 0x46b   : > { %v7670_v49 = vpop.f32.mrb[80].mxu0  ;;  %v2366_v45 = vpack.c.bf16 %v2342_v29, %v2341_v48  ;;  %v4193_v48 = vpop.permute.xlu0 %4192 }
 0x46c   : > { %v7671_v51 = vpop.f32.mrb[81].mxu0  ;;  %v5718_v54 = vpop.permute.xlu1 %5717 }
 0x46d   : > { %v7672_v33 = vadd.f32 %v7671_v51, %v7670_v49  ;;  %v7673_v56 = vpop.f32.mrb[82].mxu0  ;;  %8431 = vmatmul.mubr.msk.bf16.gmra.mrb[124].mxu1 %vm1428_vm0, %v2366_v45  ;;  %8726 = vmatprep.subr.msk.bf16.mxu0 %vm1428_vm0, %v5718_v54 }
 0x46e   : > { %v7674_v11 = vpop.f32.mrb[83].mxu0  ;;  %8093 = vmatpush3.bf16.xpose.msra.mxu0 %v5782_v7 }
 0x46f   : > { %v7675_v50 = vadd.f32 %v7674_v11, %v7673_v56  ;;  %v2343_v21 = vmul.f32 %v9069_v12, %v7672_v33  ;;  %v9085_v33 = vpop.eup %9084 }
 0x470   : > { %7937 = vmatmul.mubr.msk.bf16.gmra.mrb[188].mxu0 %vm1428_vm0, %v4185_v2  ;;  %v9087_v11 = vpop.eup %9086 }
 0x471   : > { %v2344_v59 = vmul.f32 %v9071_v30, %v7675_v50  ;;  %7938 = vmatprep.mubr.msk.bf16.mxu0 %vm1428_vm0, %v11247_v27 }
 0x473   : > { %v7676_v53 = vpop.f32.mrb[84].mxu0  ;;  %v2367_v55 = vpack.c.bf16 %v2344_v59, %v2343_v21 }
 0x474   : > { %v7677_v46 = vpop.f32.mrb[85].mxu0 }
 0x475   : > { %v7678_v23 = vadd.f32 %v7677_v46, %v7676_v53  ;;  %v7679_v3 = vpop.f32.mrb[86].mxu0  ;;  %8434 = vmatprep.mubr.msk.bf16.mxu1 %vm1428_vm0, %v2367_v55  ;;  %v9089_v53 = vpop.eup %9088 }
 0x476   : > { %v7680_v28 = vpop.f32.mrb[87].mxu0  ;;  %v9091_v46 = vpop.eup %9090 }
 0x477   : > { %v7681_v8 = vadd.f32 %v7680_v28, %v7679_v3  ;;  %v2345_v43 = vmul.f32 %v9073_v14, %v7678_v23 }
 0x478   : > { %7939 = vmatmul.mubr.msk.bf16.gmra.mrb[192].mxu0 %vm1428_vm0, %v11247_v27 }
 0x479   : > { %v2346_v38 = vmul.f32 %v9075_v62, %v7681_v8  ;;  %7940 = vmatprep.mubr.msk.bf16.mxu0 %vm1428_vm0, %v4189_v60 }
 0x47b   : > { %v7682_v4 = vpop.f32.mrb[88].mxu0  ;;  %v2368_v24 = vpack.c.bf16 %v2346_v38, %v2345_v43 }
 0x47c   : > { %v7683_v1 = vpop.f32.mrb[89].mxu0 }
 0x47d   : > { %v7684_v22 = vadd.f32 %v7683_v1, %v7682_v4  ;;  %v7685_v6 = vpop.f32.mrb[90].mxu0  ;;  %8435 = vmatmul.mubr.msk.bf16.gmra.mrb[128].mxu1 %vm1428_vm0, %v2368_v24 }
 0x47e   : > { %v7686_v41 = vpop.f32.mrb[91].mxu0 }
 0x47f   : > { %v7687_v32 = vadd.f32 %v7686_v41, %v7685_v6  ;;  %v2347_v27 = vmul.f32 %v9077_v58, %v7684_v22 }
 0x480   : > { %7941 = vmatmul.mubr.msk.bf16.gmra.mrb[196].mxu0 %vm1428_vm0, %v4189_v60  ;;  %v9093_v60 = vpop.eup %9092 }
 0x481   : > { %v2348_v19 = vmul.f32 %v9079_v9, %v7687_v32  ;;  %7942 = vmatprep.mubr.msk.bf16.mxu0 %vm1428_vm0, %v11252_v61  ;;  %v9095_v38 = vpop.eup %9094 }
 0x482   : > { %v9097_v58 = vpop.eup %9096 }
 0x483   : > { %v7688_v16 = vpop.f32.mrb[92].mxu0  ;;  %v2369_v37 = vpack.c.bf16 %v2348_v19, %v2347_v27  ;;  %v9099_v9 = vpop.eup %9098 }
 0x484   : > { %v7689_v20 = vpop.f32.mrb[93].mxu0 }
 0x485   : > { %v7690_v26 = vadd.f32 %v7689_v20, %v7688_v16  ;;  %v7691_v10 = vpop.f32.mrb[94].mxu0  ;;  %8438 = vmatprep.mubr.msk.bf16.mxu1 %vm1428_vm0, %v2369_v37 }
 0x486   : > { %v7692_v35 = vpop.f32.mrb[95].mxu0 }
 0x487   : > { %v7693_v2 = vadd.f32 %v7692_v35, %v7691_v10  ;;  %v2349_v29 = vmul.f32 %v9081_v34, %v7690_v26 }
 0x488   : > { %7943 = vmatmul.mubr.msk.bf16.gmra.mrb[200].mxu0 %vm1428_vm0, %v11252_v61 }
 0x489   : > { %v2350_v49 = vmul.f32 %v9083_v44, %v7693_v2  ;;  %7944 = vmatprep.mubr.msk.bf16.mxu0 %vm1428_vm0, %v4193_v48 }
 0x48b   : > { %v7694_v45 = vpop.f32.mrb[96].mxu0  ;;  %v2370_v25 = vpack.c.bf16 %v2350_v49, %v2349_v29 }
 0x48c   : > { %v7695_v51 = vpop.f32.mrb[97].mxu0 }
 0x48d   : > { %v7696_v54 = vadd.f32 %v7695_v51, %v7694_v45  ;;  %v7697_v7 = vpop.f32.mrb[98].mxu0  ;;  %8439 = vmatmul.mubr.msk.bf16.gmra.mrb[132].mxu1 %vm1428_vm0, %v2370_v25 }
 0x48e   : > { %v7698_v39 = vpop.f32.mrb[99].mxu0 }
 0x48f   : > { %v7699_v56 = vadd.f32 %v7698_v39, %v7697_v7  ;;  %v2351_v61 = vmul.f32 %v9085_v33, %v7696_v54 }
 0x490   : > { %7945 = vmatmul.mubr.msk.bf16.gmra.mrb[204].mxu0 %vm1428_vm0, %v4193_v48 }
 0x491   : > { %v2352_v12 = vmul.f32 %v9087_v11, %v7699_v56  ;;  %7946 = vmatprep.mubr.msk.bf16.mxu0 %vm1428_vm0, %v11258_v15 }
 0x493   : > { %v7700_v50 = vpop.f32.mrb[100].mxu0  ;;  %v2371_v30 = vpack.c.bf16 %v2352_v12, %v2351_v61 }
 0x494   : > { %v7701_v17 = vpop.f32.mrb[101].mxu0 }
 0x495   : > { %v7702_v21 = vadd.f32 %v7701_v17, %v7700_v50  ;;  %v7703_v59 = vpop.f32.mrb[102].mxu0  ;;  %8442 = vmatprep.mubr.msk.bf16.mxu1 %vm1428_vm0, %v2371_v30 }
 0x496   : > { %v7704_v42 = vpop.f32.mrb[103].mxu0 }
 0x497   : > { %v7705_v55 = vadd.f32 %v7704_v42, %v7703_v59  ;;  %v2353_v23 = vmul.f32 %v9089_v53, %v7702_v21 }
 0x498   : > { %7947 = vmatmul.mubr.msk.bf16.gmra.mrb[208].mxu0 %vm1428_vm0, %v11258_v15 }
 0x499   : > { %v2354_v3 = vmul.f32 %v9091_v46, %v7705_v55 }
 0x49b   : > { %v7706_v28 = vpop.f32.mrb[104].mxu0  ;;  %v2372_v14 = vpack.c.bf16 %v2354_v3, %v2353_v23 }
 0x49c   : > { %v7707_v8 = vpop.f32.mrb[105].mxu0 }
 0x49d   : > { %v7708_v40 = vadd.f32 %v7707_v8, %v7706_v28  ;;  %v7709_v62 = vpop.f32.mrb[106].mxu0  ;;  %8443 = vmatmul.mubr.msk.bf16.gmra.mrb[136].mxu1 %vm1428_vm0, %v2372_v14 }
 0x49e   : > { %v7710_v63 = vpop.f32.mrb[107].mxu0 }
 0x49f   : > { %v7711_v43 = vadd.f32 %v7710_v63, %v7709_v62  ;;  %v2355_v4 = vmul.f32 %v9093_v60, %v7708_v40 }
 0x4a1   : > { %v2356_v24 = vmul.f32 %v9095_v38, %v7711_v43 }
 0x4a3   : > { %v7712_v15 = vpop.f32.mrb[108].mxu0  ;;  %v2373_v1 = vpack.c.bf16 %v2356_v24, %v2355_v4 }
 0x4a4   : > { %v7713_v22 = vpop.f32.mrb[109].mxu0 }
 0x4a5   : > { %v7714_v6 = vadd.f32 %v7713_v22, %v7712_v15  ;;  %v7715_v41 = vpop.f32.mrb[110].mxu0  ;;  %8446 = vmatprep.mubr.msk.bf16.mxu1 %vm1428_vm0, %v2373_v1 }
 0x4a6   : > { %v7716_v52 = vpop.f32.mrb[111].mxu0 }
 0x4a7   : > { %v7717_v32 = vadd.f32 %v7716_v52, %v7715_v41  ;;  %v2357_v27 = vmul.f32 %v9097_v58, %v7714_v6 }
 0x4a9   : > { %v2358_v19 = vmul.f32 %v9099_v9, %v7717_v32 }
 0x4ab   : > { %v11307_v57 = vpop.f32.mrb[112].mxu0  ;;  %v2374_v16 = vpack.c.bf16 %v2358_v19, %v2357_v27 }
 0x4ac   : > { %v11309_v37 = vpop.f32.mrb[113].mxu0 }
 0x4ad   : > { %v3072_v20 = vmax.f32 %v11307_v57, %v11309_v37  ;;  %8447 = vmatmul.mubr.msk.bf16.gmra.mrb[140].mxu1 %vm1428_vm0, %v2374_v16  ;;  %v11314_v26 = vpop.f32.mrb[114].mxu0 }
 0x4ae   : > { %v11316_v10 = vpop.f32.mrb[115].mxu0 }
 0x4af   : > { %v3075_v35 = vmax.f32 %v11314_v26, %v11316_v10  ;;  %3073 = vmax.xlane.f32.xlu0 %v3072_v20 }
 0x4b1   : > { %3076 = vmax.xlane.f32.xlu1 %v3075_v35 }
 0x4b3   : > { %v11320_v34 = vpop.f32.mrb[116].mxu0 }
 0x4b4   : > { %v11322_v2 = vpop.f32.mrb[117].mxu0 }
 0x4b5   : > { %v3078_v44 = vmax.f32 %v11320_v34, %v11322_v2  ;;  %v11326_v48 = vpop.f32.mrb[118].mxu0 }
 0x4b6   : > { %v11328_v29 = vpop.f32.mrb[119].mxu0 }
 0x4b7   : > { %v3081_v49 = vmax.f32 %v11326_v48, %v11328_v29  ;;  %3079 = vmax.xlane.f32.xlu0 %v3078_v44 }
 0x4b9   : > { %3082 = vmax.xlane.f32.xlu1 %v3081_v49 }
 0x4bb   : > { %v11332_v45 = vpop.f32.mrb[120].mxu0 }
 0x4bc   : > { %v11334_v25 = vpop.f32.mrb[121].mxu0 }
 0x4bd   : > { %v3084_v51 = vmax.f32 %v11332_v45, %v11334_v25  ;;  %v11338_v54 = vpop.f32.mrb[122].mxu0 }
 0x4be   : > { %v11340_v7 = vpop.f32.mrb[123].mxu0 }
 0x4bf   : > { %v3087_v39 = vmax.f32 %v11338_v54, %v11340_v7  ;;  %3085 = vmax.xlane.f32.xlu1 %v3084_v51 }
 0x4c1   : > { %3088 = vmax.xlane.f32.xlu0 %v3087_v39 }
 0x4c3   : > { %v11344_v33 = vpop.f32.mrb[124].mxu0 }
 0x4c4   : > { %v11346_v56 = vpop.f32.mrb[125].mxu0 }
 0x4c5   : > { %v3090_v11 = vmax.f32 %v11344_v33, %v11346_v56  ;;  %v11350_v61 = vpop.f32.mrb[126].mxu0 }
 0x4c6   : > { %v11352_v12 = vpop.f32.mrb[127].mxu0 }
 0x4c7   : > { %v3093_v50 = vmax.f32 %v11350_v61, %v11352_v12  ;;  %3091 = vmax.xlane.f32.xlu0 %v3090_v11 }
 0x4c9   : > { %3094 = vmax.xlane.f32.xlu1 %v3093_v50 }
 0x4cb   : > { %v11356_v30 = vpop.f32.mrb[128].mxu0 }
 0x4cc   : > { %v11358_v17 = vpop.f32.mrb[129].mxu0 }
 0x4cd   : > { %v3096_v21 = vmax.f32 %v11356_v30, %v11358_v17  ;;  %v11362_v59 = vpop.f32.mrb[130].mxu0 }
 0x4ce   : > { %v11364_v42 = vpop.f32.mrb[131].mxu0 }
 0x4cf   : > { %v3099_v53 = vmax.f32 %v11362_v59, %v11364_v42  ;;  %3097 = vmax.xlane.f32.xlu1 %v3096_v21 }
 0x4d1   : > { %3100 = vmax.xlane.f32.xlu0 %v3099_v53 }
 0x4d3   : > { %v11368_v55 = vpop.f32.mrb[132].mxu0 }
 0x4d4   : > { %v11370_v46 = vpop.f32.mrb[133].mxu0 }
 0x4d5   : > { %v3102_v23 = vmax.f32 %v11368_v55, %v11370_v46  ;;  %v11374_v3 = vpop.f32.mrb[134].mxu0 }
 0x4d6   : > { %v11376_v28 = vpop.f32.mrb[135].mxu0 }
 0x4d7   : > { %v3105_v14 = vmax.f32 %v11374_v3, %v11376_v28  ;;  %3103 = vmax.xlane.f32.xlu1 %v3102_v23 }
 0x4db   : > { %3106 = vmax.xlane.f32.xlu1 %v3105_v14  ;;  %v11380_v8 = vpop.f32.mrb[136].mxu0 }
 0x4dc   : > { %v11382_v40 = vpop.f32.mrb[137].mxu0 }
 0x4dd   : > { %v3108_v62 = vmax.f32 %v11380_v8, %v11382_v40  ;;  %v11386_v63 = vpop.f32.mrb[138].mxu0 }
 0x4de   : > { %v11388_v60 = vpop.f32.mrb[139].mxu0 }
 0x4df   : > { %v3111_v43 = vmax.f32 %v11386_v63, %v11388_v60  ;;  %3109 = vmax.xlane.f32.xlu0 %v3108_v62 }
 0x4e1   : > { %3112 = vmax.xlane.f32.xlu1 %v3111_v43 }
 0x4e3   : > { %v11392_v38 = vpop.f32.mrb[140].mxu0 }
 0x4e4   : > { %v11394_v4 = vpop.f32.mrb[141].mxu0 }
 0x4e5   : > { %v3114_v24 = vmax.f32 %v11392_v38, %v11394_v4  ;;  %v11398_v15 = vpop.f32.mrb[142].mxu0 }
 0x4e6   : > { %v11400_v1 = vpop.f32.mrb[143].mxu0 }
 0x4e7   : > { %v3117_v22 = vmax.f32 %v11398_v15, %v11400_v1  ;;  %3115 = vmax.xlane.f32.xlu1 %v3114_v24 }
 0x4eb   : > { %3118 = vmax.xlane.f32.xlu1 %v3117_v22  ;;  %v11404_v6 = vpop.f32.mrb[144].mxu0 }
 0x4ec   : > { %v11406_v41 = vpop.f32.mrb[145].mxu0 }
 0x4ed   : > { %v3120_v52 = vmax.f32 %v11404_v6, %v11406_v41  ;;  %v11410_v58 = vpop.f32.mrb[146].mxu0 }
 0x4ee   : > { %v11412_v32 = vpop.f32.mrb[147].mxu0 }
 0x4ef   : > { %v3123_v9 = vmax.f32 %v11410_v58, %v11412_v32  ;;  %3121 = vmax.xlane.f32.xlu0 %v3120_v52 }
 0x4f1   : > { %3124 = vmax.xlane.f32.xlu1 %v3123_v9 }
 0x4f3   : > { %v11416_v27 = vpop.f32.mrb[148].mxu0 }
 0x4f4   : > { %v11418_v19 = vpop.f32.mrb[149].mxu0 }
 0x4f5   : > { %v3126_v16 = vmax.f32 %v11416_v27, %v11418_v19  ;;  %v11422_v20 = vpop.f32.mrb[150].mxu0 }
 0x4f6   : > { %v11424_v35 = vpop.f32.mrb[151].mxu0 }
 0x4f7   : > { %14167 = vst [vmem:[#allocation91_spill] sm:$0xff] %v11424_v35  ;;  %v3129_v44 = vmax.f32 %v11422_v20, %v11424_v35  ;;  %3127 = vmax.xlane.f32.xlu1 %v3126_v16 }
 0x4f9   : > { %3130 = vmax.xlane.f32.xlu0 %v3129_v44 }
 0x4fb   : > { %v11428_v49 = vpop.f32.mrb[152].mxu0 }
 0x4fc   : > { %14168 = vst [vmem:[#allocation98_spill] sm:$0xff] %v11428_v49  ;;  %v11430_v51 = vpop.f32.mrb[153].mxu0 }
 0x4fd   : > { %14169 = vst [vmem:[#allocation99_spill] sm:$0xff] %v11430_v51  ;;  %v3132_v39 = vmax.f32 %v11428_v49, %v11430_v51  ;;  %v11434_v11 = vpop.f32.mrb[154].mxu0 }
 0x4fe   : > { %14170 = vst [vmem:[#allocation77_spill] sm:$0xff] %v11434_v11  ;;  %v11436_v50 = vpop.f32.mrb[155].mxu0 }
 0x4ff   : > { %14171 = vst [vmem:[#allocation101_spill] sm:$0xff] %v11436_v50  ;;  %v3135_v21 = vmax.f32 %v11434_v11, %v11436_v50  ;;  %3133 = vmax.xlane.f32.xlu1 %v3132_v39 }
 0x501   : > { %3136 = vmax.xlane.f32.xlu0 %v3135_v21 }
 0x503   : > { %v11440_v53 = vpop.f32.mrb[156].mxu0 }
 0x504   : > { %14172 = vst [vmem:[#allocation102_spill] sm:$0xff] %v11440_v53  ;;  %v11442_v23 = vpop.f32.mrb[157].mxu0 }
 0x505   : > { %14173 = vst [vmem:[#allocation86_spill] sm:$0xff] %v11442_v23  ;;  %v3138_v14 = vmax.f32 %v11440_v53, %v11442_v23  ;;  %v11446_v62 = vpop.f32.mrb[158].mxu0 }
 0x506   : > { %14174 = vst [vmem:[#allocation103_spill] sm:$0xff] %v11446_v62  ;;  %v11448_v43 = vpop.f32.mrb[159].mxu0 }
 0x507   : > { %14175 = vst [vmem:[#allocation105_spill] sm:$0xff] %v11448_v43  ;;  %v3141_v24 = vmax.f32 %v11446_v62, %v11448_v43  ;;  %3139 = vmax.xlane.f32.xlu1 %v3138_v14  ;;  %v14181_v43 = vld [vmem:[#allocation60_spill] sm:$0xff] }
 0x508   : > { %v14183_v14 = vld [vmem:[#allocation28_spill] sm:$0xff] }
 0x50b   : > { %v11452_v22 = vpop.f32.mrb[160].mxu0 }
 0x50c   : > { %14176 = vst [vmem:[#allocation106_spill] sm:$0xff] %v11452_v22  ;;  %v11454_v52 = vpop.f32.mrb[161].mxu0 }
 0x50d   : > { %14177 = vst [vmem:[#allocation108_spill] sm:$0xff] %v11454_v52  ;;  %v3144_v9 = vmax.f32 %v11452_v22, %v11454_v52  ;;  %v11458_v16 = vpop.f32.mrb[162].mxu0  ;;  %v14180_v22 = vld [vmem:[#allocation55_spill] sm:$0xff] }
 0x50e   : > { %14178 = vst [vmem:[#allocation109_spill] sm:$0xff] %v11458_v16  ;;  %v11460_v44 = vpop.f32.mrb[163].mxu0 }
 0x50f   : > { %14179 = vst [vmem:[#allocation110_spill] sm:$0xff] %v11460_v44  ;;  %v3147_v39 = vmax.f32 %v11458_v16, %v11460_v44  ;;  %v14182_v16 = vld [vmem:[#allocation22_spill] sm:$0xff] }
 0x513   : > { %v11464_v21 = vpop.f32.mrb[164].mxu0 }
 0x514   : > { %v11466_v47 = vpop.f32.mrb[165].mxu0 }
 0x515   : > { %v11470_v5 = vpop.f32.mrb[166].mxu0 }
 0x516   : > { %v11472_v0 = vpop.f32.mrb[167].mxu0 }
 0x517   : > { %4196 = vrot.lane.b32.xlu0 %v14180_v22, %s9918_s7 }
 0x518   : > { %4198 = vrot.lane.b32.xlu1 %v14181_v43, %s9918_s7  ;;  %v14184_v43 = vld [vmem:[#allocation23_spill] sm:$0xff] }
 0x51b   : > { %v11480_v44 = vpop.f32.mrb[168].mxu0  ;;  %5703 = vrot.lane.b32.xlu0 %v14182_v16, %s9919_s9  ;;  %v14185_v16 = vld [vmem:[#allocation29_spill] sm:$0xff] }
 0x51c   : > { %5705 = vrot.lane.b32.xlu1 %v14183_v14, %s9919_s9  ;;  %v11486_v62 = vpop.f32.mrb[169].mxu0 }
 0x51d   : > { %v11490_v52 = vpop.f32.mrb[170].mxu0 }
 0x51e   : > { %v11492_v13 = vpop.f32.mrb[171].mxu0 }
 0x51f   : > { %5719 = vrot.lane.b32.xlu0 %v14184_v43, %s9919_s9 }
 0x520   : > { %5721 = vrot.lane.b32.xlu1 %v14185_v16, %s9919_s9 }
 0x523   : > { %v11500_v31 = vpop.f32.mrb[172].mxu0 }
 0x524   : > { %14186 = vst [vmem:[#allocation113_spill] sm:$0xff] %v11500_v31  ;;  %v11502_v14 = vpop.f32.mrb[173].mxu0 }
 0x525   : > { %14187 = vst [vmem:[#allocation114_spill] sm:$0xff] %v11502_v14  ;;  %v11506_v18 = vpop.f32.mrb[174].mxu0 }
 0x526   : > { %14188 = vst [vmem:[#allocation115_spill] sm:$0xff] %v11506_v18  ;;  %v11508_v23 = vpop.f32.mrb[175].mxu0 }
 0x527   : > { %14189 = vst [vmem:[#allocation117_spill] sm:$0xff] %v11508_v23 }
 0x52b   : > { %v11512_v53 = vpop.f32.mrb[176].mxu0 }
 0x52c   : > { %14190 = vst [vmem:[#allocation119_spill] sm:$0xff] %v11512_v53  ;;  %v11514_v43 = vpop.f32.mrb[177].mxu0 }
 0x52d   : > { %14191 = vst [vmem:[#allocation121_spill] sm:$0xff] %v11514_v43  ;;  %v11518_v50 = vpop.f32.mrb[178].mxu0 }
 0x52e   : > { %14192 = vst [vmem:[#allocation122_spill] sm:$0xff] %v11518_v50  ;;  %v11520_v11 = vpop.f32.mrb[179].mxu0 }
 0x52f   : > { %14193 = vst [vmem:[#allocation124_spill] sm:$0xff] %v11520_v11 }
 0x533   : > { %v11524_v51 = vpop.f32.mrb[180].mxu0 }
 0x534   : > { %14194 = vst [vmem:[#allocation126_spill] sm:$0xff] %v11524_v51  ;;  %v11526_v49 = vpop.f32.mrb[181].mxu0 }
 0x535   : > { %14195 = vst [vmem:[#allocation128_spill] sm:$0xff] %v11526_v49  ;;  %v11530_v23 = vpop.f32.mrb[182].mxu0 }
 0x536   : > { %14196 = vst [vmem:[#allocation129_spill] sm:$0xff] %v11530_v23  ;;  %v11532_v18 = vpop.f32.mrb[183].mxu0 }
 0x537   : > { %14197 = vst [vmem:[#allocation130_spill] sm:$0xff] %v11532_v18 }
 0x53b   : > { %v11536_v43 = vpop.f32.mrb[184].mxu0 }
 0x53c   : > { %v11538_v53 = vpop.f32.mrb[185].mxu0  ;;  %v3074_v14 = vpop.xlane.xlu0 %3073 }
 0x53d   : > { %v3168_v11 = vsub.f32 %v11307_v57, %v3074_v14  ;;  %v3169_v50 = vsub.f32 %v11309_v37, %v3074_v14  ;;  %v11544_v22 = vpop.f32.mrb[186].mxu0 }
 0x53e   : > { %v3077_v49 = vpop.xlane.xlu1 %3076  ;;  %v11546_v51 = vpop.f32.mrb[187].mxu0  ;;  %3142 = vmax.xlane.f32.xlu0 %v3141_v24 }
 0x53f   : > { %v3232_v31 = vmul.f32 1.442695, %v3168_v11  ;;  %v3234_v16 = vmul.f32 1.442695, %v3169_v50  ;;  %v3170_v18 = vsub.f32 %v11314_v26, %v3077_v49  ;;  %v3171_v23 = vsub.f32 %v11316_v10, %v3077_v49 }
 0x541   : > { %9100 = vpow2.f32 %v3232_v31  ;;  %v3236_v36 = vmul.f32 1.442695, %v3170_v18  ;;  %v3238_v57 = vmul.f32 1.442695, %v3171_v23 }
 0x542   : > { %9102 = vpow2.f32 %v3234_v16  ;;  %3148 = vmax.xlane.f32.xlu0 %v3147_v39  ;;  %v14202_v16 = vmax.f32 %v11464_v21, %v11466_v47 }
 0x543   : > { %9104 = vpow2.f32 %v3236_v36  ;;  %v11552_v37 = vpop.f32.mrb[188].mxu0 }
 0x544   : > { %14198 = vst [vmem:[#allocation133_spill] sm:$0xff] %v11552_v37  ;;  %9106 = vpow2.f32 %v3238_v57  ;;  %3145 = vmax.xlane.f32.xlu1 %v3144_v9  ;;  %v11554_v24 = vpop.f32.mrb[189].mxu0  ;;  %v3080_v11 = vpop.xlane.xlu0 %3079 }
 0x545   : > { %14199 = vst [vmem:[#allocation134_spill] sm:$0xff] %v11554_v24  ;;  %v3172_v10 = vsub.f32 %v11320_v34, %v3080_v11  ;;  %v3173_v49 = vsub.f32 %v11322_v2, %v3080_v11  ;;  %v11560_v31 = vpop.f32.mrb[190].mxu0 }
 0x546   : > { %14200 = vst [vmem:[#allocation135_spill] sm:$0xff] %v11560_v31  ;;  %v3083_v18 = vpop.xlane.xlu1 %3082  ;;  %v11562_v50 = vpop.f32.mrb[191].mxu0 }
 0x547   : > { %14201 = vst [vmem:[#allocation137_spill] sm:$0xff] %v11562_v50  ;;  %v3240_v36 = vmul.f32 1.442695, %v3172_v10  ;;  %v3242_v23 = vmul.f32 1.442695, %v3173_v49  ;;  %v3174_v39 = vsub.f32 %v11326_v48, %v3083_v18  ;;  %v3175_v9 = vsub.f32 %v11328_v29, %v3083_v18 }
 0x548   : > { %3151 = vmax.xlane.f32.xlu1 %v14202_v16 }
 0x549   : > { %9108 = vpow2.f32 %v3240_v36  ;;  %v3244_v34 = vmul.f32 1.442695, %v3174_v39  ;;  %v3246_v2 = vmul.f32 1.442695, %v3175_v9 }
 0x54a   : > { %9110 = vpow2.f32 %v3242_v23 }
 0x54b   : > { %v9101_v57 = vpop.eup %9100  ;;  %9112 = vpow2.f32 %v3244_v34  ;;  %v11571_v11 = vpop.f32.mrb[192].mxu0 }
 0x54c   : > { %14203 = vst [vmem:[#allocation79_spill] sm:$0xff] %v11571_v11  ;;  %v9103_v10 = vpop.eup %9102  ;;  %9114 = vpow2.f32 %v3246_v2  ;;  %v3086_v48 = vpop.xlane.xlu1 %3085 }
 0x54d   : > { %v11573_v49 = vpop.f32.mrb[193].mxu0  ;;  %v9105_v29 = vpop.eup %9104  ;;  %v3176_v18 = vsub.f32 %v11332_v45, %v3086_v48  ;;  %v3177_v26 = vsub.f32 %v11334_v25, %v3086_v48  ;;  %v11581_v23 = vadd.f32 %v9103_v10, %v9101_v57 }
 0x54e   : > { %14204 = vst [vmem:[#allocation72_spill] sm:$0xff] %v11573_v49  ;;  %v11579_v39 = vpop.f32.mrb[194].mxu0  ;;  %v9107_v9 = vpop.eup %9106  ;;  %v3456_v2 = vpack.c.bf16 %v9105_v29, %v9101_v57 }
 0x54f   : > { %14205 = vst [vmem:[#allocation95_spill] sm:$0xff] %v11579_v39  ;;  %v11583_v16 = vpop.f32.mrb[195].mxu0  ;;  %v3089_v34 = vpop.xlane.xlu0 %3088  ;;  %v3248_v14 = vmul.f32 1.442695, %v3176_v18  ;;  %v3250_v35 = vmul.f32 1.442695, %v3177_v26  ;;  %v3457_v48 = vpack.c.bf16 %v9107_v9, %v9103_v10  ;;  %v11589_v36 = vadd.f32 %v9107_v9, %v9105_v29 }
 0x550   : > { %14206 = vst [vmem:[#allocation70_spill] sm:$0xff] %v11583_v16  ;;  %v3178_v45 = vsub.f32 %v11338_v54, %v3089_v34  ;;  %v3179_v25 = vsub.f32 %v11340_v7, %v3089_v34  ;;  %v14265_v39 = vld [vmem:[#allocation106_spill] sm:$0xff] }
 0x551   : > { %9116 = vpow2.f32 %v3248_v14  ;;  %3584 = vmatprep.mubr.bf16.mxu1 %v3457_v48 }
 0x552   : > { %v3252_v49 = vmul.f32 1.442695, %v3178_v45  ;;  %9118 = vpow2.f32 %v3250_v35  ;;  %v3254_v11 = vmul.f32 1.442695, %v3179_v25  ;;  %3585 = vmatmul.mubr.bf16.vlgmr.msra.gmra.mrb[144].mxu1 %v3456_v2 }
 0x553   : > { %v9109_v37 = vpop.eup %9108  ;;  %v11591_v57 = vpop.f32.mrb[196].mxu0 }
 0x554   : > { %9120 = vpow2.f32 %v3252_v49  ;;  %14207 = vst [vmem:[#allocation71_spill] sm:$0xff] %v11591_v57  ;;  %v9111_v26 = vpop.eup %9110  ;;  %v11593_v18 = vpop.f32.mrb[197].mxu0 }
 0x555   : > { %9122 = vpow2.f32 %v3254_v11  ;;  %14208 = vst [vmem:[#allocation81_spill] sm:$0xff] %v11593_v18  ;;  %v3092_v54 = vpop.xlane.xlu0 %3091  ;;  %v9113_v24 = vpop.eup %9112  ;;  %v11601_v29 = vadd.f32 %v9111_v26, %v9109_v37 }
 0x556   : > { %v3180_v14 = vsub.f32 %v11344_v33, %v3092_v54  ;;  %v3181_v35 = vsub.f32 %v11346_v56, %v3092_v54  ;;  %v11599_v10 = vpop.f32.mrb[198].mxu0  ;;  %v9115_v49 = vpop.eup %9114  ;;  %v3458_v11 = vpack.c.bf16 %v9113_v24, %v9109_v37  ;;  %v14211_v56 = vld [vmem:[#allocation58_spill] sm:$0xff]  ;;  %v14212_v37 = vld [vmem:[#allocation64_spill] sm:$0xff] }
 0x557   : > { %14209 = vst [vmem:[#allocation88_spill] sm:$0xff] %v11599_v10  ;;  %v3095_v9 = vpop.xlane.xlu1 %3094  ;;  %v11603_v34 = vpop.f32.mrb[199].mxu0  ;;  %v3459_v54 = vpack.c.bf16 %v9115_v49, %v9111_v26  ;;  %v11611_v7 = vadd.f32 %v9115_v49, %v9113_v24  ;;  %v14214_v26 = vld [vmem:[#allocation26_spill] sm:$0xff] }
 0x558   : > { %14210 = vst [vmem:[#allocation74_spill] sm:$0xff] %v11603_v34  ;;  %v3256_v2 = vmul.f32 1.442695, %v3180_v14  ;;  %v3258_v45 = vmul.f32 1.442695, %v3181_v35  ;;  %v3182_v25 = vsub.f32 %v11350_v61, %v3095_v9  ;;  %v3183_v48 = vsub.f32 %v11352_v12, %v3095_v9  ;;  %4200 = vrot.lane.b32.xlu0 %v14211_v56, %s9918_s7 }
 0x559   : > { %4202 = vrot.lane.b32.xlu1 %v14212_v37, %s9918_s7  ;;  %3592 = vmatprep.mubr.bf16.mxu1 %v3459_v54 }
 0x55a   : > { %9124 = vpow2.f32 %v3256_v2  ;;  %v3260_v18 = vmul.f32 1.442695, %v3182_v25  ;;  %v3262_v57 = vmul.f32 1.442695, %v3183_v48  ;;  %3593 = vmatmul.mubr.bf16.gmra.mrb[148].mxu1 %v3458_v11 }
 0x55b   : > { %9126 = vpow2.f32 %v3258_v45  ;;  %v9117_v61 = vpop.eup %9116  ;;  %v11615_v12 = vpop.f32.mrb[200].mxu0 }
 0x55c   : > { %9128 = vpow2.f32 %v3260_v18  ;;  %14213 = vst [vmem:[#allocation24_spill] sm:$0xff] %v11615_v12  ;;  %v9119_v14 = vpop.eup %9118  ;;  %v3098_v35 = vpop.xlane.xlu1 %3097  ;;  %5707 = vrot.lane.b32.xlu0 %v14214_v26, %s9919_s9  ;;  %v14216_v18 = vld [vmem:[#allocation32_spill] sm:$0xff]  ;;  %v14220_v12 = vld [vmem:[#allocation33_spill] sm:$0xff] }
 0x55d   : > { %9130 = vpow2.f32 %v3262_v57  ;;  %v11619_v24 = vpop.f32.mrb[201].mxu0  ;;  %v3184_v9 = vsub.f32 %v11356_v30, %v3098_v35  ;;  %v3185_v2 = vsub.f32 %v11358_v17, %v3098_v35  ;;  %5709 = vrot.lane.b32.xlu1 %v14216_v18, %s9919_s9  ;;  %v11629_v57 = vadd.f32 %v9119_v14, %v9117_v61  ;;  %v14219_v18 = vld [vmem:[#allocation27_spill] sm:$0xff] }
 0x55e   : > { %14215 = vst [vmem:[#allocation100_spill] sm:$0xff] %v11619_v24  ;;  %v9121_v49 = vpop.eup %9120  ;;  %v11627_v11 = vpop.f32.mrb[202].mxu0 }
 0x55f   : > { %14217 = vst [vmem:[#allocation87_spill] sm:$0xff] %v11627_v11  ;;  %v9123_v25 = vpop.eup %9122  ;;  %v11631_v48 = vpop.f32.mrb[203].mxu0  ;;  %v3460_v26 = vpack.c.bf16 %v9121_v49, %v9117_v61  ;;  %v3264_v33 = vmul.f32 1.442695, %v3184_v9  ;;  %v3266_v34 = vmul.f32 1.442695, %v3185_v2 }
 0x560   : > { %14218 = vst [vmem:[#allocation25_spill] sm:$0xff] %v11631_v48  ;;  %v3101_v54 = vpop.xlane.xlu0 %3100  ;;  %5723 = vrot.lane.b32.xlu0 %v14219_v18, %s9919_s9  ;;  %v3461_v45 = vpack.c.bf16 %v9123_v25, %v9119_v14  ;;  %v11639_v10 = vadd.f32 %v9123_v25, %v9121_v49 }
 0x561   : > { %v3186_v17 = vsub.f32 %v11362_v59, %v3101_v54  ;;  %v3187_v35 = vsub.f32 %v11364_v42, %v3101_v54  ;;  %9132 = vpow2.f32 %v3264_v33  ;;  %5725 = vrot.lane.b32.xlu1 %v14220_v12, %s9919_s9 }
 0x562   : > { %9134 = vpow2.f32 %v3266_v34  ;;  %3600 = vmatprep.mubr.bf16.mxu1 %v3461_v45 }
 0x563   : > { %v3268_v24 = vmul.f32 1.442695, %v3186_v17  ;;  %v3270_v61 = vmul.f32 1.442695, %v3187_v35  ;;  %3601 = vmatmul.mubr.bf16.gmra.mrb[152].mxu1 %v3460_v26  ;;  %v11643_v59 = vpop.f32.mrb[204].mxu0 }
 0x564   : > { %v9125_v9 = vpop.eup %9124  ;;  %14221 = vst [vmem:[#allocation73_spill] sm:$0xff] %v11643_v59  ;;  %v3104_v2 = vpop.xlane.xlu1 %3103 }
 0x565   : > { %9136 = vpow2.f32 %v3268_v24  ;;  %v9127_v42 = vpop.eup %9126  ;;  %v11645_v54 = vpop.f32.mrb[205].mxu0  ;;  %v3188_v33 = vsub.f32 %v11368_v55, %v3104_v2  ;;  %v3189_v49 = vsub.f32 %v11370_v46, %v3104_v2 }
 0x566   : > { %9138 = vpow2.f32 %v3270_v61  ;;  %14222 = vst [vmem:[#allocation82_spill] sm:$0xff] %v11645_v54  ;;  %v9129_v14 = vpop.eup %9128  ;;  %v11651_v12 = vpop.f32.mrb[206].mxu0  ;;  %v11653_v45 = vadd.f32 %v9127_v42, %v9125_v9  ;;  %v14264_v54 = vld [vmem:[#allocation110_spill] sm:$0xff] }
 0x567   : > { %14223 = vst [vmem:[#allocation90_spill] sm:$0xff] %v11651_v12  ;;  %v9131_v24 = vpop.eup %9130  ;;  %v11655_v25 = vpop.f32.mrb[207].mxu0  ;;  %v3462_v26 = vpack.c.bf16 %v9129_v14, %v9125_v9  ;;  %v3272_v17 = vmul.f32 1.442695, %v3188_v33  ;;  %v3274_v35 = vmul.f32 1.442695, %v3189_v49 }
 0x568   : > { %14224 = vst [vmem:[#allocation76_spill] sm:$0xff] %v11655_v25  ;;  %v3463_v61 = vpack.c.bf16 %v9131_v24, %v9127_v42  ;;  %v3107_v55 = vpop.xlane.xlu1 %3106  ;;  %v11659_v30 = vadd.f32 %v9131_v24, %v9129_v14 }
 0x569   : > { %9140 = vpow2.f32 %v3272_v17  ;;  %v3190_v46 = vsub.f32 %v11374_v3, %v3107_v55  ;;  %v3191_v2 = vsub.f32 %v11376_v28, %v3107_v55 }
 0x56a   : > { %3608 = vmatprep.mubr.bf16.mxu1 %v3463_v61  ;;  %9142 = vpow2.f32 %v3274_v35 }
 0x56b   : > { %v9133_v34 = vpop.eup %9132  ;;  %v3276_v48 = vmul.f32 1.442695, %v3190_v46  ;;  %v3278_v11 = vmul.f32 1.442695, %v3191_v2  ;;  %3609 = vmatmul.mubr.bf16.gmra.mrb[156].mxu1 %v3462_v26  ;;  %v11663_v9 = vpop.f32.mrb[208].mxu0 }
 0x56c   : > { %14225 = vst [vmem:[#allocation107_spill] sm:$0xff] %v11663_v9  ;;  %v9135_v33 = vpop.eup %9134  ;;  %v11665_v49 = vpop.f32.mrb[209].mxu0  ;;  %v14263_v9 = vld [vmem:[#allocation109_spill] sm:$0xff] }
 0x56d   : > { %14226 = vst [vmem:[#allocation89_spill] sm:$0xff] %v11665_v49  ;;  %v3110_v42 = vpop.xlane.xlu0 %3109  ;;  %9144 = vpow2.f32 %v3276_v48  ;;  %v11671_v24 = vpop.f32.mrb[210].mxu0  ;;  %v11675_v55 = vadd.f32 %v9135_v33, %v9133_v34 }
 0x56e   : > { %v3192_v3 = vsub.f32 %v11380_v8, %v3110_v42  ;;  %v3193_v28 = vsub.f32 %v11382_v40, %v3110_v42  ;;  %14227 = vst [vmem:[#allocation75_spill] sm:$0xff] %v11671_v24  ;;  %9146 = vpow2.f32 %v3278_v11  ;;  %v3113_v26 = vpop.xlane.xlu1 %3112  ;;  %v11673_v35 = vpop.f32.mrb[211].mxu0 }
 0x56f   : > { %v9137_v18 = vpop.eup %9136  ;;  %14228 = vst [vmem:[#allocation83_spill] sm:$0xff] %v11673_v35  ;;  %v3194_v48 = vsub.f32 %v11386_v63, %v3113_v26  ;;  %v3195_v14 = vsub.f32 %v11388_v60, %v3113_v26 }
 0x570   : > { %v9139_v17 = vpop.eup %9138  ;;  %v3464_v61 = vpack.c.bf16 %v9137_v18, %v9133_v34  ;;  %v3280_v46 = vmul.f32 1.442695, %v3192_v3  ;;  %v3282_v2 = vmul.f32 1.442695, %v3193_v28 }
 0x571   : > { %v3465_v40 = vpack.c.bf16 %v9139_v17, %v9135_v33  ;;  %v11681_v42 = vadd.f32 %v9139_v17, %v9137_v18  ;;  %v3284_v11 = vmul.f32 1.442695, %v3194_v48  ;;  %v3286_v25 = vmul.f32 1.442695, %v3195_v14 }
 0x572   : > { %9148 = vpow2.f32 %v3280_v46 }
 0x573   : > { %9150 = vpow2.f32 %v3282_v2  ;;  %3616 = vmatprep.mubr.bf16.mxu1 %v3465_v40  ;;  %v9141_v12 = vpop.eup %9140 }
 0x574   : > { %9152 = vpow2.f32 %v3284_v11  ;;  %3617 = vmatmul.mubr.bf16.gmra.mrb[160].mxu1 %v3464_v61  ;;  %v9143_v34 = vpop.eup %9142  ;;  %v3116_v3 = vpop.xlane.xlu1 %3115 }
 0x575   : > { %9154 = vpow2.f32 %v3286_v25  ;;  %v3196_v63 = vsub.f32 %v11392_v38, %v3116_v3  ;;  %v3197_v60 = vsub.f32 %v11394_v4, %v3116_v3  ;;  %v11685_v28 = vadd.f32 %v9143_v34, %v9141_v12 }
 0x577   : > { %v9145_v33 = vpop.eup %9144  ;;  %v3288_v18 = vmul.f32 1.442695, %v3196_v63  ;;  %v3290_v17 = vmul.f32 1.442695, %v3197_v60 }
 0x578   : > { %v9147_v26 = vpop.eup %9146  ;;  %v3119_v46 = vpop.xlane.xlu1 %3118  ;;  %v3466_v14 = vpack.c.bf16 %v9145_v33, %v9141_v12 }
 0x579   : > { %9156 = vpow2.f32 %v3288_v18  ;;  %v3198_v2 = vsub.f32 %v11398_v15, %v3119_v46  ;;  %v3199_v61 = vsub.f32 %v11400_v1, %v3119_v46  ;;  %v3467_v48 = vpack.c.bf16 %v9147_v26, %v9143_v34 }
 0x57a   : > { %9158 = vpow2.f32 %v3290_v17  ;;  %v11689_v25 = vadd.f32 %v9147_v26, %v9145_v33 }
 0x57b   : > { %v3292_v40 = vmul.f32 1.442695, %v3198_v2  ;;  %v3294_v4 = vmul.f32 1.442695, %v3199_v61  ;;  %3624 = vmatprep.mubr.bf16.mxu1 %v3467_v48 }
 0x57c   : > { %v9149_v38 = vpop.eup %9148  ;;  %3625 = vmatmul.mubr.bf16.gmra.mrb[164].mxu1 %v3466_v14  ;;  %v3122_v3 = vpop.xlane.xlu0 %3121  ;;  %v14229_v14 = vmax.f32 %v11470_v5, %v11472_v0 }
 0x57d   : > { %v9151_v11 = vpop.eup %9150  ;;  %9160 = vpow2.f32 %v3292_v40  ;;  %v3200_v12 = vsub.f32 %v11404_v6, %v3122_v3  ;;  %v3201_v60 = vsub.f32 %v11406_v41, %v3122_v3 }
 0x57e   : > { %v9153_v63 = vpop.eup %9152  ;;  %v11693_v15 = vadd.f32 %v9151_v11, %v9149_v38  ;;  %9162 = vpow2.f32 %v3294_v4  ;;  %v3125_v34 = vpop.xlane.xlu1 %3124 }
 0x57f   : > { %v9155_v1 = vpop.eup %9154  ;;  %v3468_v33 = vpack.c.bf16 %v9153_v63, %v9149_v38  ;;  %v3296_v18 = vmul.f32 1.442695, %v3200_v12  ;;  %v3298_v17 = vmul.f32 1.442695, %v3201_v60  ;;  %v3202_v26 = vsub.f32 %v11410_v58, %v3125_v34  ;;  %3154 = vmax.xlane.f32.xlu0 %v14229_v14  ;;  %v14234_v14 = vld [vmem:[#allocation114_spill] sm:$0xff] }
 0x580   : > { %v3203_v46 = vsub.f32 %v11412_v32, %v3125_v34  ;;  %v3469_v2 = vpack.c.bf16 %v9155_v1, %v9151_v11  ;;  %v11700_v6 = vadd.f32 %v9155_v1, %v9153_v63  ;;  %v14230_v38 = vmax.f32 %v11490_v52, %v11492_v13 }
 0x581   : > { %9164 = vpow2.f32 %v3296_v18  ;;  %v3300_v41 = vmul.f32 1.442695, %v3202_v26  ;;  %v14231_v11 = vmax.f32 %v11480_v44, %v11486_v62  ;;  %v14232_v18 = vld [vmem:[#allocation91_spill] sm:$0xff] }
 0x582   : > { %v3302_v61 = vmul.f32 1.442695, %v3203_v46  ;;  %9166 = vpow2.f32 %v3298_v17  ;;  %3632 = vmatprep.mubr.bf16.mxu1 %v3469_v2 }
 0x583   : > { %v9157_v48 = vpop.eup %9156  ;;  %9168 = vpow2.f32 %v3300_v41  ;;  %3160 = vmax.xlane.f32.xlu0 %v14230_v38 }
 0x584   : > { %v9159_v58 = vpop.eup %9158  ;;  %9170 = vpow2.f32 %v3302_v61  ;;  %3633 = vmatmul.mubr.bf16.gmra.mrb[168].mxu1 %v3468_v33  ;;  %v3128_v32 = vpop.xlane.xlu1 %3127 }
 0x585   : > { %v3204_v40 = vsub.f32 %v11416_v27, %v3128_v32  ;;  %v3205_v4 = vsub.f32 %v11418_v19, %v3128_v32  ;;  %3157 = vmax.xlane.f32.xlu1 %v14231_v11  ;;  %v11710_v3 = vadd.f32 %v9159_v58, %v9157_v48  ;;  %v14233_v19 = vld [vmem:[#allocation113_spill] sm:$0xff]  ;;  %v14237_v11 = vld [vmem:[#allocation99_spill] sm:$0xff] }
 0x586   : > { %v3131_v63 = vpop.xlane.xlu0 %3130  ;;  %v14235_v2 = vmax.f32 %v14233_v19, %v14234_v14 }
 0x587   : > { %v9161_v12 = vpop.eup %9160  ;;  %v3304_v60 = vmul.f32 1.442695, %v3204_v40  ;;  %v3306_v1 = vmul.f32 1.442695, %v3205_v4  ;;  %v3206_v34 = vsub.f32 %v11422_v20, %v3131_v63  ;;  %v3207_v17 = vsub.f32 %v14232_v18, %v3131_v63 }
 0x588   : > { %v9163_v33 = vpop.eup %9162  ;;  %v3470_v26 = vpack.c.bf16 %v9161_v12, %v9157_v48  ;;  %v14236_v48 = vld [vmem:[#allocation98_spill] sm:$0xff] }
 0x589   : > { %9172 = vpow2.f32 %v3304_v60  ;;  %v3308_v27 = vmul.f32 1.442695, %v3206_v34  ;;  %v3310_v46 = vmul.f32 1.442695, %v3207_v17  ;;  %3163 = vmax.xlane.f32.xlu1 %v14235_v2  ;;  %v3471_v41 = vpack.c.bf16 %v9163_v33, %v9159_v58  ;;  %v14238_v17 = vld [vmem:[#allocation77_spill] sm:$0xff] }
 0x58a   : > { %9174 = vpow2.f32 %v3306_v1  ;;  %v11717_v61 = vadd.f32 %v9163_v33, %v9161_v12 }
 0x58b   : > { %v9165_v38 = vpop.eup %9164  ;;  %9176 = vpow2.f32 %v3308_v27  ;;  %3640 = vmatprep.mubr.bf16.mxu1 %v3471_v41  ;;  %v14239_v27 = vld [vmem:[#allocation101_spill] sm:$0xff] }
 0x58c   : > { %v9167_v32 = vpop.eup %9166  ;;  %9178 = vpow2.f32 %v3310_v46  ;;  %3641 = vmatmul.mubr.bf16.gmra.mrb[172].mxu1 %v3470_v26  ;;  %v3134_v20 = vpop.xlane.xlu1 %3133 }
 0x58d   : > { %v9169_v40 = vpop.eup %9168  ;;  %v3208_v4 = vsub.f32 %v14236_v48, %v3134_v20  ;;  %v3209_v63 = vsub.f32 %v14237_v11, %v3134_v20  ;;  %v11721_v60 = vadd.f32 %v9167_v32, %v9165_v38 }
 0x58e   : > { %v9171_v34 = vpop.eup %9170  ;;  %v3137_v18 = vpop.xlane.xlu0 %3136  ;;  %v3472_v58 = vpack.c.bf16 %v9169_v40, %v9165_v38 }
 0x58f   : > { %v3312_v1 = vmul.f32 1.442695, %v3208_v4  ;;  %v3314_v12 = vmul.f32 1.442695, %v3209_v63  ;;  %v3210_v33 = vsub.f32 %v14238_v17, %v3137_v18  ;;  %v3211_v2 = vsub.f32 %v14239_v27, %v3137_v18  ;;  %v14241_v63 = vld [vmem:[#allocation86_spill] sm:$0xff] }
 0x590   : > { %v3473_v41 = vpack.c.bf16 %v9171_v34, %v9167_v32  ;;  %v11725_v46 = vadd.f32 %v9171_v34, %v9169_v40  ;;  %v14240_v32 = vld [vmem:[#allocation102_spill] sm:$0xff] }
 0x591   : > { %9180 = vpow2.f32 %v3312_v1  ;;  %v3316_v26 = vmul.f32 1.442695, %v3210_v33  ;;  %v3318_v8 = vmul.f32 1.442695, %v3211_v2 }
 0x592   : > { %9182 = vpow2.f32 %v3314_v12  ;;  %3648 = vmatprep.mubr.bf16.mxu1 %v3473_v41  ;;  %v4197_v20 = vpop.permute.xlu0 %4196 }
 0x593   : > { %v9173_v48 = vpop.eup %9172  ;;  %9184 = vpow2.f32 %v3316_v26  ;;  %7948 = vmatprep.mubr.msk.bf16.mxu0 %vm1428_vm0, %v4197_v20 }
 0x594   : > { %v9175_v38 = vpop.eup %9174  ;;  %9186 = vpow2.f32 %v3318_v8  ;;  %3649 = vmatmul.mubr.bf16.gmra.mrb[176].mxu1 %v3472_v58  ;;  %v3140_v4 = vpop.xlane.xlu1 %3139  ;;  %7949 = vmatmul.mubr.msk.bf16.gmra.mrb[212].mxu0 %vm1428_vm0, %v4197_v20  ;;  %v14242_v8 = vld [vmem:[#allocation62_spill] sm:$0xff]  ;;  %v14243_v58 = vld [vmem:[#allocation68_spill] sm:$0xff] }
 0x595   : > { %v9177_v11 = vpop.eup %9176  ;;  %v3212_v40 = vsub.f32 %v14240_v32, %v3140_v4  ;;  %v3213_v34 = vsub.f32 %v14241_v63, %v3140_v4  ;;  %v11731_v18 = vadd.f32 %v9175_v38, %v9173_v48 }
 0x596   : > { %v9179_v1 = vpop.eup %9178  ;;  %v5704_v12 = vpop.permute.xlu0 %5703  ;;  %v3474_v17 = vpack.c.bf16 %v9177_v11, %v9173_v48 }
 0x597   : > { %v3320_v33 = vmul.f32 1.442695, %v3212_v40  ;;  %v3322_v27 = vmul.f32 1.442695, %v3213_v34  ;;  %v3475_v2 = vpack.c.bf16 %v9179_v1, %v9175_v38  ;;  %v11733_v26 = vadd.f32 %v9179_v1, %v9177_v11  ;;  %v14244_v40 = vld [vmem:[#allocation30_spill] sm:$0xff]  ;;  %v14245_v1 = vld [vmem:[#allocation36_spill] sm:$0xff] }
 0x598   : > { %v4199_v41 = vpop.permute.xlu1 %4198  ;;  %v5785_v38 = vsel %vm1428_vm0, %v5704_v12, 0 }
 0x599   : > { %9188 = vpow2.f32 %v3320_v33  ;;  %3656 = vmatprep.mubr.bf16.mxu1 %v3475_v2  ;;  %4204 = vrot.lane.b32.xlu0 %v14242_v8, %s9918_s7 }
 0x59a   : > { %9190 = vpow2.f32 %v3322_v27  ;;  %7950 = vmatprep.mubr.msk.bf16.mxu0 %vm1428_vm0, %v4199_v41  ;;  %4206 = vrot.lane.b32.xlu1 %v14243_v58, %s9918_s7  ;;  %v5720_v20 = vpop.permute.xlu0 %5719 }
 0x59b   : > { %v9181_v4 = vpop.eup %9180  ;;  %8727 = vmatprep.subr.msk.bf16.mxu0 %vm1428_vm0, %v5720_v20 }
 0x59c   : > { %v9183_v48 = vpop.eup %9182  ;;  %3657 = vmatmul.mubr.bf16.gmra.mrb[180].mxu1 %v3474_v17  ;;  %v5706_v11 = vpop.permute.xlu1 %5705  ;;  %7951 = vmatmul.mubr.msk.bf16.gmra.mrb[216].mxu0 %vm1428_vm0, %v4199_v41  ;;  %v14246_v17 = vld [vmem:[#allocation31_spill] sm:$0xff]  ;;  %v14247_v41 = vld [vmem:[#allocation37_spill] sm:$0xff] }
 0x59d   : > { %v9185_v32 = vpop.eup %9184  ;;  %8095 = vmatpush3.bf16.xpose.msra.mxu0 %v5785_v38  ;;  %5711 = vrot.lane.b32.xlu0 %v14244_v40, %s9919_s9  ;;  %v11745_v63 = vadd.f32 %v9183_v48, %v9181_v4  ;;  %v5788_v40 = vsel %vm1428_vm0, %v5706_v11, 0  ;;  %v14252_v11 = vld [vmem:[#allocation44_spill] sm:$0xff] }
 0x59e   : > { %v9187_v34 = vpop.eup %9186  ;;  %5713 = vrot.lane.b32.xlu1 %v14245_v1, %s9919_s9  ;;  %v3476_v33 = vpack.c.bf16 %v9185_v32, %v9181_v4  ;;  %v14251_v1 = vld [vmem:[#allocation38_spill] sm:$0xff] }
 0x59f   : > { %v3477_v27 = vpack.c.bf16 %v9187_v34, %v9183_v48  ;;  %v11749_v2 = vadd.f32 %v9187_v34, %v9185_v32  ;;  %v14248_v48 = vld [vmem:[#allocation66_spill] sm:$0xff]  ;;  %v14249_v32 = vld [vmem:[#allocation35_spill] sm:$0xff]  ;;  %v14250_v34 = vld [vmem:[#allocation40_spill] sm:$0xff] }
 0x5a0   : > { %v5722_v12 = vpop.permute.xlu1 %5721 }
 0x5a1   : > { %3664 = vmatprep.mubr.bf16.mxu1 %v3477_v27  ;;  %5727 = vrot.lane.b32.xlu0 %v14246_v17, %s9919_s9  ;;  %v14254_v27 = vld [vmem:[#allocation48_spill] sm:$0xff]  ;;  %v14256_v17 = vld [vmem:[#allocation117_spill] sm:$0xff] }
 0x5a2   : > { %8728 = vmatprep.subr.msk.bf16.mxu0 %vm1428_vm0, %v5722_v12  ;;  %5729 = vrot.lane.b32.xlu1 %v14247_v41, %s9919_s9  ;;  %v14255_v12 = vld [vmem:[#allocation115_spill] sm:$0xff] }
 0x5a3   : > { %v11756_v20 = vpop.eup %9188  ;;  %v14257_v41 = vmax.f32 %v14255_v12, %v14256_v17 }
 0x5a4   : > { %v11758_v38 = vpop.eup %9190  ;;  %3665 = vmatmul.mubr.bf16.gmra.mrb[184].mxu1 %v3476_v33  ;;  %v14253_v33 = vld [vmem:[#allocation42_spill] sm:$0xff] }
 0x5a5   : > { %8097 = vmatpush3.bf16.xpose.msra.mxu0 %v5788_v40  ;;  %v11763_v4 = vadd.f32 %v11758_v38, %v11756_v20  ;;  %v14258_v40 = vld [vmem:[#allocation52_spill] sm:$0xff] }
 0x5a6   : > { %4208 = vrot.lane.b32.xlu1 %v14248_v48, %s9918_s7 }
 0x5aa   : > { %5731 = vrot.lane.b32.xlu1 %v14249_v32, %s9919_s9  ;;  %v14259_v32 = vld [vmem:[#allocation56_spill] sm:$0xff] }
 0x5ae   : > { %5653 = vrot.lane.b32.xlu1 %v14250_v34, %s9919_s9  ;;  %v14260_v34 = vld [vmem:[#allocation60_spill] sm:$0xff] }
 0x5b2   : > { %5655 = vrot.lane.b32.xlu1 %v14251_v1, %s9919_s9 }
 0x5b6   : > { %5657 = vrot.lane.b32.xlu1 %v14252_v11, %s9919_s9  ;;  %v14261_v11 = vld [vmem:[#allocation103_spill] sm:$0xff] }
 0x5ba   : > { %5659 = vrot.lane.b32.xlu1 %v14253_v33, %s9919_s9  ;;  %v14262_v33 = vld [vmem:[#allocation105_spill] sm:$0xff] }
 0x5be   : > { %5661 = vrot.lane.b32.xlu1 %v14254_v27, %s9919_s9 }
 0x5c0   : > { %3166 = vmax.xlane.f32.xlu0 %v14257_v41 }
 0x5c2   : > { %5665 = vrot.lane.b32.xlu1 %v14258_v40, %s9919_s9 }
 0x5c6   : > { %5669 = vrot.lane.b32.xlu1 %v14259_v32, %s9919_s9 }
 0x5ca   : > { %5673 = vrot.lane.b32.xlu1 %v14260_v34, %s9919_s9 }
 0x5cb   : > { %v3143_v1 = vpop.xlane.xlu0 %3142 }
 0x5cc   : > { %v3214_v35 = vsub.f32 %v14261_v11, %v3143_v1  ;;  %v3215_v24 = vsub.f32 %v14262_v33, %v3143_v1  ;;  %v14266_v11 = vld [vmem:[#allocation108_spill] sm:$0xff]  ;;  %v14268_v1 = vld [vmem:[#allocation46_spill] sm:$0xff] }
 0x5ce   : > { %v3324_v49 = vmul.f32 1.442695, %v3214_v35  ;;  %v3326_v27 = vmul.f32 1.442695, %v3215_v24  ;;  %5677 = vrot.lane.b32.xlu1 %v14212_v37, %s9919_s9 }
 0x5cf   : > { %v3149_v41 = vpop.xlane.xlu0 %3148 }
 0x5d0   : > { %9192 = vpow2.f32 %v3324_v49  ;;  %v3218_v40 = vsub.f32 %v14263_v9, %v3149_v41  ;;  %v3219_v59 = vsub.f32 %v14264_v54, %v3149_v41  ;;  %v14267_v54 = vld [vmem:[#allocation34_spill] sm:$0xff] }
 0x5d1   : > { %9194 = vpow2.f32 %v3326_v27  ;;  %v3146_v32 = vpop.xlane.xlu1 %3145 }
 0x5d2   : > { %v3332_v16 = vmul.f32 1.442695, %v3218_v40  ;;  %v3334_v34 = vmul.f32 1.442695, %v3219_v59  ;;  %v3216_v50 = vsub.f32 %v14265_v39, %v3146_v32  ;;  %v3217_v31 = vsub.f32 %v14266_v11, %v3146_v32  ;;  %5681 = vrot.lane.b32.xlu1 %v14243_v58, %s9919_s9 }
 0x5d3   : > { %v4201_v24 = vpop.permute.xlu0 %4200 }
 0x5d4   : > { %9196 = vpow2.f32 %v3332_v16  ;;  %v3328_v37 = vmul.f32 1.442695, %v3216_v50  ;;  %v3330_v35 = vmul.f32 1.442695, %v3217_v31  ;;  %7952 = vmatprep.mubr.msk.bf16.mxu0 %vm1428_vm0, %v4201_v24 }
 0x5d5   : > { %9198 = vpow2.f32 %v3334_v34  ;;  %v3152_v9 = vpop.xlane.xlu1 %3151  ;;  %7953 = vmatmul.mubr.msk.bf16.gmra.mrb[220].mxu0 %vm1428_vm0, %v4201_v24  ;;  %v14269_v24 = vld [vmem:[#allocation50_spill] sm:$0xff] }
 0x5d6   : > { %9200 = vpow2.f32 %v3328_v37  ;;  %v3220_v59 = vsub.f32 %v11464_v21, %v3152_v9  ;;  %v3221_v39 = vsub.f32 %v11466_v47, %v3152_v9  ;;  %5715 = vrot.lane.b32.xlu0 %v14267_v54, %s9919_s9  ;;  %v14270_v54 = vld [vmem:[#allocation55_spill] sm:$0xff] }
 0x5d7   : > { %9202 = vpow2.f32 %v3330_v35  ;;  %v5708_v49 = vpop.permute.xlu0 %5707 }
 0x5d8   : > { %v3336_v58 = vmul.f32 1.442695, %v3220_v59  ;;  %v3338_v16 = vmul.f32 1.442695, %v3221_v39  ;;  %v5791_v40 = vsel %vm1428_vm0, %v5708_v49, 0 }
 0x5d9   : > { %v4203_v50 = vpop.permute.xlu1 %4202 }
 0x5da   : > { %v9193_v31 = vpop.eup %9192  ;;  %9204 = vpow2.f32 %v3336_v58  ;;  %5663 = vrot.lane.b32.xlu0 %v14268_v1, %s9919_s9  ;;  %7954 = vmatprep.mubr.msk.bf16.mxu0 %vm1428_vm0, %v4203_v50 }
 0x5db   : > { %v9195_v33 = vpop.eup %9194  ;;  %9206 = vpow2.f32 %v3338_v16  ;;  %v5724_v21 = vpop.permute.xlu0 %5723  ;;  %v3478_v47 = vpack.c.bf16 %v9193_v31, %v11756_v20 }
 0x5dc   : > { %8729 = vmatprep.subr.msk.bf16.mxu0 %vm1428_vm0, %v5724_v21  ;;  %v3479_v27 = vpack.c.bf16 %v9195_v33, %v11758_v38  ;;  %v11810_v41 = vadd.f32 %v9195_v33, %v9193_v31 }
 0x5dd   : > { %v5710_v32 = vpop.permute.xlu1 %5709  ;;  %7955 = vmatmul.mubr.msk.bf16.gmra.mrb[224].mxu0 %vm1428_vm0, %v4203_v50 }
 0x5de   : > { %v9197_v34 = vpop.eup %9196  ;;  %3672 = vmatprep.mubr.bf16.mxu1 %v3479_v27  ;;  %8099 = vmatpush3.bf16.xpose.msra.mxu0 %v5791_v40  ;;  %v5794_v16 = vsel %vm1428_vm0, %v5710_v32, 0 }
 0x5df   : > { %v9199_v11 = vpop.eup %9198  ;;  %5667 = vrot.lane.b32.xlu0 %v14269_v24, %s9919_s9  ;;  %3673 = vmatmul.mubr.bf16.gmra.mrb[188].mxu1 %v3478_v47 }
 0x5e0   : > { %v9201_v20 = vpop.eup %9200  ;;  %v11816_v37 = vadd.f32 %v9199_v11, %v9197_v34 }
 0x5e1   : > { %v9203_v35 = vpop.eup %9202  ;;  %v5726_v38 = vpop.permute.xlu1 %5725  ;;  %v3480_v9 = vpack.c.bf16 %v9197_v34, %v9201_v20 }
 0x5e2   : > { %8730 = vmatprep.subr.msk.bf16.mxu0 %vm1428_vm0, %v5726_v38  ;;  %v3481_v59 = vpack.c.bf16 %v9199_v11, %v9203_v35  ;;  %v11819_v39 = vadd.f32 %v9203_v35, %v9201_v20 }
 0x5e3   : > { %5671 = vrot.lane.b32.xlu0 %v14270_v54, %s9919_s9 }
 0x5e4   : > { %v11823_v49 = vpop.eup %9204  ;;  %3680 = vmatprep.mubr.bf16.mxu1 %v3481_v59 }
 0x5e5   : > { %v11825_v58 = vpop.eup %9206 }
 0x5e6   : > { %8101 = vmatpush3.bf16.xpose.msra.mxu0 %v5794_v16  ;;  %v11830_v50 = vadd.f32 %v11825_v58, %v11823_v49 }
 0x5e7   : > { %5675 = vrot.lane.b32.xlu0 %v14211_v56, %s9919_s9  ;;  %3681 = vmatmul.mubr.bf16.gmra.mrb[192].mxu1 %v3480_v9 }
 0x5eb   : > { %5679 = vrot.lane.b32.xlu0 %v14242_v8, %s9919_s9 }
 0x5ef   : > { %5683 = vrot.lane.b32.xlu0 %v14248_v48, %s9919_s9 }
 0x5f6   : > { %3361 = vadd.xlane.f32.xlu1 %v11581_v23 }
 0x5fa   : > { %3370 = vadd.xlane.f32.xlu1 %v11611_v7 }
 0x5fe   : > { %3376 = vadd.xlane.f32.xlu1 %v11639_v10 }
 0x602   : > { %3382 = vadd.xlane.f32.xlu1 %v11659_v30 }
 0x606   : > { %3388 = vadd.xlane.f32.xlu1 %v11681_v42 }
 0x60a   : > { %3394 = vadd.xlane.f32.xlu1 %v11689_v25 }
 0x60c   : > { %v3155_v56 = vpop.xlane.xlu0 %3154 }
 0x60d   : > { %v3222_v31 = vsub.f32 %v11470_v5, %v3155_v56  ;;  %v3223_v8 = vsub.f32 %v11472_v0, %v3155_v56 }
 0x60e   : > { %3364 = vadd.xlane.f32.xlu0 %v11589_v36  ;;  %3400 = vadd.xlane.f32.xlu1 %v11700_v6 }
 0x60f   : > { %v3340_v23 = vmul.f32 1.442695, %v3222_v31  ;;  %v3342_v48 = vmul.f32 1.442695, %v3223_v8  ;;  %v8903_v8 = vld [vmem:[#allocation14 + $0x18] sm:$0xff]  }
 0x610   : > { %v3161_v7 = vpop.xlane.xlu0 %3160 }
 0x611   : > { %9208 = vpow2.f32 %v3340_v23  ;;  %v3226_v10 = vsub.f32 %v11490_v52, %v3161_v7  ;;  %v3227_v30 = vsub.f32 %v11492_v13, %v3161_v7 }
 0x612   : > { %9210 = vpow2.f32 %v3342_v48  ;;  %3367 = vadd.xlane.f32.xlu0 %v11601_v29  ;;  %v3158_v42 = vpop.xlane.xlu1 %3157  ;;  %3406 = vadd.xlane.f32.xlu1 %v11717_v61 }
 0x613   : > { %v3348_v5 = vmul.f32 1.442695, %v3226_v10  ;;  %v3350_v0 = vmul.f32 1.442695, %v3227_v30  ;;  %v3224_v36 = vsub.f32 %v11480_v44, %v3158_v42  ;;  %v3225_v25 = vsub.f32 %v11486_v62, %v3158_v42 }
 0x614   : > { %v4205_v6 = vpop.permute.xlu0 %4204 }
 0x615   : > { %9212 = vpow2.f32 %v3348_v5  ;;  %v3344_v1 = vmul.f32 1.442695, %v3224_v36  ;;  %v3346_v33 = vmul.f32 1.442695, %v3225_v25  ;;  %7956 = vmatprep.mubr.msk.bf16.mxu0 %vm1428_vm0, %v4205_v6 }
 0x616   : > { %9214 = vpow2.f32 %v3350_v0  ;;  %3373 = vadd.xlane.f32.xlu0 %v11629_v57  ;;  %v3164_v13 = vpop.xlane.xlu1 %3163  ;;  %3412 = vadd.xlane.f32.xlu1 %v11725_v46 }
 0x617   : > { %9216 = vpow2.f32 %v3344_v1  ;;  %v3228_v52 = vsub.f32 %v14233_v19, %v3164_v13  ;;  %v3229_v29 = vsub.f32 %v14234_v14, %v3164_v13  ;;  %7957 = vmatmul.mubr.msk.bf16.gmra.mrb[228].mxu0 %vm1428_vm0, %v4205_v6 }
 0x618   : > { %9218 = vpow2.f32 %v3346_v33  ;;  %v5712_v62 = vpop.permute.xlu0 %5711 }
 0x619   : > { %v3352_v44 = vmul.f32 1.442695, %v3228_v52  ;;  %v3354_v61 = vmul.f32 1.442695, %v3229_v29  ;;  %v5797_v40 = vsel %vm1428_vm0, %v5712_v62, 0 }
 0x61a   : > { %3379 = vadd.xlane.f32.xlu0 %v11653_v45  ;;  %v4207_v21 = vpop.permute.xlu1 %4206  ;;  %3418 = vadd.xlane.f32.xlu1 %v11733_v26 }
 0x61b   : > { %v9209_v57 = vpop.eup %9208  ;;  %9220 = vpow2.f32 %v3352_v44  ;;  %7958 = vmatprep.mubr.msk.bf16.mxu0 %vm1428_vm0, %v4207_v21 }
 0x61c   : > { %v9211_v46 = vpop.eup %9210  ;;  %9222 = vpow2.f32 %v3354_v61  ;;  %v5728_v19 = vpop.permute.xlu0 %5727  ;;  %v3482_v14 = vpack.c.bf16 %v9209_v57, %v11823_v49 }
 0x61d   : > { %8731 = vmatprep.subr.msk.bf16.mxu0 %vm1428_vm0, %v5728_v19  ;;  %v3483_v47 = vpack.c.bf16 %v9211_v46, %v11825_v58  ;;  %v3441_v27 = vadd.f32 %v9211_v46, %v9209_v57  ;;  %v14271_v19 = vld [vmem:[#allocation119_spill] sm:$0xff] }
 0x61e   : > { %3385 = vadd.xlane.f32.xlu0 %v11675_v55  ;;  %v5714_v45 = vpop.permute.xlu1 %5713  ;;  %3424 = vadd.xlane.f32.xlu1 %v11749_v2 }
 0x61f   : > { %v9213_v26 = vpop.eup %9212  ;;  %3688 = vmatprep.mubr.bf16.mxu1 %v3483_v47  ;;  %7959 = vmatmul.mubr.msk.bf16.gmra.mrb[232].mxu0 %vm1428_vm0, %v4207_v21  ;;  %v5800_v49 = vsel %vm1428_vm0, %v5714_v45, 0 }
 0x620   : > { %v9215_v32 = vpop.eup %9214  ;;  %8103 = vmatpush3.bf16.xpose.msra.mxu0 %v5797_v40  ;;  %3689 = vmatmul.mubr.bf16.gmra.mrb[196].mxu1 %v3482_v14  ;;  %v14272_v14 = vld [vmem:[#allocation121_spill] sm:$0xff] }
 0x621   : > { %v9217_v34 = vpop.eup %9216  ;;  %v3447_v11 = vadd.f32 %v9215_v32, %v9213_v26  ;;  %v14273_v47 = vmax.f32 %v14271_v19, %v14272_v14 }
 0x622   : > { %v9219_v24 = vpop.eup %9218  ;;  %3391 = vadd.xlane.f32.xlu0 %v11685_v28  ;;  %v5730_v20 = vpop.permute.xlu1 %5729  ;;  %3430 = vadd.xlane.f32.xlu1 %v11810_v41  ;;  %v3484_v55 = vpack.c.bf16 %v9213_v26, %v9217_v34  ;;  %v8902_v28 = vld [vmem:[#allocation14 + $0x10] sm:$0xff]  }
 0x623   : > { %8732 = vmatprep.subr.msk.bf16.mxu0 %vm1428_vm0, %v5730_v20  ;;  %v3485_v2 = vpack.c.bf16 %v9215_v32, %v9219_v24  ;;  %v3444_v35 = vadd.f32 %v9219_v24, %v9217_v34  ;;  %8450 = vmatprep.subr.bf16.mxu1 %v8902_v28 }
 0x624   : > { %8451 = vmatpush3.bf16.msra.mxu1 %v8902_v28 }
 0x625   : > { %v11873_v38 = vpop.eup %9220  ;;  %3696 = vmatprep.mubr.bf16.mxu1 %v3485_v2  ;;  %v7800_v59 = vpop.f32.mrb[144].mxu1  ;;  %8452 = vmatprep.subr.bf16.mxu1 %v8903_v8 }
 0x626   : > { %v11875_v9 = vpop.eup %9222  ;;  %3397 = vadd.xlane.f32.xlu0 %v11693_v15  ;;  %v4209_v54 = vpop.permute.xlu1 %4208  ;;  %3436 = vadd.xlane.f32.xlu1 %v11816_v37 }
 0x627   : > { %v7801_v41 = vpop.f32.mrb[145].mxu1  ;;  %7960 = vmatprep.mubr.msk.bf16.mxu0 %vm1428_vm0, %v4209_v54  ;;  %v3450_v58 = vadd.f32 %v11875_v9, %v11873_v38 }
 0x628   : > { %v11883_v16 = vadd.f32 %v7801_v41, %v7800_v59  ;;  %v7803_v56 = vpop.f32.mrb[146].mxu1  ;;  %8105 = vmatpush3.bf16.xpose.msra.mxu0 %v5800_v49  ;;  %3697 = vmatmul.mubr.bf16.gmra.mrb[200].mxu1 %v3484_v55 }
 0x629   : > { %v7804_v31 = vpop.f32.mrb[147].mxu1  ;;  %7961 = vmatmul.mubr.msk.bf16.gmra.mrb[236].mxu0 %vm1428_vm0, %v4209_v54  ;;  %8453 = vmatpush3.bf16.msra.mxu1 %v8903_v8 }
 0x62a   : > { %v11886_v15 = vadd.f32 %v7804_v31, %v7803_v56  ;;  %3403 = vadd.xlane.f32.xlu0 %v11710_v3  ;;  %v5732_v37 = vpop.permute.xlu1 %5731  ;;  %3442 = vadd.xlane.f32.xlu1 %v3441_v27 }
 0x62b   : > { %8733 = vmatprep.subr.msk.bf16.mxu0 %vm1428_vm0, %v5732_v37 }
 0x62d   : > { %v7806_v23 = vpop.f32.mrb[148].mxu1 }
 0x62e   : > { %3409 = vadd.xlane.f32.xlu0 %v11721_v60  ;;  %v5654_v48 = vpop.permute.xlu1 %5653  ;;  %3448 = vadd.xlane.f32.xlu1 %v3447_v11  ;;  %v7807_v7 = vpop.f32.mrb[149].mxu1 }
 0x62f   : > { %8108 = vmatprep.mubr.msk.bf16.mxu0 %vm1428_vm0, %v5654_v48  ;;  %v11892_v10 = vadd.f32 %v7807_v7, %v7806_v23  ;;  %v7809_v30 = vpop.f32.mrb[150].mxu1 }
 0x630   : > { %v7810_v3 = vpop.f32.mrb[151].mxu1 }
 0x631   : > { %v11894_v42 = vadd.f32 %v7810_v3, %v7809_v30 }
 0x632   : > { %3415 = vadd.xlane.f32.xlu0 %v11731_v18  ;;  %v5656_v44 = vpop.permute.xlu1 %5655 }
 0x636   : > { %v7812_v5 = vpop.f32.mrb[152].mxu1  ;;  %3421 = vadd.xlane.f32.xlu0 %v11745_v63  ;;  %v5658_v46 = vpop.permute.xlu1 %5657 }
 0x637   : > { %v7813_v0 = vpop.f32.mrb[153].mxu1 }
 0x638   : > { %v11898_v36 = vadd.f32 %v7813_v0, %v7812_v5  ;;  %v7815_v60 = vpop.f32.mrb[154].mxu1 }
 0x639   : > { %v7816_v25 = vpop.f32.mrb[155].mxu1 }
 0x63a   : > { %v11900_v6 = vadd.f32 %v7816_v25, %v7815_v60  ;;  %3427 = vadd.xlane.f32.xlu0 %v11763_v4  ;;  %v14276_v60 = vld [vmem:[#allocation124_spill] sm:$0xff] }
 0x63e   : > { %v7818_v1 = vpop.f32.mrb[156].mxu1  ;;  %3433 = vadd.xlane.f32.xlu0 %v11819_v39 }
 0x63f   : > { %v7819_v33 = vpop.f32.mrb[157].mxu1 }
 0x640   : > { %v11904_v13 = vadd.f32 %v7819_v33, %v7818_v1  ;;  %v7821_v52 = vpop.f32.mrb[158].mxu1 }
 0x641   : > { %v7822_v18 = vpop.f32.mrb[159].mxu1 }
 0x642   : > { %v11906_v29 = vadd.f32 %v7822_v18, %v7821_v52  ;;  %3439 = vadd.xlane.f32.xlu0 %v11830_v50 }
 0x646   : > { %3445 = vadd.xlane.f32.xlu0 %v3444_v35  ;;  %v5660_v35 = vpop.permute.xlu1 %5659 }
 0x647   : > { %v7824_v63 = vpop.f32.mrb[160].mxu1 }
 0x648   : > { %v7825_v62 = vpop.f32.mrb[161].mxu1 }
 0x649   : > { %v11909_v61 = vadd.f32 %v7825_v62, %v7824_v63  ;;  %v7827_v21 = vpop.f32.mrb[162].mxu1  ;;  %v14278_v63 = vld [vmem:[#allocation39_spill] sm:$0xff] }
 0x64a   : > { %v7828_v4 = vpop.f32.mrb[163].mxu1  ;;  %3451 = vadd.xlane.f32.xlu0 %v3450_v58  ;;  %v11925_v28 = vpop.permute.xlu1 %5661 }
 0x64b   : > { %v11911_v57 = vadd.f32 %v7828_v4, %v7827_v21  ;;  %v14291_v4 = vld [vmem:[#allocation128_spill] sm:$0xff] }
 0x64d   : > { %v3167_v39 = vpop.xlane.xlu0 %3166 }
 0x64e   : > { %4548 = vmax.xlane.f32.xlu0 %v14273_v47  ;;  %v3230_v27 = vsub.f32 %v14255_v12, %v3167_v39  ;;  %v3231_v50 = vsub.f32 %v14256_v17, %v3167_v39  ;;  %v11933_v7 = vpop.permute.xlu1 %5665 }
 0x64f   : > { %v7830_v45 = vpop.f32.mrb[164].mxu1 }
 0x650   : > { %v3356_v26 = vmul.f32 1.442695, %v3230_v27  ;;  %v3358_v40 = vmul.f32 1.442695, %v3231_v50  ;;  %v7831_v32 = vpop.f32.mrb[165].mxu1 }
 0x651   : > { %v11918_v34 = vadd.f32 %v7831_v32, %v7830_v45  ;;  %v7833_v11 = vpop.f32.mrb[166].mxu1  ;;  %v5716_v24 = vpop.permute.xlu0 %5715 }
 0x652   : > { %9224 = vpow2.f32 %v3356_v26  ;;  %v7834_v20 = vpop.f32.mrb[167].mxu1  ;;  %v5803_v55 = vsel %vm1428_vm0, %v5716_v24, 0  ;;  %v5670_v1 = vpop.permute.xlu1 %5669 }
 0x653   : > { %9226 = vpow2.f32 %v3358_v40  ;;  %v11921_v2 = vadd.f32 %v7834_v20, %v7833_v11  ;;  %8107 = vmatpush3.bf16.xpose.msra.mxu0 %v5803_v55  ;;  %v14289_v55 = vld [vmem:[#allocation61_spill] sm:$0xff] }
 0x656   : > { %v11966_v26 = vpop.permute.xlu1 %5673 }
 0x657   : > { %v7836_v12 = vpop.f32.mrb[168].mxu1 }
 0x658   : > { %v7837_v59 = vpop.f32.mrb[169].mxu1 }
 0x659   : > { %v11923_v17 = vadd.f32 %v7837_v59, %v7836_v12  ;;  %v7839_v54 = vpop.f32.mrb[170].mxu1 }
 0x65a   : > { %v7840_v49 = vpop.f32.mrb[171].mxu1  ;;  %8109 = vmatmul.mubr.msk.bf16.vlgmr.msra.gmra.mrb[240].mxu0 %vm1428_vm0, %v5654_v48 }
 0x65b   : > { %v11928_v41 = vadd.f32 %v7840_v49, %v7839_v54  ;;  %8110 = vmatprep.mubr.msk.bf16.mxu0 %vm1428_vm0, %v5656_v44 }
 0x65c   : > { %v9225_v58 = vpop.eup %9224 }
 0x65d   : > { %v9227_v56 = vpop.eup %9226  ;;  %v3486_v31 = vpack.c.bf16 %v9225_v58, %v11873_v38  ;;  %v14274_v38 = vld [vmem:[#allocation57_spill] sm:$0xff] }
 0x65e   : > { %v3487_v37 = vpack.c.bf16 %v9227_v56, %v11875_v9  ;;  %v3453_v8 = vadd.f32 %v9227_v56, %v9225_v58  ;;  %v14275_v9 = vld [vmem:[#allocation122_spill] sm:$0xff]  ;;  %v14284_v56 = vld [vmem:[#allocation41_spill] sm:$0xff] }
 0x65f   : > { %v7842_v23 = vpop.f32.mrb[172].mxu1  ;;  %v14277_v25 = vmax.f32 %v14275_v9, %v14276_v60  ;;  %v14290_v58 = vld [vmem:[#allocation126_spill] sm:$0xff] }
 0x660   : > { %v7843_v30 = vpop.f32.mrb[173].mxu1  ;;  %3704 = vmatprep.mubr.bf16.mxu1 %v3487_v37  ;;  %3454 = vadd.xlane.f32.xlu1 %v3453_v8  ;;  %v11989_v37 = vpop.permute.xlu1 %5677  ;;  %v14292_v45 = vmax.f32 %v14290_v58, %v14291_v4 }
 0x661   : > { %v11935_v3 = vadd.f32 %v7843_v30, %v7842_v23  ;;  %v7845_v48 = vpop.f32.mrb[174].mxu1  ;;  %3705 = vmatmul.mubr.bf16.gmra.mrb[204].mxu1 %v3486_v31  ;;  %v5664_v23 = vpop.permute.xlu0 %5663 }
 0x662   : > { %v7846_v5 = vpop.f32.mrb[175].mxu1  ;;  %8111 = vmatmul.mubr.msk.bf16.gmra.mrb[244].mxu0 %vm1428_vm0, %v5656_v44 }
 0x663   : > { %v11938_v0 = vadd.f32 %v7846_v5, %v7845_v48  ;;  %8112 = vmatprep.mubr.msk.bf16.mxu0 %vm1428_vm0, %v5658_v46 }
 0x664   : > { %4995 = vrot.lane.b32.xlu0 %v14274_v38, %s9918_s7  ;;  %4551 = vmax.xlane.f32.xlu1 %v14277_v25 }
 0x667   : > { %v7848_v33 = vpop.f32.mrb[176].mxu1  ;;  %v11946_v52 = vpop.f32.mrb[212].mxu0 }
 0x668   : > { %v7849_v18 = vpop.f32.mrb[177].mxu1  ;;  %4981 = vrot.lane.b32.xlu0 %v14278_v63, %s9918_s7  ;;  %v11950_v62 = vpop.f32.mrb[213].mxu0 }
 0x669   : > { %14279 = vst [vmem:[#allocation94_spill] sm:$0xff] %v11950_v62  ;;  %v11952_v44 = vadd.f32 %v7849_v18, %v7848_v33  ;;  %v7851_v21 = vpop.f32.mrb[178].mxu1  ;;  %v11956_v39 = vpop.f32.mrb[214].mxu0 }
 0x66a   : > { %v7852_v47 = vpop.f32.mrb[179].mxu1  ;;  %8113 = vmatmul.mubr.msk.bf16.gmra.mrb[248].mxu0 %vm1428_vm0, %v5658_v46  ;;  %v11961_v50 = vpop.f32.mrb[215].mxu0 }
 0x66b   : > { %v11959_v27 = vadd.f32 %v7852_v47, %v7851_v21  ;;  %8114 = vmatprep.mubr.msk.bf16.mxu0 %vm1428_vm0, %v5660_v35  ;;  %v12000_v33 = vpop.permute.xlu1 %5681  ;;  %v5668_v18 = vpop.permute.xlu0 %5667 }
 0x66f   : > { %v7854_v40 = vpop.f32.mrb[180].mxu1  ;;  %v11968_v32 = vpop.f32.mrb[216].mxu0 }
 0x670   : > { %14280 = vst [vmem:[#allocation78_spill] sm:$0xff] %v11968_v32  ;;  %v7855_v11 = vpop.f32.mrb[181].mxu1  ;;  %v11970_v24 = vpop.f32.mrb[217].mxu0 }
 0x671   : > { %14281 = vst [vmem:[#allocation112_spill] sm:$0xff] %v11970_v24  ;;  %v11972_v20 = vadd.f32 %v7855_v11, %v7854_v40  ;;  %v7857_v46 = vpop.f32.mrb[182].mxu1  ;;  %v11976_v12 = vpop.f32.mrb[218].mxu0  ;;  %v14286_v40 = vld [vmem:[#allocation129_spill] sm:$0xff]  ;;  %v14287_v11 = vld [vmem:[#allocation130_spill] sm:$0xff]  ;;  %v14293_v24 = vld [vmem:[#allocation43_spill] sm:$0xff] }
 0x672   : > { %14282 = vst [vmem:[#allocation93_spill] sm:$0xff] %v11976_v12  ;;  %v7858_v59 = vpop.f32.mrb[183].mxu1  ;;  %v11978_v54 = vpop.f32.mrb[219].mxu0  ;;  %8115 = vmatmul.mubr.msk.bf16.gmra.mrb[252].mxu0 %vm1428_vm0, %v5660_v35  ;;  %v14285_v35 = vld [vmem:[#allocation54_spill] sm:$0xff] }
 0x673   : > { %14283 = vst [vmem:[#allocation92_spill] sm:$0xff] %v11978_v54  ;;  %v11981_v49 = vadd.f32 %v7858_v59, %v7857_v46  ;;  %8116 = vmatprep.mubr.msk.bf16.mxu0 %vm1428_vm0, %v11925_v28  ;;  %v5672_v47 = vpop.permute.xlu0 %5671  ;;  %v14288_v46 = vmax.f32 %v14286_v40, %v14287_v11 }
 0x675   : > { %4979 = vrot.lane.b32.xlu1 %v14284_v56, %s9918_s7 }
 0x677   : > { %v7860_v31 = vpop.f32.mrb[184].mxu1 }
 0x678   : > { %v7861_v8 = vpop.f32.mrb[185].mxu1 }
 0x679   : > { %v11991_v30 = vadd.f32 %v7861_v8, %v7860_v31  ;;  %v7863_v48 = vpop.f32.mrb[186].mxu1  ;;  %4997 = vrot.lane.b32.xlu1 %v14285_v35, %s9918_s7 }
 0x67a   : > { %v7864_v5 = vpop.f32.mrb[187].mxu1  ;;  %8117 = vmatmul.mubr.msk.bf16.gmra.mrb[0].mxu0 %vm1428_vm0, %v11925_v28  ;;  %v12010_v28 = vpop.permute.xlu0 %5675 }
 0x67b   : > { %v11997_v25 = vadd.f32 %v7864_v5, %v7863_v48  ;;  %8118 = vmatprep.mubr.msk.bf16.mxu0 %vm1428_vm0, %v5664_v23 }
 0x682   : > { %8119 = vmatmul.mubr.msk.bf16.gmra.mrb[4].mxu0 %vm1428_vm0, %v5664_v23  ;;  %v12013_v23 = vpop.permute.xlu0 %5679 }
 0x683   : > { %v3362_v21 = vpop.xlane.xlu1 %3361  ;;  %8120 = vmatprep.mubr.msk.bf16.mxu0 %vm1428_vm0, %v11933_v7 }
 0x684   : > { %9228 = vrcp.f32 %v3362_v21 }
 0x686   : > { %v12017_v5 = vpop.permute.xlu0 %5683 }
 0x687   : > { %4557 = vmax.xlane.f32.xlu0 %v14288_v46  ;;  %v3371_v59 = vpop.xlane.xlu1 %3370 }
 0x68a   : > { %8121 = vmatmul.mubr.msk.bf16.gmra.mrb[8].mxu0 %vm1428_vm0, %v11933_v7 }
 0x68b   : > { %v3377_v31 = vpop.xlane.xlu1 %3376  ;;  %8122 = vmatprep.mubr.msk.bf16.mxu0 %vm1428_vm0, %v5668_v18 }
 0x68f   : > { %v3383_v8 = vpop.xlane.xlu1 %3382 }
 0x692   : > { %8123 = vmatmul.mubr.msk.bf16.gmra.mrb[12].mxu0 %vm1428_vm0, %v5668_v18 }
 0x693   : > { %8124 = vmatprep.mubr.msk.bf16.mxu0 %vm1428_vm0, %v5670_v1  ;;  %v3389_v48 = vpop.xlane.xlu1 %3388 }
 0x697   : > { %v3395_v7 = vpop.xlane.xlu1 %3394 }
 0x69a   : > { %8125 = vmatmul.mubr.msk.bf16.gmra.mrb[16].mxu0 %vm1428_vm0, %v5670_v1 }
 0x69b   : > { %v3365_v46 = vpop.xlane.xlu0 %3364  ;;  %8126 = vmatprep.mubr.msk.bf16.mxu0 %vm1428_vm0, %v5672_v47  ;;  %v3401_v1 = vpop.xlane.xlu1 %3400 }
 0x69c   : > { %9230 = vrcp.f32 %v3365_v46  ;;  %v9229_v46 = vpop.eup %9228 }
 0x69d   : > { %4999 = vrot.lane.b32.xlu0 %v14289_v55, %s9918_s7  ;;  %4554 = vmax.xlane.f32.xlu1 %v14292_v45  ;;  %9232 = vrcp.f32 %v3371_v59  ;;  %v3745_v45 = vmul.f32 %v9229_v46, %v11883_v16 }
 0x69f   : > { %v3368_v18 = vpop.xlane.xlu0 %3367  ;;  %v3407_v12 = vpop.xlane.xlu1 %3406 }
 0x6a0   : > { %9234 = vrcp.f32 %v3368_v18 }
 0x6a1   : > { %4985 = vrot.lane.b32.xlu0 %v14293_v24, %s9918_s7  ;;  %9236 = vrcp.f32 %v3377_v31 }
 0x6a2   : > { %8127 = vmatmul.mubr.msk.bf16.gmra.mrb[20].mxu0 %vm1428_vm0, %v5672_v47 }
 0x6a3   : > { %v3374_v21 = vpop.xlane.xlu0 %3373  ;;  %8128 = vmatprep.mubr.msk.bf16.mxu0 %vm1428_vm0, %v11966_v26 }
 0x6a4   : > { %9238 = vrcp.f32 %v3374_v21 }
 0x6a5   : > { %9240 = vrcp.f32 %v3383_v8 }
 0x6a6   : > { %v9231_v32 = vpop.eup %9230 }
 0x6a7   : > { %v3380_v54 = vpop.xlane.xlu0 %3379  ;;  %v3746_v59 = vmul.f32 %v9231_v32, %v11886_v15  ;;  %v9233_v18 = vpop.eup %9232 }
 0x6a8   : > { %9242 = vrcp.f32 %v3380_v54  ;;  %v12033_v31 = vpop.f32.mrb[220].mxu0  ;;  %v3748_v16 = vmul.f32 %v9233_v18, %v11894_v42  ;;  %v14298_v42 = vld [vmem:[#allocation45_spill] sm:$0xff] }
 0x6a9   : > { %14294 = vst [vmem:[#allocation85_spill] sm:$0xff] %v12033_v31  ;;  %v12035_v24 = vpop.f32.mrb[221].mxu0  ;;  %v3777_v47 = vpack.c.bf16 %v3746_v59, %v3745_v45  ;;  %9244 = vrcp.f32 %v3389_v48 }
 0x6aa   : > { %14295 = vst [vmem:[#allocation118_spill] sm:$0xff] %v12035_v24  ;;  %v9235_v55 = vpop.eup %9234  ;;  %v12039_v62 = vpop.f32.mrb[222].mxu0  ;;  %8129 = vmatmul.mubr.msk.bf16.gmra.mrb[24].mxu0 %vm1428_vm0, %v11966_v26 }
 0x6ab   : > { %14296 = vst [vmem:[#allocation111_spill] sm:$0xff] %v12039_v62  ;;  %v3747_v15 = vmul.f32 %v9235_v55, %v11892_v10  ;;  %8454 = vmatprep.mubr.msk.bf16.mxu1 %vm1428_vm0, %v3777_v47  ;;  %v3386_v32 = vpop.xlane.xlu0 %3385  ;;  %8130 = vmatprep.mubr.msk.bf16.mxu0 %vm1428_vm0, %v12010_v28  ;;  %v9237_v54 = vpop.eup %9236 }
 0x6ac   : > { %9246 = vrcp.f32 %v3386_v32  ;;  %v12048_v8 = vpop.f32.mrb[223].mxu0  ;;  %v3413_v26 = vpop.xlane.xlu1 %3412  ;;  %v3750_v59 = vmul.f32 %v9237_v54, %v11900_v6 }
 0x6ad   : > { %14297 = vst [vmem:[#allocation123_spill] sm:$0xff] %v12048_v8  ;;  %v3778_v48 = vpack.c.bf16 %v3748_v16, %v3747_v15  ;;  %9248 = vrcp.f32 %v3395_v7 }
 0x6ae   : > { %v9239_v45 = vpop.eup %9238  ;;  %4983 = vrot.lane.b32.xlu1 %v14298_v42, %s9918_s7 }
 0x6af   : > { %8455 = vmatmul.mubr.msk.bf16.vlgmr.msra.gmra.mrb[112].mxu1 %vm1428_vm0, %v3778_v48  ;;  %v3392_v10 = vpop.xlane.xlu0 %3391  ;;  %v3749_v55 = vmul.f32 %v9239_v45, %v11898_v36  ;;  %v9241_v18 = vpop.eup %9240  ;;  %v14301_v48 = vld [vmem:[#allocation59_spill] sm:$0xff] }
 0x6b0   : > { %9250 = vrcp.f32 %v3392_v10  ;;  %v12057_v47 = vpop.f32.mrb[224].mxu0  ;;  %v3752_v54 = vmul.f32 %v9241_v18, %v11906_v29  ;;  %v3419_v10 = vpop.xlane.xlu1 %3418 }
 0x6b1   : > { %14299 = vst [vmem:[#allocation125_spill] sm:$0xff] %v12057_v47  ;;  %v12059_v16 = vpop.f32.mrb[225].mxu0  ;;  %v3779_v15 = vpack.c.bf16 %v3750_v59, %v3749_v55  ;;  %9252 = vrcp.f32 %v3401_v1 }
 0x6b2   : > { %14300 = vst [vmem:[#allocation132_spill] sm:$0xff] %v12059_v16  ;;  %v9243_v32 = vpop.eup %9242  ;;  %v7866_v7 = vpop.f32.mrb[188].mxu1  ;;  %5001 = vrot.lane.b32.xlu1 %v14301_v48, %s9918_s7  ;;  %8131 = vmatmul.mubr.msk.bf16.gmra.mrb[28].mxu0 %vm1428_vm0, %v12010_v28 }
 0x6b3   : > { %v12065_v46 = vpop.f32.mrb[226].mxu0  ;;  %v7867_v36 = vpop.f32.mrb[189].mxu1  ;;  %8458 = vmatprep.mubr.msk.bf16.mxu1 %vm1428_vm0, %v3779_v15  ;;  %8132 = vmatprep.mubr.msk.bf16.mxu0 %vm1428_vm0, %v11989_v37  ;;  %v3751_v1 = vmul.f32 %v9243_v32, %v11904_v13  ;;  %v14333_v15 = vld [vmem:[#allocation67_spill] sm:$0xff] }
 0x6b4   : > { %14302 = vst [vmem:[#allocation97_spill] sm:$0xff] %v12065_v46  ;;  %v3398_v6 = vpop.xlane.xlu0 %3397  ;;  %v9245_v45 = vpop.eup %9244  ;;  %v12074_v55 = vadd.f32 %v7867_v36, %v7866_v7  ;;  %v14347_v46 = vld [vmem:[#allocation73_spill] sm:$0xff] }
 0x6b5   : > { %9254 = vrcp.f32 %v3398_v6  ;;  %v7869_v59 = vpop.f32.mrb[190].mxu1  ;;  %v12076_v21 = vpop.f32.mrb[227].mxu0  ;;  %v3780_v16 = vpack.c.bf16 %v3752_v54, %v3751_v1  ;;  %v3754_v18 = vmul.f32 %v9245_v45, %v11911_v57 }
 0x6b6   : > { %14303 = vst [vmem:[#allocation84_spill] sm:$0xff] %v12076_v21  ;;  %v7870_v28 = vpop.f32.mrb[191].mxu1  ;;  %v9247_v47 = vpop.eup %9246  ;;  %9256 = vrcp.f32 %v3407_v12 }
 0x6b7   : > { %v12080_v24 = vadd.f32 %v7870_v28, %v7869_v59  ;;  %8459 = vmatmul.mubr.msk.bf16.gmra.mrb[116].mxu1 %vm1428_vm0, %v3780_v16  ;;  %v3753_v29 = vmul.f32 %v9247_v47, %v11909_v61  ;;  %v9249_v32 = vpop.eup %9248  ;;  %v3425_v6 = vpop.xlane.xlu1 %3424 }
 0x6b8   : > { %v3404_v13 = vpop.xlane.xlu0 %3403  ;;  %v3756_v57 = vmul.f32 %v9249_v32, %v11921_v2  ;;  %v14304_v2 = vmax.f32 %v11544_v22, %v11546_v51 }
 0x6b9   : > { %9258 = vrcp.f32 %v3404_v13  ;;  %v3781_v7 = vpack.c.bf16 %v3754_v18, %v3753_v29 }
 0x6ba   : > { %v9251_v36 = vpop.eup %9250  ;;  %9260 = vrcp.f32 %v3413_v26  ;;  %v7872_v1 = vpop.f32.mrb[192].mxu1  ;;  %8133 = vmatmul.mubr.msk.bf16.gmra.mrb[32].mxu0 %vm1428_vm0, %v11989_v37 }
 0x6bb   : > { %v7873_v12 = vpop.f32.mrb[193].mxu1  ;;  %8462 = vmatprep.mubr.msk.bf16.mxu1 %vm1428_vm0, %v3781_v7  ;;  %8134 = vmatprep.mubr.msk.bf16.mxu0 %vm1428_vm0, %v12013_v23  ;;  %v3755_v61 = vmul.f32 %v9251_v36, %v11918_v34  ;;  %v9253_v47 = vpop.eup %9252 }
 0x6bc   : > { %v3410_v54 = vpop.xlane.xlu0 %3409  ;;  %v12092_v16 = vadd.f32 %v7873_v12, %v7872_v1  ;;  %v7875_v26 = vpop.f32.mrb[194].mxu1  ;;  %v3758_v18 = vmul.f32 %v9253_v47, %v11928_v41 }
 0x6bd   : > { %9262 = vrcp.f32 %v3410_v54  ;;  %v7876_v45 = vpop.f32.mrb[195].mxu1  ;;  %v3782_v59 = vpack.c.bf16 %v3756_v57, %v3755_v61  ;;  %v3431_v32 = vpop.xlane.xlu1 %3430 }
 0x6be   : > { %9264 = vrcp.f32 %v3419_v10  ;;  %v7877_v37 = vadd.f32 %v7876_v45, %v7875_v26 }
 0x6bf   : > { %v9255_v28 = vpop.eup %9254  ;;  %8463 = vmatmul.mubr.msk.bf16.gmra.mrb[120].mxu1 %vm1428_vm0, %v3782_v59 }
 0x6c0   : > { %v3416_v13 = vpop.xlane.xlu0 %3415  ;;  %v3757_v29 = vmul.f32 %v9255_v28, %v11923_v17  ;;  %v9257_v34 = vpop.eup %9256  ;;  %4563 = vmax.xlane.f32.xlu0 %v14304_v2 }
 0x6c1   : > { %9266 = vrcp.f32 %v3416_v13  ;;  %v3760_v41 = vmul.f32 %v9257_v34, %v11938_v0  ;;  %v3437_v61 = vpop.xlane.xlu1 %3436 }
 0x6c2   : > { %v3783_v7 = vpack.c.bf16 %v3758_v18, %v3757_v29  ;;  %9268 = vrcp.f32 %v3425_v6  ;;  %8135 = vmatmul.mubr.msk.bf16.gmra.mrb[36].mxu0 %vm1428_vm0, %v12013_v23 }
 0x6c3   : > { %v9259_v36 = vpop.eup %9258  ;;  %8136 = vmatprep.mubr.msk.bf16.mxu0 %vm1428_vm0, %v12000_v33 }
 0x6c4   : > { %8466 = vmatprep.mubr.msk.bf16.mxu1 %vm1428_vm0, %v3783_v7  ;;  %v3422_v10 = vpop.xlane.xlu0 %3421  ;;  %v3759_v17 = vmul.f32 %v9259_v36, %v11935_v3  ;;  %v9261_v1 = vpop.eup %9260 }
 0x6c5   : > { %9270 = vrcp.f32 %v3422_v10  ;;  %v3762_v57 = vmul.f32 %v9261_v1, %v11959_v27 }
 0x6c6   : > { %v3784_v12 = vpack.c.bf16 %v3760_v41, %v3759_v17  ;;  %9272 = vrcp.f32 %v3431_v32 }
 0x6c7   : > { %v9263_v54 = vpop.eup %9262 }
 0x6c8   : > { %8467 = vmatmul.mubr.msk.bf16.gmra.mrb[124].mxu1 %vm1428_vm0, %v3784_v12  ;;  %v3428_v6 = vpop.xlane.xlu0 %3427  ;;  %v3761_v23 = vmul.f32 %v9263_v54, %v11952_v44  ;;  %v9265_v47 = vpop.eup %9264 }
 0x6c9   : > { %9274 = vrcp.f32 %v3428_v6  ;;  %v3764_v44 = vmul.f32 %v9265_v47, %v11981_v49 }
 0x6ca   : > { %v3785_v26 = vpack.c.bf16 %v3762_v57, %v3761_v23  ;;  %9276 = vrcp.f32 %v3437_v61  ;;  %8137 = vmatmul.mubr.msk.bf16.gmra.mrb[40].mxu0 %vm1428_vm0, %v12000_v33  ;;  %v3443_v23 = vpop.xlane.xlu1 %3442 }
 0x6cb   : > { %v9267_v45 = vpop.eup %9266  ;;  %8138 = vmatprep.mubr.msk.bf16.mxu0 %vm1428_vm0, %v12017_v5 }
 0x6cc   : > { %8470 = vmatprep.mubr.msk.bf16.mxu1 %vm1428_vm0, %v3785_v26  ;;  %v3434_v3 = vpop.xlane.xlu0 %3433  ;;  %v3763_v0 = vmul.f32 %v9267_v45, %v11972_v20  ;;  %v9269_v59 = vpop.eup %9268 }
 0x6cd   : > { %9278 = vrcp.f32 %v3434_v3  ;;  %v3766_v33 = vmul.f32 %v9269_v59, %v11997_v25  ;;  %v14306_v25 = vmax.f32 %v11536_v43, %v11538_v53 }
 0x6ce   : > { %v3786_v27 = vpack.c.bf16 %v3764_v44, %v3763_v0  ;;  %v3449_v57 = vpop.xlane.xlu1 %3448 }
 0x6cf   : > { %v9271_v28 = vpop.eup %9270 }
 0x6d0   : > { %8471 = vmatmul.mubr.msk.bf16.gmra.mrb[128].mxu1 %vm1428_vm0, %v3786_v27  ;;  %v3440_v13 = vpop.xlane.xlu0 %3439  ;;  %v3765_v29 = vmul.f32 %v9271_v28, %v11991_v30  ;;  %v9273_v18 = vpop.eup %9272  ;;  %v14305_v30 = vld [vmem:[#allocation65_spill] sm:$0xff]  ;;  %v14329_v28 = vld [vmem:[#allocation134_spill] sm:$0xff] }
 0x6d1   : > { %v3768_v20 = vmul.f32 %v9273_v18, %v12080_v24 }
 0x6d2   : > { %v3787_v34 = vpack.c.bf16 %v3766_v33, %v3765_v29  ;;  %8139 = vmatmul.mubr.msk.bf16.gmra.mrb[44].mxu0 %vm1428_vm0, %v12017_v5 }
 0x6d3   : > { %v9275_v2 = vpop.eup %9274 }
 0x6d4   : > { %8474 = vmatprep.mubr.msk.bf16.mxu1 %vm1428_vm0, %v3787_v34  ;;  %v3446_v49 = vpop.xlane.xlu0 %3445  ;;  %v3767_v32 = vmul.f32 %v9275_v2, %v12074_v55  ;;  %v9277_v7 = vpop.eup %9276  ;;  %v14307_v55 = vld [vmem:[#allocation47_spill] sm:$0xff] }
 0x6d5   : > { %v3770_v17 = vmul.f32 %v9277_v7, %v7877_v37 }
 0x6d6   : > { %v3788_v36 = vpack.c.bf16 %v3768_v20, %v3767_v32  ;;  %5003 = vrot.lane.b32.xlu0 %v14305_v30, %s9918_s7  ;;  %4560 = vmax.xlane.f32.xlu1 %v14306_v25 }
 0x6d7   : > { %v9279_v10 = vpop.eup %9278 }
 0x6d8   : > { %8475 = vmatmul.mubr.msk.bf16.gmra.mrb[132].mxu1 %vm1428_vm0, %v3788_v36  ;;  %v12131_v5 = vpop.xlane.xlu0 %3451  ;;  %v3769_v24 = vmul.f32 %v9279_v10, %v12092_v16  ;;  %v14308_v16 = vld [vmem:[#allocation49_spill] sm:$0xff] }
 0x6da   : > { %v3789_v41 = vpack.c.bf16 %v3770_v17, %v3769_v24  ;;  %4989 = vrot.lane.b32.xlu0 %v14307_v55, %s9918_s7 }
 0x6dc   : > { %8478 = vmatprep.mubr.msk.bf16.mxu1 %vm1428_vm0, %v3789_v41  ;;  %v4549_v1 = vpop.xlane.xlu0 %4548 }
 0x6dd   : > { %v4643_v12 = vsub.f32 %v14271_v19, %v4549_v1  ;;  %v4644_v54 = vsub.f32 %v14272_v14, %v4549_v1  ;;  %v14311_v14 = vld [vmem:[#allocation63_spill] sm:$0xff] }
 0x6df   : > { %v4707_v61 = vmul.f32 1.442695, %v4643_v12  ;;  %v4709_v6 = vmul.f32 1.442695, %v4644_v54 }
 0x6e0   : > { %v4996_v37 = vpop.permute.xlu0 %4995 }
 0x6e1   : > { %9280 = vpow2.f32 %v4707_v61  ;;  %7962 = vmatprep.subr.bf16.mxu1 %v4996_v37  ;;  %v14319_v37 = vld [vmem:[#allocation135_spill] sm:$0xff] }
 0x6e2   : > { %9282 = vpow2.f32 %v4709_v6 }
 0x6e3   : > { %9284 = vrcp.f32 %v3443_v23  ;;  %v14320_v23 = vld [vmem:[#allocation137_spill] sm:$0xff] }
 0x6e4   : > { %9286 = vrcp.f32 %v3440_v13 }
 0x6e5   : > { %9288 = vrcp.f32 %v3449_v57 }
 0x6e6   : > { %9290 = vrcp.f32 %v3446_v49  ;;  %v14321_v49 = vmax.f32 %v14319_v37, %v14320_v23 }
 0x6e7   : > { %4987 = vrot.lane.b32.xlu1 %v14308_v16, %s9918_s7 }
 0x6ea   : > { %v12143_v26 = vpop.f32.mrb[228].mxu0 }
 0x6eb   : > { %v12141_v47 = vpop.eup %9280  ;;  %14309 = vst [vmem:[#allocation131_spill] sm:$0xff] %v12143_v26  ;;  %v12147_v19 = vpop.f32.mrb[229].mxu0  ;;  %5005 = vrot.lane.b32.xlu1 %v14311_v14, %s9918_s7 }
 0x6ec   : > { %v12145_v45 = vpop.eup %9282  ;;  %14310 = vst [vmem:[#allocation96_spill] sm:$0xff] %v12147_v19  ;;  %v12153_v0 = vpop.f32.mrb[230].mxu0  ;;  %v14344_v19 = vld [vmem:[#allocation100_spill] sm:$0xff] }
 0x6ed   : > { %14312 = vst [vmem:[#allocation116_spill] sm:$0xff] %v12153_v0  ;;  %v12157_v44 = vadd.f32 %v12145_v45, %v12141_v47  ;;  %v12159_v59 = vpop.f32.mrb[231].mxu0  ;;  %v12161_v27 = vpop.xlane.xlu1 %3454 }
 0x6ee   : > { %14314 = vst [vmem:[#allocation127_spill] sm:$0xff] %v12159_v59  ;;  %v9285_v1 = vpop.eup %9284 }
 0x6ef   : > { %14313 = vst [vmem:[#allocation104_spill] sm:$0xff] %v12157_v44  ;;  %v9287_v54 = vpop.eup %9286 }
 0x6f1   : > { %v4552_v29 = vpop.xlane.xlu1 %4551 }
 0x6f2   : > { %v4645_v33 = vsub.f32 %v14275_v9, %v4552_v29  ;;  %v4646_v18 = vsub.f32 %v14276_v60, %v4552_v29  ;;  %v12167_v34 = vpop.f32.mrb[232].mxu0  ;;  %v4982_v29 = vpop.permute.xlu0 %4981  ;;  %v14327_v60 = vld [vmem:[#allocation69_spill] sm:$0xff] }
 0x6f3   : > { %14315 = vst [vmem:[#allocation138_spill] sm:$0xff] %v12167_v34  ;;  %v7878_v2 = vpop.f32.mrb[196].mxu1  ;;  %v12169_v20 = vpop.f32.mrb[233].mxu0  ;;  %v14343_v34 = vld [vmem:[#allocation24_spill] sm:$0xff] }
 0x6f4   : > { %14316 = vst [vmem:[#allocation120_spill] sm:$0xff] %v12169_v20  ;;  %v4711_v32 = vmul.f32 1.442695, %v4645_v33  ;;  %v4713_v7 = vmul.f32 1.442695, %v4646_v18  ;;  %v7879_v13 = vpop.f32.mrb[197].mxu1  ;;  %v14345_v26 = vmax.f32 %v14343_v34, %v14344_v19 }
 0x6f5   : > { %v12173_v10 = vpop.f32.mrb[234].mxu0  ;;  %v7880_v25 = vadd.f32 %v7879_v13, %v7878_v2  ;;  %v7881_v17 = vpop.f32.mrb[198].mxu1 }
 0x6f6   : > { %14317 = vst [vmem:[#allocation136_spill] sm:$0xff] %v12173_v10  ;;  %v12175_v9 = vpop.f32.mrb[235].mxu0  ;;  %9292 = vpow2.f32 %v4711_v32  ;;  %v4980_v24 = vpop.permute.xlu1 %4979 }
 0x6f7   : > { %14318 = vst [vmem:[#allocation140_spill] sm:$0xff] %v12175_v9  ;;  %v7882_v41 = vpop.f32.mrb[199].mxu1  ;;  %9294 = vpow2.f32 %v4713_v7  ;;  %7963 = vmatpush3.bf16.msra.mxu1 %v4980_v24  ;;  %v3771_v61 = vmul.f32 %v9287_v54, %v7880_v25  ;;  %v9289_v25 = vpop.eup %9288 }
 0x6f8   : > { %v7883_v12 = vadd.f32 %v7882_v41, %v7881_v17 }
 0x6f9   : > { %4569 = vmax.xlane.f32.xlu0 %v14321_v49  ;;  %v14328_v49 = vld [vmem:[#allocation133_spill] sm:$0xff] }
 0x6fa   : > { %v3772_v6 = vmul.f32 %v9285_v1, %v7883_v12  ;;  %v4998_v57 = vpop.permute.xlu1 %4997  ;;  %v9291_v12 = vpop.eup %9290 }
 0x6fb   : > { %7964 = vmatprep.subr.bf16.mxu1 %v4998_v57  ;;  %v7884_v18 = vpop.f32.mrb[200].mxu1 }
 0x6fc   : > { %v3790_v33 = vpack.c.bf16 %v3772_v6, %v3771_v61  ;;  %7965 = vmatpush3.bf16.msra.mxu1 %v4982_v29  ;;  %v7885_v2 = vpop.f32.mrb[201].mxu1  ;;  %v12182_v32 = vpop.f32.mrb[236].mxu0 }
 0x6fd   : > { %14322 = vst [vmem:[#allocation139_spill] sm:$0xff] %v12182_v32  ;;  %v7886_v13 = vadd.f32 %v7885_v2, %v7884_v18  ;;  %v7887_v7 = vpop.f32.mrb[202].mxu1  ;;  %v12185_v17 = vpop.f32.mrb[237].mxu0 }
 0x6fe   : > { %8479 = vmatmul.mubr.msk.bf16.gmra.mrb[136].mxu1 %vm1428_vm0, %v3790_v33  ;;  %14323 = vst [vmem:[#allocation80_spill] sm:$0xff] %v12185_v17  ;;  %v7888_v41 = vpop.f32.mrb[203].mxu1  ;;  %v12189_v1 = vpop.f32.mrb[238].mxu0 }
 0x6ff   : > { %14324 = vst [vmem:[#allocation144_spill] sm:$0xff] %v12189_v1  ;;  %v7889_v54 = vadd.f32 %v7888_v41, %v7887_v7  ;;  %v12191_v61 = vpop.f32.mrb[239].mxu0  ;;  %v3773_v29 = vmul.f32 %v9291_v12, %v7886_v13  ;;  %v14330_v13 = vmax.f32 %v14328_v49, %v14329_v28 }
 0x700   : > { %14325 = vst [vmem:[#allocation141_spill] sm:$0xff] %v12191_v61  ;;  %v12193_v6 = vpop.eup %9292  ;;  %v14340_v61 = vld [vmem:[#allocation71_spill] sm:$0xff] }
 0x701   : > { %v12197_v57 = vpop.eup %9294  ;;  %v3774_v33 = vmul.f32 %v9289_v25, %v7889_v54  ;;  %v14331_v25 = vld [vmem:[#allocation51_spill] sm:$0xff] }
 0x702   : > { %v12205_v7 = vadd.f32 %v12197_v57, %v12193_v6 }
 0x703   : > { %v3791_v41 = vpack.c.bf16 %v3774_v33, %v3773_v29  ;;  %v14332_v33 = vld [vmem:[#allocation53_spill] sm:$0xff] }
 0x704   : > { %14326 = vst [vmem:[#allocation145_spill] sm:$0xff] %v12205_v7 }
 0x705   : > { %8482 = vmatprep.mubr.msk.bf16.mxu1 %vm1428_vm0, %v3791_v41 }
 0x70f   : > { %5007 = vrot.lane.b32.xlu0 %v14327_v60, %s9918_s7  ;;  %4566 = vmax.xlane.f32.xlu1 %v14330_v13  ;;  %v14362_v60 = vld [vmem:[#allocation74_spill] sm:$0xff] }
 0x713   : > { %4993 = vrot.lane.b32.xlu0 %v14331_v25, %s9918_s7 }
 0x714   : > { %v4558_v12 = vpop.xlane.xlu0 %4557 }
 0x715   : > { %v4649_v54 = vsub.f32 %v14286_v40, %v4558_v12  ;;  %v4650_v24 = vsub.f32 %v14287_v11, %v4558_v12 }
 0x717   : > { %v4719_v36 = vmul.f32 1.442695, %v4649_v54  ;;  %v4721_v3 = vmul.f32 1.442695, %v4650_v24 }
 0x718   : > { %v5000_v29 = vpop.permute.xlu0 %4999 }
 0x719   : > { %9296 = vpow2.f32 %v4719_v36  ;;  %7966 = vmatprep.subr.bf16.mxu1 %v5000_v29 }
 0x71a   : > { %9298 = vpow2.f32 %v4721_v3 }
 0x71b   : > { %9300 = vrcp.f32 %v12131_v5  ;;  %v14337_v5 = vld [vmem:[#allocation95_spill] sm:$0xff] }
 0x71c   : > { %9302 = vrcp.f32 %v12161_v27 }
 0x720   : > { %4991 = vrot.lane.b32.xlu1 %v14332_v33, %s9918_s7 }
 0x723   : > { %v12219_v41 = vpop.eup %9296 }
 0x724   : > { %v12221_v13 = vpop.eup %9298  ;;  %5009 = vrot.lane.b32.xlu1 %v14333_v15, %s9918_s7 }
 0x725   : > { %v12227_v40 = vadd.f32 %v12221_v13, %v12219_v41 }
 0x727   : > { %14334 = vst [vmem:[#allocation142_spill] sm:$0xff] %v12227_v40 }
 0x72a   : > { %v4555_v11 = vpop.xlane.xlu1 %4554 }
 0x72b   : > { %v4647_v24 = vsub.f32 %v14290_v58, %v4555_v11  ;;  %v4648_v36 = vsub.f32 %v14291_v4, %v4555_v11  ;;  %v14338_v11 = vld [vmem:[#allocation70_spill] sm:$0xff]  ;;  %v9301_v58 = vpop.eup %9300 }
 0x72d   : > { %v4715_v3 = vmul.f32 1.442695, %v4647_v24  ;;  %v4717_v12 = vmul.f32 1.442695, %v4648_v36  ;;  %v12232_v54 = vpop.f32.mrb[240].mxu0  ;;  %v14339_v24 = vmax.f32 %v14337_v5, %v14338_v11  ;;  %v4986_v36 = vpop.permute.xlu0 %4985 }
 0x72e   : > { %v4984_v29 = vpop.permute.xlu1 %4983  ;;  %v12235_v18 = vpop.f32.mrb[241].mxu0 }
 0x72f   : > { %9304 = vpow2.f32 %v4715_v3  ;;  %7967 = vmatpush3.bf16.msra.mxu1 %v4984_v29  ;;  %v6022_v2 = vmax.f32 %v12232_v54, %v12235_v18  ;;  %v12239_v40 = vpop.f32.mrb[242].mxu0 }
 0x730   : > { %14335 = vst [vmem:[#allocation143_spill] sm:$0xff] %v12239_v40  ;;  %9306 = vpow2.f32 %v4717_v12  ;;  %v12241_v4 = vpop.f32.mrb[243].mxu0  ;;  %v14341_v12 = vld [vmem:[#allocation81_spill] sm:$0xff] }
 0x731   : > { %14336 = vst [vmem:[#allocation22_spill] sm:$0xff] %v12241_v4  ;;  %v14342_v1 = vmax.f32 %v14340_v61, %v14341_v12 }
 0x732   : > { %4575 = vmax.xlane.f32.xlu0 %v14339_v24  ;;  %v5002_v27 = vpop.permute.xlu1 %5001 }
 0x733   : > { %7968 = vmatprep.subr.bf16.mxu1 %v5002_v27  ;;  %v9303_v27 = vpop.eup %9302 }
 0x734   : > { %v7890_v3 = vpop.f32.mrb[204].mxu1  ;;  %7969 = vmatpush3.bf16.msra.mxu1 %v4986_v36 }
 0x735   : > { %v7891_v29 = vpop.f32.mrb[205].mxu1  ;;  %v12248_v7 = vpop.f32.mrb[244].mxu0 }
 0x736   : > { %v7892_v44 = vadd.f32 %v7891_v29, %v7890_v3  ;;  %4578 = vmax.xlane.f32.xlu0 %v14342_v1  ;;  %v7893_v9 = vpop.f32.mrb[206].mxu1  ;;  %v12253_v10 = vpop.f32.mrb[245].mxu0 }
 0x737   : > { %v7894_v59 = vpop.f32.mrb[207].mxu1  ;;  %v12257_v0 = vpop.f32.mrb[246].mxu0 }
 0x738   : > { %v7895_v36 = vadd.f32 %v7894_v59, %v7893_v9  ;;  %v12259_v17 = vpop.f32.mrb[247].mxu0  ;;  %v3775_v29 = vmul.f32 %v9301_v58, %v7892_v44  ;;  %v14348_v44 = vld [vmem:[#allocation82_spill] sm:$0xff]  ;;  %v14351_v59 = vld [vmem:[#allocation107_spill] sm:$0xff] }
 0x739   : > { %v12261_v32 = vpop.eup %9304  ;;  %v14349_v58 = vmax.f32 %v14347_v46, %v14348_v44 }
 0x73a   : > { %v12265_v1 = vpop.eup %9306  ;;  %v3776_v20 = vmul.f32 %v9303_v27, %v7895_v36  ;;  %4584 = vmax.xlane.f32.xlu0 %v14345_v26  ;;  %v14350_v27 = vpack.c.bf16 %v12197_v57, %v12145_v45  ;;  %v14358_v36 = vld [vmem:[#allocation72_spill] sm:$0xff] }
 0x73b   : > { %v12276_v9 = vadd.f32 %v12265_v1, %v12261_v32 }
 0x73c   : > { %v3792_v21 = vpack.c.bf16 %v3776_v20, %v3775_v29 }
 0x73d   : > { %14346 = vst [vmem:[#allocation28_spill] sm:$0xff] %v12276_v9  ;;  %v12278_v3 = vpop.f32.mrb[248].mxu0 }
 0x73e   : > { %4590 = vmax.xlane.f32.xlu0 %v14349_v58  ;;  %8483 = vmatmul.mubr.msk.bf16.gmra.mrb[140].mxu1 %vm1428_vm0, %v3792_v21  ;;  %v12284_v26 = vpop.f32.mrb[249].mxu0  ;;  %v14352_v58 = vld [vmem:[#allocation89_spill] sm:$0xff] }
 0x73f   : > { %5059 = vmatprep.mubr.bf16.mxu1 %v14350_v27  ;;  %v12291_v24 = vpop.f32.mrb[250].mxu0  ;;  %v14353_v9 = vmax.f32 %v14351_v59, %v14352_v58  ;;  %v14357_v27 = vld [vmem:[#allocation79_spill] sm:$0xff] }
 0x740   : > { %v12293_v20 = vpop.f32.mrb[251].mxu0  ;;  %v14359_v33 = vmax.f32 %v14357_v27, %v14358_v36 }
 0x742   : > { %4596 = vmax.xlane.f32.xlu0 %v14353_v9  ;;  %v14361_v9 = vld [vmem:[#allocation88_spill] sm:$0xff] }
 0x743   : > { %v14363_v31 = vmax.f32 %v14361_v9, %v14362_v60 }
 0x745   : > { %v12300_v21 = vpop.f32.mrb[252].mxu0 }
 0x746   : > { %14354 = vst [vmem:[#allocation23_spill] sm:$0xff] %v12300_v21  ;;  %6023 = vmax.xlane.f32.xlu0 %v6022_v2  ;;  %v12302_v15 = vpop.f32.mrb[253].mxu0 }
 0x747   : > { %14355 = vst [vmem:[#allocation29_spill] sm:$0xff] %v12302_v15  ;;  %v12306_v57 = vpop.f32.mrb[254].mxu0 }
 0x748   : > { %14356 = vst [vmem:[#allocation58_spill] sm:$0xff] %v12306_v57  ;;  %4572 = vmax.xlane.f32.xlu1 %v14359_v33  ;;  %v12311_v25 = vpop.f32.mrb[255].mxu0  ;;  %v14368_v57 = vld [vmem:[#allocation25_spill] sm:$0xff] }
 0x749   : > { %14360 = vst [vmem:[#allocation64_spill] sm:$0xff] %v12311_v25  ;;  %v14367_v25 = vld [vmem:[#allocation87_spill] sm:$0xff] }
 0x74a   : > { %v14369_v16 = vmax.f32 %v14367_v25, %v14368_v57  ;;  %v14378_v57 = vld [vmem:[#allocation83_spill] sm:$0xff] }
 0x74c   : > { %4581 = vmax.xlane.f32.xlu1 %v14363_v31 }
 0x74d   : > { %v4564_v2 = vpop.xlane.xlu0 %4563  ;;  %v12318_v8 = vpop.f32.mrb[0].mxu0 }
 0x74e   : > { %14364 = vst [vmem:[#allocation26_spill] sm:$0xff] %v12318_v8  ;;  %v4653_v45 = vsub.f32 %v11544_v22, %v4564_v2  ;;  %v4654_v15 = vsub.f32 %v11546_v51, %v4564_v2  ;;  %v12322_v21 = vpop.f32.mrb[1].mxu0  ;;  %v14371_v51 = vld [vmem:[#allocation90_spill] sm:$0xff]  ;;  %v14372_v2 = vld [vmem:[#allocation76_spill] sm:$0xff]  ;;  %v14377_v8 = vld [vmem:[#allocation75_spill] sm:$0xff] }
 0x74f   : > { %14365 = vst [vmem:[#allocation32_spill] sm:$0xff] %v12322_v21  ;;  %v12326_v62 = vpop.f32.mrb[2].mxu0  ;;  %v14373_v33 = vmax.f32 %v14371_v51, %v14372_v2  ;;  %v14379_v22 = vmax.f32 %v14377_v8, %v14378_v57 }
 0x750   : > { %14366 = vst [vmem:[#allocation27_spill] sm:$0xff] %v12326_v62  ;;  %v4727_v14 = vmul.f32 1.442695, %v4653_v45  ;;  %v4729_v29 = vmul.f32 1.442695, %v4654_v15  ;;  %4587 = vmax.xlane.f32.xlu1 %v14369_v16  ;;  %v12331_v31 = vpop.f32.mrb[3].mxu0 }
 0x751   : > { %14370 = vst [vmem:[#allocation33_spill] sm:$0xff] %v12331_v31  ;;  %v5004_v55 = vpop.permute.xlu0 %5003 }
 0x752   : > { %9308 = vpow2.f32 %v4727_v14  ;;  %7970 = vmatprep.subr.bf16.mxu1 %v5004_v55 }
 0x753   : > { %9310 = vpow2.f32 %v4729_v29 }
 0x754   : > { %4593 = vmax.xlane.f32.xlu1 %v14373_v33  ;;  %v14381_v33 = vmax.f32 %v12239_v40, %v12241_v4 }
 0x755   : > { %v12338_v21 = vpop.f32.mrb[4].mxu0 }
 0x756   : > { %14374 = vst [vmem:[#allocation91_spill] sm:$0xff] %v12338_v21  ;;  %v12340_v15 = vpop.f32.mrb[5].mxu0 }
 0x757   : > { %14375 = vst [vmem:[#allocation113_spill] sm:$0xff] %v12340_v15  ;;  %v12344_v45 = vpop.f32.mrb[6].mxu0 }
 0x758   : > { %14376 = vst [vmem:[#allocation114_spill] sm:$0xff] %v12344_v45  ;;  %4599 = vmax.xlane.f32.xlu1 %v14379_v22  ;;  %v12349_v14 = vpop.f32.mrb[7].mxu0 }
 0x759   : > { %14380 = vst [vmem:[#allocation98_spill] sm:$0xff] %v12349_v14 }
 0x75c   : > { %v12353_v29 = vpop.eup %9308  ;;  %6470 = vrot.lane.b32.xlu0 %v14274_v38, %s9919_s9  ;;  %6026 = vmax.xlane.f32.xlu1 %v14381_v33 }
 0x75d   : > { %v12360_v16 = vpop.eup %9310  ;;  %v12362_v31 = vpop.f32.mrb[8].mxu0 }
 0x75e   : > { %14382 = vst [vmem:[#allocation99_spill] sm:$0xff] %v12362_v31  ;;  %v12364_v62 = vpop.f32.mrb[9].mxu0  ;;  %v12368_v22 = vadd.f32 %v12360_v16, %v12353_v29 }
 0x75f   : > { %14383 = vst [vmem:[#allocation77_spill] sm:$0xff] %v12364_v62  ;;  %v12372_v14 = vpop.f32.mrb[10].mxu0 }
 0x760   : > { %14384 = vst [vmem:[#allocation101_spill] sm:$0xff] %v12368_v22  ;;  %14385 = vst [vmem:[#allocation102_spill] sm:$0xff] %v12372_v14  ;;  %6456 = vrot.lane.b32.xlu0 %v14278_v63, %s9919_s9  ;;  %v12376_v38 = vpop.f32.mrb[11].mxu0 }
 0x761   : > { %14386 = vst [vmem:[#allocation86_spill] sm:$0xff] %v12376_v38 }
 0x763   : > { %v4561_v45 = vpop.xlane.xlu1 %4560 }
 0x764   : > { %v4651_v15 = vsub.f32 %v11536_v43, %v4561_v45  ;;  %v4652_v21 = vsub.f32 %v11538_v53, %v4561_v45  ;;  %v4990_v45 = vpop.permute.xlu0 %4989 }
 0x765   : > { %v12382_v4 = vpop.f32.mrb[12].mxu0 }
 0x766   : > { %14387 = vst [vmem:[#allocation62_spill] sm:$0xff] %v12382_v4  ;;  %v4723_v22 = vmul.f32 1.442695, %v4651_v15  ;;  %v4725_v40 = vmul.f32 1.442695, %v4652_v21  ;;  %v12384_v55 = vpop.f32.mrb[13].mxu0 }
 0x767   : > { %14388 = vst [vmem:[#allocation68_spill] sm:$0xff] %v12384_v55  ;;  %v4988_v62 = vpop.permute.xlu1 %4987  ;;  %v12388_v31 = vpop.f32.mrb[14].mxu0 }
 0x768   : > { %14389 = vst [vmem:[#allocation30_spill] sm:$0xff] %v12388_v31  ;;  %9312 = vpow2.f32 %v4723_v22  ;;  %7971 = vmatpush3.bf16.msra.mxu1 %v4988_v62  ;;  %v12390_v33 = vpop.f32.mrb[15].mxu0 }
 0x769   : > { %14390 = vst [vmem:[#allocation36_spill] sm:$0xff] %v12390_v33  ;;  %9314 = vpow2.f32 %v4725_v40 }
 0x76b   : > { %v5006_v43 = vpop.permute.xlu1 %5005 }
 0x76c   : > { %7972 = vmatprep.subr.bf16.mxu1 %v5006_v43 }
 0x76d   : > { %6454 = vrot.lane.b32.xlu1 %v14284_v56, %s9919_s9  ;;  %7973 = vmatpush3.bf16.msra.mxu1 %v4990_v45  ;;  %v12396_v21 = vpop.f32.mrb[16].mxu0  ;;  %v14405_v45 = vmax.f32 %v12248_v7, %v12253_v10 }
 0x76e   : > { %14391 = vst [vmem:[#allocation31_spill] sm:$0xff] %v12396_v21  ;;  %v12398_v15 = vpop.f32.mrb[17].mxu0 }
 0x76f   : > { %14392 = vst [vmem:[#allocation37_spill] sm:$0xff] %v12398_v15  ;;  %v12402_v22 = vpop.f32.mrb[18].mxu0 }
 0x770   : > { %14393 = vst [vmem:[#allocation66_spill] sm:$0xff] %v12402_v22  ;;  %v12404_v40 = vpop.f32.mrb[19].mxu0 }
 0x771   : > { %14394 = vst [vmem:[#allocation35_spill] sm:$0xff] %v12404_v40  ;;  %6472 = vrot.lane.b32.xlu1 %v14285_v35, %s9919_s9 }
 0x772   : > { %v12410_v53 = vpop.eup %9312 }
 0x773   : > { %v12412_v56 = vpop.eup %9314 }
 0x774   : > { %v12420_v63 = vadd.f32 %v12412_v56, %v12410_v53 }
 0x775   : > { %v12422_v33 = vpop.f32.mrb[20].mxu0 }
 0x776   : > { %14395 = vst [vmem:[#allocation40_spill] sm:$0xff] %v12420_v63  ;;  %14396 = vst [vmem:[#allocation38_spill] sm:$0xff] %v12422_v33  ;;  %v12424_v35 = vpop.f32.mrb[21].mxu0  ;;  %v14402_v63 = vmax.f32 %v11956_v39, %v11961_v50 }
 0x777   : > { %14397 = vst [vmem:[#allocation44_spill] sm:$0xff] %v12424_v35  ;;  %v12428_v40 = vpop.f32.mrb[22].mxu0 }
 0x778   : > { %14398 = vst [vmem:[#allocation42_spill] sm:$0xff] %v12428_v40  ;;  %v12430_v22 = vpop.f32.mrb[23].mxu0 }
 0x779   : > { %14399 = vst [vmem:[#allocation48_spill] sm:$0xff] %v12430_v22 }
 0x77d   : > { %v12434_v31 = vpop.f32.mrb[24].mxu0 }
 0x77e   : > { %14400 = vst [vmem:[#allocation115_spill] sm:$0xff] %v12434_v31  ;;  %v12436_v62 = vpop.f32.mrb[25].mxu0 }
 0x77f   : > { %14401 = vst [vmem:[#allocation117_spill] sm:$0xff] %v12436_v62  ;;  %4605 = vmax.xlane.f32.xlu0 %v14402_v63  ;;  %v12443_v14 = vpop.f32.mrb[26].mxu0 }
 0x780   : > { %14403 = vst [vmem:[#allocation52_spill] sm:$0xff] %v12443_v14  ;;  %v12445_v43 = vpop.f32.mrb[27].mxu0 }
 0x781   : > { %14404 = vst [vmem:[#allocation56_spill] sm:$0xff] %v12445_v43 }
 0x783   : > { %6029 = vmax.xlane.f32.xlu0 %v14405_v45  ;;  %v14414_v45 = vld [vmem:[#allocation94_spill] sm:$0xff] }
 0x785   : > { %v12452_v22 = vpop.f32.mrb[28].mxu0 }
 0x786   : > { %14406 = vst [vmem:[#allocation60_spill] sm:$0xff] %v12452_v22  ;;  %v4570_v40 = vpop.xlane.xlu0 %4569  ;;  %v12454_v33 = vpop.f32.mrb[29].mxu0 }
 0x787   : > { %14407 = vst [vmem:[#allocation103_spill] sm:$0xff] %v12454_v33  ;;  %v4657_v63 = vsub.f32 %v14319_v37, %v4570_v40  ;;  %v4658_v38 = vsub.f32 %v14320_v23, %v4570_v40  ;;  %v12460_v31 = vpop.f32.mrb[30].mxu0 }
 0x788   : > { %14408 = vst [vmem:[#allocation105_spill] sm:$0xff] %v12460_v31  ;;  %v12462_v15 = vpop.f32.mrb[31].mxu0 }
 0x789   : > { %14409 = vst [vmem:[#allocation109_spill] sm:$0xff] %v12462_v15  ;;  %v4735_v35 = vmul.f32 1.442695, %v4657_v63  ;;  %v4737_v43 = vmul.f32 1.442695, %v4658_v38  ;;  %v14421_v38 = vld [vmem:[#allocation61_spill] sm:$0xff] }
 0x78a   : > { %v5008_v14 = vpop.permute.xlu0 %5007 }
 0x78b   : > { %9316 = vpow2.f32 %v4735_v35  ;;  %7974 = vmatprep.subr.bf16.mxu1 %v5008_v14  ;;  %v14415_v35 = vmax.f32 %v11946_v52, %v14414_v45 }
 0x78c   : > { %9318 = vpow2.f32 %v4737_v43 }
 0x78d   : > { %v12466_v21 = vpop.f32.mrb[32].mxu0 }
 0x78e   : > { %14410 = vst [vmem:[#allocation110_spill] sm:$0xff] %v12466_v21  ;;  %v12468_v37 = vpop.f32.mrb[33].mxu0 }
 0x78f   : > { %14411 = vst [vmem:[#allocation106_spill] sm:$0xff] %v12468_v37  ;;  %v12472_v40 = vpop.f32.mrb[34].mxu0 }
 0x790   : > { %14412 = vst [vmem:[#allocation108_spill] sm:$0xff] %v12472_v40  ;;  %v12474_v62 = vpop.f32.mrb[35].mxu0 }
 0x791   : > { %14413 = vst [vmem:[#allocation34_spill] sm:$0xff] %v12474_v62 }
 0x795   : > { %v9317_v63 = vpop.eup %9316  ;;  %4602 = vmax.xlane.f32.xlu1 %v14415_v35  ;;  %v12481_v14 = vpop.f32.mrb[36].mxu0  ;;  %v14422_v35 = vmax.f32 %v12257_v0, %v12259_v17 }
 0x796   : > { %14416 = vst [vmem:[#allocation46_spill] sm:$0xff] %v12481_v14  ;;  %v9319_v43 = vpop.eup %9318  ;;  %v12483_v15 = vpop.f32.mrb[37].mxu0 }
 0x797   : > { %14417 = vst [vmem:[#allocation50_spill] sm:$0xff] %v12483_v15  ;;  %v12487_v31 = vpop.f32.mrb[38].mxu0  ;;  %v12489_v37 = vadd.f32 %v9319_v43, %v9317_v63  ;;  %v14423_v15 = vld [vmem:[#allocation43_spill] sm:$0xff] }
 0x798   : > { %14418 = vst [vmem:[#allocation55_spill] sm:$0xff] %v12487_v31  ;;  %v12491_v21 = vpop.f32.mrb[39].mxu0 }
 0x799   : > { %14419 = vst [vmem:[#allocation119_spill] sm:$0xff] %v12489_v37  ;;  %14420 = vst [vmem:[#allocation121_spill] sm:$0xff] %v12491_v21  ;;  %6474 = vrot.lane.b32.xlu0 %v14421_v38, %s9919_s9  ;;  %6032 = vmax.xlane.f32.xlu1 %v14422_v35 }
 0x79c   : > { %v4567_v40 = vpop.xlane.xlu1 %4566 }
 0x79d   : > { %v4655_v33 = vsub.f32 %v14328_v49, %v4567_v40  ;;  %v4656_v23 = vsub.f32 %v14329_v28, %v4567_v40  ;;  %6460 = vrot.lane.b32.xlu0 %v14423_v15, %s9919_s9  ;;  %v12504_v37 = vpop.f32.mrb[40].mxu0  ;;  %v4994_v15 = vpop.permute.xlu0 %4993 }
 0x79e   : > { %14424 = vst [vmem:[#allocation57_spill] sm:$0xff] %v12504_v37  ;;  %v12506_v14 = vpop.f32.mrb[41].mxu0 }
 0x79f   : > { %14425 = vst [vmem:[#allocation122_spill] sm:$0xff] %v12506_v14  ;;  %v4731_v38 = vmul.f32 1.442695, %v4655_v33  ;;  %v4733_v22 = vmul.f32 1.442695, %v4656_v23  ;;  %v12510_v55 = vpop.f32.mrb[42].mxu0 }
 0x7a0   : > { %v4992_v62 = vpop.permute.xlu1 %4991  ;;  %v12512_v21 = vpop.f32.mrb[43].mxu0 }
 0x7a1   : > { %14426 = vst [vmem:[#allocation124_spill] sm:$0xff] %v12512_v21  ;;  %9320 = vpow2.f32 %v4731_v38  ;;  %7975 = vmatpush3.bf16.msra.mxu1 %v4992_v62  ;;  %v14429_v62 = vpack.c.bf16 %v12193_v6, %v12141_v47  ;;  %v14430_v38 = vpack.c.bf16 %v12221_v13, %v12265_v1  ;;  %v14431_v47 = vpack.c.bf16 %v12219_v41, %v12261_v32  ;;  %v14434_v13 = vld [vmem:[#allocation93_spill] sm:$0xff]  ;;  %v14435_v1 = vld [vmem:[#allocation92_spill] sm:$0xff] }
 0x7a2   : > { %9322 = vpow2.f32 %v4733_v22  ;;  %v14433_v6 = vpack.c.bf16 %v12353_v29, %v12410_v53  ;;  %v14437_v32 = vmax.f32 %v12278_v3, %v12284_v26 }
 0x7a4   : > { %v5010_v49 = vpop.permute.xlu1 %5009 }
 0x7a5   : > { %7976 = vmatprep.subr.bf16.mxu1 %v5010_v49  ;;  %v12516_v40 = vpop.f32.mrb[44].mxu0 }
 0x7a6   : > { %14427 = vst [vmem:[#allocation39_spill] sm:$0xff] %v12516_v40  ;;  %7977 = vmatpush3.bf16.msra.mxu1 %v4994_v15  ;;  %v12518_v33 = vpop.f32.mrb[45].mxu0 }
 0x7a7   : > { %14428 = vst [vmem:[#allocation41_spill] sm:$0xff] %v12518_v33  ;;  %v12522_v35 = vpop.f32.mrb[46].mxu0 }
 0x7a8   : > { %v12524_v31 = vpop.f32.mrb[47].mxu0 }
 0x7a9   : > { %5060 = vmatmul.mubr.bf16.vlgmr.msra.gmra.mrb[208].mxu1 %v14429_v62 }
 0x7aa   : > { %6458 = vrot.lane.b32.xlu1 %v14298_v42, %s9919_s9  ;;  %5067 = vmatprep.mubr.bf16.mxu1 %v14430_v38  ;;  %v14432_v42 = vpack.c.bf16 %v12360_v16, %v12412_v56 }
 0x7ab   : > { %v9321_v49 = vpop.eup %9320 }
 0x7ac   : > { %v9323_v15 = vpop.eup %9322  ;;  %v4937_v28 = vpack.c.bf16 %v9317_v63, %v9321_v49  ;;  %v14436_v63 = vmax.f32 %v14434_v13, %v14435_v1 }
 0x7ad   : > { %v4938_v23 = vpack.c.bf16 %v9319_v43, %v9323_v15  ;;  %v12536_v21 = vadd.f32 %v9323_v15, %v9321_v49 }
 0x7ae   : > { %6476 = vrot.lane.b32.xlu1 %v14301_v48, %s9919_s9 }
 0x7b1   : > { %5068 = vmatmul.mubr.bf16.gmra.mrb[212].mxu1 %v14431_v47 }
 0x7b2   : > { %5075 = vmatprep.mubr.bf16.mxu1 %v14432_v42 }
 0x7b9   : > { %5076 = vmatmul.mubr.bf16.gmra.mrb[216].mxu1 %v14433_v6 }
 0x7ba   : > { %5083 = vmatprep.mubr.bf16.mxu1 %v4938_v23 }
 0x7bc   : > { %4611 = vmax.xlane.f32.xlu0 %v14436_v63 }
 0x7bf   : > { %v4576_v43 = vpop.xlane.xlu0 %4575 }
 0x7c0   : > { %v4661_v48 = vsub.f32 %v14337_v5, %v4576_v43  ;;  %v4662_v62 = vsub.f32 %v14338_v11, %v4576_v43  ;;  %6035 = vmax.xlane.f32.xlu0 %v14437_v32 }
 0x7c1   : > { %5084 = vmatmul.mubr.bf16.gmra.mrb[220].mxu1 %v4937_v28 }
 0x7c2   : > { %v4743_v41 = vmul.f32 1.442695, %v4661_v48  ;;  %v4745_v16 = vmul.f32 1.442695, %v4662_v62 }
 0x7c3   : > { %v4579_v56 = vpop.xlane.xlu0 %4578 }
 0x7c4   : > { %9324 = vpow2.f32 %v4743_v41  ;;  %v4663_v29 = vsub.f32 %v14340_v61, %v4579_v56  ;;  %v4664_v53 = vsub.f32 %v14341_v12, %v4579_v56  ;;  %v14438_v41 = vld [vmem:[#allocation78_spill] sm:$0xff] }
 0x7c5   : > { %9326 = vpow2.f32 %v4745_v16  ;;  %v14439_v16 = vld [vmem:[#allocation112_spill] sm:$0xff] }
 0x7c6   : > { %v4747_v23 = vmul.f32 1.442695, %v4663_v29  ;;  %v4749_v38 = vmul.f32 1.442695, %v4664_v53  ;;  %v14440_v56 = vmax.f32 %v14438_v41, %v14439_v16 }
 0x7c7   : > { %v4585_v49 = vpop.xlane.xlu0 %4584 }
 0x7c8   : > { %9328 = vpow2.f32 %v4747_v23  ;;  %v4667_v5 = vsub.f32 %v14343_v34, %v4585_v49  ;;  %v4668_v11 = vsub.f32 %v14344_v19, %v4585_v49 }
 0x7c9   : > { %9330 = vpow2.f32 %v4749_v38 }
 0x7ca   : > { %v4755_v15 = vmul.f32 1.442695, %v4667_v5  ;;  %v4757_v28 = vmul.f32 1.442695, %v4668_v11 }
 0x7cb   : > { %v4591_v47 = vpop.xlane.xlu0 %4590 }
 0x7cc   : > { %9332 = vpow2.f32 %v4755_v15  ;;  %v4671_v42 = vsub.f32 %v14347_v46, %v4591_v47  ;;  %v4672_v61 = vsub.f32 %v14348_v44, %v4591_v47 }
 0x7cd   : > { %9334 = vpow2.f32 %v4757_v28 }
 0x7ce   : > { %v12563_v12 = vpop.eup %9324  ;;  %v4763_v6 = vmul.f32 1.442695, %v4671_v42  ;;  %v4765_v63 = vmul.f32 1.442695, %v4672_v61 }
 0x7cf   : > { %v12565_v43 = vpop.eup %9326  ;;  %v4597_v48 = vpop.xlane.xlu0 %4596 }
 0x7d0   : > { %9336 = vpow2.f32 %v4763_v6  ;;  %v4675_v19 = vsub.f32 %v14351_v59, %v4597_v48  ;;  %v4676_v34 = vsub.f32 %v14352_v58, %v4597_v48  ;;  %v12571_v62 = vadd.f32 %v12565_v43, %v12563_v12  ;;  %v14442_v48 = vld [vmem:[#allocation47_spill] sm:$0xff] }
 0x7d1   : > { %9338 = vpow2.f32 %v4765_v63 }
 0x7d2   : > { %v12573_v46 = vpop.eup %9328  ;;  %v4771_v44 = vmul.f32 1.442695, %v4675_v19  ;;  %v4773_v32 = vmul.f32 1.442695, %v4676_v34  ;;  %4608 = vmax.xlane.f32.xlu1 %v14440_v56 }
 0x7d3   : > { %v12578_v29 = vpop.eup %9330  ;;  %v6024_v53 = vpop.xlane.xlu0 %6023 }
 0x7d4   : > { %9340 = vpow2.f32 %v4771_v44  ;;  %v6118_v59 = vsub.f32 %v12232_v54, %v6024_v53  ;;  %v6119_v58 = vsub.f32 %v12235_v18, %v6024_v53  ;;  %v12584_v23 = vadd.f32 %v12578_v29, %v12573_v46 }
 0x7d5   : > { %9342 = vpow2.f32 %v4773_v32  ;;  %v4573_v38 = vpop.xlane.xlu1 %4572  ;;  %v14441_v18 = vmax.f32 %v12291_v24, %v12293_v20 }
 0x7d6   : > { %v12586_v49 = vpop.eup %9332  ;;  %v6182_v5 = vmul.f32 1.442695, %v6118_v59  ;;  %v6184_v11 = vmul.f32 1.442695, %v6119_v58  ;;  %v4659_v15 = vsub.f32 %v14357_v27, %v4573_v38  ;;  %v4660_v28 = vsub.f32 %v14358_v36, %v4573_v38  ;;  %6478 = vrot.lane.b32.xlu0 %v14305_v30, %s9919_s9  ;;  %v14443_v59 = vld [vmem:[#allocation25_spill] sm:$0xff] }
 0x7d7   : > { %6038 = vmax.xlane.f32.xlu1 %v14441_v18  ;;  %v12595_v54 = vpop.eup %9334  ;;  %v6471_v47 = vpop.permute.xlu0 %6470 }
 0x7d8   : > { %9344 = vpow2.f32 %v6182_v5  ;;  %v4739_v42 = vmul.f32 1.442695, %v4659_v15  ;;  %v4741_v61 = vmul.f32 1.442695, %v4660_v28  ;;  %8140 = vmatprep.subr.bf16.mxu0 %v6471_v47  ;;  %v12599_v6 = vadd.f32 %v12595_v54, %v12586_v49 }
 0x7d9   : > { %9346 = vpow2.f32 %v6184_v11  ;;  %v4582_v36 = vpop.xlane.xlu1 %4581 }
 0x7da   : > { %v12601_v27 = vpop.eup %9336  ;;  %9348 = vpow2.f32 %v4739_v42  ;;  %v4665_v30 = vsub.f32 %v14361_v9, %v4582_v36  ;;  %v4666_v63 = vsub.f32 %v14362_v60, %v4582_v36  ;;  %6464 = vrot.lane.b32.xlu0 %v14442_v48, %s9919_s9 }
 0x7db   : > { %v12607_v19 = vpop.eup %9338  ;;  %9350 = vpow2.f32 %v4741_v61 }
 0x7dc   : > { %v4751_v34 = vmul.f32 1.442695, %v4665_v30  ;;  %v4753_v44 = vmul.f32 1.442695, %v4666_v63  ;;  %v12611_v32 = vadd.f32 %v12607_v19, %v12601_v27 }
 0x7dd   : > { %v4588_v56 = vpop.xlane.xlu1 %4587 }
 0x7de   : > { %v12613_v53 = vpop.eup %9340  ;;  %9352 = vpow2.f32 %v4751_v34  ;;  %v4669_v9 = vsub.f32 %v14367_v25, %v4588_v56  ;;  %v4670_v60 = vsub.f32 %v14443_v59, %v4588_v56  ;;  %v14445_v56 = vld [vmem:[#allocation49_spill] sm:$0xff] }
 0x7df   : > { %v12617_v58 = vpop.eup %9342  ;;  %9354 = vpow2.f32 %v4753_v44 }
 0x7e0   : > { %v4759_v38 = vmul.f32 1.442695, %v4669_v9  ;;  %v4761_v5 = vmul.f32 1.442695, %v4670_v60  ;;  %v12621_v11 = vadd.f32 %v12617_v58, %v12613_v53 }
 0x7e1   : > { %v4594_v15 = vpop.xlane.xlu1 %4593 }
 0x7e2   : > { %v12623_v28 = vpop.eup %9344  ;;  %9356 = vpow2.f32 %v4759_v38  ;;  %v4673_v18 = vsub.f32 %v14371_v51, %v4594_v15  ;;  %v4674_v47 = vsub.f32 %v14372_v2, %v4594_v15 }
 0x7e3   : > { %v12627_v25 = vpop.eup %9346  ;;  %9358 = vpow2.f32 %v4761_v5 }
 0x7e4   : > { %v9349_v42 = vpop.eup %9348  ;;  %v4767_v61 = vmul.f32 1.442695, %v4673_v18  ;;  %v4769_v36 = vmul.f32 1.442695, %v4674_v47  ;;  %v12631_v30 = vadd.f32 %v12627_v25, %v12623_v28  ;;  %v14447_v18 = vld [vmem:[#allocation22_spill] sm:$0xff] }
 0x7e5   : > { %v9351_v63 = vpop.eup %9350  ;;  %v4600_v48 = vpop.xlane.xlu1 %4599  ;;  %v4939_v34 = vpack.c.bf16 %v12563_v12, %v9349_v42 }
 0x7e6   : > { %14444 = vst [vmem:[#allocation54_spill] sm:$0xff] %v12631_v30  ;;  %9360 = vpow2.f32 %v4767_v61  ;;  %v4677_v44 = vsub.f32 %v14377_v8, %v4600_v48  ;;  %v4678_v51 = vsub.f32 %v14378_v57, %v4600_v48  ;;  %v4940_v2 = vpack.c.bf16 %v12565_v43, %v9351_v63  ;;  %v14446_v8 = vld [vmem:[#allocation143_spill] sm:$0xff] }
 0x7e7   : > { %9362 = vpow2.f32 %v4769_v36  ;;  %v12639_v9 = vadd.f32 %v9351_v63, %v9349_v42  ;;  %v14448_v42 = vld [vmem:[#allocation63_spill] sm:$0xff] }
 0x7e8   : > { %6462 = vrot.lane.b32.xlu1 %v14445_v56, %s9919_s9  ;;  %v9353_v59 = vpop.eup %9352  ;;  %v4775_v60 = vmul.f32 1.442695, %v4677_v44  ;;  %v4777_v38 = vmul.f32 1.442695, %v4678_v51  ;;  %5091 = vmatprep.mubr.bf16.mxu1 %v4940_v2 }
 0x7e9   : > { %v9355_v5 = vpop.eup %9354  ;;  %5092 = vmatmul.mubr.bf16.gmra.mrb[224].mxu1 %v4939_v34  ;;  %v6027_v12 = vpop.xlane.xlu1 %6026  ;;  %v4941_v15 = vpack.c.bf16 %v9353_v59, %v12573_v46 }
 0x7ea   : > { %9364 = vpow2.f32 %v4775_v60  ;;  %v6120_v57 = vsub.f32 %v14446_v8, %v6027_v12  ;;  %v6121_v43 = vsub.f32 %v14447_v18, %v6027_v12  ;;  %v4942_v47 = vpack.c.bf16 %v9355_v5, %v12578_v29 }
 0x7eb   : > { %9366 = vpow2.f32 %v4777_v38  ;;  %v12647_v61 = vadd.f32 %v9355_v5, %v9353_v59  ;;  %v6457_v38 = vpop.permute.xlu0 %6456 }
 0x7ec   : > { %6480 = vrot.lane.b32.xlu1 %v14448_v42, %s9919_s9  ;;  %v9357_v36 = vpop.eup %9356  ;;  %v6186_v63 = vmul.f32 1.442695, %v6120_v57  ;;  %v6188_v48 = vmul.f32 1.442695, %v6121_v43  ;;  %5099 = vmatprep.mubr.bf16.mxu1 %v4942_v47  ;;  %v14449_v47 = vld [vmem:[#allocation111_spill] sm:$0xff] }
 0x7ed   : > { %v9359_v34 = vpop.eup %9358  ;;  %v6455_v44 = vpop.permute.xlu1 %6454  ;;  %v4943_v46 = vpack.c.bf16 %v9357_v36, %v12586_v49 }
 0x7ee   : > { %9368 = vpow2.f32 %v6186_v63  ;;  %8141 = vmatpush3.bf16.msra.mxu0 %v6455_v44  ;;  %v4944_v51 = vpack.c.bf16 %v9359_v34, %v12595_v54  ;;  %v12651_v2 = vadd.f32 %v9359_v34, %v9357_v36  ;;  %v14454_v63 = vld [vmem:[#allocation29_spill] sm:$0xff] }
 0x7ef   : > { %9370 = vpow2.f32 %v6188_v48 }
 0x7f0   : > { %v9361_v29 = vpop.eup %9360 }
 0x7f1   : > { %v9363_v56 = vpop.eup %9362  ;;  %5100 = vmatmul.mubr.bf16.gmra.mrb[228].mxu1 %v4941_v15  ;;  %v6473_v59 = vpop.permute.xlu1 %6472  ;;  %v4945_v60 = vpack.c.bf16 %v9361_v29, %v12601_v27 }
 0x7f2   : > { %5107 = vmatprep.mubr.bf16.mxu1 %v4944_v51  ;;  %8142 = vmatprep.subr.bf16.mxu0 %v6473_v59  ;;  %v4946_v5 = vpack.c.bf16 %v9363_v56, %v12607_v19  ;;  %v12655_v12 = vadd.f32 %v9363_v56, %v9361_v29  ;;  %v14450_v19 = vld [vmem:[#allocation123_spill] sm:$0xff]  ;;  %v14456_v56 = vld [vmem:[#allocation85_spill] sm:$0xff] }
 0x7f3   : > { %8143 = vmatpush3.bf16.msra.mxu0 %v6457_v38  ;;  %v14451_v42 = vmax.f32 %v14449_v47, %v14450_v19 }
 0x7f4   : > { %v9365_v49 = vpop.eup %9364 }
 0x7f5   : > { %v9367_v8 = vpop.eup %9366  ;;  %v4947_v54 = vpack.c.bf16 %v9365_v49, %v12613_v53 }
 0x7f6   : > { %v4948_v57 = vpack.c.bf16 %v9367_v8, %v12617_v58  ;;  %v12659_v18 = vadd.f32 %v9367_v8, %v9365_v49  ;;  %v14453_v58 = vld [vmem:[#allocation23_spill] sm:$0xff] }
 0x7f7   : > { %v14455_v48 = vmax.f32 %v14453_v58, %v14454_v63 }
 0x7f8   : > { %v12661_v15 = vpop.eup %9368 }
 0x7f9   : > { %v9371_v43 = vpop.eup %9370  ;;  %5108 = vmatmul.mubr.bf16.gmra.mrb[232].mxu1 %v4943_v46  ;;  %4617 = vmax.xlane.f32.xlu0 %v14451_v42  ;;  %v14463_v42 = vld [vmem:[#allocation51_spill] sm:$0xff] }
 0x7fa   : > { %5115 = vmatprep.mubr.bf16.mxu1 %v4946_v5  ;;  %v6407_v36 = vpack.c.bf16 %v9371_v43, %v12627_v25  ;;  %v12670_v53 = vadd.f32 %v9371_v43, %v12661_v15  ;;  %v14457_v25 = vld [vmem:[#allocation118_spill] sm:$0xff] }
 0x7fb   : > { %v14458_v59 = vmax.f32 %v14456_v56, %v14457_v25 }
 0x7fc   : > { %14452 = vst [vmem:[#allocation129_spill] sm:$0xff] %v12670_v53  ;;  %6534 = vmatprep.mubr.bf16.mxu0 %v6407_v36  ;;  %v14484_v53 = vld [vmem:[#allocation77_spill] sm:$0xff] }
 0x7fd   : > { %6041 = vmax.xlane.f32.xlu0 %v14455_v48 }
 0x801   : > { %5116 = vmatmul.mubr.bf16.gmra.mrb[236].mxu1 %v4945_v60 }
 0x802   : > { %5123 = vmatprep.mubr.bf16.mxu1 %v4948_v57  ;;  %v14460_v57 = vld [vmem:[#allocation64_spill] sm:$0xff] }
 0x809   : > { %5124 = vmatmul.mubr.bf16.gmra.mrb[240].mxu1 %v4947_v54  ;;  %v14459_v54 = vld [vmem:[#allocation58_spill] sm:$0xff] }
 0x80c   : > { %v4606_v34 = vpop.xlane.xlu0 %4605 }
 0x80d   : > { %v4681_v44 = vsub.f32 %v11956_v39, %v4606_v34  ;;  %v4682_v46 = vsub.f32 %v11961_v50, %v4606_v34  ;;  %v14461_v39 = vmax.f32 %v14459_v54, %v14460_v57  ;;  %v14462_v50 = vld [vmem:[#allocation69_spill] sm:$0xff] }
 0x80f   : > { %v4783_v51 = vmul.f32 1.442695, %v4681_v44  ;;  %v4785_v29 = vmul.f32 1.442695, %v4682_v46 }
 0x810   : > { %4614 = vmax.xlane.f32.xlu1 %v14458_v59  ;;  %v6030_v38 = vpop.xlane.xlu0 %6029  ;;  %v14465_v59 = vld [vmem:[#allocation53_spill] sm:$0xff] }
 0x811   : > { %9372 = vpow2.f32 %v4783_v51  ;;  %v6122_v5 = vsub.f32 %v12248_v7, %v6030_v38  ;;  %v6123_v49 = vsub.f32 %v12253_v10, %v6030_v38 }
 0x812   : > { %9374 = vpow2.f32 %v4785_v29 }
 0x813   : > { %v6190_v60 = vmul.f32 1.442695, %v6122_v5  ;;  %v6192_v8 = vmul.f32 1.442695, %v6123_v49  ;;  %6482 = vrot.lane.b32.xlu0 %v14462_v50, %s9919_s9 }
 0x814   : > { %6044 = vmax.xlane.f32.xlu1 %v14461_v39  ;;  %v6475_v43 = vpop.permute.xlu0 %6474  ;;  %v14466_v39 = vld [vmem:[#allocation67_spill] sm:$0xff] }
 0x815   : > { %9376 = vpow2.f32 %v6190_v60  ;;  %8144 = vmatprep.subr.bf16.mxu0 %v6475_v43 }
 0x816   : > { %9378 = vpow2.f32 %v6192_v8 }
 0x817   : > { %6468 = vrot.lane.b32.xlu0 %v14463_v42, %s9919_s9 }
 0x818   : > { %v6461_v42 = vpop.permute.xlu0 %6460 }
 0x81b   : > { %v9373_v7 = vpop.eup %9372 }
 0x81c   : > { %v9375_v36 = vpop.eup %9374 }
 0x81d   : > { %v12689_v10 = vadd.f32 %v9375_v36, %v9373_v7 }
 0x81f   : > { %v12691_v48 = vpop.eup %9376 }
 0x820   : > { %v12693_v34 = vpop.eup %9378 }
 0x821   : > { %v12697_v44 = vadd.f32 %v12693_v34, %v12691_v48 }
 0x822   : > { %v4603_v46 = vpop.xlane.xlu1 %4602 }
 0x823   : > { %14464 = vst [vmem:[#allocation130_spill] sm:$0xff] %v12697_v44  ;;  %v4679_v51 = vsub.f32 %v11946_v52, %v4603_v46  ;;  %v4680_v29 = vsub.f32 %v14414_v45, %v4603_v46 }
 0x825   : > { %6466 = vrot.lane.b32.xlu1 %v14465_v59, %s9919_s9  ;;  %v4779_v38 = vmul.f32 1.442695, %v4679_v51  ;;  %v4781_v5 = vmul.f32 1.442695, %v4680_v29 }
 0x826   : > { %v6033_v49 = vpop.xlane.xlu1 %6032 }
 0x827   : > { %9380 = vpow2.f32 %v4779_v38  ;;  %v6124_v60 = vsub.f32 %v12257_v0, %v6033_v49  ;;  %v6125_v8 = vsub.f32 %v12259_v17, %v6033_v49  ;;  %v14467_v49 = vld [vmem:[#allocation97_spill] sm:$0xff] }
 0x828   : > { %9382 = vpow2.f32 %v4781_v5 }
 0x829   : > { %6484 = vrot.lane.b32.xlu1 %v14466_v39, %s9919_s9  ;;  %v6194_v50 = vmul.f32 1.442695, %v6124_v60  ;;  %v6196_v43 = vmul.f32 1.442695, %v6125_v8  ;;  %v14468_v60 = vld [vmem:[#allocation84_spill] sm:$0xff] }
 0x82a   : > { %v6459_v52 = vpop.permute.xlu1 %6458  ;;  %v14469_v8 = vmax.f32 %v14467_v49, %v14468_v60 }
 0x82b   : > { %9384 = vpow2.f32 %v6194_v50  ;;  %8145 = vmatpush3.bf16.msra.mxu0 %v6459_v52  ;;  %v14472_v50 = vld [vmem:[#allocation32_spill] sm:$0xff]  ;;  %v14474_v52 = vld [vmem:[#allocation131_spill] sm:$0xff] }
 0x82c   : > { %9386 = vpow2.f32 %v6196_v43 }
 0x82e   : > { %v6477_v45 = vpop.permute.xlu1 %6476 }
 0x82f   : > { %8146 = vmatprep.subr.bf16.mxu0 %v6477_v45  ;;  %v14475_v45 = vld [vmem:[#allocation96_spill] sm:$0xff] }
 0x830   : > { %8147 = vmatpush3.bf16.msra.mxu0 %v6461_v42  ;;  %v14476_v42 = vmax.f32 %v14474_v52, %v14475_v45  ;;  %v14487_v45 = vld [vmem:[#allocation132_spill] sm:$0xff] }
 0x831   : > { %v9381_v46 = vpop.eup %9380 }
 0x832   : > { %v9383_v51 = vpop.eup %9382  ;;  %v4949_v29 = vpack.c.bf16 %v9373_v7, %v9381_v46 }
 0x833   : > { %v4950_v0 = vpack.c.bf16 %v9375_v36, %v9383_v51  ;;  %v12707_v59 = vadd.f32 %v9383_v51, %v9381_v46  ;;  %v14471_v36 = vld [vmem:[#allocation26_spill] sm:$0xff]  ;;  %v14477_v46 = vld [vmem:[#allocation91_spill] sm:$0xff]  ;;  %v14478_v51 = vld [vmem:[#allocation113_spill] sm:$0xff] }
 0x834   : > { %v14473_v43 = vmax.f32 %v14471_v36, %v14472_v50 }
 0x835   : > { %v12709_v17 = vpop.eup %9384  ;;  %5131 = vmatprep.mubr.bf16.mxu1 %v4950_v0  ;;  %v14480_v0 = vld [vmem:[#allocation138_spill] sm:$0xff] }
 0x836   : > { %v12711_v38 = vpop.eup %9386  ;;  %5132 = vmatmul.mubr.bf16.gmra.mrb[244].mxu1 %v4949_v29  ;;  %4623 = vmax.xlane.f32.xlu0 %v14469_v8  ;;  %v14479_v29 = vmax.f32 %v14477_v46, %v14478_v51  ;;  %v14481_v8 = vld [vmem:[#allocation120_spill] sm:$0xff] }
 0x837   : > { %v12722_v7 = vadd.f32 %v12711_v38, %v12709_v17  ;;  %v14482_v5 = vmax.f32 %v14480_v0, %v14481_v8  ;;  %v14489_v0 = vld [vmem:[#allocation139_spill] sm:$0xff] }
 0x839   : > { %14470 = vst [vmem:[#allocation126_spill] sm:$0xff] %v12722_v7  ;;  %v14483_v7 = vld [vmem:[#allocation99_spill] sm:$0xff] }
 0x83a   : > { %6047 = vmax.xlane.f32.xlu0 %v14473_v43  ;;  %v14485_v43 = vmax.f32 %v14483_v7, %v14484_v53 }
 0x83e   : > { %4626 = vmax.xlane.f32.xlu0 %v14476_v42  ;;  %v14486_v42 = vld [vmem:[#allocation125_spill] sm:$0xff] }
 0x83f   : > { %v14488_v52 = vmax.f32 %v14486_v42, %v14487_v45  ;;  %v14520_v45 = vld [vmem:[#allocation103_spill] sm:$0xff] }
 0x842   : > { %6053 = vmax.xlane.f32.xlu0 %v14479_v29 }
 0x846   : > { %4632 = vmax.xlane.f32.xlu0 %v14482_v5 }
 0x849   : > { %v4612_v39 = vpop.xlane.xlu0 %4611 }
 0x84a   : > { %v4685_v27 = vsub.f32 %v14434_v13, %v4612_v39  ;;  %v4686_v22 = vsub.f32 %v14435_v1, %v4612_v39  ;;  %6059 = vmax.xlane.f32.xlu0 %v14485_v43  ;;  %v14490_v13 = vld [vmem:[#allocation80_spill] sm:$0xff]  ;;  %v14492_v43 = vld [vmem:[#allocation27_spill] sm:$0xff] }
 0x84b   : > { %v14491_v51 = vmax.f32 %v14489_v0, %v14490_v13  ;;  %v14503_v13 = vld [vmem:[#allocation114_spill] sm:$0xff]  ;;  %v14507_v0 = vld [vmem:[#allocation44_spill] sm:$0xff] }
 0x84c   : > { %v4791_v44 = vmul.f32 1.442695, %v4685_v27  ;;  %v4793_v30 = vmul.f32 1.442695, %v4686_v22  ;;  %v14493_v27 = vld [vmem:[#allocation33_spill] sm:$0xff] }
 0x84d   : > { %4620 = vmax.xlane.f32.xlu1 %v14488_v52  ;;  %v6036_v29 = vpop.xlane.xlu0 %6035  ;;  %v14494_v22 = vmax.f32 %v14492_v43, %v14493_v27  ;;  %v14495_v52 = vld [vmem:[#allocation68_spill] sm:$0xff]  ;;  %v14504_v27 = vld [vmem:[#allocation98_spill] sm:$0xff] }
 0x84e   : > { %9388 = vpow2.f32 %v4791_v44  ;;  %v6126_v8 = vsub.f32 %v12278_v3, %v6036_v29  ;;  %v6127_v5 = vsub.f32 %v12284_v26, %v6036_v29  ;;  %4638 = vmax.xlane.f32.xlu0 %v14491_v51  ;;  %v14496_v44 = vmax.f32 %v12382_v4, %v14495_v52  ;;  %v14497_v3 = vld [vmem:[#allocation116_spill] sm:$0xff]  ;;  %v14498_v26 = vld [vmem:[#allocation127_spill] sm:$0xff]  ;;  %v14506_v43 = vld [vmem:[#allocation38_spill] sm:$0xff] }
 0x84f   : > { %9390 = vpow2.f32 %v4793_v30  ;;  %v14499_v29 = vmax.f32 %v14497_v3, %v14498_v26  ;;  %v14500_v51 = vld [vmem:[#allocation31_spill] sm:$0xff]  ;;  %v14501_v30 = vld [vmem:[#allocation37_spill] sm:$0xff]  ;;  %v14508_v52 = vmax.f32 %v14506_v43, %v14507_v0 }
 0x850   : > { %v6198_v1 = vmul.f32 1.442695, %v6126_v8  ;;  %v6200_v39 = vmul.f32 1.442695, %v6127_v5  ;;  %v14502_v8 = vmax.f32 %v14500_v51, %v14501_v30  ;;  %v14513_v51 = vld [vmem:[#allocation117_spill] sm:$0xff] }
 0x851   : > { %6050 = vmax.xlane.f32.xlu1 %v14494_v22  ;;  %v6479_v53 = vpop.permute.xlu0 %6478  ;;  %v14505_v22 = vmax.f32 %v14503_v13, %v14504_v27  ;;  %v14516_v27 = vld [vmem:[#allocation102_spill] sm:$0xff] }
 0x852   : > { %9392 = vpow2.f32 %v6198_v1  ;;  %6065 = vmax.xlane.f32.xlu0 %v14496_v44  ;;  %8148 = vmatprep.subr.bf16.mxu0 %v6479_v53  ;;  %v14509_v44 = vld [vmem:[#allocation136_spill] sm:$0xff]  ;;  %v14517_v13 = vld [vmem:[#allocation86_spill] sm:$0xff] }
 0x853   : > { %9394 = vpow2.f32 %v6200_v39  ;;  %v14518_v4 = vmax.f32 %v14516_v27, %v14517_v13 }
 0x855   : > { %4629 = vmax.xlane.f32.xlu1 %v14499_v29  ;;  %v14510_v29 = vld [vmem:[#allocation140_spill] sm:$0xff] }
 0x856   : > { %6071 = vmax.xlane.f32.xlu0 %v14502_v8  ;;  %v14511_v26 = vmax.f32 %v14509_v44, %v14510_v29  ;;  %v14512_v8 = vld [vmem:[#allocation115_spill] sm:$0xff]  ;;  %v14519_v44 = vld [vmem:[#allocation60_spill] sm:$0xff] }
 0x857   : > { %v14514_v3 = vmax.f32 %v14512_v8, %v14513_v51  ;;  %v14521_v42 = vmax.f32 %v14519_v44, %v14520_v45  ;;  %v14522_v8 = vld [vmem:[#allocation144_spill] sm:$0xff] }
 0x858   : > { %v9389_v5 = vpop.eup %9388  ;;  %v14529_v45 = vld [vmem:[#allocation36_spill] sm:$0xff] }
 0x859   : > { %6056 = vmax.xlane.f32.xlu1 %v14505_v22  ;;  %v9391_v1 = vpop.eup %9390 }
 0x85a   : > { %6077 = vmax.xlane.f32.xlu0 %v14508_v52  ;;  %v12767_v53 = vadd.f32 %v9391_v1, %v9389_v5 }
 0x85c   : > { %v12769_v39 = vpop.eup %9392 }
 0x85d   : > { %4635 = vmax.xlane.f32.xlu1 %v14511_v26  ;;  %v12774_v30 = vpop.eup %9394 }
 0x85e   : > { %6083 = vmax.xlane.f32.xlu0 %v14514_v3  ;;  %v12781_v22 = vadd.f32 %v12774_v30, %v12769_v39 }
 0x85f   : > { %v4609_v0 = vpop.xlane.xlu1 %4608 }
 0x860   : > { %14515 = vst [vmem:[#allocation128_spill] sm:$0xff] %v12781_v22  ;;  %v4683_v52 = vsub.f32 %v14438_v41, %v4609_v0  ;;  %v4684_v43 = vsub.f32 %v14439_v16, %v4609_v0  ;;  %v14523_v41 = vld [vmem:[#allocation141_spill] sm:$0xff] }
 0x861   : > { %6062 = vmax.xlane.f32.xlu1 %v14518_v4  ;;  %v14524_v7 = vmax.f32 %v14522_v8, %v14523_v41  ;;  %v14525_v4 = vld [vmem:[#allocation110_spill] sm:$0xff] }
 0x862   : > { %v4787_v26 = vmul.f32 1.442695, %v4683_v52  ;;  %v4789_v29 = vmul.f32 1.442695, %v4684_v43  ;;  %6089 = vmax.xlane.f32.xlu0 %v14521_v42  ;;  %v14526_v52 = vld [vmem:[#allocation106_spill] sm:$0xff] }
 0x863   : > { %v14527_v43 = vmax.f32 %v14525_v4, %v14526_v52  ;;  %v14528_v42 = vld [vmem:[#allocation30_spill] sm:$0xff] }
 0x864   : > { %v6039_v3 = vpop.xlane.xlu1 %6038  ;;  %9396 = vpow2.f32 %v4787_v26  ;;  %v14530_v26 = vmax.f32 %v14528_v42, %v14529_v45  ;;  %v14539_v45 = vld [vmem:[#allocation48_spill] sm:$0xff] }
 0x865   : > { %v6128_v51 = vsub.f32 %v12291_v24, %v6039_v3  ;;  %v6129_v22 = vsub.f32 %v12293_v20, %v6039_v3  ;;  %4641 = vmax.xlane.f32.xlu1 %v14524_v7  ;;  %9398 = vpow2.f32 %v4789_v29  ;;  %v14531_v24 = vld [vmem:[#allocation46_spill] sm:$0xff]  ;;  %v6465_v29 = vpop.permute.xlu0 %6464 }
 0x866   : > { %6095 = vmax.xlane.f32.xlu0 %v14527_v43  ;;  %v14532_v20 = vld [vmem:[#allocation50_spill] sm:$0xff] }
 0x867   : > { %v6202_v16 = vmul.f32 1.442695, %v6128_v51  ;;  %v6204_v0 = vmul.f32 1.442695, %v6129_v22  ;;  %v14533_v3 = vmax.f32 %v14531_v24, %v14532_v20  ;;  %v14534_v51 = vld [vmem:[#allocation66_spill] sm:$0xff]  ;;  %v14535_v22 = vld [vmem:[#allocation35_spill] sm:$0xff] }
 0x868   : > { %v6463_v13 = vpop.permute.xlu1 %6462  ;;  %v14536_v41 = vmax.f32 %v14534_v51, %v14535_v22 }
 0x869   : > { %9400 = vpow2.f32 %v6202_v16  ;;  %6068 = vmax.xlane.f32.xlu1 %v14530_v26  ;;  %8149 = vmatpush3.bf16.msra.mxu0 %v6463_v13  ;;  %v14537_v16 = vmax.f32 %v12504_v37, %v12506_v14  ;;  %v14558_v37 = vld [vmem:[#allocation121_spill] sm:$0xff] }
 0x86a   : > { %9402 = vpow2.f32 %v6204_v0  ;;  %6101 = vmax.xlane.f32.xlu0 %v14533_v3  ;;  %v14538_v0 = vld [vmem:[#allocation42_spill] sm:$0xff] }
 0x86b   : > { %v14540_v42 = vmax.f32 %v14538_v0, %v14539_v45 }
 0x86c   : > { %v6481_v7 = vpop.permute.xlu1 %6480 }
 0x86d   : > { %6074 = vmax.xlane.f32.xlu1 %v14536_v41  ;;  %8150 = vmatprep.subr.bf16.mxu0 %v6481_v7  ;;  %v14541_v41 = vmax.f32 %v12516_v40, %v12518_v33  ;;  %v14550_v33 = vld [vmem:[#allocation28_spill] sm:$0xff] }
 0x86e   : > { %8151 = vmatpush3.bf16.msra.mxu0 %v6465_v29  ;;  %v9397_v43 = vpop.eup %9396  ;;  %6107 = vmax.xlane.f32.xlu0 %v14537_v16  ;;  %v14543_v16 = vld [vmem:[#allocation56_spill] sm:$0xff]  ;;  %v14552_v29 = vld [vmem:[#allocation34_spill] sm:$0xff] }
 0x86f   : > { %v9399_v26 = vpop.eup %9398  ;;  %v4951_v13 = vpack.c.bf16 %v9389_v5, %v9397_v43  ;;  %v14542_v5 = vld [vmem:[#allocation52_spill] sm:$0xff] }
 0x870   : > { %v4952_v3 = vpack.c.bf16 %v9391_v1, %v9399_v26  ;;  %v12814_v20 = vadd.f32 %v9399_v26, %v9397_v43  ;;  %v14544_v45 = vmax.f32 %v14542_v5, %v14543_v16  ;;  %v14546_v43 = vld [vmem:[#allocation104_spill] sm:$0xff]  ;;  %v14547_v26 = vld [vmem:[#allocation105_spill] sm:$0xff] }
 0x871   : > { %6080 = vmax.xlane.f32.xlu1 %v14540_v42  ;;  %v14555_v1 = vld [vmem:[#allocation40_spill] sm:$0xff] }
 0x872   : > { %5139 = vmatprep.mubr.bf16.mxu1 %v4952_v3  ;;  %6113 = vmax.xlane.f32.xlu0 %v14541_v41  ;;  %v14548_v3 = vld [vmem:[#allocation109_spill] sm:$0xff] }
 0x873   : > { %v12816_v24 = vpop.eup %9400  ;;  %5140 = vmatmul.mubr.bf16.gmra.mrb[248].mxu1 %v4951_v13  ;;  %v14549_v41 = vmax.f32 %v14547_v26, %v14548_v3  ;;  %v14551_v13 = vld [vmem:[#allocation108_spill] sm:$0xff] }
 0x874   : > { %v12821_v7 = vpop.eup %9402  ;;  %v14553_v40 = vmax.f32 %v14551_v13, %v14552_v29 }
 0x875   : > { %6086 = vmax.xlane.f32.xlu1 %v14544_v45  ;;  %v12832_v42 = vadd.f32 %v12821_v7, %v12816_v24 }
 0x876   : > { %4836 = vadd.xlane.f32.xlu0 %v14546_v43  ;;  %v14557_v43 = vld [vmem:[#allocation55_spill] sm:$0xff] }
 0x877   : > { %14545 = vst [vmem:[#allocation45_spill] sm:$0xff] %v12832_v42  ;;  %v14559_v3 = vmax.f32 %v14557_v43, %v14558_v37 }
 0x879   : > { %6092 = vmax.xlane.f32.xlu1 %v14549_v41 }
 0x87a   : > { %4842 = vadd.xlane.f32.xlu0 %v14550_v33  ;;  %v14560_v33 = vld [vmem:[#allocation124_spill] sm:$0xff] }
 0x87b   : > { %v14561_v41 = vmax.f32 %v12510_v55, %v14560_v33 }
 0x87c   : > { %v7978_v45 = vpop.f32.mrb[208].mxu1 }
 0x87d   : > { %6098 = vmax.xlane.f32.xlu1 %v14553_v40  ;;  %v7979_v16 = vpop.f32.mrb[209].mxu1 }
 0x87e   : > { %v12842_v5 = vadd.f32 %v7979_v16, %v7978_v45  ;;  %4848 = vadd.xlane.f32.xlu0 %v14555_v1  ;;  %v7981_v0 = vpop.f32.mrb[210].mxu1 }
 0x87f   : > { %v7982_v42 = vpop.f32.mrb[211].mxu1 }
 0x880   : > { %14554 = vst [vmem:[#allocation59_spill] sm:$0xff] %v12842_v5  ;;  %v12845_v14 = vadd.f32 %v7982_v42, %v7981_v0 }
 0x881   : > { %6104 = vmax.xlane.f32.xlu1 %v14559_v3 }
 0x882   : > { %14556 = vst [vmem:[#allocation65_spill] sm:$0xff] %v12845_v14  ;;  %4854 = vadd.xlane.f32.xlu0 %v12536_v21  ;;  %v14563_v21 = vmax.f32 %v12522_v35, %v12524_v31 }
 0x884   : > { %v7984_v40 = vpop.f32.mrb[212].mxu1 }
 0x885   : > { %6110 = vmax.xlane.f32.xlu1 %v14561_v41  ;;  %v7985_v29 = vpop.f32.mrb[213].mxu1 }
 0x886   : > { %v12854_v16 = vadd.f32 %v7985_v29, %v7984_v40  ;;  %4860 = vadd.xlane.f32.xlu0 %v12639_v9  ;;  %v7987_v1 = vpop.f32.mrb[214].mxu1  ;;  %v4618_v45 = vpop.xlane.xlu0 %4617 }
 0x887   : > { %v4689_v0 = vsub.f32 %v14449_v47, %v4618_v45  ;;  %v4690_v42 = vsub.f32 %v14450_v19, %v4618_v45  ;;  %v7988_v14 = vpop.f32.mrb[215].mxu1  ;;  %v14564_v47 = vld [vmem:[#allocation145_spill] sm:$0xff] }
 0x888   : > { %v12859_v3 = vadd.f32 %v7988_v14, %v7987_v1 }
 0x889   : > { %6116 = vmax.xlane.f32.xlu1 %v14563_v21  ;;  %v4799_v41 = vmul.f32 1.442695, %v4689_v0  ;;  %v4801_v5 = vmul.f32 1.442695, %v4690_v42 }
 0x88a   : > { %14562 = vst [vmem:[#allocation135_spill] sm:$0xff] %v12859_v3  ;;  %4866 = vadd.xlane.f32.xlu0 %v12584_v23  ;;  %v6042_v29 = vpop.xlane.xlu0 %6041 }
 0x88b   : > { %9404 = vpow2.f32 %v4799_v41  ;;  %v6130_v9 = vsub.f32 %v14453_v58, %v6042_v29  ;;  %v6131_v40 = vsub.f32 %v14454_v63, %v6042_v29  ;;  %v14565_v63 = vld [vmem:[#allocation142_spill] sm:$0xff] }
 0x88c   : > { %9406 = vpow2.f32 %v4801_v5  ;;  %v7990_v19 = vpop.f32.mrb[216].mxu1  ;;  %v14566_v5 = vld [vmem:[#allocation101_spill] sm:$0xff] }
 0x88d   : > { %4839 = vadd.xlane.f32.xlu1 %v14564_v47  ;;  %v6206_v14 = vmul.f32 1.442695, %v6130_v9  ;;  %v6208_v1 = vmul.f32 1.442695, %v6131_v40  ;;  %v7991_v45 = vpop.f32.mrb[217].mxu1 }
 0x88e   : > { %v12868_v3 = vadd.f32 %v7991_v45, %v7990_v19  ;;  %v7993_v21 = vpop.f32.mrb[218].mxu1  ;;  %4872 = vadd.xlane.f32.xlu0 %v12599_v6  ;;  %v6483_v0 = vpop.permute.xlu0 %6482 }
 0x88f   : > { %9408 = vpow2.f32 %v6206_v14  ;;  %v7994_v23 = vpop.f32.mrb[219].mxu1  ;;  %8152 = vmatprep.subr.bf16.mxu0 %v6483_v0 }
 0x890   : > { %9410 = vpow2.f32 %v6208_v1  ;;  %v12871_v58 = vadd.f32 %v7994_v23, %v7993_v21  ;;  %v14567_v1 = vld [vmem:[#allocation119_spill] sm:$0xff] }
 0x891   : > { %4845 = vadd.xlane.f32.xlu1 %v14565_v63 }
 0x892   : > { %4878 = vadd.xlane.f32.xlu0 %v12611_v32 }
 0x894   : > { %v7996_v42 = vpop.f32.mrb[220].mxu1 }
 0x895   : > { %4851 = vadd.xlane.f32.xlu1 %v14566_v5  ;;  %v9405_v41 = vpop.eup %9404  ;;  %v7997_v29 = vpop.f32.mrb[221].mxu1 }
 0x896   : > { %v9407_v9 = vpop.eup %9406  ;;  %v12876_v40 = vadd.f32 %v7997_v29, %v7996_v42  ;;  %v7999_v6 = vpop.f32.mrb[222].mxu1  ;;  %4884 = vadd.xlane.f32.xlu0 %v12621_v11 }
 0x897   : > { %v8000_v47 = vpop.f32.mrb[223].mxu1  ;;  %v4904_v19 = vadd.f32 %v9407_v9, %v9405_v41 }
 0x898   : > { %v12879_v14 = vadd.f32 %v8000_v47, %v7999_v6 }
 0x899   : > { %4857 = vadd.xlane.f32.xlu1 %v14567_v1  ;;  %v12882_v45 = vpop.eup %9408 }
 0x89a   : > { %v9411_v32 = vpop.eup %9410  ;;  %4890 = vadd.xlane.f32.xlu0 %v12707_v59 }
 0x89b   : > { %v12886_v21 = vadd.f32 %v9411_v32, %v12882_v45 }
 0x89d   : > { %v4615_v0 = vpop.xlane.xlu1 %4614  ;;  %4863 = vadd.xlane.f32.xlu1 %v12571_v62 }
 0x89e   : > { %v4687_v23 = vsub.f32 %v14456_v56, %v4615_v0  ;;  %v4688_v11 = vsub.f32 %v14457_v25, %v4615_v0  ;;  %4896 = vadd.xlane.f32.xlu0 %v12814_v20  ;;  %v8904_v56 = vld [vmem:[#allocation14 + $0x20] sm:$0xff]   ;;  %v6469_v20 = vpop.permute.xlu0 %6468 }
 0x89f   : > { %8486 = vmatprep.subr.bf16.mxu1 %v8904_v56 }
 0x8a0   : > { %v4795_v63 = vmul.f32 1.442695, %v4687_v23  ;;  %v4797_v5 = vmul.f32 1.442695, %v4688_v11  ;;  %8487 = vmatpush3.bf16.msra.mxu1 %v8904_v56 }
 0x8a1   : > { %v6045_v42 = vpop.xlane.xlu1 %6044  ;;  %4869 = vadd.xlane.f32.xlu1 %v12647_v61 }
 0x8a2   : > { %9412 = vpow2.f32 %v4795_v63  ;;  %v6132_v59 = vsub.f32 %v14459_v54, %v6045_v42  ;;  %v6133_v29 = vsub.f32 %v14460_v57, %v6045_v42  ;;  %v8905_v54 = vld [vmem:[#allocation14 + $0x28] sm:$0xff]  }
 0x8a3   : > { %9414 = vpow2.f32 %v4797_v5  ;;  %8488 = vmatprep.subr.bf16.mxu1 %v8905_v54 }
 0x8a4   : > { %v6210_v6 = vmul.f32 1.442695, %v6132_v59  ;;  %v6212_v47 = vmul.f32 1.442695, %v6133_v29  ;;  %8489 = vmatpush3.bf16.msra.mxu1 %v8905_v54 }
 0x8a5   : > { %v6467_v62 = vpop.permute.xlu1 %6466  ;;  %4875 = vadd.xlane.f32.xlu1 %v12651_v2  ;;  %v14568_v2 = vpack.c.bf16 %v12661_v15, %v12623_v28  ;;  %v14570_v15 = vpack.c.bf16 %v12709_v17, %v12691_v48 }
 0x8a6   : > { %9416 = vpow2.f32 %v6210_v6  ;;  %8153 = vmatpush3.bf16.msra.mxu0 %v6467_v62 }
 0x8a7   : > { %9418 = vpow2.f32 %v6212_v47 }
 0x8a9   : > { %v6485_v25 = vpop.permute.xlu1 %6484  ;;  %4881 = vadd.xlane.f32.xlu1 %v12655_v12  ;;  %v14569_v12 = vpack.c.bf16 %v12711_v38, %v12693_v34  ;;  %v14571_v34 = vpack.c.bf16 %v12821_v7, %v12774_v30 }
 0x8aa   : > { %8154 = vmatprep.subr.bf16.mxu0 %v6485_v25 }
 0x8ab   : > { %8155 = vmatpush3.bf16.msra.mxu0 %v6469_v20 }
 0x8ac   : > { %v9413_v61 = vpop.eup %9412 }
 0x8ad   : > { %v9415_v57 = vpop.eup %9414  ;;  %4887 = vadd.xlane.f32.xlu1 %v12659_v18  ;;  %v4953_v1 = vpack.c.bf16 %v9405_v41, %v9413_v61 }
 0x8ae   : > { %6535 = vmatmul.mubr.bf16.vlgmr.msra.gmra.mrb[48].mxu0 %v14568_v2  ;;  %v4901_v0 = vadd.f32 %v9415_v57, %v9413_v61  ;;  %v4954_v23 = vpack.c.bf16 %v9407_v9, %v9415_v57  ;;  %v14572_v9 = vpack.c.bf16 %v12816_v24, %v12769_v39  ;;  %v14575_v61 = vld [vmem:[#allocation131_spill] sm:$0xff]  ;;  %v14576_v57 = vld [vmem:[#allocation96_spill] sm:$0xff] }
 0x8af   : > { %6542 = vmatprep.mubr.bf16.mxu0 %v14569_v12 }
 0x8b0   : > { %v9417_v11 = vpop.eup %9416  ;;  %4902 = vadd.xlane.f32.xlu0 %v4901_v0  ;;  %5147 = vmatprep.mubr.bf16.mxu1 %v4954_v23 }
 0x8b1   : > { %v9419_v63 = vpop.eup %9418  ;;  %v6412_v5 = vpack.c.bf16 %v9417_v11, %v12882_v45  ;;  %5148 = vmatmul.mubr.bf16.gmra.mrb[252].mxu1 %v4953_v1  ;;  %4893 = vadd.xlane.f32.xlu1 %v12689_v10 }
 0x8b2   : > { %v6413_v18 = vpack.c.bf16 %v9419_v63, %v9411_v32  ;;  %v12906_v28 = vadd.f32 %v9419_v63, %v9417_v11 }
 0x8b5   : > { %4899 = vadd.xlane.f32.xlu1 %v12767_v53 }
 0x8b6   : > { %6543 = vmatmul.mubr.bf16.gmra.mrb[52].mxu0 %v14570_v15 }
 0x8b7   : > { %6550 = vmatprep.mubr.bf16.mxu0 %v14571_v34 }
 0x8b9   : > { %4905 = vadd.xlane.f32.xlu1 %v4904_v19 }
 0x8bc   : > { %v8002_v38 = vpop.f32.mrb[224].mxu1 }
 0x8bd   : > { %v8003_v41 = vpop.f32.mrb[225].mxu1 }
 0x8be   : > { %6551 = vmatmul.mubr.bf16.gmra.mrb[56].mxu0 %v14572_v9  ;;  %v12918_v10 = vadd.f32 %v8003_v41, %v8002_v38  ;;  %v8005_v45 = vpop.f32.mrb[226].mxu1 }
 0x8bf   : > { %6558 = vmatprep.mubr.bf16.mxu0 %v6413_v18  ;;  %v8006_v53 = vpop.f32.mrb[227].mxu1  ;;  %v14579_v18 = vld [vmem:[#allocation113_spill] sm:$0xff] }
 0x8c0   : > { %v12920_v32 = vadd.f32 %v8006_v53, %v8005_v45 }
 0x8c3   : > { %v4624_v48 = vpop.xlane.xlu0 %4623 }
 0x8c4   : > { %v8008_v17 = vpop.f32.mrb[228].mxu1  ;;  %v4693_v42 = vsub.f32 %v14467_v49, %v4624_v48  ;;  %v4694_v30 = vsub.f32 %v14468_v60, %v4624_v48  ;;  %v14580_v48 = vld [vmem:[#allocation138_spill] sm:$0xff] }
 0x8c5   : > { %v8009_v7 = vpop.f32.mrb[229].mxu1 }
 0x8c6   : > { %6559 = vmatmul.mubr.bf16.gmra.mrb[60].mxu0 %v6412_v5  ;;  %v4807_v19 = vmul.f32 1.442695, %v4693_v42  ;;  %v4809_v59 = vmul.f32 1.442695, %v4694_v30  ;;  %v12924_v29 = vadd.f32 %v8009_v7, %v8008_v17  ;;  %v8011_v39 = vpop.f32.mrb[230].mxu1  ;;  %v14581_v42 = vld [vmem:[#allocation120_spill] sm:$0xff] }
 0x8c7   : > { %v8012_v24 = vpop.f32.mrb[231].mxu1  ;;  %v6048_v6 = vpop.xlane.xlu0 %6047 }
 0x8c8   : > { %14573 = vst [vmem:[#allocation137_spill] sm:$0xff] %v12924_v29  ;;  %9420 = vpow2.f32 %v4807_v19  ;;  %v12926_v47 = vadd.f32 %v8012_v24, %v8011_v39  ;;  %v6134_v62 = vsub.f32 %v14471_v36, %v6048_v6  ;;  %v6135_v56 = vsub.f32 %v14472_v50, %v6048_v6 }
 0x8c9   : > { %9422 = vpow2.f32 %v4809_v59 }
 0x8ca   : > { %14574 = vst [vmem:[#allocation133_spill] sm:$0xff] %v12926_v47  ;;  %v6214_v49 = vmul.f32 1.442695, %v6134_v62  ;;  %v6216_v25 = vmul.f32 1.442695, %v6135_v56  ;;  %v14606_v47 = vld [vmem:[#allocation115_spill] sm:$0xff] }
 0x8cb   : > { %v4627_v60 = vpop.xlane.xlu0 %4626 }
 0x8cc   : > { %9424 = vpow2.f32 %v6214_v49  ;;  %v8014_v20 = vpop.f32.mrb[232].mxu1  ;;  %v4695_v54 = vsub.f32 %v14575_v61, %v4627_v60  ;;  %v4696_v1 = vsub.f32 %v14576_v57, %v4627_v60  ;;  %v14584_v60 = vld [vmem:[#allocation99_spill] sm:$0xff]  ;;  %v14585_v61 = vld [vmem:[#allocation77_spill] sm:$0xff] }
 0x8cd   : > { %9426 = vpow2.f32 %v6216_v25  ;;  %v8015_v2 = vpop.f32.mrb[233].mxu1 }
 0x8ce   : > { %v4811_v0 = vmul.f32 1.442695, %v4695_v54  ;;  %v4813_v23 = vmul.f32 1.442695, %v4696_v1  ;;  %v12932_v12 = vadd.f32 %v8015_v2, %v8014_v20  ;;  %v8017_v11 = vpop.f32.mrb[234].mxu1 }
 0x8cf   : > { %v8018_v36 = vpop.f32.mrb[235].mxu1  ;;  %v6054_v63 = vpop.xlane.xlu0 %6053 }
 0x8d0   : > { %14577 = vst [vmem:[#allocation134_spill] sm:$0xff] %v12932_v12  ;;  %9428 = vpow2.f32 %v4811_v0  ;;  %v12934_v50 = vadd.f32 %v8018_v36, %v8017_v11  ;;  %v6138_v5 = vsub.f32 %v14477_v46, %v6054_v63  ;;  %v6139_v15 = vsub.f32 %v14579_v18, %v6054_v63  ;;  %v14586_v11 = vld [vmem:[#allocation125_spill] sm:$0xff]  ;;  %v14587_v63 = vld [vmem:[#allocation132_spill] sm:$0xff] }
 0x8d1   : > { %9430 = vpow2.f32 %v4813_v23 }
 0x8d2   : > { %14578 = vst [vmem:[#allocation95_spill] sm:$0xff] %v12934_v50  ;;  %v12938_v34 = vpop.eup %9420  ;;  %v6222_v38 = vmul.f32 1.442695, %v6138_v5  ;;  %v6224_v41 = vmul.f32 1.442695, %v6139_v15 }
 0x8d3   : > { %v12940_v9 = vpop.eup %9422  ;;  %v4633_v45 = vpop.xlane.xlu0 %4632 }
 0x8d4   : > { %9432 = vpow2.f32 %v6222_v38  ;;  %v8020_v53 = vpop.f32.mrb[236].mxu1  ;;  %v4699_v17 = vsub.f32 %v14580_v48, %v4633_v45  ;;  %v4700_v30 = vsub.f32 %v14581_v42, %v4633_v45  ;;  %v4910_v7 = vadd.f32 %v12940_v9, %v12938_v34 }
 0x8d5   : > { %9434 = vpow2.f32 %v6224_v41  ;;  %v8021_v46 = vpop.f32.mrb[237].mxu1 }
 0x8d6   : > { %v12946_v19 = vpop.eup %9424  ;;  %v4819_v59 = vmul.f32 1.442695, %v4699_v17  ;;  %v4821_v39 = vmul.f32 1.442695, %v4700_v30  ;;  %v12948_v24 = vadd.f32 %v8021_v46, %v8020_v53  ;;  %v8023_v6 = vpop.f32.mrb[238].mxu1  ;;  %4911 = vadd.xlane.f32.xlu1 %v4910_v7  ;;  %v14588_v53 = vld [vmem:[#allocation139_spill] sm:$0xff] }
 0x8d7   : > { %v12950_v62 = vpop.eup %9426  ;;  %v8024_v56 = vpop.f32.mrb[239].mxu1  ;;  %v14589_v17 = vld [vmem:[#allocation80_spill] sm:$0xff] }
 0x8d8   : > { %14582 = vst [vmem:[#allocation70_spill] sm:$0xff] %v12948_v24  ;;  %v6060_v49 = vpop.xlane.xlu0 %6059  ;;  %9436 = vpow2.f32 %v4819_v59  ;;  %v12952_v25 = vadd.f32 %v8024_v56, %v8023_v6  ;;  %v12958_v1 = vadd.f32 %v12950_v62, %v12946_v19  ;;  %v14591_v56 = vld [vmem:[#allocation27_spill] sm:$0xff] }
 0x8d9   : > { %v6142_v20 = vsub.f32 %v14584_v60, %v6060_v49  ;;  %v6143_v54 = vsub.f32 %v14585_v61, %v6060_v49  ;;  %9438 = vpow2.f32 %v4821_v39 }
 0x8da   : > { %14583 = vst [vmem:[#allocation71_spill] sm:$0xff] %v12952_v25  ;;  %v4621_v57 = vpop.xlane.xlu1 %4620  ;;  %v12960_v2 = vpop.eup %9428 }
 0x8db   : > { %v6230_v0 = vmul.f32 1.442695, %v6142_v20  ;;  %v6232_v23 = vmul.f32 1.442695, %v6143_v54  ;;  %v4691_v36 = vsub.f32 %v14586_v11, %v4621_v57  ;;  %v4692_v5 = vsub.f32 %v14587_v63, %v4621_v57  ;;  %v12964_v18 = vpop.eup %9430  ;;  %v14592_v54 = vld [vmem:[#allocation33_spill] sm:$0xff]  ;;  %v14594_v63 = vld [vmem:[#allocation62_spill] sm:$0xff] }
 0x8dc   : > { %v4639_v15 = vpop.xlane.xlu0 %4638  ;;  %v8026_v45 = vpop.f32.mrb[240].mxu1  ;;  %v12970_v46 = vadd.f32 %v12964_v18, %v12960_v2 }
 0x8dd   : > { %9440 = vpow2.f32 %v6230_v0  ;;  %v4803_v38 = vmul.f32 1.442695, %v4691_v36  ;;  %v4805_v41 = vmul.f32 1.442695, %v4692_v5  ;;  %v4703_v48 = vsub.f32 %v14588_v53, %v4639_v15  ;;  %v8027_v30 = vpop.f32.mrb[241].mxu1 }
 0x8de   : > { %9442 = vpow2.f32 %v6232_v23  ;;  %v4704_v42 = vsub.f32 %v14589_v17, %v4639_v15  ;;  %v6051_v7 = vpop.xlane.xlu1 %6050  ;;  %v12972_v59 = vpop.eup %9432  ;;  %v12974_v6 = vadd.f32 %v8027_v30, %v8026_v45 }
 0x8df   : > { %9444 = vpow2.f32 %v4803_v38  ;;  %v4827_v39 = vmul.f32 1.442695, %v4703_v48  ;;  %v6136_v49 = vsub.f32 %v14591_v56, %v6051_v7  ;;  %v8029_v60 = vpop.f32.mrb[242].mxu1  ;;  %v12977_v20 = vpop.eup %9434  ;;  %v6137_v57 = vsub.f32 %v14592_v54, %v6051_v7  ;;  %v14595_v38 = vld [vmem:[#allocation68_spill] sm:$0xff]  ;;  %v14597_v7 = vld [vmem:[#allocation127_spill] sm:$0xff] }
 0x8e0   : > { %14590 = vst [vmem:[#allocation81_spill] sm:$0xff] %v12974_v6  ;;  %9446 = vpow2.f32 %v4805_v41  ;;  %v4829_v61 = vmul.f32 1.442695, %v4704_v42  ;;  %v8030_v0 = vpop.f32.mrb[243].mxu1  ;;  %v6066_v23 = vpop.xlane.xlu0 %6065  ;;  %v12986_v48 = vadd.f32 %v12977_v20, %v12972_v59  ;;  %v14596_v42 = vld [vmem:[#allocation116_spill] sm:$0xff] }
 0x8e1   : > { %9448 = vpow2.f32 %v4827_v39  ;;  %v6218_v11 = vmul.f32 1.442695, %v6136_v49  ;;  %v12980_v36 = vadd.f32 %v8030_v0, %v8029_v60  ;;  %v6146_v5 = vsub.f32 %v14594_v63, %v6066_v23 }
 0x8e2   : > { %9450 = vpow2.f32 %v4829_v61  ;;  %v6220_v15 = vmul.f32 1.442695, %v6137_v57  ;;  %v6147_v45 = vsub.f32 %v14595_v38, %v6066_v23  ;;  %v4630_v53 = vpop.xlane.xlu1 %4629  ;;  %v12988_v41 = vpop.eup %9436  ;;  %v14598_v57 = vld [vmem:[#allocation31_spill] sm:$0xff]  ;;  %v14599_v23 = vld [vmem:[#allocation37_spill] sm:$0xff] }
 0x8e3   : > { %14593 = vst [vmem:[#allocation24_spill] sm:$0xff] %v12980_v36  ;;  %9452 = vpow2.f32 %v6218_v11  ;;  %v6238_v17 = vmul.f32 1.442695, %v6146_v5  ;;  %v4697_v30 = vsub.f32 %v14596_v42, %v4630_v53  ;;  %v4698_v39 = vsub.f32 %v14597_v7, %v4630_v53  ;;  %v12992_v56 = vpop.eup %9438  ;;  %v14601_v42 = vld [vmem:[#allocation98_spill] sm:$0xff] }
 0x8e4   : > { %9454 = vpow2.f32 %v6220_v15  ;;  %v6240_v49 = vmul.f32 1.442695, %v6147_v45  ;;  %v6072_v60 = vpop.xlane.xlu0 %6071  ;;  %v12998_v11 = vadd.f32 %v12992_v56, %v12988_v41  ;;  %v14600_v15 = vld [vmem:[#allocation114_spill] sm:$0xff] }
 0x8e5   : > { %9456 = vpow2.f32 %v6238_v17  ;;  %v4815_v61 = vmul.f32 1.442695, %v4697_v30  ;;  %v4817_v54 = vmul.f32 1.442695, %v4698_v39  ;;  %v6150_v0 = vsub.f32 %v14598_v57, %v6072_v60 }
 0x8e6   : > { %9458 = vpow2.f32 %v6240_v49  ;;  %v6151_v63 = vsub.f32 %v14599_v23, %v6072_v60  ;;  %v6057_v38 = vpop.xlane.xlu1 %6056  ;;  %v14602_v23 = vld [vmem:[#allocation38_spill] sm:$0xff] }
 0x8e7   : > { %v13000_v5 = vpop.eup %9440  ;;  %9460 = vpow2.f32 %v4815_v61  ;;  %v6246_v53 = vmul.f32 1.442695, %v6150_v0  ;;  %v6140_v45 = vsub.f32 %v14600_v15, %v6057_v38  ;;  %v6141_v17 = vsub.f32 %v14601_v42, %v6057_v38  ;;  %v14603_v61 = vld [vmem:[#allocation44_spill] sm:$0xff] }
 0x8e8   : > { %v13004_v30 = vpop.eup %9442  ;;  %9462 = vpow2.f32 %v4817_v54  ;;  %v6248_v7 = vmul.f32 1.442695, %v6151_v63  ;;  %v6078_v39 = vpop.xlane.xlu0 %6077  ;;  %v14605_v42 = vld [vmem:[#allocation140_spill] sm:$0xff] }
 0x8e9   : > { %v9445_v49 = vpop.eup %9444  ;;  %9464 = vpow2.f32 %v6246_v53  ;;  %v6226_v60 = vmul.f32 1.442695, %v6140_v45  ;;  %v6228_v57 = vmul.f32 1.442695, %v6141_v17  ;;  %v6154_v36 = vsub.f32 %v14602_v23, %v6078_v39  ;;  %v14604_v53 = vld [vmem:[#allocation136_spill] sm:$0xff] }
 0x8ea   : > { %v9447_v6 = vpop.eup %9446  ;;  %v4955_v25 = vpack.c.bf16 %v12938_v34, %v9445_v49  ;;  %9466 = vpow2.f32 %v6248_v7  ;;  %v6155_v0 = vsub.f32 %v14603_v61, %v6078_v39  ;;  %v4636_v15 = vpop.xlane.xlu1 %4635  ;;  %v13011_v38 = vadd.f32 %v13004_v30, %v13000_v5 }
 0x8eb   : > { %v13013_v54 = vpop.eup %9448  ;;  %9468 = vpow2.f32 %v6226_v60  ;;  %v6254_v63 = vmul.f32 1.442695, %v6154_v36  ;;  %v4701_v45 = vsub.f32 %v14604_v53, %v4636_v15  ;;  %v4702_v17 = vsub.f32 %v14605_v42, %v4636_v15  ;;  %v14607_v15 = vld [vmem:[#allocation117_spill] sm:$0xff] }
 0x8ec   : > { %v13017_v23 = vpop.eup %9450  ;;  %9470 = vpow2.f32 %v6228_v57  ;;  %v6256_v34 = vmul.f32 1.442695, %v6155_v0  ;;  %v4907_v7 = vadd.f32 %v9447_v6, %v9445_v49  ;;  %v4956_v39 = vpack.c.bf16 %v12940_v9, %v9447_v6  ;;  %v6084_v61 = vpop.xlane.xlu0 %6083  ;;  %v14608_v0 = vld [vmem:[#allocation86_spill] sm:$0xff] }
 0x8ed   : > { %v9453_v24 = vpop.eup %9452  ;;  %9472 = vpow2.f32 %v6254_v63  ;;  %v4823_v50 = vmul.f32 1.442695, %v4701_v45  ;;  %v4825_v12 = vmul.f32 1.442695, %v4702_v17  ;;  %v6158_v29 = vsub.f32 %v14606_v47, %v6084_v61 }
 0x8ee   : > { %v9455_v60 = vpop.eup %9454  ;;  %v6414_v36 = vpack.c.bf16 %v9453_v24, %v12946_v19  ;;  %9474 = vpow2.f32 %v6256_v34  ;;  %4908 = vadd.xlane.f32.xlu0 %v4907_v7  ;;  %5155 = vmatprep.mubr.bf16.mxu1 %v4956_v39  ;;  %v6159_v53 = vsub.f32 %v14607_v15, %v6084_v61  ;;  %v6063_v57 = vpop.xlane.xlu1 %6062  ;;  %v13025_v49 = vadd.f32 %v13017_v23, %v13013_v54 }
 0x8ef   : > { %v13027_v9 = vpop.eup %9456  ;;  %9476 = vpow2.f32 %v4823_v50  ;;  %v6262_v6 = vmul.f32 1.442695, %v6158_v29  ;;  %5156 = vmatmul.mubr.bf16.gmra.mrb[0].mxu1 %v4955_v25  ;;  %v6144_v47 = vsub.f32 %v14516_v27, %v6063_v57  ;;  %v6145_v63 = vsub.f32 %v14608_v0, %v6063_v57 }
 0x8f0   : > { %v13031_v19 = vpop.eup %9458  ;;  %9478 = vpow2.f32 %v4825_v12  ;;  %v6264_v45 = vmul.f32 1.442695, %v6159_v53  ;;  %v6415_v42 = vpack.c.bf16 %v9455_v60, %v12950_v62  ;;  %v6090_v17 = vpop.xlane.xlu0 %6089  ;;  %v13034_v34 = vadd.f32 %v9455_v60, %v9453_v24  ;;  %v14609_v12 = vld [vmem:[#allocation103_spill] sm:$0xff]  ;;  %v14610_v53 = vld [vmem:[#allocation141_spill] sm:$0xff] }
 0x8f1   : > { %v9461_v7 = vpop.eup %9460  ;;  %9480 = vpow2.f32 %v6262_v6  ;;  %v6234_v39 = vmul.f32 1.442695, %v6144_v47  ;;  %v6236_v61 = vmul.f32 1.442695, %v6145_v63  ;;  %v6162_v29 = vsub.f32 %v14519_v44, %v6090_v17 }
 0x8f2   : > { %v9463_v50 = vpop.eup %9462  ;;  %v4957_v27 = vpack.c.bf16 %v9461_v7, %v12960_v2  ;;  %9482 = vpow2.f32 %v6264_v45  ;;  %6566 = vmatprep.mubr.bf16.mxu0 %v6415_v42  ;;  %4914 = vadd.xlane.f32.xlu0 %v12970_v46  ;;  %v6163_v25 = vsub.f32 %v14609_v12, %v6090_v17  ;;  %v4642_v15 = vpop.xlane.xlu1 %4641  ;;  %v13042_v24 = vadd.f32 %v13031_v19, %v13027_v9 }
 0x8f3   : > { %v13044_v62 = vpop.eup %9464  ;;  %9484 = vpow2.f32 %v6234_v39  ;;  %v6270_v60 = vmul.f32 1.442695, %v6162_v29  ;;  %6567 = vmatmul.mubr.bf16.gmra.mrb[64].mxu0 %v6414_v36  ;;  %v4705_v44 = vsub.f32 %v14522_v8, %v4642_v15  ;;  %v4706_v2 = vsub.f32 %v14610_v53, %v4642_v15 }
 0x8f4   : > { %v13048_v57 = vpop.eup %9466  ;;  %9486 = vpow2.f32 %v6236_v61  ;;  %v6272_v46 = vmul.f32 1.442695, %v6163_v25  ;;  %v4916_v6 = vadd.f32 %v9463_v50, %v9461_v7  ;;  %v4958_v47 = vpack.c.bf16 %v9463_v50, %v12964_v18  ;;  %v6096_v0 = vpop.xlane.xlu0 %6095 }
 0x8f5   : > { %v9469_v63 = vpop.eup %9468  ;;  %9488 = vpow2.f32 %v6270_v60  ;;  %v4831_v45 = vmul.f32 1.442695, %v4705_v44  ;;  %v4833_v42 = vmul.f32 1.442695, %v4706_v2  ;;  %v6166_v17 = vsub.f32 %v14525_v4, %v6096_v0  ;;  %v14611_v4 = vld [vmem:[#allocation30_spill] sm:$0xff] }
 0x8f6   : > { %v9471_v39 = vpop.eup %9470  ;;  %v6416_v36 = vpack.c.bf16 %v9469_v63, %v12972_v59  ;;  %9490 = vpow2.f32 %v6272_v46  ;;  %4917 = vadd.xlane.f32.xlu1 %v4916_v6  ;;  %5163 = vmatprep.mubr.bf16.mxu1 %v4958_v47  ;;  %v6167_v8 = vsub.f32 %v14526_v52, %v6096_v0  ;;  %v6069_v61 = vpop.xlane.xlu1 %6068  ;;  %v13056_v7 = vadd.f32 %v13048_v57, %v13044_v62  ;;  %v14612_v59 = vld [vmem:[#allocation36_spill] sm:$0xff]  ;;  %v14614_v0 = vld [vmem:[#allocation50_spill] sm:$0xff] }
 0x8f7   : > { %v13058_v18 = vpop.eup %9472  ;;  %9492 = vpow2.f32 %v4831_v45  ;;  %4920 = vadd.xlane.f32.xlu0 %v12998_v11  ;;  %v6278_v29 = vmul.f32 1.442695, %v6166_v17  ;;  %5164 = vmatmul.mubr.bf16.gmra.mrb[4].mxu1 %v4957_v27  ;;  %v6148_v50 = vsub.f32 %v14611_v4, %v6069_v61  ;;  %v6149_v12 = vsub.f32 %v14612_v59, %v6069_v61  ;;  %v14613_v11 = vld [vmem:[#allocation46_spill] sm:$0xff] }
 0x8f8   : > { %v13063_v25 = vpop.eup %9474  ;;  %9494 = vpow2.f32 %v4833_v42  ;;  %v6280_v52 = vmul.f32 1.442695, %v6167_v8  ;;  %v6417_v15 = vpack.c.bf16 %v9471_v39, %v12977_v20  ;;  %v6102_v60 = vpop.xlane.xlu0 %6101  ;;  %v13066_v44 = vadd.f32 %v9471_v39, %v9469_v63 }
 0x8f9   : > { %v9477_v53 = vpop.eup %9476  ;;  %9496 = vpow2.f32 %v6278_v29  ;;  %v6242_v2 = vmul.f32 1.442695, %v6148_v50  ;;  %v6244_v46 = vmul.f32 1.442695, %v6149_v12  ;;  %v6170_v6 = vsub.f32 %v14613_v11, %v6102_v60 }
 0x8fa   : > { %v9479_v27 = vpop.eup %9478  ;;  %v4959_v47 = vpack.c.bf16 %v9477_v53, %v12988_v41  ;;  %9498 = vpow2.f32 %v6280_v52  ;;  %6574 = vmatprep.mubr.bf16.mxu0 %v6417_v15  ;;  %v6171_v45 = vsub.f32 %v14614_v0, %v6102_v60  ;;  %v6075_v42 = vpop.xlane.xlu1 %6074  ;;  %v13073_v20 = vadd.f32 %v13063_v25, %v13058_v18  ;;  %v14615_v15 = vld [vmem:[#allocation57_spill] sm:$0xff] }
 0x8fb   : > { %v13075_v63 = vpop.eup %9480  ;;  %9500 = vpow2.f32 %v6242_v2  ;;  %4926 = vadd.xlane.f32.xlu0 %v13025_v49  ;;  %v6286_v17 = vmul.f32 1.442695, %v6170_v6  ;;  %6575 = vmatmul.mubr.bf16.gmra.mrb[68].mxu0 %v6416_v36  ;;  %v6152_v39 = vsub.f32 %v14534_v51, %v6075_v42  ;;  %v6153_v41 = vsub.f32 %v14535_v22, %v6075_v42  ;;  %v14616_v51 = vld [vmem:[#allocation122_spill] sm:$0xff] }
 0x8fc   : > { %v13080_v8 = vpop.eup %9482  ;;  %9502 = vpow2.f32 %v6244_v46  ;;  %v6288_v61 = vmul.f32 1.442695, %v6171_v45  ;;  %v4922_v29 = vadd.f32 %v9479_v27, %v9477_v53  ;;  %v4960_v4 = vpack.c.bf16 %v9479_v27, %v12992_v56  ;;  %v6108_v50 = vpop.xlane.xlu0 %6107  ;;  %v14617_v46 = vld [vmem:[#allocation54_spill] sm:$0xff] }
 0x8fd   : > { %v9485_v59 = vpop.eup %9484  ;;  %9504 = vpow2.f32 %v6286_v17  ;;  %v6250_v12 = vmul.f32 1.442695, %v6152_v39  ;;  %v6252_v52 = vmul.f32 1.442695, %v6153_v41  ;;  %v6174_v49 = vsub.f32 %v14615_v15, %v6108_v50  ;;  %v14618_v6 = vld [vmem:[#allocation42_spill] sm:$0xff] }
 0x8fe   : > { %v9487_v60 = vpop.eup %9486  ;;  %v6418_v36 = vpack.c.bf16 %v9485_v59, %v13000_v5  ;;  %9506 = vpow2.f32 %v6288_v61  ;;  %4923 = vadd.xlane.f32.xlu1 %v4922_v29  ;;  %5171 = vmatprep.mubr.bf16.mxu1 %v4960_v4  ;;  %v6175_v22 = vsub.f32 %v14616_v51, %v6108_v50  ;;  %v6081_v2 = vpop.xlane.xlu1 %6080  ;;  %v13088_v53 = vadd.f32 %v13080_v8, %v13075_v63  ;;  %v14619_v5 = vld [vmem:[#allocation48_spill] sm:$0xff]  ;;  %v14620_v50 = vld [vmem:[#allocation39_spill] sm:$0xff] }
 0x8ff   : > { %v13090_v56 = vpop.eup %9488  ;;  %9508 = vpow2.f32 %v6250_v12  ;;  %6311 = vadd.xlane.f32.xlu0 %v14617_v46  ;;  %v6294_v11 = vmul.f32 1.442695, %v6174_v49  ;;  %5172 = vmatmul.mubr.bf16.gmra.mrb[8].mxu1 %v4959_v47  ;;  %v6156_v27 = vsub.f32 %v14618_v6, %v6081_v2  ;;  %v6157_v0 = vsub.f32 %v14619_v5, %v6081_v2  ;;  %v14621_v49 = vld [vmem:[#allocation41_spill] sm:$0xff]  ;;  %v14623_v2 = vld [vmem:[#allocation52_spill] sm:$0xff] }
 0x900   : > { %v13095_v45 = vpop.eup %9490  ;;  %9510 = vpow2.f32 %v6252_v52  ;;  %v6296_v42 = vmul.f32 1.442695, %v6175_v22  ;;  %v6419_v17 = vpack.c.bf16 %v9487_v60, %v13004_v30  ;;  %v6114_v39 = vpop.xlane.xlu0 %6113  ;;  %v13098_v41 = vadd.f32 %v9487_v60, %v9485_v59  ;;  %v14622_v60 = vld [vmem:[#allocation130_spill] sm:$0xff] }
 0x901   : > { %v9493_v61 = vpop.eup %9492  ;;  %9512 = vpow2.f32 %v6294_v11  ;;  %v6258_v29 = vmul.f32 1.442695, %v6156_v27  ;;  %v6260_v4 = vmul.f32 1.442695, %v6157_v0  ;;  %v6178_v12 = vsub.f32 %v14620_v50, %v6114_v39  ;;  %v14624_v11 = vld [vmem:[#allocation56_spill] sm:$0xff] }
 0x902   : > { %v9495_v47 = vpop.eup %9494  ;;  %v4961_v15 = vpack.c.bf16 %v9493_v61, %v13013_v54  ;;  %9514 = vpow2.f32 %v6296_v42  ;;  %6582 = vmatprep.mubr.bf16.mxu0 %v6419_v17  ;;  %v6179_v51 = vsub.f32 %v14621_v49, %v6114_v39  ;;  %v6087_v52 = vpop.xlane.xlu1 %6086  ;;  %v13105_v30 = vadd.f32 %v13095_v45, %v13090_v56  ;;  %v14626_v49 = vld [vmem:[#allocation109_spill] sm:$0xff] }
 0x903   : > { %v13107_v59 = vpop.eup %9496  ;;  %9516 = vpow2.f32 %v6258_v29  ;;  %6317 = vadd.xlane.f32.xlu0 %v14622_v60  ;;  %v6302_v22 = vmul.f32 1.442695, %v6178_v12  ;;  %6583 = vmatmul.mubr.bf16.gmra.mrb[72].mxu0 %v6418_v36  ;;  %v6160_v46 = vsub.f32 %v14623_v2, %v6087_v52  ;;  %v6161_v54 = vsub.f32 %v14624_v11, %v6087_v52 }
 0x904   : > { %v13112_v6 = vpop.eup %9498  ;;  %9518 = vpow2.f32 %v6260_v4  ;;  %v6304_v27 = vmul.f32 1.442695, %v6179_v51  ;;  %v4928_v5 = vadd.f32 %v9495_v47, %v9493_v61  ;;  %v4962_v0 = vpack.c.bf16 %v9495_v47, %v13017_v23  ;;  %v13115_v42 = vpop.xlane.xlu0 %4836  ;;  %v14625_v23 = vld [vmem:[#allocation128_spill] sm:$0xff] }
 0x905   : > { %v9501_v17 = vpop.eup %9500  ;;  %9520 = vpow2.f32 %v6302_v22  ;;  %v6266_v39 = vmul.f32 1.442695, %v6160_v46  ;;  %v6268_v29 = vmul.f32 1.442695, %v6161_v54  ;;  %v13119_v36 = vadd.f32 %v13112_v6, %v13107_v59 }
 0x906   : > { %v9503_v50 = vpop.eup %9502  ;;  %v6420_v12 = vpack.c.bf16 %v9501_v17, %v13027_v9  ;;  %9522 = vpow2.f32 %v6304_v27  ;;  %4929 = vadd.xlane.f32.xlu1 %v4928_v5  ;;  %5179 = vmatprep.mubr.bf16.mxu1 %v4962_v0  ;;  %v6093_v4 = vpop.xlane.xlu1 %6092  ;;  %v14627_v27 = vld [vmem:[#allocation129_spill] sm:$0xff] }
 0x907   : > { %v13122_v61 = vpop.eup %9504  ;;  %9524 = vpow2.f32 %v6266_v39  ;;  %6323 = vadd.xlane.f32.xlu0 %v14625_v23  ;;  %5180 = vmatmul.mubr.bf16.gmra.mrb[12].mxu1 %v4961_v15  ;;  %v6164_v47 = vsub.f32 %v14547_v26, %v6093_v4  ;;  %v6165_v51 = vsub.f32 %v14626_v49, %v6093_v4  ;;  %v6421_v52 = vpack.c.bf16 %v9503_v50, %v13031_v19  ;;  %v14628_v39 = vld [vmem:[#allocation34_spill] sm:$0xff] }
 0x908   : > { %v13128_v60 = vpop.eup %9506  ;;  %9526 = vpow2.f32 %v6268_v29  ;;  %v13130_v9 = vadd.f32 %v9503_v50, %v9501_v17  ;;  %v13132_v11 = vpop.xlane.xlu0 %4842 }
 0x909   : > { %v9509_v22 = vpop.eup %9508  ;;  %v6274_v2 = vmul.f32 1.442695, %v6164_v47  ;;  %v6276_v46 = vmul.f32 1.442695, %v6165_v51  ;;  %6590 = vmatprep.mubr.bf16.mxu0 %v6421_v52  ;;  %v13136_v15 = vadd.f32 %v13128_v60, %v13122_v61  ;;  %v8032_v19 = vpop.f32.mrb[244].mxu1 }
 0x90a   : > { %v9511_v26 = vpop.eup %9510  ;;  %v6422_v54 = vpack.c.bf16 %v9509_v22, %v13044_v62  ;;  %6314 = vadd.xlane.f32.xlu1 %v14627_v27  ;;  %v6099_v5 = vpop.xlane.xlu1 %6098  ;;  %v14629_v27 = vld [vmem:[#allocation126_spill] sm:$0xff] }
 0x90b   : > { %v13140_v0 = vpop.eup %9512  ;;  %9528 = vpow2.f32 %v6274_v2  ;;  %6329 = vadd.xlane.f32.xlu0 %v12886_v21  ;;  %6591 = vmatmul.mubr.bf16.gmra.mrb[76].mxu0 %v6420_v12  ;;  %v6168_v17 = vsub.f32 %v14551_v13, %v6099_v5  ;;  %v6169_v29 = vsub.f32 %v14628_v39, %v6099_v5  ;;  %v8033_v50 = vpop.f32.mrb[245].mxu1  ;;  %v6423_v4 = vpack.c.bf16 %v9511_v26, %v13048_v57 }
 0x90c   : > { %v13146_v23 = vpop.eup %9514  ;;  %9530 = vpow2.f32 %v6276_v46  ;;  %v13148_v62 = vadd.f32 %v8033_v50, %v8032_v19  ;;  %v8035_v47 = vpop.f32.mrb[246].mxu1  ;;  %v13150_v49 = vadd.f32 %v9511_v26, %v9509_v22 }
 0x90d   : > { %v13152_v51 = vpop.eup %9516  ;;  %v6282_v52 = vmul.f32 1.442695, %v6168_v17  ;;  %v6284_v21 = vmul.f32 1.442695, %v6169_v29  ;;  %v8036_v12 = vpop.f32.mrb[247].mxu1  ;;  %6598 = vmatprep.mubr.bf16.mxu0 %v6423_v4  ;;  %v13156_v13 = vadd.f32 %v13146_v23, %v13140_v0 }
 0x90e   : > { %v9519_v2 = vpop.eup %9518  ;;  %v6424_v57 = vpack.c.bf16 %v13152_v51, %v13058_v18  ;;  %v13160_v46 = vadd.f32 %v8036_v12, %v8035_v47  ;;  %6320 = vadd.xlane.f32.xlu1 %v14629_v27  ;;  %v6105_v22 = vpop.xlane.xlu1 %6104 }
 0x90f   : > { %v13163_v26 = vpop.eup %9520  ;;  %9532 = vpow2.f32 %v6282_v52  ;;  %6335 = vadd.xlane.f32.xlu0 %v12958_v1  ;;  %v13166_v19 = vpop.xlane.xlu0 %4848  ;;  %v6172_v5 = vsub.f32 %v14557_v43, %v6105_v22  ;;  %v6173_v17 = vsub.f32 %v14558_v37, %v6105_v22  ;;  %v6425_v39 = vpack.c.bf16 %v9519_v2, %v13063_v25  ;;  %v14630_v43 = vld [vmem:[#allocation45_spill] sm:$0xff] }
 0x910   : > { %v13171_v29 = vpop.eup %9522  ;;  %9534 = vpow2.f32 %v6284_v21  ;;  %v13174_v18 = vadd.f32 %v9519_v2, %v13152_v51 }
 0x911   : > { %v13176_v50 = vpop.eup %9524  ;;  %v6290_v4 = vmul.f32 1.442695, %v6172_v5  ;;  %v6292_v47 = vmul.f32 1.442695, %v6173_v17  ;;  %v13180_v1 = vadd.f32 %v13171_v29, %v13163_v26 }
 0x912   : > { %v9527_v52 = vpop.eup %9526  ;;  %v6426_v37 = vpack.c.bf16 %v13176_v50, %v13075_v63  ;;  %6326 = vadd.xlane.f32.xlu1 %v14630_v43  ;;  %v6111_v25 = vpop.xlane.xlu1 %6110 }
 0x913   : > { %9536 = vpow2.f32 %v6290_v4  ;;  %6341 = vadd.xlane.f32.xlu0 %v12986_v48  ;;  %6599 = vmatmul.mubr.bf16.gmra.mrb[80].mxu0 %v6422_v54  ;;  %v6176_v51 = vsub.f32 %v12510_v55, %v6111_v25  ;;  %v6177_v21 = vsub.f32 %v14560_v33, %v6111_v25  ;;  %v6427_v12 = vpack.c.bf16 %v9527_v52, %v13080_v8  ;;  %v4855_v63 = vpop.xlane.xlu0 %4854 }
 0x914   : > { %9538 = vpow2.f32 %v6292_v47  ;;  %6606 = vmatprep.mubr.bf16.mxu0 %v6425_v39  ;;  %v13190_v2 = vadd.f32 %v9527_v52, %v13176_v50 }
 0x915   : > { %v13192_v27 = vpop.eup %9528  ;;  %v6298_v22 = vmul.f32 1.442695, %v6176_v51  ;;  %v6300_v5 = vmul.f32 1.442695, %v6177_v21 }
 0x916   : > { %v9531_v17 = vpop.eup %9530  ;;  %v6428_v48 = vpack.c.bf16 %v13192_v27, %v13090_v56  ;;  %6332 = vadd.xlane.f32.xlu1 %v12906_v28  ;;  %v6117_v55 = vpop.xlane.xlu1 %6116 }
 0x917   : > { %9540 = vpow2.f32 %v6298_v22  ;;  %6347 = vadd.xlane.f32.xlu0 %v13011_v38  ;;  %v6180_v33 = vsub.f32 %v12522_v35, %v6117_v55  ;;  %v6181_v8 = vsub.f32 %v12524_v31, %v6117_v55  ;;  %v6429_v54 = vpack.c.bf16 %v9531_v17, %v13095_v45  ;;  %v4861_v38 = vpop.xlane.xlu0 %4860 }
 0x918   : > { %9542 = vpow2.f32 %v6300_v5  ;;  %v13202_v39 = vadd.f32 %v9531_v17, %v13192_v27 }
 0x919   : > { %v13204_v50 = vpop.eup %9532  ;;  %9544 = vrcp.f32 %v13115_v42  ;;  %v6306_v4 = vmul.f32 1.442695, %v6180_v33  ;;  %v6308_v28 = vmul.f32 1.442695, %v6181_v8 }
 0x91a   : > { %v13207_v47 = vpop.eup %9534  ;;  %9546 = vrcp.f32 %v13132_v11  ;;  %v6430_v35 = vpack.c.bf16 %v13204_v50, %v13107_v59  ;;  %6338 = vadd.xlane.f32.xlu1 %v13034_v34  ;;  %v4840_v31 = vpop.xlane.xlu1 %4839 }
 0x91b   : > { %9548 = vpow2.f32 %v6306_v4  ;;  %6353 = vadd.xlane.f32.xlu0 %v13042_v24  ;;  %6607 = vmatmul.mubr.bf16.gmra.mrb[84].mxu0 %v6424_v57  ;;  %v6431_v45 = vpack.c.bf16 %v13207_v47, %v13112_v6  ;;  %v13218_v42 = vadd.f32 %v13207_v47, %v13204_v50  ;;  %v4867_v25 = vpop.xlane.xlu0 %4866  ;;  %v14632_v4 = vld [vmem:[#allocation65_spill] sm:$0xff] }
 0x91c   : > { %9550 = vpow2.f32 %v6308_v28  ;;  %6614 = vmatprep.mubr.bf16.mxu0 %v6427_v12 }
 0x91d   : > { %v13220_v11 = vpop.eup %9536  ;;  %9552 = vrcp.f32 %v4840_v31  ;;  %v14633_v31 = vld [vmem:[#allocation135_spill] sm:$0xff] }
 0x91e   : > { %v13222_v52 = vpop.eup %9538  ;;  %v6432_v34 = vpack.c.bf16 %v13220_v11, %v13122_v61  ;;  %6344 = vadd.xlane.f32.xlu1 %v13066_v44  ;;  %v4846_v24 = vpop.xlane.xlu1 %4845 }
 0x91f   : > { %6359 = vadd.xlane.f32.xlu0 %v13056_v7  ;;  %9554 = vrcp.f32 %v4846_v24  ;;  %v6433_v6 = vpack.c.bf16 %v13222_v52, %v13128_v60  ;;  %v13232_v57 = vadd.f32 %v13222_v52, %v13220_v11  ;;  %v4873_v55 = vpop.xlane.xlu0 %4872 }
 0x920   : > { %9556 = vrcp.f32 %v13166_v19 }
 0x921   : > { %v13234_v43 = vpop.eup %9540 }
 0x922   : > { %v13237_v51 = vpop.eup %9542  ;;  %v6434_v44 = vpack.c.bf16 %v13234_v43, %v13140_v0  ;;  %6350 = vadd.xlane.f32.xlu1 %v13098_v41  ;;  %v4852_v7 = vpop.xlane.xlu1 %4851 }
 0x923   : > { %v9545_v21 = vpop.eup %9544  ;;  %6365 = vadd.xlane.f32.xlu0 %v13073_v20  ;;  %6615 = vmatmul.mubr.bf16.gmra.mrb[88].mxu0 %v6426_v37  ;;  %9558 = vrcp.f32 %v4852_v7  ;;  %v6435_v12 = vpack.c.bf16 %v13237_v51, %v13146_v23  ;;  %v13247_v19 = vadd.f32 %v13237_v51, %v13234_v43  ;;  %v14638_v51 = vld [vmem:[#allocation70_spill] sm:$0xff] }
 0x924   : > { %v9547_v22 = vpop.eup %9546  ;;  %6622 = vmatprep.mubr.bf16.mxu0 %v6429_v54  ;;  %9560 = vrcp.f32 %v4855_v63  ;;  %v14631_v63 = vld [vmem:[#allocation59_spill] sm:$0xff] }
 0x925   : > { %v13249_v5 = vpop.eup %9548  ;;  %v5220_v54 = vmul.f32 %v9545_v21, %v14631_v63 }
 0x926   : > { %v13251_v17 = vpop.eup %9550  ;;  %v6436_v41 = vpack.c.bf16 %v13249_v5, %v13163_v26  ;;  %6356 = vadd.xlane.f32.xlu1 %v13130_v9  ;;  %v4858_v20 = vpop.xlane.xlu1 %4857  ;;  %v5222_v9 = vmul.f32 %v9547_v22, %v12854_v16 }
 0x927   : > { %v9553_v37 = vpop.eup %9552  ;;  %6371 = vadd.xlane.f32.xlu0 %v13088_v53  ;;  %9562 = vrcp.f32 %v4858_v20  ;;  %v6437_v33 = vpack.c.bf16 %v13251_v17, %v13171_v29  ;;  %v13261_v8 = vadd.f32 %v13251_v17, %v13249_v5  ;;  %v4879_v16 = vpop.xlane.xlu0 %4878 }
 0x928   : > { %v5221_v28 = vmul.f32 %v9553_v37, %v14632_v4  ;;  %9564 = vrcp.f32 %v4861_v38 }
 0x929   : > { %v9555_v47 = vpop.eup %9554 }
 0x92a   : > { %v5223_v24 = vmul.f32 %v9555_v47, %v14633_v31  ;;  %6362 = vadd.xlane.f32.xlu1 %v13150_v49  ;;  %v4864_v53 = vpop.xlane.xlu1 %4863  ;;  %v5252_v7 = vpack.c.bf16 %v5221_v28, %v5220_v54  ;;  %v9557_v20 = vpop.eup %9556  ;;  %v14636_v54 = vld [vmem:[#allocation134_spill] sm:$0xff] }
 0x92b   : > { %6377 = vadd.xlane.f32.xlu0 %v13105_v30  ;;  %6623 = vmatmul.mubr.bf16.gmra.mrb[92].mxu0 %v6428_v48  ;;  %9566 = vrcp.f32 %v4864_v53  ;;  %v5224_v22 = vmul.f32 %v9557_v20, %v12868_v3  ;;  %v8906_v48 = vld [vmem:[#allocation14 + $0x30] sm:$0xff]   ;;  %v4885_v63 = vpop.xlane.xlu0 %4884 }
 0x92c   : > { %v5253_v21 = vpack.c.bf16 %v5223_v24, %v5222_v9  ;;  %8490 = vmatprep.mubr.msk.bf16.mxu1 %vm1428_vm0, %v5252_v7  ;;  %6630 = vmatprep.mubr.bf16.mxu0 %v6431_v45  ;;  %9568 = vrcp.f32 %v4867_v25  ;;  %v14641_v20 = vld [vmem:[#allocation24_spill] sm:$0xff] }
 0x92d   : > { %v9559_v38 = vpop.eup %9558  ;;  %8522 = vmatprep.subr.bf16.mxu1 %v8906_v48 }
 0x92e   : > { %6368 = vadd.xlane.f32.xlu1 %v13174_v18  ;;  %v4870_v49 = vpop.xlane.xlu1 %4869  ;;  %8491 = vmatmul.mubr.msk.bf16.vlgmr.msra.gmra.mrb[112].mxu1 %vm1428_vm0, %v5253_v21  ;;  %v5225_v30 = vmul.f32 %v9559_v38, %v12871_v58  ;;  %v9561_v37 = vpop.eup %9560 }
 0x92f   : > { %6383 = vadd.xlane.f32.xlu0 %v13119_v36  ;;  %9570 = vrcp.f32 %v4870_v49  ;;  %v5226_v18 = vmul.f32 %v9561_v37, %v12876_v40  ;;  %8523 = vmatpush3.bf16.msra.mxu1 %v8906_v48  ;;  %v4891_v50 = vpop.xlane.xlu0 %4890 }
 0x930   : > { %v5254_v56 = vpack.c.bf16 %v5225_v30, %v5224_v22  ;;  %9572 = vrcp.f32 %v4873_v55 }
 0x931   : > { %v9563_v27 = vpop.eup %9562 }
 0x932   : > { %6374 = vadd.xlane.f32.xlu1 %v13190_v2  ;;  %v4876_v45 = vpop.xlane.xlu1 %4875  ;;  %8494 = vmatprep.mubr.msk.bf16.mxu1 %vm1428_vm0, %v5254_v56  ;;  %v5227_v25 = vmul.f32 %v9563_v27, %v12879_v14  ;;  %v9565_v3 = vpop.eup %9564 }
 0x933   : > { %6389 = vadd.xlane.f32.xlu0 %v13136_v15  ;;  %6631 = vmatmul.mubr.bf16.gmra.mrb[96].mxu0 %v6430_v35  ;;  %9574 = vrcp.f32 %v4876_v45  ;;  %v5228_v14 = vmul.f32 %v9565_v3, %v12918_v10  ;;  %v4897_v61 = vpop.xlane.xlu0 %4896 }
 0x934   : > { %6638 = vmatprep.mubr.bf16.mxu0 %v6433_v6  ;;  %v5255_v58 = vpack.c.bf16 %v5227_v25, %v5226_v18  ;;  %9576 = vrcp.f32 %v4879_v16  ;;  %v14635_v6 = vld [vmem:[#allocation133_spill] sm:$0xff] }
 0x935   : > { %v9567_v36 = vpop.eup %9566  ;;  %v8907_v18 = vld [vmem:[#allocation14 + $0x38] sm:$0xff]  }
 0x936   : > { %6380 = vadd.xlane.f32.xlu1 %v13202_v39  ;;  %v4882_v40 = vpop.xlane.xlu1 %4881  ;;  %8495 = vmatmul.mubr.msk.bf16.gmra.mrb[116].mxu1 %vm1428_vm0, %v5255_v58  ;;  %v5229_v59 = vmul.f32 %v9567_v36, %v12920_v32  ;;  %v9569_v15 = vpop.eup %9568  ;;  %v14634_v39 = vld [vmem:[#allocation137_spill] sm:$0xff] }
 0x937   : > { %6395 = vadd.xlane.f32.xlu0 %v13156_v13  ;;  %9578 = vrcp.f32 %v4882_v40  ;;  %v5230_v52 = vmul.f32 %v9569_v15, %v14634_v39  ;;  %8524 = vmatprep.subr.bf16.mxu1 %v8907_v18 }
 0x938   : > { %v5256_v60 = vpack.c.bf16 %v5229_v59, %v5228_v14  ;;  %9580 = vrcp.f32 %v4885_v63  ;;  %8525 = vmatpush3.bf16.msra.mxu1 %v8907_v18 }
 0x939   : > { %v9571_v2 = vpop.eup %9570 }
 0x93a   : > { %6386 = vadd.xlane.f32.xlu1 %v13218_v42  ;;  %v4888_v35 = vpop.xlane.xlu1 %4887  ;;  %8498 = vmatprep.mubr.msk.bf16.mxu1 %vm1428_vm0, %v5256_v60  ;;  %v5231_v55 = vmul.f32 %v9571_v2, %v14635_v6  ;;  %v9573_v10 = vpop.eup %9572 }
 0x93b   : > { %6401 = vadd.xlane.f32.xlu0 %v13180_v1  ;;  %6639 = vmatmul.mubr.bf16.gmra.mrb[100].mxu0 %v6432_v34  ;;  %9582 = vrcp.f32 %v4888_v35  ;;  %v5232_v4 = vmul.f32 %v9573_v10, %v14636_v54  ;;  %v14637_v1 = vld [vmem:[#allocation95_spill] sm:$0xff] }
 0x93c   : > { %6646 = vmatprep.mubr.bf16.mxu0 %v6435_v12  ;;  %v5257_v32 = vpack.c.bf16 %v5231_v55, %v5230_v52  ;;  %9584 = vrcp.f32 %v4891_v50  ;;  %v14639_v12 = vld [vmem:[#allocation71_spill] sm:$0xff] }
 0x93d   : > { %v9575_v13 = vpop.eup %9574 }
 0x93e   : > { %6392 = vadd.xlane.f32.xlu1 %v13232_v57  ;;  %v4894_v42 = vpop.xlane.xlu1 %4893  ;;  %8499 = vmatmul.mubr.msk.bf16.gmra.mrb[120].mxu1 %vm1428_vm0, %v5257_v32  ;;  %v5233_v28 = vmul.f32 %v9575_v13, %v14637_v1  ;;  %v9577_v47 = vpop.eup %9576 }
 0x93f   : > { %9586 = vrcp.f32 %v4894_v42  ;;  %v5234_v57 = vmul.f32 %v9577_v47, %v14638_v51 }
 0x940   : > { %v5258_v11 = vpack.c.bf16 %v5233_v28, %v5232_v4  ;;  %9588 = vrcp.f32 %v4897_v61 }
 0x941   : > { %v9579_v34 = vpop.eup %9578 }
 0x942   : > { %6398 = vadd.xlane.f32.xlu1 %v13247_v19  ;;  %v4900_v23 = vpop.xlane.xlu1 %4899  ;;  %8502 = vmatprep.mubr.msk.bf16.mxu1 %vm1428_vm0, %v5258_v11  ;;  %v5235_v9 = vmul.f32 %v9579_v34, %v14639_v12  ;;  %v9581_v31 = vpop.eup %9580  ;;  %v14640_v19 = vld [vmem:[#allocation81_spill] sm:$0xff] }
 0x943   : > { %6647 = vmatmul.mubr.bf16.gmra.mrb[104].mxu0 %v6434_v44  ;;  %9590 = vrcp.f32 %v4900_v23  ;;  %v5236_v7 = vmul.f32 %v9581_v31, %v14640_v19 }
 0x944   : > { %6654 = vmatprep.mubr.bf16.mxu0 %v6437_v33  ;;  %v5259_v24 = vpack.c.bf16 %v5235_v9, %v5234_v57 }
 0x945   : > { %v9583_v53 = vpop.eup %9582 }
 0x946   : > { %6404 = vadd.xlane.f32.xlu1 %v13261_v8  ;;  %8503 = vmatmul.mubr.msk.bf16.gmra.mrb[124].mxu1 %vm1428_vm0, %v5259_v24  ;;  %v5237_v21 = vmul.f32 %v9583_v53, %v14641_v20  ;;  %v9585_v38 = vpop.eup %9584  ;;  %v8038_v16 = vpop.f32.mrb[248].mxu1 }
 0x947   : > { %v8039_v49 = vpop.f32.mrb[249].mxu1  ;;  %v5238_v29 = vmul.f32 %v9585_v38, %v13148_v62  ;;  %v4903_v62 = vpop.xlane.xlu0 %4902 }
 0x948   : > { %v5260_v0 = vpack.c.bf16 %v5237_v21, %v5236_v7  ;;  %v8040_v44 = vadd.f32 %v8039_v49, %v8038_v16  ;;  %v8041_v22 = vpop.f32.mrb[250].mxu1  ;;  %v4906_v25 = vpop.xlane.xlu1 %4905  ;;  %9592 = vrcp.f32 %v4903_v62 }
 0x949   : > { %v9587_v43 = vpop.eup %9586  ;;  %v8042_v30 = vpop.f32.mrb[251].mxu1  ;;  %9594 = vrcp.f32 %v4906_v25 }
 0x94a   : > { %8506 = vmatprep.mubr.msk.bf16.mxu1 %vm1428_vm0, %v5260_v0  ;;  %v5239_v17 = vmul.f32 %v9587_v43, %v13160_v46  ;;  %v8043_v33 = vadd.f32 %v8042_v30, %v8041_v22  ;;  %v9589_v8 = vpop.eup %9588 }
 0x94b   : > { %6655 = vmatmul.mubr.bf16.gmra.mrb[108].mxu0 %v6436_v41  ;;  %v5240_v27 = vmul.f32 %v9589_v8, %v8040_v44 }
 0x94c   : > { %v5261_v37 = vpack.c.bf16 %v5239_v17, %v5238_v29 }
 0x94d   : > { %v9591_v56 = vpop.eup %9590 }
 0x94e   : > { %v5241_v48 = vmul.f32 %v9591_v56, %v8043_v33  ;;  %8507 = vmatmul.mubr.msk.bf16.gmra.mrb[128].mxu1 %vm1428_vm0, %v5261_v37 }
 0x950   : > { %v5262_v45 = vpack.c.bf16 %v5241_v48, %v5240_v27 }
 0x952   : > { %8510 = vmatprep.mubr.msk.bf16.mxu1 %vm1428_vm0, %v5262_v45  ;;  %v9593_v35 = vpop.eup %9592 }
 0x953   : > { %v9595_v6 = vpop.eup %9594 }
 0x963   : > { %v13337_v2 = vpop.xlane.xlu1 %4911 }
 0x97b   : > { %v13331_v46 = vpop.xlane.xlu0 %4908 }
 0x97f   : > { %v13333_v26 = vpop.xlane.xlu0 %4914 }
 0x981   : > { %v8156_v5 = vpop.f32.mrb[48].mxu0 }
 0x982   : > { %v8157_v41 = vpop.f32.mrb[49].mxu0 }
 0x983   : > { %v8158_v3 = vadd.f32 %v8157_v41, %v8156_v5  ;;  %v8159_v63 = vpop.f32.mrb[50].mxu0  ;;  %v13341_v42 = vpop.xlane.xlu1 %4917 }
 0x984   : > { %v13335_v58 = vpop.xlane.xlu0 %4920  ;;  %v8044_v36 = vpop.f32.mrb[252].mxu1 }
 0x985   : > { %v8045_v40 = vpop.f32.mrb[253].mxu1  ;;  %v8160_v14 = vpop.f32.mrb[51].mxu0 }
 0x986   : > { %v8046_v59 = vadd.f32 %v8045_v40, %v8044_v36  ;;  %v8161_v15 = vadd.f32 %v8160_v14, %v8159_v63  ;;  %v8047_v60 = vpop.f32.mrb[254].mxu1 }
 0x987   : > { %v8048_v50 = vpop.f32.mrb[255].mxu1 }
 0x988   : > { %v13339_v39 = vpop.xlane.xlu0 %4926  ;;  %v8049_v52 = vadd.f32 %v8048_v50, %v8047_v60  ;;  %v5242_v10 = vmul.f32 %v9593_v35, %v8046_v59 }
 0x989   : > { %v8162_v55 = vpop.f32.mrb[52].mxu0 }
 0x98a   : > { %v5243_v32 = vmul.f32 %v9595_v6, %v8049_v52  ;;  %v8163_v13 = vpop.f32.mrb[53].mxu0 }
 0x98b   : > { %v8164_v54 = vadd.f32 %v8163_v13, %v8162_v55  ;;  %v8165_v4 = vpop.f32.mrb[54].mxu0  ;;  %v13344_v11 = vpop.xlane.xlu1 %4923 }
 0x98c   : > { %v5263_v1 = vpack.c.bf16 %v5243_v32, %v5242_v10  ;;  %v6312_v28 = vpop.xlane.xlu0 %6311  ;;  %v8166_v47 = vpop.f32.mrb[55].mxu0 }
 0x98d   : > { %v8167_v61 = vadd.f32 %v8166_v47, %v8165_v4  ;;  %9596 = vrcp.f32 %v6312_v28 }
 0x98e   : > { %8511 = vmatmul.mubr.msk.bf16.gmra.mrb[132].mxu1 %vm1428_vm0, %v5263_v1 }
 0x990   : > { %v6318_v23 = vpop.xlane.xlu0 %6317 }
 0x991   : > { %v8168_v34 = vpop.f32.mrb[56].mxu0 }
 0x992   : > { %v8169_v51 = vpop.f32.mrb[57].mxu0 }
 0x993   : > { %v13346_v57 = vpop.xlane.xlu1 %4929  ;;  %v8170_v12 = vadd.f32 %v8169_v51, %v8168_v34  ;;  %v8171_v9 = vpop.f32.mrb[58].mxu0 }
 0x994   : > { %v8172_v31 = vpop.f32.mrb[59].mxu0  ;;  %v6324_v19 = vpop.xlane.xlu0 %6323 }
 0x995   : > { %v8173_v24 = vadd.f32 %v8172_v31, %v8171_v9 }
 0x997   : > { %v6315_v53 = vpop.xlane.xlu1 %6314  ;;  %v9597_v22 = vpop.eup %9596 }
 0x998   : > { %9598 = vrcp.f32 %v6315_v53  ;;  %v6330_v43 = vpop.xlane.xlu0 %6329  ;;  %v13348_v17 = vmul.f32 %v9597_v22, %v8158_v3 }
 0x999   : > { %v8174_v7 = vpop.f32.mrb[60].mxu0  ;;  %9600 = vrcp.f32 %v6318_v23 }
 0x99a   : > { %v8175_v20 = vpop.f32.mrb[61].mxu0 }
 0x99b   : > { %v6321_v21 = vpop.xlane.xlu1 %6320  ;;  %v8176_v38 = vadd.f32 %v8175_v20, %v8174_v7  ;;  %v8177_v16 = vpop.f32.mrb[62].mxu0 }
 0x99c   : > { %9602 = vrcp.f32 %v6321_v21  ;;  %v8178_v49 = vpop.f32.mrb[63].mxu0  ;;  %v6336_v59 = vpop.xlane.xlu0 %6335 }
 0x99d   : > { %v8179_v0 = vadd.f32 %v8178_v49, %v8177_v16  ;;  %9604 = vrcp.f32 %v6324_v19 }
 0x99f   : > { %v6327_v44 = vpop.xlane.xlu1 %6326 }
 0x9a0   : > { %9606 = vrcp.f32 %v6327_v44  ;;  %v6342_v6 = vpop.xlane.xlu0 %6341 }
 0x9a1   : > { %9608 = vrcp.f32 %v6330_v43 }
 0x9a2   : > { %v9599_v30 = vpop.eup %9598 }
 0x9a3   : > { %v6333_v29 = vpop.xlane.xlu1 %6332  ;;  %v13350_v33 = vmul.f32 %v9599_v30, %v8161_v15  ;;  %v9601_v8 = vpop.eup %9600 }
 0x9a4   : > { %9610 = vrcp.f32 %v6333_v29  ;;  %v13354_v27 = vmul.f32 %v9601_v8, %v8164_v54  ;;  %v6348_v19 = vpop.xlane.xlu0 %6347 }
 0x9a5   : > { %v6727_v37 = vpack.c.bf16 %v13350_v33, %v13348_v17  ;;  %9612 = vrcp.f32 %v13337_v2 }
 0x9a6   : > { %v9603_v56 = vpop.eup %9602  ;;  %9614 = vrcp.f32 %v13331_v46 }
 0x9a7   : > { %v13356_v48 = vmul.f32 %v9603_v56, %v8167_v61  ;;  %v9605_v45 = vpop.eup %9604  ;;  %v6339_v15 = vpop.xlane.xlu1 %6338  ;;  %9616 = vrcp.f32 %v6336_v59 }
 0x9a8   : > { %v13360_v25 = vmul.f32 %v9605_v45, %v8170_v12  ;;  %9618 = vrcp.f32 %v6339_v15 }
 0x9a9   : > { %v6728_v18 = vpack.c.bf16 %v13356_v48, %v13354_v27  ;;  %9620 = vrcp.f32 %v13333_v26 }
 0x9aa   : > { %v9607_v62 = vpop.eup %9606  ;;  %9622 = vrcp.f32 %v13341_v42 }
 0x9ab   : > { %v13362_v5 = vmul.f32 %v9607_v62, %v8173_v24  ;;  %v9609_v41 = vpop.eup %9608  ;;  %v6345_v32 = vpop.xlane.xlu1 %6344  ;;  %9624 = vrcp.f32 %v6342_v6 }
 0x9ac   : > { %v13366_v36 = vmul.f32 %v9609_v41, %v8176_v38  ;;  %9626 = vrcp.f32 %v6345_v32 }
 0x9ad   : > { %v6729_v3 = vpack.c.bf16 %v13362_v5, %v13360_v25  ;;  %9628 = vrcp.f32 %v13335_v58 }
 0x9ae   : > { %v9611_v63 = vpop.eup %9610  ;;  %9630 = vrcp.f32 %v13344_v11 }
 0x9af   : > { %v13368_v40 = vmul.f32 %v9611_v63, %v8179_v0  ;;  %v9613_v10 = vpop.eup %9612  ;;  %v6351_v21 = vpop.xlane.xlu1 %6350  ;;  %9632 = vrcp.f32 %v6348_v19 }
 0x9b0   : > { %v9615_v54 = vpop.eup %9614  ;;  %9634 = vrcp.f32 %v6351_v21 }
 0x9b1   : > { %v6730_v14 = vpack.c.bf16 %v13368_v40, %v13366_v36  ;;  %v9617_v26 = vpop.eup %9616  ;;  %9636 = vrcp.f32 %v13339_v39 }
 0x9b2   : > { %v9619_v42 = vpop.eup %9618  ;;  %9638 = vrcp.f32 %v13346_v57 }
 0x9b3   : > { %v9621_v20 = vpop.eup %9620  ;;  %v6357_v6 = vpop.xlane.xlu1 %6356 }
 0x9b4   : > { %v9623_v58 = vpop.eup %9622 }
 0x9b5   : > { %v9625_v8 = vpop.eup %9624 }
 0x9b6   : > { %v9627_v62 = vpop.eup %9626 }
 0x9c2   : > { %v8050_v60 = vpop.f32.mrb[0].mxu1 }
 0x9c3   : > { %v8051_v50 = vpop.f32.mrb[1].mxu1 }
 0x9c4   : > { %v8052_v35 = vadd.f32 %v8051_v50, %v8050_v60  ;;  %v8053_v52 = vpop.f32.mrb[2].mxu1  ;;  %v6354_v50 = vpop.xlane.xlu0 %6353 }
 0x9c5   : > { %v8054_v55 = vpop.f32.mrb[3].mxu1  ;;  %9640 = vrcp.f32 %v6354_v50 }
 0x9c6   : > { %v8055_v13 = vadd.f32 %v8054_v55, %v8053_v52  ;;  %v8180_v2 = vpop.f32.mrb[64].mxu0  ;;  %v5244_v4 = vmul.f32 %v9615_v54, %v8052_v35  ;;  %v9629_v52 = vpop.eup %9628  ;;  %9642 = vrcp.f32 %v6357_v6 }
 0x9c7   : > { %v8181_v46 = vpop.f32.mrb[65].mxu0  ;;  %v9631_v39 = vpop.eup %9630 }
 0x9c8   : > { %v5245_v1 = vmul.f32 %v9613_v10, %v8055_v13  ;;  %v8182_v28 = vadd.f32 %v8181_v46, %v8180_v2  ;;  %v8183_v47 = vpop.f32.mrb[66].mxu0 }
 0x9c9   : > { %v8184_v61 = vpop.f32.mrb[67].mxu0 }
 0x9ca   : > { %v5264_v34 = vpack.c.bf16 %v5245_v1, %v5244_v4  ;;  %v8185_v23 = vadd.f32 %v8184_v61, %v8183_v47  ;;  %v8056_v51 = vpop.f32.mrb[4].mxu1  ;;  %v13377_v9 = vmul.f32 %v9617_v26, %v8182_v28  ;;  %v9633_v28 = vpop.eup %9632 }
 0x9cb   : > { %v8057_v12 = vpop.f32.mrb[5].mxu1  ;;  %v9635_v26 = vpop.eup %9634 }
 0x9cc   : > { %v13379_v31 = vmul.f32 %v9619_v42, %v8185_v23  ;;  %v8058_v24 = vadd.f32 %v8057_v12, %v8056_v51  ;;  %v8059_v53 = vpop.f32.mrb[6].mxu1  ;;  %8514 = vmatprep.mubr.msk.bf16.mxu1 %vm1428_vm0, %v5264_v34  ;;  %v9637_v19 = vpop.eup %9636 }
 0x9cd   : > { %v8060_v7 = vpop.f32.mrb[7].mxu1 }
 0x9ce   : > { %v6731_v38 = vpack.c.bf16 %v13379_v31, %v13377_v9  ;;  %v8061_v16 = vadd.f32 %v8060_v7, %v8059_v53  ;;  %v8186_v49 = vpop.f32.mrb[68].mxu0  ;;  %v5246_v43 = vmul.f32 %v9621_v20, %v8058_v24  ;;  %v6360_v24 = vpop.xlane.xlu0 %6359 }
 0x9cf   : > { %v8187_v0 = vpop.f32.mrb[69].mxu0  ;;  %v6363_v7 = vpop.xlane.xlu1 %6362  ;;  %9644 = vrcp.f32 %v6360_v24 }
 0x9d0   : > { %v5247_v44 = vmul.f32 %v9623_v58, %v8061_v16  ;;  %v8188_v22 = vadd.f32 %v8187_v0, %v8186_v49  ;;  %v8189_v30 = vpop.f32.mrb[70].mxu0  ;;  %v9639_v49 = vpop.eup %9638  ;;  %9646 = vrcp.f32 %v6363_v7 }
 0x9d1   : > { %v8190_v29 = vpop.f32.mrb[71].mxu0 }
 0x9d2   : > { %v5265_v11 = vpack.c.bf16 %v5247_v44, %v5246_v43  ;;  %v8191_v56 = vadd.f32 %v8190_v29, %v8189_v30  ;;  %v8062_v45 = vpop.f32.mrb[8].mxu1  ;;  %v13386_v63 = vmul.f32 %v9625_v8, %v8188_v22  ;;  %v9641_v29 = vpop.eup %9640 }
 0x9d3   : > { %v8063_v41 = vpop.f32.mrb[9].mxu1 }
 0x9d4   : > { %v13388_v59 = vmul.f32 %v9627_v62, %v8191_v56  ;;  %v8064_v15 = vadd.f32 %v8063_v41, %v8062_v45  ;;  %v8065_v60 = vpop.f32.mrb[10].mxu1  ;;  %8515 = vmatmul.mubr.msk.bf16.gmra.mrb[136].mxu1 %vm1428_vm0, %v5265_v11  ;;  %v9643_v56 = vpop.eup %9642 }
 0x9d5   : > { %v8066_v35 = vpop.f32.mrb[11].mxu1  ;;  %v6366_v41 = vpop.xlane.xlu0 %6365 }
 0x9d6   : > { %v6732_v55 = vpack.c.bf16 %v13388_v59, %v13386_v63  ;;  %v8067_v10 = vadd.f32 %v8066_v35, %v8065_v60  ;;  %v8192_v32 = vpop.f32.mrb[72].mxu0  ;;  %v5248_v2 = vmul.f32 %v9629_v52, %v8064_v15  ;;  %v6369_v15 = vpop.xlane.xlu1 %6368  ;;  %9648 = vrcp.f32 %v6366_v41 }
 0x9d7   : > { %v8193_v13 = vpop.f32.mrb[73].mxu0  ;;  %9650 = vrcp.f32 %v6369_v15 }
 0x9d8   : > { %v5249_v54 = vmul.f32 %v9631_v39, %v8067_v10  ;;  %v8194_v46 = vadd.f32 %v8193_v13, %v8192_v32  ;;  %v8195_v4 = vpop.f32.mrb[74].mxu0 }
 0x9d9   : > { %v8196_v1 = vpop.f32.mrb[75].mxu0  ;;  %v9645_v32 = vpop.eup %9644 }
 0x9da   : > { %v5266_v57 = vpack.c.bf16 %v5249_v54, %v5248_v2  ;;  %v8197_v47 = vadd.f32 %v8196_v1, %v8195_v4  ;;  %v8068_v61 = vpop.f32.mrb[12].mxu1  ;;  %v13394_v23 = vmul.f32 %v9633_v28, %v8194_v46  ;;  %v9647_v13 = vpop.eup %9646 }
 0x9db   : > { %v8069_v34 = vpop.f32.mrb[13].mxu1  ;;  %v6372_v17 = vpop.xlane.xlu0 %6371 }
 0x9dc   : > { %v13396_v51 = vmul.f32 %v9635_v26, %v8197_v47  ;;  %v8070_v42 = vadd.f32 %v8069_v34, %v8068_v61  ;;  %v8071_v12 = vpop.f32.mrb[14].mxu1  ;;  %8518 = vmatprep.mubr.msk.bf16.mxu1 %vm1428_vm0, %v5266_v57  ;;  %v6375_v33 = vpop.xlane.xlu1 %6374  ;;  %9652 = vrcp.f32 %v6372_v17 }
 0x9dd   : > { %v8072_v53 = vpop.f32.mrb[15].mxu1  ;;  %9654 = vrcp.f32 %v6375_v33 }
 0x9de   : > { %v6733_v20 = vpack.c.bf16 %v13396_v51, %v13394_v23  ;;  %v8073_v21 = vadd.f32 %v8072_v53, %v8071_v12  ;;  %v8198_v16 = vpop.f32.mrb[76].mxu0  ;;  %v5250_v0 = vmul.f32 %v9637_v19, %v8070_v42 }
 0x9df   : > { %v8199_v58 = vpop.f32.mrb[77].mxu0  ;;  %v6378_v25 = vpop.xlane.xlu0 %6377 }
 0x9e0   : > { %v5251_v43 = vmul.f32 %v9639_v49, %v8073_v21  ;;  %v8200_v44 = vadd.f32 %v8199_v58, %v8198_v16  ;;  %v8201_v22 = vpop.f32.mrb[78].mxu0  ;;  %v9649_v47 = vpop.eup %9648  ;;  %9656 = vrcp.f32 %v6378_v25 }
 0x9e1   : > { %v8202_v30 = vpop.f32.mrb[79].mxu0  ;;  %v9651_v27 = vpop.eup %9650 }
 0x9e2   : > { %v5267_v8 = vpack.c.bf16 %v5251_v43, %v5250_v0  ;;  %v8203_v11 = vadd.f32 %v8202_v30, %v8201_v22  ;;  %v13401_v45 = vmul.f32 %v9641_v29, %v8200_v44  ;;  %v6381_v5 = vpop.xlane.xlu1 %6380 }
 0x9e3   : > { %9658 = vrcp.f32 %v6381_v5  ;;  %v6384_v9 = vpop.xlane.xlu0 %6383 }
 0x9e4   : > { %v13403_v62 = vmul.f32 %v9643_v56, %v8203_v11  ;;  %8519 = vmatmul.mubr.msk.bf16.gmra.mrb[140].mxu1 %vm1428_vm0, %v5267_v8  ;;  %9660 = vrcp.f32 %v6384_v9  ;;  %v13452_v9 = vld [vmem:[%s13581_s5] ss:$0 sm:$0xff] }
 0x9e5   : > { %8526 = vmatprep.mubr.msk.bf16.mxu1 %vm1428_vm0, %v6727_v37 }
 0x9e6   : > { %v6734_v60 = vpack.c.bf16 %v13403_v62, %v13401_v45  ;;  %v8204_v50 = vpop.f32.mrb[80].mxu0  ;;  %v9653_v53 = vpop.eup %9652 }
 0x9e7   : > { %v8205_v35 = vpop.f32.mrb[81].mxu0  ;;  %v9655_v36 = vpop.eup %9654 }
 0x9e8   : > { %v8206_v52 = vadd.f32 %v8205_v35, %v8204_v50  ;;  %v8207_v6 = vpop.f32.mrb[82].mxu0  ;;  %v6387_v31 = vpop.xlane.xlu1 %6386 }
 0x9e9   : > { %v8208_v10 = vpop.f32.mrb[83].mxu0  ;;  %9662 = vrcp.f32 %v6387_v31  ;;  %v6390_v23 = vpop.xlane.xlu0 %6389 }
 0x9ea   : > { %v8209_v39 = vadd.f32 %v8208_v10, %v8207_v6  ;;  %v6711_v2 = vmul.f32 %v9645_v32, %v8206_v52  ;;  %v9657_v0 = vpop.eup %9656  ;;  %9664 = vrcp.f32 %v6390_v23 }
 0x9ec   : > { %v6712_v54 = vmul.f32 %v9647_v13, %v8209_v39  ;;  %8527 = vmatmul.mubr.msk.bf16.vlgmr.msra.gmra.mrb[112].mxu1 %vm1428_vm0, %v6728_v18  ;;  %v6393_v51 = vpop.xlane.xlu1 %6392 }
 0x9ed   : > { %8530 = vmatprep.mubr.msk.bf16.mxu1 %vm1428_vm0, %v6729_v3  ;;  %v9659_v63 = vpop.eup %9658  ;;  %9666 = vrcp.f32 %v6393_v51  ;;  %v6396_v45 = vpop.xlane.xlu0 %6395 }
 0x9ee   : > { %v6735_v37 = vpack.c.bf16 %v6712_v54, %v6711_v2  ;;  %v8210_v46 = vpop.f32.mrb[84].mxu0  ;;  %v9661_v11 = vpop.eup %9660  ;;  %9668 = vrcp.f32 %v6396_v45 }
 0x9ef   : > { %v8211_v4 = vpop.f32.mrb[85].mxu0 }
 0x9f0   : > { %v8212_v1 = vadd.f32 %v8211_v4, %v8210_v46  ;;  %v8213_v28 = vpop.f32.mrb[86].mxu0  ;;  %v6399_v62 = vpop.xlane.xlu1 %6398 }
 0x9f1   : > { %v8214_v57 = vpop.f32.mrb[87].mxu0  ;;  %9670 = vrcp.f32 %v6399_v62  ;;  %v6402_v33 = vpop.xlane.xlu0 %6401 }
 0x9f2   : > { %v8215_v61 = vadd.f32 %v8214_v57, %v8213_v28  ;;  %v6713_v48 = vmul.f32 %v9649_v47, %v8212_v1  ;;  %9672 = vrcp.f32 %v6402_v33 }
 0x9f3   : > { %v9663_v41 = vpop.eup %9662 }
 0x9f4   : > { %v6714_v18 = vmul.f32 %v9651_v27, %v8215_v61  ;;  %8531 = vmatmul.mubr.msk.bf16.gmra.mrb[116].mxu1 %vm1428_vm0, %v6730_v14  ;;  %v9665_v39 = vpop.eup %9664 }
 0x9f5   : > { %8534 = vmatprep.mubr.msk.bf16.mxu1 %vm1428_vm0, %v6731_v38 }
 0x9f6   : > { %v6736_v3 = vpack.c.bf16 %v6714_v18, %v6713_v48  ;;  %v8216_v26 = vpop.f32.mrb[88].mxu0 }
 0x9f7   : > { %v8217_v34 = vpop.f32.mrb[89].mxu0  ;;  %v9667_v2 = vpop.eup %9666 }
 0x9f8   : > { %v8218_v42 = vadd.f32 %v8217_v34, %v8216_v26  ;;  %v8219_v12 = vpop.f32.mrb[90].mxu0  ;;  %v9669_v61 = vpop.eup %9668 }
 0x9f9   : > { %v8220_v24 = vpop.f32.mrb[91].mxu0 }
 0x9fa   : > { %v8221_v19 = vadd.f32 %v8220_v24, %v8219_v12  ;;  %v6715_v40 = vmul.f32 %v9653_v53, %v8218_v42 }
 0x9fb   : > { %v9671_v48 = vpop.eup %9670 }
 0x9fc   : > { %v6716_v14 = vmul.f32 %v9655_v36, %v8221_v19  ;;  %8535 = vmatmul.mubr.msk.bf16.gmra.mrb[120].mxu1 %vm1428_vm0, %v6732_v55  ;;  %v9673_v24 = vpop.eup %9672 }
 0x9fd   : > { %8538 = vmatprep.mubr.msk.bf16.mxu1 %vm1428_vm0, %v6733_v20 }
 0x9fe   : > { %v6737_v38 = vpack.c.bf16 %v6716_v14, %v6715_v40  ;;  %v8222_v7 = vpop.f32.mrb[92].mxu0 }
 0x9ff   : > { %v8223_v21 = vpop.f32.mrb[93].mxu0 }
 0xa00   : > { %v8224_v16 = vadd.f32 %v8223_v21, %v8222_v7  ;;  %v8225_v49 = vpop.f32.mrb[94].mxu0 }
 0xa01   : > { %v8226_v58 = vpop.f32.mrb[95].mxu0 }
 0xa02   : > { %v8227_v43 = vadd.f32 %v8226_v58, %v8225_v49  ;;  %v6717_v59 = vmul.f32 %v9657_v0, %v8224_v16 }
 0xa04   : > { %v6718_v55 = vmul.f32 %v9659_v63, %v8227_v43  ;;  %8539 = vmatmul.mubr.msk.bf16.gmra.mrb[124].mxu1 %vm1428_vm0, %v6734_v60 }
 0xa05   : > { %8542 = vmatprep.mubr.msk.bf16.mxu1 %vm1428_vm0, %v6735_v37  ;;  %v6405_v37 = vpop.xlane.xlu1 %6404 }
 0xa06   : > { %v6738_v20 = vpack.c.bf16 %v6718_v55, %v6717_v59  ;;  %v8228_v44 = vpop.f32.mrb[96].mxu0  ;;  %9674 = vrcp.f32 %v6405_v37 }
 0xa07   : > { %v8229_v22 = vpop.f32.mrb[97].mxu0 }
 0xa08   : > { %v8230_v30 = vadd.f32 %v8229_v22, %v8228_v44  ;;  %v8231_v29 = vpop.f32.mrb[98].mxu0 }
 0xa09   : > { %v8232_v8 = vpop.f32.mrb[99].mxu0 }
 0xa0a   : > { %v8233_v56 = vadd.f32 %v8232_v8, %v8231_v29  ;;  %v6719_v15 = vmul.f32 %v9661_v11, %v8230_v30 }
 0xa0c   : > { %v6720_v50 = vmul.f32 %v9663_v41, %v8233_v56  ;;  %8543 = vmatmul.mubr.msk.bf16.gmra.mrb[128].mxu1 %vm1428_vm0, %v6736_v3 }
 0xa0d   : > { %8546 = vmatprep.mubr.msk.bf16.mxu1 %vm1428_vm0, %v6737_v38 }
 0xa0e   : > { %v6739_v60 = vpack.c.bf16 %v6720_v50, %v6719_v15  ;;  %v8234_v35 = vpop.f32.mrb[100].mxu0 }
 0xa0f   : > { %v8235_v52 = vpop.f32.mrb[101].mxu0 }
 0xa10   : > { %v8236_v6 = vadd.f32 %v8235_v52, %v8234_v35  ;;  %v8237_v10 = vpop.f32.mrb[102].mxu0  ;;  %v9675_v19 = vpop.eup %9674 }
 0xa11   : > { %v8238_v32 = vpop.f32.mrb[103].mxu0 }
 0xa12   : > { %v8239_v13 = vadd.f32 %v8238_v32, %v8237_v10  ;;  %v6721_v54 = vmul.f32 %v9665_v39, %v8236_v6 }
 0xa14   : > { %v6722_v17 = vmul.f32 %v9667_v2, %v8239_v13  ;;  %8547 = vmatmul.mubr.msk.bf16.gmra.mrb[132].mxu1 %vm1428_vm0, %v6738_v20 }
 0xa15   : > { %8550 = vmatprep.mubr.msk.bf16.mxu1 %vm1428_vm0, %v6739_v60 }
 0xa16   : > { %v6740_v46 = vpack.c.bf16 %v6722_v17, %v6721_v54  ;;  %v8240_v4 = vpop.f32.mrb[104].mxu0 }
 0xa17   : > { %v8241_v1 = vpop.f32.mrb[105].mxu0 }
 0xa18   : > { %v8242_v28 = vadd.f32 %v8241_v1, %v8240_v4  ;;  %v8243_v57 = vpop.f32.mrb[106].mxu0 }
 0xa19   : > { %v8244_v47 = vpop.f32.mrb[107].mxu0 }
 0xa1a   : > { %v8245_v27 = vadd.f32 %v8244_v47, %v8243_v57  ;;  %v6723_v18 = vmul.f32 %v9669_v61, %v8242_v28 }
 0xa1c   : > { %v6724_v25 = vmul.f32 %v9671_v48, %v8245_v27  ;;  %8551 = vmatmul.mubr.msk.bf16.gmra.mrb[136].mxu1 %vm1428_vm0, %v6740_v46 }
 0xa1e   : > { %v6741_v5 = vpack.c.bf16 %v6724_v25, %v6723_v18  ;;  %v8246_v3 = vpop.f32.mrb[108].mxu0 }
 0xa1f   : > { %v8247_v26 = vpop.f32.mrb[109].mxu0 }
 0xa20   : > { %v8248_v34 = vadd.f32 %v8247_v26, %v8246_v3  ;;  %v8249_v42 = vpop.f32.mrb[110].mxu0  ;;  %8554 = vmatprep.mubr.msk.bf16.mxu1 %vm1428_vm0, %v6741_v5 }
 0xa21   : > { %v8250_v12 = vpop.f32.mrb[111].mxu0 }
 0xa22   : > { %v8251_v53 = vadd.f32 %v8250_v12, %v8249_v42  ;;  %v6725_v36 = vmul.f32 %v9673_v24, %v8248_v34 }
 0xa24   : > { %v6726_v40 = vmul.f32 %v9675_v19, %v8251_v53 }
 0xa26   : > { %v6742_v14 = vpack.c.bf16 %v6726_v40, %v6725_v36 }
 0xa28   : > { %8555 = vmatmul.mubr.msk.bf16.gmra.mrb[140].mxu1 %vm1428_vm0, %v6742_v14 }
 0xabf   : > { %v8528_v31 = vpop.f32.mrb[112].mxu1 }
 0xac0   : > { %v8574_v38 = vadd.f32 %v8528_v31, %v13452_v9  ;;  %v6841_v7 = vpop.f32.mrb[113].mxu1 }
 0xac1   : > { %v8575_v21 = vadd.f32 %v13452_v9, %v6841_v7  ;;  %v8529_v16 = vpop.f32.mrb[114].mxu1 }
 0xac2   : > { %7098 = vst [vmem:[%s13456_s16 + $0x10] sm:$0xff] %v8574_v38  ;;  %v8576_v49 = vadd.f32 %v8529_v16, %v13452_v9  ;;  %v6844_v58 = vpop.f32.mrb[115].mxu1 }
 0xac3   : > { %7096 = vst [vmem:[%s13456_s16] sm:$0xff] %v8575_v21  ;;  %v8577_v0 = vadd.f32 %v13452_v9, %v6844_v58 }
 0xac4   : > { %7099 = vst [vmem:[%s13456_s16 + $0x18] sm:$0xff] %v8576_v49 }
 0xac5   : > { %7097 = vst [vmem:[%s13456_s16 + $0x8] sm:$0xff] %v8577_v0 }
 0xac7   : > { %v8532_v43 = vpop.f32.mrb[116].mxu1 }
 0xac8   : > { %v8578_v63 = vadd.f32 %v8532_v43, %v13452_v9  ;;  %v6857_v59 = vpop.f32.mrb[117].mxu1 }
 0xac9   : > { %v8579_v55 = vadd.f32 %v13452_v9, %v6857_v59  ;;  %v8533_v23 = vpop.f32.mrb[118].mxu1 }
 0xaca   : > { %7102 = vst [vmem:[%s13456_s16 + $0x30] sm:$0xff] %v8578_v63  ;;  %v8580_v51 = vadd.f32 %v8533_v23, %v13452_v9  ;;  %v6860_v20 = vpop.f32.mrb[119].mxu1 }
 0xacb   : > { %7100 = vst [vmem:[%s13456_s16 + $0x20] sm:$0xff] %v8579_v55  ;;  %v8581_v44 = vadd.f32 %v13452_v9, %v6860_v20 }
 0xacc   : > { %7103 = vst [vmem:[%s13456_s16 + $0x38] sm:$0xff] %v8580_v51 }
 0xacd   : > { %7101 = vst [vmem:[%s13456_s16 + $0x28] sm:$0xff] %v8581_v44 }
 0xacf   : > { %v8536_v22 = vpop.f32.mrb[120].mxu1 }
 0xad0   : > { %v8582_v30 = vadd.f32 %v8536_v22, %v13452_v9  ;;  %v6873_v29 = vpop.f32.mrb[121].mxu1 }
 0xad1   : > { %v8583_v8 = vadd.f32 %v13452_v9, %v6873_v29  ;;  %v8537_v11 = vpop.f32.mrb[122].mxu1 }
 0xad2   : > { %7106 = vst [vmem:[%s13456_s16 + $0x50] sm:$0xff] %v8582_v30  ;;  %v8584_v56 = vadd.f32 %v8537_v11, %v13452_v9  ;;  %v6876_v41 = vpop.f32.mrb[123].mxu1 }
 0xad3   : > { %7104 = vst [vmem:[%s13456_s16 + $0x40] sm:$0xff] %v8583_v8  ;;  %v8585_v15 = vadd.f32 %v13452_v9, %v6876_v41 }
 0xad4   : > { %7107 = vst [vmem:[%s13456_s16 + $0x58] sm:$0xff] %v8584_v56 }
 0xad5   : > { %7105 = vst [vmem:[%s13456_s16 + $0x48] sm:$0xff] %v8585_v15 }
 0xad7   : > { %v8540_v50 = vpop.f32.mrb[124].mxu1 }
 0xad8   : > { %v8586_v45 = vadd.f32 %v8540_v50, %v13452_v9  ;;  %v6889_v62 = vpop.f32.mrb[125].mxu1 }
 0xad9   : > { %v8587_v60 = vadd.f32 %v13452_v9, %v6889_v62  ;;  %v8541_v35 = vpop.f32.mrb[126].mxu1 }
 0xada   : > { %7110 = vst [vmem:[%s13456_s16 + $0x70] sm:$0xff] %v8586_v45  ;;  %v8588_v52 = vadd.f32 %v8541_v35, %v13452_v9  ;;  %v6892_v6 = vpop.f32.mrb[127].mxu1 }
 0xadb   : > { %7108 = vst [vmem:[%s13456_s16 + $0x60] sm:$0xff] %v8587_v60  ;;  %v8589_v10 = vadd.f32 %v13452_v9, %v6892_v6 }
 0xadc   : > { %7111 = vst [vmem:[%s13456_s16 + $0x78] sm:$0xff] %v8588_v52 }
 0xadd   : > { %7109 = vst [vmem:[%s13456_s16 + $0x68] sm:$0xff] %v8589_v10 }
 0xadf   : > { %v8544_v32 = vpop.f32.mrb[128].mxu1 }
 0xae0   : > { %v8590_v39 = vadd.f32 %v8544_v32, %v13452_v9  ;;  %v6905_v13 = vpop.f32.mrb[129].mxu1 }
 0xae1   : > { %v8591_v2 = vadd.f32 %v13452_v9, %v6905_v13  ;;  %v8545_v54 = vpop.f32.mrb[130].mxu1 }
 0xae2   : > { %7114 = vst [vmem:[%s13456_s16 + $0x90] sm:$0xff] %v8590_v39  ;;  %v8592_v17 = vadd.f32 %v8545_v54, %v13452_v9  ;;  %v6908_v33 = vpop.f32.mrb[131].mxu1 }
 0xae3   : > { %7112 = vst [vmem:[%s13456_s16 + $0x80] sm:$0xff] %v8591_v2  ;;  %v8593_v37 = vadd.f32 %v13452_v9, %v6908_v33 }
 0xae4   : > { %7115 = vst [vmem:[%s13456_s16 + $0x98] sm:$0xff] %v8592_v17 }
 0xae5   : > { %7113 = vst [vmem:[%s13456_s16 + $0x88] sm:$0xff] %v8593_v37 }
 0xae7   : > { %v8548_v46 = vpop.f32.mrb[132].mxu1 }
 0xae8   : > { %v8594_v4 = vadd.f32 %v8548_v46, %v13452_v9  ;;  %v6921_v1 = vpop.f32.mrb[133].mxu1 }
 0xae9   : > { %v8595_v28 = vadd.f32 %v13452_v9, %v6921_v1  ;;  %v8549_v57 = vpop.f32.mrb[134].mxu1 }
 0xaea   : > { %7118 = vst [vmem:[%s13456_s16 + $0xb0] sm:$0xff] %v8594_v4  ;;  %v8596_v47 = vadd.f32 %v8549_v57, %v13452_v9  ;;  %v6924_v61 = vpop.f32.mrb[135].mxu1 }
 0xaeb   : > { %7116 = vst [vmem:[%s13456_s16 + $0xa0] sm:$0xff] %v8595_v28  ;;  %v8597_v27 = vadd.f32 %v13452_v9, %v6924_v61 }
 0xaec   : > { %7119 = vst [vmem:[%s13456_s16 + $0xb8] sm:$0xff] %v8596_v47 }
 0xaed   : > { %7117 = vst [vmem:[%s13456_s16 + $0xa8] sm:$0xff] %v8597_v27 }
 0xaef   : > { %v8552_v48 = vpop.f32.mrb[136].mxu1 }
 0xaf0   : > { %v8598_v18 = vadd.f32 %v8552_v48, %v13452_v9  ;;  %v6937_v25 = vpop.f32.mrb[137].mxu1 }
 0xaf1   : > { %v8599_v5 = vadd.f32 %v13452_v9, %v6937_v25  ;;  %v8553_v3 = vpop.f32.mrb[138].mxu1 }
 0xaf2   : > { %7122 = vst [vmem:[%s13456_s16 + $0xd0] sm:$0xff] %v8598_v18  ;;  %v8600_v26 = vadd.f32 %v8553_v3, %v13452_v9  ;;  %v6940_v34 = vpop.f32.mrb[139].mxu1 }
 0xaf3   : > { %7120 = vst [vmem:[%s13456_s16 + $0xc0] sm:$0xff] %v8599_v5  ;;  %v8601_v42 = vadd.f32 %v13452_v9, %v6940_v34 }
 0xaf4   : > { %7123 = vst [vmem:[%s13456_s16 + $0xd8] sm:$0xff] %v8600_v26 }
 0xaf5   : > { %7121 = vst [vmem:[%s13456_s16 + $0xc8] sm:$0xff] %v8601_v42 }
 0xafb   : > { %v8556_v12 = vpop.f32.mrb[140].mxu1 }
 0xafc   : > { %v8602_v24 = vadd.f32 %v8556_v12, %v13452_v9  ;;  %v6953_v53 = vpop.f32.mrb[141].mxu1 }
 0xafd   : > { %v8603_v19 = vadd.f32 %v13452_v9, %v6953_v53  ;;  %v8557_v36 = vpop.f32.mrb[142].mxu1 }
 0xafe   : > { %7126 = vst [vmem:[%s13456_s16 + $0xf0] sm:$0xff] %v8602_v24  ;;  %v8604_v40 = vadd.f32 %v8557_v36, %v13452_v9  ;;  %v6956_v14 = vpop.f32.mrb[143].mxu1 }
 0xaff   : > { %7124 = vst [vmem:[%s13456_s16 + $0xe0] sm:$0xff] %v8603_v19  ;;  %v8605_v31 = vadd.f32 %v13452_v9, %v6956_v14 }
 0xb00   : > { %7127 = vst [vmem:[%s13456_s16 + $0xf8] sm:$0xff] %v8604_v40 }
 0xb01   : > { %7125 = vst [vmem:[%s13456_s16 + $0xe8] sm:$0xff] %v8605_v31 }
 0xb02   : > { %9831 = shalt.err (!%p9828_p0)
}
 0xb03   : > { %s9832_s7 = scalar_lea.hbm %s13521_s8, 4096  ;;  %s9836_s18 = scalar_lea.hbm %s14642_s19, 8192 }
 0xb04   : > { %p9833_p4 = scmp.ne.s32.totalorder %s13521_s8, %s9832_s7  ;;  %p9837_p12 = scmp.lt.u32.totalorder %s13521_s8, %s14642_s19 }
 0xb05   : > { %p9838_p1 = scmp.lt.u32.totalorder %s9836_s18, %s9832_s7  ;;  %p9840_p8 = scmp.lt.u32.totalorder %s9832_s7, %s13521_s8 }
 0xb06   : > { %p9834_p13 = pnand %p9833_p4, %p10142_p5 }
 0xb07   : > { %p9839_p11 = por %p9838_p1, %p9837_p12 }
 0xb08   : > { %p9835_p2 = pneg %p9834_p13 }
 0xb09   : > { %p9841_p6 = por %p9840_p8, %p9839_p11 }
 0xb0b   : > { %p9842_p10 = pnand %p9841_p6, %p9835_p2 }
 0xb0d   : > { %9845 = shalt.err (!%p9842_p10)
}
 0xb0e   : > { %s9921_s14 = smov 128   ;;  %s9922_s20 = smov 8  }
 0xb0f   : > { %8752 = dma.vmem_to_hbm [thread:$0]  (%p10142_p5), %s13523_s6, 4096, %s13521_s8, %s7129_s24, %s9921_s14, %s9921_s14, %s9922_s20  }
 0xb10 PF: > { %s14643_s30 = sld [smem:[#allocation20_spill]]  ;;  %s14644_s27 = sld [smem:[#allocation21_spill]] }
 0xb11   : > { %p14646_p7 = scmp.ge.s32.totalorder %s9908_s26, 2 }
 0xb16   : > { %s7159_s13 = sand.u32 1, %s14643_s30   ;;  %p14645_p3 = scmp.ne.s32.totalorder %s14644_s27, 0 }
 0xb17   : > { %s7160_s15 = scalar_lea.sflag [#allocation8], %s7159_s13 }
 0xb18   : > { %p8772_p9 = pnand %p14646_p7, %p14645_p3 }
 0xb1a   : > { %9883 = dma.done.wait (!%p8772_p9), %s7160_s15, 4096  }
 0xb1b   : > { %9885 = vsyncadd (!%p8772_p9), %s7160_s15, 4294963200  ;;  %s24_s26 = sadd.s32 1, %s9908_s26   ;;  %s14647_s21 = smov %s9892_s22 }
 0xb1c   : > { %p21_p0 = scmp.ge.s32.totalorder %s24_s26, 4   ;;  %s14648_s22 = smov %s9896_s23 }
 0xb1d   : > { %s14649_s23 = smov %s10151_s10  ;;  %s14650_s24 = smov %s9904_s25 }
 0xb1e   : > { %s14651_s25 = smov %s14653_s28  ;;  %23 = sbr.rel (!%p21_p0) target bundleno = 10 (0xa), region = 110 }
 0xb25   :  { %7165 = vsyncpa [#allocation7], 1 }
 0xb26   :  { %7167 = vsyncpa [#allocation7 + $0x1], 1 }
 0xb27   :  { %7168 = vsyncpa [#allocation10], 1 }
 0xb28   :  { %7169 = vsyncpa [#allocation13], 1 }
 0xb29   :  { %7170 = vsyncpa [#allocation8], 1 }
 0xb2a   :  { %7172 = vsyncpa [#allocation8 + $0x1], 1 }

</bundles_post_ra>
